<compile_context>
chip_gen: v7x
topology: tpu7x:2x2x1
jax: 0.10.0
libtpu: 0.0.40
codegen_flags: <defaults>
</compile_context>

<pallas_src>
import numpy as np

import jax
import jax.numpy as jnp
from jax.experimental import pallas as pl
from jax.experimental.pallas import tpu as pltpu

LATENT_DIM = 32  # laten_code_dim in the PyTorch source


# ----------------------------------------------------------------------------
# In-kernel helper: valid 2-D conv as ONE K-folded MXU matmul.
# ----------------------------------------------------------------------------
def _conv_valid(x2d, w_ref, b_ref, *, hin, win, kh, kw):
    """Returns the pre-activation (Cout, Hout*Wout); everything stays in VMEM.

    x2d   : (Cin, Hin*Win) feature map, spatial row-major along lanes.
    w_ref : (Cout, KH*KW*Cin) VMEM ref, column index = (i*KW + j)*Cin + c.
    b_ref : (Cout, 1) VMEM ref (bias broadcast along lanes).

    The KH*KW statically lane-shifted views of x2d are sublane-stacked into a
    (KH*KW*Cin, span) operand so a single jnp.dot performs both the multiply
    and the kernel-offset accumulation on the MXU (no per-offset VPU add
    chain, no re-pushing the large stationary operand per offset).
    """
    hout, wout = hin - kh + 1, win - kw + 1
    span = (hout - 1) * win + wout            # lanes that carry valid outputs
    stack = jnp.concatenate(
        [x2d[:, i * win + j: i * win + j + span]
         for i in range(kh) for j in range(kw)], axis=0)
    acc = jnp.dot(w_ref[...], stack, preferred_element_type=jnp.float32)
    if hout > 1:  # keep only the Wout valid columns of each output row
        acc = jnp.concatenate(
            [acc[:, ph * win: ph * win + wout] for ph in range(hout)], axis=1)
    return acc + b_ref[...]


# ----------------------------------------------------------------------------
# Fused decoder kernel: lin2 -> conv3 -> resize -> conv4 -> resize -> conv5
# ----------------------------------------------------------------------------
def _decoder_kernel(x_ref, w2_ref, b2_ref,
                    w3_ref, b3_ref, u1_ref,
                    w4_ref, b4_ref, u2_ref,
                    w5_ref, b5_ref, o_ref):
    # lin2 + ReLU -> (1, 768)
    h = jnp.dot(x_ref[...], w2_ref[...], preferred_element_type=jnp.float32)
    h = jnp.maximum(h + b2_ref[...], 0.0)
    # x.view(12, 4, 16): split the 768 lanes into 12 channel rows of 64 (=4*16).
    f = jnp.concatenate([h[:, 64 * c: 64 * (c + 1)] for c in range(12)], axis=0)
    # conv3 (12->16, k=4x4, valid) + ReLU -> (16, 13)    [spatial (1, 13)]
    o3 = jnp.maximum(
        _conv_valid(f, w3_ref, b3_ref, hin=4, win=16, kh=4, kw=4), 0.0)
    # nearest resize (1,13) -> (24,8): constant 0/1 matmul; u1 stored bf16 and
    # upcast so the selection is bit-exact on the f32 activation. -> (16, 192)
    r4 = jnp.dot(o3, u1_ref[...].astype(jnp.float32),
                 preferred_element_type=jnp.float32)
    # conv4 (16->8, k=10x2, valid) + ReLU -> (8, 105)    [spatial (15, 7)]
    o4 = jnp.maximum(
        _conv_valid(r4, w4_ref, b4_ref, hin=24, win=8, kh=10, kw=2), 0.0)
    # nearest resize (15,7) -> (75,35): constant 0/1 matmul (u2 bf16, upcast).
    r5 = jnp.dot(o4, u2_ref[...].astype(jnp.float32),
                 preferred_element_type=jnp.float32)
    # conv5 (8->3, k=12x4, valid) + sigmoid -> (3, 2048) [spatial (64, 32)]
    z = _conv_valid(r5, w5_ref, b5_ref, hin=75, win=35, kh=12, kw=4)
    # Sigmoid via EUP exp + EUP approx reciprocal (co-issues with the epilogue);
    # lane-dense (3, 2048) store.
    o_ref[...] = pl.reciprocal(1.0 + jnp.exp(-z), approx=True)


def _decoder_pallas_call(x3, kp):
    """x3: (B, 1, 32) latent codes -> (B, 3, 2048) decoded, flat spatial."""
    B = x3.shape[0]

    def const_spec(arr):  # full-array block, resident across the batch grid
        return pl.BlockSpec(arr.shape, lambda b: (0,) * arr.ndim)

    weight_args = (kp["lin2_w"], kp["lin2_b"],
                   kp["conv3_w"], kp["conv3_b"], kp["u1"],
                   kp["conv4_w"], kp["conv4_b"], kp["u2"],
                   kp["conv5_w"], kp["conv5_b"])

    return pl.pallas_call(
        _decoder_kernel,
        out_shape=jax.ShapeDtypeStruct((B, 3, 64 * 32), jnp.float32),
        grid=(B,),
        in_specs=[pl.BlockSpec((None, 1, LATENT_DIM), lambda b: (b, 0, 0))]
                 + [const_spec(a) for a in weight_args],
        out_specs=pl.BlockSpec((None, 3, 64 * 32), lambda b: (b, 0, 0)),
        compiler_params=pltpu.CompilerParams(
            # Batch axis is independent work -> shard across v7x's 2 TCs.
            dimension_semantics=("parallel",),
            # Peak usage ~6 MiB (conv5 stack 3.4 MiB + u2 upcast 1.1 MiB +
            # resident weights < 1 MiB); 32 MiB fits every generation incl.
            # v7x's 64 MiB physical VMEM per core.
            vmem_limit_bytes=32 * 1024 * 1024),
    )(x3, *weight_args)


@jax.jit
def auto_enc_critic_forward(x, kernel_params):
    """x: (B, 32) latent codes -> decoded (B, 3, 64, 32) images (NCHW)."""
    B = x.shape[0]
    out = _decoder_pallas_call(x.reshape(B, 1, LATENT_DIM), kernel_params)
    return out.reshape(B, 3, 64, 32)


# ----------------------------------------------------------------------------
# One-time host-side parameter preparation (PyTorch layout -> kernel layout)
# ----------------------------------------------------------------------------
def _nearest_resize_matrix(in_hw, out_hw):
    """Constant 0/1 matrix U with (x2d @ U) == nearest-resize(x), row-major."""
    (ih, iw), (oh, ow) = in_hw, out_hw
    hs = (np.arange(oh) * ih) // oh          # F.interpolate(mode='nearest') index
    ws = (np.arange(ow) * iw) // ow
    src = (hs[:, None] * iw + ws[None, :]).reshape(-1)
    u = np.zeros((ih * iw, oh * ow), np.float32)
    u[src, np.arange(oh * ow)] = 1.0
    return jnp.asarray(u)


def _conv_weight_kfold(w):
    """(Cout, Cin, KH, KW) -> (Cout, KH*KW*Cin); col (i*KW+j)*Cin + c == w[o,c,i,j]."""
    cout, cin, kh, kw = w.shape
    return jnp.transpose(w, (0, 2, 3, 1)).reshape(cout, kh * kw * cin)


def prepare_decoder_params(params):
    return {
        "lin2_w": params["lin2_w"],                           # (32, 768)
        "lin2_b": params["lin2_b"].reshape(1, 768),
        "conv3_w": _conv_weight_kfold(params["conv3_w"]),     # (16, 192)
        "conv3_b": params["conv3_b"].reshape(16, 1),
        # 0/1 selection matrices stored bf16 (exact) to cut param DMA; upcast
        # in-kernel so the gathered activations are never rounded.
        "u1": _nearest_resize_matrix((1, 13), (24, 8)).astype(jnp.bfloat16),
        "conv4_w": _conv_weight_kfold(params["conv4_w"]),     # (8, 320)
        "conv4_b": params["conv4_b"].reshape(8, 1),
        "u2": _nearest_resize_matrix((15, 7), (75, 35)).astype(jnp.bfloat16),
        "conv5_w": _conv_weight_kfold(params["conv5_w"]),     # (3, 384)
        "conv5_b": params["conv5_b"].reshape(3, 1),
    }


# ----------------------------------------------------------------------------
# Deterministic parameter init (shapes from Auto_Enc_Critic.__init__)
# ----------------------------------------------------------------------------
def init_params(key):
    ks = jax.random.split(key, 8)

    def u(k, shape, fan_in):
        bound = 1.0 / (fan_in ** 0.5)
        return jax.random.uniform(k, shape, jnp.float32, -bound, bound)

    # Linear weights stored as (in, out) for direct x @ w; conv weights in
    # PyTorch (Cout, Cin, KH, KW) layout.
    return {
        "lin2_w": u(ks[0], (LATENT_DIM, 768), LATENT_DIM),
        "lin2_b": u(ks[1], (768,), LATENT_DIM),
        "conv3_w": u(ks[2], (16, 12, 4, 4), 12 * 4 * 4),
        "conv3_b": u(ks[3], (16,), 12 * 4 * 4),
        "conv4_w": u(ks[4], (8, 16, 10, 2), 16 * 10 * 2),
        "conv4_b": u(ks[5], (8,), 16 * 10 * 2),
        "conv5_w": u(ks[6], (3, 8, 12, 4), 8 * 12 * 4),
        "conv5_b": u(ks[7], (3,), 8 * 12 * 4),
    }


# ----------------------------------------------------------------------------
# Pure-JAX reference (XLA conv / gather) used only for the correctness check.
# ----------------------------------------------------------------------------
def _ref_conv(x, w, b, act):
    y = jax.lax.conv_general_dilated(
        x[None], w, window_strides=(1, 1), padding="VALID",
        dimension_numbers=("NCHW", "OIHW", "NCHW"),
        precision=jax.lax.Precision.HIGHEST)[0]
    y = y + b[:, None, None]
    return jnp.maximum(y, 0.0) if act == "relu" else jax.nn.sigmoid(y)


def _ref_resize(x, oh, ow):
    c, h, w = x.shape
    hi = (jnp.arange(oh) * h) // oh
    wi = (jnp.arange(ow) * w) // ow
    return x[:, hi[:, None], wi[None, :]]


def reference_forward(x, params):
    h = jnp.maximum(
        jnp.dot(x, params["lin2_w"], precision=jax.lax.Precision.HIGHEST)
        + params["lin2_b"], 0.0)
    f = h.reshape(12, 4, 16)
    f = _ref_conv(f, params["conv3_w"], params["conv3_b"], "relu")
    f = _ref_resize(f, 24, 8)
    f = _ref_conv(f, params["conv4_w"], params["conv4_b"], "relu")
    f = _ref_resize(f, 75, 35)
    return _ref_conv(f, params["conv5_w"], params["conv5_b"], "sigmoid")


if __name__ == "__main__":
    root = jax.random.PRNGKey(0)
    pkey, xkey = jax.random.split(root)
    params = init_params(pkey)
    kparams = prepare_decoder_params(params)      # one-time, outside the hot path

    B = 4                                          # small batch over the grid
    x = jax.random.normal(xkey, (B, LATENT_DIM), dtype=jnp.float32)

    decoded = auto_enc_critic_forward(x, kparams)
    decoded = jax.block_until_ready(decoded)

    assert decoded.shape == (B, 3, 64, 32), decoded.shape
    assert bool(jnp.all(jnp.isfinite(decoded)))
    # approx reciprocal can overshoot by ~1e-4 near 1.0; allow that slack.
    assert bool(jnp.all((decoded > -1e-4) & (decoded < 1.0 + 1e-4)))

    # Correctness vs. a pure-JAX reference of the same forward semantics.
    ref = jnp.stack([reference_forward(x[b:b + 1], params) for b in range(B)])
    max_err = float(jnp.max(jnp.abs(decoded - ref)))
    assert max_err < 5e-3, f"mismatch vs pure-JAX reference: {max_err}"

    print("KERNEL_OK")
</pallas_src>

<mosaic_0001>
module attributes {stable_mosaic.version = 11 : i64} {
  func.func @_decoder_kernel(%arg0: i32, %arg1: memref<1x1x32xf32, #tpu.memory_space<vmem>>, %arg2: memref<32x768xf32, #tpu.memory_space<vmem>>, %arg3: memref<1x768xf32, #tpu.memory_space<vmem>>, %arg4: memref<16x192xf32, #tpu.memory_space<vmem>>, %arg5: memref<16x1xf32, #tpu.memory_space<vmem>>, %arg6: memref<13x192xbf16, #tpu.memory_space<vmem>>, %arg7: memref<8x320xf32, #tpu.memory_space<vmem>>, %arg8: memref<8x1xf32, #tpu.memory_space<vmem>>, %arg9: memref<105x2625xbf16, #tpu.memory_space<vmem>>, %arg10: memref<3x384xf32, #tpu.memory_space<vmem>>, %arg11: memref<3x1xf32, #tpu.memory_space<vmem>>, %arg12: memref<1x3x2048xf32, #tpu.memory_space<vmem>>) attributes {dimension_semantics = [#tpu.dimension_semantics<parallel>], iteration_bounds = array<i64: 4>, scalar_prefetch = 0 : i64, scratch_operands = 0 : i64, tpu.core_type = #tpu.core_type<tc>, window_params = [{transform_indices = @transform_0, window_bounds = array<i64: 1, 1, 32>}, {pipeline_mode = #tpu.pipeline_mode<synchronous>, transform_indices = @transform_1, window_bounds = array<i64: 32, 768>}, {pipeline_mode = #tpu.pipeline_mode<synchronous>, transform_indices = @transform_2, window_bounds = array<i64: 1, 768>}, {pipeline_mode = #tpu.pipeline_mode<synchronous>, transform_indices = @transform_3, window_bounds = array<i64: 16, 192>}, {pipeline_mode = #tpu.pipeline_mode<synchronous>, transform_indices = @transform_4, window_bounds = array<i64: 16, 1>}, {pipeline_mode = #tpu.pipeline_mode<synchronous>, transform_indices = @transform_5, window_bounds = array<i64: 13, 192>}, {pipeline_mode = #tpu.pipeline_mode<synchronous>, transform_indices = @transform_6, window_bounds = array<i64: 8, 320>}, {pipeline_mode = #tpu.pipeline_mode<synchronous>, transform_indices = @transform_7, window_bounds = array<i64: 8, 1>}, {pipeline_mode = #tpu.pipeline_mode<synchronous>, transform_indices = @transform_8, window_bounds = array<i64: 105, 2625>}, {pipeline_mode = #tpu.pipeline_mode<synchronous>, transform_indices = @transform_9, window_bounds = array<i64: 3, 384>}, {pipeline_mode = #tpu.pipeline_mode<synchronous>, transform_indices = @transform_10, window_bounds = array<i64: 3, 1>}, {transform_indices = @transform_11, window_bounds = array<i64: 1, 3, 2048>}]} {
    %c0 = arith.constant 0 : index
    %c0_0 = arith.constant 0 : index
    %c0_1 = arith.constant 0 : index
    %0 = vector.load %arg1[%c0, %c0_0, %c0_1] : memref<1x1x32xf32, #tpu.memory_space<vmem>>, vector<1x1x32xf32>
    %1 = vector.shape_cast %0 : vector<1x1x32xf32> to vector<1x32xf32>
    %c0_2 = arith.constant 0 : index
    %c0_3 = arith.constant 0 : index
    %2 = vector.load %arg2[%c0_2, %c0_3] : memref<32x768xf32, #tpu.memory_space<vmem>>, vector<32x768xf32>
    %cst = arith.constant dense<0.000000e+00> : vector<1x768xf32>
    %3 = tpu.matmul %1, %2, %cst {dimension_numbers = #tpu.dot_dimension_numbers<[1], [0], [0], [1], [0, 0, 1, 1], [], []>} : vector<1x32xf32>, vector<32x768xf32>, vector<1x768xf32> -> vector<1x768xf32>
    %c0_4 = arith.constant 0 : index
    %c0_5 = arith.constant 0 : index
    %4 = vector.load %arg3[%c0_4, %c0_5] : memref<1x768xf32, #tpu.memory_space<vmem>>, vector<1x768xf32>
    %5 = arith.addf %3, %4 : vector<1x768xf32>
    %cst_6 = arith.constant 0.000000e+00 : f32
    %6 = vector.broadcast %cst_6 : f32 to vector<1x768xf32>
    %7 = arith.maximumf %5, %6 : vector<1x768xf32>
    %8 = vector.extract_strided_slice %7 {offsets = [0, 0], sizes = [1, 64], strides = [1, 1]} : vector<1x768xf32> to vector<1x64xf32>
    %9 = vector.extract_strided_slice %7 {offsets = [0, 64], sizes = [1, 64], strides = [1, 1]} : vector<1x768xf32> to vector<1x64xf32>
    %10 = vector.extract_strided_slice %7 {offsets = [0, 128], sizes = [1, 64], strides = [1, 1]} : vector<1x768xf32> to vector<1x64xf32>
    %11 = vector.extract_strided_slice %7 {offsets = [0, 192], sizes = [1, 64], strides = [1, 1]} : vector<1x768xf32> to vector<1x64xf32>
    %12 = vector.extract_strided_slice %7 {offsets = [0, 256], sizes = [1, 64], strides = [1, 1]} : vector<1x768xf32> to vector<1x64xf32>
    %13 = vector.extract_strided_slice %7 {offsets = [0, 320], sizes = [1, 64], strides = [1, 1]} : vector<1x768xf32> to vector<1x64xf32>
    %14 = vector.extract_strided_slice %7 {offsets = [0, 384], sizes = [1, 64], strides = [1, 1]} : vector<1x768xf32> to vector<1x64xf32>
    %15 = vector.extract_strided_slice %7 {offsets = [0, 448], sizes = [1, 64], strides = [1, 1]} : vector<1x768xf32> to vector<1x64xf32>
    %16 = vector.extract_strided_slice %7 {offsets = [0, 512], sizes = [1, 64], strides = [1, 1]} : vector<1x768xf32> to vector<1x64xf32>
    %17 = vector.extract_strided_slice %7 {offsets = [0, 576], sizes = [1, 64], strides = [1, 1]} : vector<1x768xf32> to vector<1x64xf32>
    %18 = vector.extract_strided_slice %7 {offsets = [0, 640], sizes = [1, 64], strides = [1, 1]} : vector<1x768xf32> to vector<1x64xf32>
    %19 = vector.extract_strided_slice %7 {offsets = [0, 704], sizes = [1, 64], strides = [1, 1]} : vector<1x768xf32> to vector<1x64xf32>
    %20 = tpu.concatenate %8, %9, %10, %11, %12, %13, %14, %15, %16, %17, %18, %19 in 0 : vector<1x64xf32>, vector<1x64xf32>, vector<1x64xf32>, vector<1x64xf32>, vector<1x64xf32>, vector<1x64xf32>, vector<1x64xf32>, vector<1x64xf32>, vector<1x64xf32>, vector<1x64xf32>, vector<1x64xf32>, vector<1x64xf32> -> vector<12x64xf32>
    %21 = vector.extract_strided_slice %20 {offsets = [0, 0], sizes = [12, 13], strides = [1, 1]} : vector<12x64xf32> to vector<12x13xf32>
    %22 = vector.extract_strided_slice %20 {offsets = [0, 1], sizes = [12, 13], strides = [1, 1]} : vector<12x64xf32> to vector<12x13xf32>
    %23 = vector.extract_strided_slice %20 {offsets = [0, 2], sizes = [12, 13], strides = [1, 1]} : vector<12x64xf32> to vector<12x13xf32>
    %24 = vector.extract_strided_slice %20 {offsets = [0, 3], sizes = [12, 13], strides = [1, 1]} : vector<12x64xf32> to vector<12x13xf32>
    %25 = vector.extract_strided_slice %20 {offsets = [0, 16], sizes = [12, 13], strides = [1, 1]} : vector<12x64xf32> to vector<12x13xf32>
    %26 = vector.extract_strided_slice %20 {offsets = [0, 17], sizes = [12, 13], strides = [1, 1]} : vector<12x64xf32> to vector<12x13xf32>
    %27 = vector.extract_strided_slice %20 {offsets = [0, 18], sizes = [12, 13], strides = [1, 1]} : vector<12x64xf32> to vector<12x13xf32>
    %28 = vector.extract_strided_slice %20 {offsets = [0, 19], sizes = [12, 13], strides = [1, 1]} : vector<12x64xf32> to vector<12x13xf32>
    %29 = vector.extract_strided_slice %20 {offsets = [0, 32], sizes = [12, 13], strides = [1, 1]} : vector<12x64xf32> to vector<12x13xf32>
    %30 = vector.extract_strided_slice %20 {offsets = [0, 33], sizes = [12, 13], strides = [1, 1]} : vector<12x64xf32> to vector<12x13xf32>
    %31 = vector.extract_strided_slice %20 {offsets = [0, 34], sizes = [12, 13], strides = [1, 1]} : vector<12x64xf32> to vector<12x13xf32>
    %32 = vector.extract_strided_slice %20 {offsets = [0, 35], sizes = [12, 13], strides = [1, 1]} : vector<12x64xf32> to vector<12x13xf32>
    %33 = vector.extract_strided_slice %20 {offsets = [0, 48], sizes = [12, 13], strides = [1, 1]} : vector<12x64xf32> to vector<12x13xf32>
    %34 = vector.extract_strided_slice %20 {offsets = [0, 49], sizes = [12, 13], strides = [1, 1]} : vector<12x64xf32> to vector<12x13xf32>
    %35 = vector.extract_strided_slice %20 {offsets = [0, 50], sizes = [12, 13], strides = [1, 1]} : vector<12x64xf32> to vector<12x13xf32>
    %36 = vector.extract_strided_slice %20 {offsets = [0, 51], sizes = [12, 13], strides = [1, 1]} : vector<12x64xf32> to vector<12x13xf32>
    %37 = tpu.concatenate %21, %22, %23, %24, %25, %26, %27, %28, %29, %30, %31, %32, %33, %34, %35, %36 in 0 : vector<12x13xf32>, vector<12x13xf32>, vector<12x13xf32>, vector<12x13xf32>, vector<12x13xf32>, vector<12x13xf32>, vector<12x13xf32>, vector<12x13xf32>, vector<12x13xf32>, vector<12x13xf32>, vector<12x13xf32>, vector<12x13xf32>, vector<12x13xf32>, vector<12x13xf32>, vector<12x13xf32>, vector<12x13xf32> -> vector<192x13xf32>
    %c0_7 = arith.constant 0 : index
    %c0_8 = arith.constant 0 : index
    %38 = vector.load %arg4[%c0_7, %c0_8] : memref<16x192xf32, #tpu.memory_space<vmem>>, vector<16x192xf32>
    %cst_9 = arith.constant dense<0.000000e+00> : vector<16x13xf32>
    %39 = tpu.matmul %38, %37, %cst_9 {dimension_numbers = #tpu.dot_dimension_numbers<[1], [0], [0], [1], [0, 0, 1, 1], [], []>} : vector<16x192xf32>, vector<192x13xf32>, vector<16x13xf32> -> vector<16x13xf32>
    %c0_10 = arith.constant 0 : index
    %c0_11 = arith.constant 0 : index
    %40 = vector.load %arg5[%c0_10, %c0_11] : memref<16x1xf32, #tpu.memory_space<vmem>>, vector<16x1xf32>
    %41 = vector.broadcast %40 : vector<16x1xf32> to vector<16x13xf32>
    %42 = arith.addf %39, %41 : vector<16x13xf32>
    %cst_12 = arith.constant 0.000000e+00 : f32
    %43 = vector.broadcast %cst_12 : f32 to vector<16x13xf32>
    %44 = arith.maximumf %42, %43 : vector<16x13xf32>
    %c0_13 = arith.constant 0 : index
    %c0_14 = arith.constant 0 : index
    %45 = vector.load %arg6[%c0_13, %c0_14] : memref<13x192xbf16, #tpu.memory_space<vmem>>, vector<13x192xbf16>
    %46 = arith.extf %45 : vector<13x192xbf16> to vector<13x192xf32>
    %cst_15 = arith.constant dense<0.000000e+00> : vector<16x192xf32>
    %47 = tpu.matmul %44, %46, %cst_15 {dimension_numbers = #tpu.dot_dimension_numbers<[1], [0], [0], [1], [0, 0, 1, 1], [], []>} : vector<16x13xf32>, vector<13x192xf32>, vector<16x192xf32> -> vector<16x192xf32>
    %48 = vector.extract_strided_slice %47 {offsets = [0, 0], sizes = [16, 119], strides = [1, 1]} : vector<16x192xf32> to vector<16x119xf32>
    %49 = vector.extract_strided_slice %47 {offsets = [0, 1], sizes = [16, 119], strides = [1, 1]} : vector<16x192xf32> to vector<16x119xf32>
    %50 = vector.extract_strided_slice %47 {offsets = [0, 8], sizes = [16, 119], strides = [1, 1]} : vector<16x192xf32> to vector<16x119xf32>
    %51 = vector.extract_strided_slice %47 {offsets = [0, 9], sizes = [16, 119], strides = [1, 1]} : vector<16x192xf32> to vector<16x119xf32>
    %52 = vector.extract_strided_slice %47 {offsets = [0, 16], sizes = [16, 119], strides = [1, 1]} : vector<16x192xf32> to vector<16x119xf32>
    %53 = vector.extract_strided_slice %47 {offsets = [0, 17], sizes = [16, 119], strides = [1, 1]} : vector<16x192xf32> to vector<16x119xf32>
    %54 = vector.extract_strided_slice %47 {offsets = [0, 24], sizes = [16, 119], strides = [1, 1]} : vector<16x192xf32> to vector<16x119xf32>
    %55 = vector.extract_strided_slice %47 {offsets = [0, 25], sizes = [16, 119], strides = [1, 1]} : vector<16x192xf32> to vector<16x119xf32>
    %56 = vector.extract_strided_slice %47 {offsets = [0, 32], sizes = [16, 119], strides = [1, 1]} : vector<16x192xf32> to vector<16x119xf32>
    %57 = vector.extract_strided_slice %47 {offsets = [0, 33], sizes = [16, 119], strides = [1, 1]} : vector<16x192xf32> to vector<16x119xf32>
    %58 = vector.extract_strided_slice %47 {offsets = [0, 40], sizes = [16, 119], strides = [1, 1]} : vector<16x192xf32> to vector<16x119xf32>
    %59 = vector.extract_strided_slice %47 {offsets = [0, 41], sizes = [16, 119], strides = [1, 1]} : vector<16x192xf32> to vector<16x119xf32>
    %60 = vector.extract_strided_slice %47 {offsets = [0, 48], sizes = [16, 119], strides = [1, 1]} : vector<16x192xf32> to vector<16x119xf32>
    %61 = vector.extract_strided_slice %47 {offsets = [0, 49], sizes = [16, 119], strides = [1, 1]} : vector<16x192xf32> to vector<16x119xf32>
    %62 = vector.extract_strided_slice %47 {offsets = [0, 56], sizes = [16, 119], strides = [1, 1]} : vector<16x192xf32> to vector<16x119xf32>
    %63 = vector.extract_strided_slice %47 {offsets = [0, 57], sizes = [16, 119], strides = [1, 1]} : vector<16x192xf32> to vector<16x119xf32>
    %64 = vector.extract_strided_slice %47 {offsets = [0, 64], sizes = [16, 119], strides = [1, 1]} : vector<16x192xf32> to vector<16x119xf32>
    %65 = vector.extract_strided_slice %47 {offsets = [0, 65], sizes = [16, 119], strides = [1, 1]} : vector<16x192xf32> to vector<16x119xf32>
    %66 = vector.extract_strided_slice %47 {offsets = [0, 72], sizes = [16, 119], strides = [1, 1]} : vector<16x192xf32> to vector<16x119xf32>
    %67 = vector.extract_strided_slice %47 {offsets = [0, 73], sizes = [16, 119], strides = [1, 1]} : vector<16x192xf32> to vector<16x119xf32>
    %68 = tpu.concatenate %48, %49, %50, %51, %52, %53, %54, %55, %56, %57, %58, %59, %60, %61, %62, %63 in 0 : vector<16x119xf32>, vector<16x119xf32>, vector<16x119xf32>, vector<16x119xf32>, vector<16x119xf32>, vector<16x119xf32>, vector<16x119xf32>, vector<16x119xf32>, vector<16x119xf32>, vector<16x119xf32>, vector<16x119xf32>, vector<16x119xf32>, vector<16x119xf32>, vector<16x119xf32>, vector<16x119xf32>, vector<16x119xf32> -> vector<256x119xf32>
    %69 = tpu.concatenate %64, %65, %66, %67 in 0 : vector<16x119xf32>, vector<16x119xf32>, vector<16x119xf32>, vector<16x119xf32> -> vector<64x119xf32>
    %70 = tpu.concatenate %68, %69 in 0 : vector<256x119xf32>, vector<64x119xf32> -> vector<320x119xf32>
    %c0_16 = arith.constant 0 : index
    %c0_17 = arith.constant 0 : index
    %71 = vector.load %arg7[%c0_16, %c0_17] : memref<8x320xf32, #tpu.memory_space<vmem>>, vector<8x320xf32>
    %cst_18 = arith.constant dense<0.000000e+00> : vector<8x119xf32>
    %72 = tpu.matmul %71, %70, %cst_18 {dimension_numbers = #tpu.dot_dimension_numbers<[1], [0], [0], [1], [0, 0, 1, 1], [], []>} : vector<8x320xf32>, vector<320x119xf32>, vector<8x119xf32> -> vector<8x119xf32>
    %73 = vector.extract_strided_slice %72 {offsets = [0, 0], sizes = [8, 7], strides = [1, 1]} : vector<8x119xf32> to vector<8x7xf32>
    %74 = vector.extract_strided_slice %72 {offsets = [0, 8], sizes = [8, 7], strides = [1, 1]} : vector<8x119xf32> to vector<8x7xf32>
    %75 = vector.extract_strided_slice %72 {offsets = [0, 16], sizes = [8, 7], strides = [1, 1]} : vector<8x119xf32> to vector<8x7xf32>
    %76 = vector.extract_strided_slice %72 {offsets = [0, 24], sizes = [8, 7], strides = [1, 1]} : vector<8x119xf32> to vector<8x7xf32>
    %77 = vector.extract_strided_slice %72 {offsets = [0, 32], sizes = [8, 7], strides = [1, 1]} : vector<8x119xf32> to vector<8x7xf32>
    %78 = vector.extract_strided_slice %72 {offsets = [0, 40], sizes = [8, 7], strides = [1, 1]} : vector<8x119xf32> to vector<8x7xf32>
    %79 = vector.extract_strided_slice %72 {offsets = [0, 48], sizes = [8, 7], strides = [1, 1]} : vector<8x119xf32> to vector<8x7xf32>
    %80 = vector.extract_strided_slice %72 {offsets = [0, 56], sizes = [8, 7], strides = [1, 1]} : vector<8x119xf32> to vector<8x7xf32>
    %81 = vector.extract_strided_slice %72 {offsets = [0, 64], sizes = [8, 7], strides = [1, 1]} : vector<8x119xf32> to vector<8x7xf32>
    %82 = vector.extract_strided_slice %72 {offsets = [0, 72], sizes = [8, 7], strides = [1, 1]} : vector<8x119xf32> to vector<8x7xf32>
    %83 = vector.extract_strided_slice %72 {offsets = [0, 80], sizes = [8, 7], strides = [1, 1]} : vector<8x119xf32> to vector<8x7xf32>
    %84 = vector.extract_strided_slice %72 {offsets = [0, 88], sizes = [8, 7], strides = [1, 1]} : vector<8x119xf32> to vector<8x7xf32>
    %85 = vector.extract_strided_slice %72 {offsets = [0, 96], sizes = [8, 7], strides = [1, 1]} : vector<8x119xf32> to vector<8x7xf32>
    %86 = vector.extract_strided_slice %72 {offsets = [0, 104], sizes = [8, 7], strides = [1, 1]} : vector<8x119xf32> to vector<8x7xf32>
    %87 = vector.extract_strided_slice %72 {offsets = [0, 112], sizes = [8, 7], strides = [1, 1]} : vector<8x119xf32> to vector<8x7xf32>
    %88 = tpu.concatenate %73, %74, %75, %76, %77, %78, %79, %80, %81, %82, %83, %84, %85, %86, %87 in 1 : vector<8x7xf32>, vector<8x7xf32>, vector<8x7xf32>, vector<8x7xf32>, vector<8x7xf32>, vector<8x7xf32>, vector<8x7xf32>, vector<8x7xf32>, vector<8x7xf32>, vector<8x7xf32>, vector<8x7xf32>, vector<8x7xf32>, vector<8x7xf32>, vector<8x7xf32>, vector<8x7xf32> -> vector<8x105xf32>
    %c0_19 = arith.constant 0 : index
    %c0_20 = arith.constant 0 : index
    %89 = vector.load %arg8[%c0_19, %c0_20] : memref<8x1xf32, #tpu.memory_space<vmem>>, vector<8x1xf32>
    %90 = vector.broadcast %89 : vector<8x1xf32> to vector<8x105xf32>
    %91 = arith.addf %88, %90 : vector<8x105xf32>
    %cst_21 = arith.constant 0.000000e+00 : f32
    %92 = vector.broadcast %cst_21 : f32 to vector<8x105xf32>
    %93 = arith.maximumf %91, %92 : vector<8x105xf32>
    %c0_22 = arith.constant 0 : index
    %c0_23 = arith.constant 0 : index
    %94 = vector.load %arg9[%c0_22, %c0_23] : memref<105x2625xbf16, #tpu.memory_space<vmem>>, vector<105x2625xbf16>
    %95 = arith.extf %94 : vector<105x2625xbf16> to vector<105x2625xf32>
    %cst_24 = arith.constant dense<0.000000e+00> : vector<8x2625xf32>
    %96 = tpu.matmul %93, %95, %cst_24 {dimension_numbers = #tpu.dot_dimension_numbers<[1], [0], [0], [1], [0, 0, 1, 1], [], []>} : vector<8x105xf32>, vector<105x2625xf32>, vector<8x2625xf32> -> vector<8x2625xf32>
    %97 = vector.extract_strided_slice %96 {offsets = [0, 0], sizes = [8, 2237], strides = [1, 1]} : vector<8x2625xf32> to vector<8x2237xf32>
    %98 = vector.extract_strided_slice %96 {offsets = [0, 1], sizes = [8, 2237], strides = [1, 1]} : vector<8x2625xf32> to vector<8x2237xf32>
    %99 = vector.extract_strided_slice %96 {offsets = [0, 2], sizes = [8, 2237], strides = [1, 1]} : vector<8x2625xf32> to vector<8x2237xf32>
    %100 = vector.extract_strided_slice %96 {offsets = [0, 3], sizes = [8, 2237], strides = [1, 1]} : vector<8x2625xf32> to vector<8x2237xf32>
    %101 = vector.extract_strided_slice %96 {offsets = [0, 35], sizes = [8, 2237], strides = [1, 1]} : vector<8x2625xf32> to vector<8x2237xf32>
    %102 = vector.extract_strided_slice %96 {offsets = [0, 36], sizes = [8, 2237], strides = [1, 1]} : vector<8x2625xf32> to vector<8x2237xf32>
    %103 = vector.extract_strided_slice %96 {offsets = [0, 37], sizes = [8, 2237], strides = [1, 1]} : vector<8x2625xf32> to vector<8x2237xf32>
    %104 = vector.extract_strided_slice %96 {offsets = [0, 38], sizes = [8, 2237], strides = [1, 1]} : vector<8x2625xf32> to vector<8x2237xf32>
    %105 = vector.extract_strided_slice %96 {offsets = [0, 70], sizes = [8, 2237], strides = [1, 1]} : vector<8x2625xf32> to vector<8x2237xf32>
    %106 = vector.extract_strided_slice %96 {offsets = [0, 71], sizes = [8, 2237], strides = [1, 1]} : vector<8x2625xf32> to vector<8x2237xf32>
    %107 = vector.extract_strided_slice %96 {offsets = [0, 72], sizes = [8, 2237], strides = [1, 1]} : vector<8x2625xf32> to vector<8x2237xf32>
    %108 = vector.extract_strided_slice %96 {offsets = [0, 73], sizes = [8, 2237], strides = [1, 1]} : vector<8x2625xf32> to vector<8x2237xf32>
    %109 = vector.extract_strided_slice %96 {offsets = [0, 105], sizes = [8, 2237], strides = [1, 1]} : vector<8x2625xf32> to vector<8x2237xf32>
    %110 = vector.extract_strided_slice %96 {offsets = [0, 106], sizes = [8, 2237], strides = [1, 1]} : vector<8x2625xf32> to vector<8x2237xf32>
    %111 = vector.extract_strided_slice %96 {offsets = [0, 107], sizes = [8, 2237], strides = [1, 1]} : vector<8x2625xf32> to vector<8x2237xf32>
    %112 = vector.extract_strided_slice %96 {offsets = [0, 108], sizes = [8, 2237], strides = [1, 1]} : vector<8x2625xf32> to vector<8x2237xf32>
    %113 = vector.extract_strided_slice %96 {offsets = [0, 140], sizes = [8, 2237], strides = [1, 1]} : vector<8x2625xf32> to vector<8x2237xf32>
    %114 = vector.extract_strided_slice %96 {offsets = [0, 141], sizes = [8, 2237], strides = [1, 1]} : vector<8x2625xf32> to vector<8x2237xf32>
    %115 = vector.extract_strided_slice %96 {offsets = [0, 142], sizes = [8, 2237], strides = [1, 1]} : vector<8x2625xf32> to vector<8x2237xf32>
    %116 = vector.extract_strided_slice %96 {offsets = [0, 143], sizes = [8, 2237], strides = [1, 1]} : vector<8x2625xf32> to vector<8x2237xf32>
    %117 = vector.extract_strided_slice %96 {offsets = [0, 175], sizes = [8, 2237], strides = [1, 1]} : vector<8x2625xf32> to vector<8x2237xf32>
    %118 = vector.extract_strided_slice %96 {offsets = [0, 176], sizes = [8, 2237], strides = [1, 1]} : vector<8x2625xf32> to vector<8x2237xf32>
    %119 = vector.extract_strided_slice %96 {offsets = [0, 177], sizes = [8, 2237], strides = [1, 1]} : vector<8x2625xf32> to vector<8x2237xf32>
    %120 = vector.extract_strided_slice %96 {offsets = [0, 178], sizes = [8, 2237], strides = [1, 1]} : vector<8x2625xf32> to vector<8x2237xf32>
    %121 = vector.extract_strided_slice %96 {offsets = [0, 210], sizes = [8, 2237], strides = [1, 1]} : vector<8x2625xf32> to vector<8x2237xf32>
    %122 = vector.extract_strided_slice %96 {offsets = [0, 211], sizes = [8, 2237], strides = [1, 1]} : vector<8x2625xf32> to vector<8x2237xf32>
    %123 = vector.extract_strided_slice %96 {offsets = [0, 212], sizes = [8, 2237], strides = [1, 1]} : vector<8x2625xf32> to vector<8x2237xf32>
    %124 = vector.extract_strided_slice %96 {offsets = [0, 213], sizes = [8, 2237], strides = [1, 1]} : vector<8x2625xf32> to vector<8x2237xf32>
    %125 = vector.extract_strided_slice %96 {offsets = [0, 245], sizes = [8, 2237], strides = [1, 1]} : vector<8x2625xf32> to vector<8x2237xf32>
    %126 = vector.extract_strided_slice %96 {offsets = [0, 246], sizes = [8, 2237], strides = [1, 1]} : vector<8x2625xf32> to vector<8x2237xf32>
    %127 = vector.extract_strided_slice %96 {offsets = [0, 247], sizes = [8, 2237], strides = [1, 1]} : vector<8x2625xf32> to vector<8x2237xf32>
    %128 = vector.extract_strided_slice %96 {offsets = [0, 248], sizes = [8, 2237], strides = [1, 1]} : vector<8x2625xf32> to vector<8x2237xf32>
    %129 = vector.extract_strided_slice %96 {offsets = [0, 280], sizes = [8, 2237], strides = [1, 1]} : vector<8x2625xf32> to vector<8x2237xf32>
    %130 = vector.extract_strided_slice %96 {offsets = [0, 281], sizes = [8, 2237], strides = [1, 1]} : vector<8x2625xf32> to vector<8x2237xf32>
    %131 = vector.extract_strided_slice %96 {offsets = [0, 282], sizes = [8, 2237], strides = [1, 1]} : vector<8x2625xf32> to vector<8x2237xf32>
    %132 = vector.extract_strided_slice %96 {offsets = [0, 283], sizes = [8, 2237], strides = [1, 1]} : vector<8x2625xf32> to vector<8x2237xf32>
    %133 = vector.extract_strided_slice %96 {offsets = [0, 315], sizes = [8, 2237], strides = [1, 1]} : vector<8x2625xf32> to vector<8x2237xf32>
    %134 = vector.extract_strided_slice %96 {offsets = [0, 316], sizes = [8, 2237], strides = [1, 1]} : vector<8x2625xf32> to vector<8x2237xf32>
    %135 = vector.extract_strided_slice %96 {offsets = [0, 317], sizes = [8, 2237], strides = [1, 1]} : vector<8x2625xf32> to vector<8x2237xf32>
    %136 = vector.extract_strided_slice %96 {offsets = [0, 318], sizes = [8, 2237], strides = [1, 1]} : vector<8x2625xf32> to vector<8x2237xf32>
    %137 = vector.extract_strided_slice %96 {offsets = [0, 350], sizes = [8, 2237], strides = [1, 1]} : vector<8x2625xf32> to vector<8x2237xf32>
    %138 = vector.extract_strided_slice %96 {offsets = [0, 351], sizes = [8, 2237], strides = [1, 1]} : vector<8x2625xf32> to vector<8x2237xf32>
    %139 = vector.extract_strided_slice %96 {offsets = [0, 352], sizes = [8, 2237], strides = [1, 1]} : vector<8x2625xf32> to vector<8x2237xf32>
    %140 = vector.extract_strided_slice %96 {offsets = [0, 353], sizes = [8, 2237], strides = [1, 1]} : vector<8x2625xf32> to vector<8x2237xf32>
    %141 = vector.extract_strided_slice %96 {offsets = [0, 385], sizes = [8, 2237], strides = [1, 1]} : vector<8x2625xf32> to vector<8x2237xf32>
    %142 = vector.extract_strided_slice %96 {offsets = [0, 386], sizes = [8, 2237], strides = [1, 1]} : vector<8x2625xf32> to vector<8x2237xf32>
    %143 = vector.extract_strided_slice %96 {offsets = [0, 387], sizes = [8, 2237], strides = [1, 1]} : vector<8x2625xf32> to vector<8x2237xf32>
    %144 = vector.extract_strided_slice %96 {offsets = [0, 388], sizes = [8, 2237], strides = [1, 1]} : vector<8x2625xf32> to vector<8x2237xf32>
    %145 = tpu.concatenate %97, %98, %99, %100, %101, %102, %103, %104, %105, %106, %107, %108, %109, %110, %111, %112 in 0 : vector<8x2237xf32>, vector<8x2237xf32>, vector<8x2237xf32>, vector<8x2237xf32>, vector<8x2237xf32>, vector<8x2237xf32>, vector<8x2237xf32>, vector<8x2237xf32>, vector<8x2237xf32>, vector<8x2237xf32>, vector<8x2237xf32>, vector<8x2237xf32>, vector<8x2237xf32>, vector<8x2237xf32>, vector<8x2237xf32>, vector<8x2237xf32> -> vector<128x2237xf32>
    %146 = tpu.concatenate %113, %114, %115, %116, %117, %118, %119, %120, %121, %122, %123, %124, %125, %126, %127, %128 in 0 : vector<8x2237xf32>, vector<8x2237xf32>, vector<8x2237xf32>, vector<8x2237xf32>, vector<8x2237xf32>, vector<8x2237xf32>, vector<8x2237xf32>, vector<8x2237xf32>, vector<8x2237xf32>, vector<8x2237xf32>, vector<8x2237xf32>, vector<8x2237xf32>, vector<8x2237xf32>, vector<8x2237xf32>, vector<8x2237xf32>, vector<8x2237xf32> -> vector<128x2237xf32>
    %147 = tpu.concatenate %129, %130, %131, %132, %133, %134, %135, %136, %137, %138, %139, %140, %141, %142, %143, %144 in 0 : vector<8x2237xf32>, vector<8x2237xf32>, vector<8x2237xf32>, vector<8x2237xf32>, vector<8x2237xf32>, vector<8x2237xf32>, vector<8x2237xf32>, vector<8x2237xf32>, vector<8x2237xf32>, vector<8x2237xf32>, vector<8x2237xf32>, vector<8x2237xf32>, vector<8x2237xf32>, vector<8x2237xf32>, vector<8x2237xf32>, vector<8x2237xf32> -> vector<128x2237xf32>
    %148 = tpu.concatenate %145, %146, %147 in 0 : vector<128x2237xf32>, vector<128x2237xf32>, vector<128x2237xf32> -> vector<384x2237xf32>
    %c0_25 = arith.constant 0 : index
    %c0_26 = arith.constant 0 : index
    %149 = vector.load %arg10[%c0_25, %c0_26] : memref<3x384xf32, #tpu.memory_space<vmem>>, vector<3x384xf32>
    %cst_27 = arith.constant dense<0.000000e+00> : vector<3x2237xf32>
    %150 = tpu.matmul %149, %148, %cst_27 {dimension_numbers = #tpu.dot_dimension_numbers<[1], [0], [0], [1], [0, 0, 1, 1], [], []>} : vector<3x384xf32>, vector<384x2237xf32>, vector<3x2237xf32> -> vector<3x2237xf32>
    %151 = vector.extract_strided_slice %150 {offsets = [0, 0], sizes = [3, 32], strides = [1, 1]} : vector<3x2237xf32> to vector<3x32xf32>
    %152 = vector.extract_strided_slice %150 {offsets = [0, 35], sizes = [3, 32], strides = [1, 1]} : vector<3x2237xf32> to vector<3x32xf32>
    %153 = vector.extract_strided_slice %150 {offsets = [0, 70], sizes = [3, 32], strides = [1, 1]} : vector<3x2237xf32> to vector<3x32xf32>
    %154 = vector.extract_strided_slice %150 {offsets = [0, 105], sizes = [3, 32], strides = [1, 1]} : vector<3x2237xf32> to vector<3x32xf32>
    %155 = vector.extract_strided_slice %150 {offsets = [0, 140], sizes = [3, 32], strides = [1, 1]} : vector<3x2237xf32> to vector<3x32xf32>
    %156 = vector.extract_strided_slice %150 {offsets = [0, 175], sizes = [3, 32], strides = [1, 1]} : vector<3x2237xf32> to vector<3x32xf32>
    %157 = vector.extract_strided_slice %150 {offsets = [0, 210], sizes = [3, 32], strides = [1, 1]} : vector<3x2237xf32> to vector<3x32xf32>
    %158 = vector.extract_strided_slice %150 {offsets = [0, 245], sizes = [3, 32], strides = [1, 1]} : vector<3x2237xf32> to vector<3x32xf32>
    %159 = vector.extract_strided_slice %150 {offsets = [0, 280], sizes = [3, 32], strides = [1, 1]} : vector<3x2237xf32> to vector<3x32xf32>
    %160 = vector.extract_strided_slice %150 {offsets = [0, 315], sizes = [3, 32], strides = [1, 1]} : vector<3x2237xf32> to vector<3x32xf32>
    %161 = vector.extract_strided_slice %150 {offsets = [0, 350], sizes = [3, 32], strides = [1, 1]} : vector<3x2237xf32> to vector<3x32xf32>
    %162 = vector.extract_strided_slice %150 {offsets = [0, 385], sizes = [3, 32], strides = [1, 1]} : vector<3x2237xf32> to vector<3x32xf32>
    %163 = vector.extract_strided_slice %150 {offsets = [0, 420], sizes = [3, 32], strides = [1, 1]} : vector<3x2237xf32> to vector<3x32xf32>
    %164 = vector.extract_strided_slice %150 {offsets = [0, 455], sizes = [3, 32], strides = [1, 1]} : vector<3x2237xf32> to vector<3x32xf32>
    %165 = vector.extract_strided_slice %150 {offsets = [0, 490], sizes = [3, 32], strides = [1, 1]} : vector<3x2237xf32> to vector<3x32xf32>
    %166 = vector.extract_strided_slice %150 {offsets = [0, 525], sizes = [3, 32], strides = [1, 1]} : vector<3x2237xf32> to vector<3x32xf32>
    %167 = vector.extract_strided_slice %150 {offsets = [0, 560], sizes = [3, 32], strides = [1, 1]} : vector<3x2237xf32> to vector<3x32xf32>
    %168 = vector.extract_strided_slice %150 {offsets = [0, 595], sizes = [3, 32], strides = [1, 1]} : vector<3x2237xf32> to vector<3x32xf32>
    %169 = vector.extract_strided_slice %150 {offsets = [0, 630], sizes = [3, 32], strides = [1, 1]} : vector<3x2237xf32> to vector<3x32xf32>
    %170 = vector.extract_strided_slice %150 {offsets = [0, 665], sizes = [3, 32], strides = [1, 1]} : vector<3x2237xf32> to vector<3x32xf32>
    %171 = vector.extract_strided_slice %150 {offsets = [0, 700], sizes = [3, 32], strides = [1, 1]} : vector<3x2237xf32> to vector<3x32xf32>
    %172 = vector.extract_strided_slice %150 {offsets = [0, 735], sizes = [3, 32], strides = [1, 1]} : vector<3x2237xf32> to vector<3x32xf32>
    %173 = vector.extract_strided_slice %150 {offsets = [0, 770], sizes = [3, 32], strides = [1, 1]} : vector<3x2237xf32> to vector<3x32xf32>
    %174 = vector.extract_strided_slice %150 {offsets = [0, 805], sizes = [3, 32], strides = [1, 1]} : vector<3x2237xf32> to vector<3x32xf32>
    %175 = vector.extract_strided_slice %150 {offsets = [0, 840], sizes = [3, 32], strides = [1, 1]} : vector<3x2237xf32> to vector<3x32xf32>
    %176 = vector.extract_strided_slice %150 {offsets = [0, 875], sizes = [3, 32], strides = [1, 1]} : vector<3x2237xf32> to vector<3x32xf32>
    %177 = vector.extract_strided_slice %150 {offsets = [0, 910], sizes = [3, 32], strides = [1, 1]} : vector<3x2237xf32> to vector<3x32xf32>
    %178 = vector.extract_strided_slice %150 {offsets = [0, 945], sizes = [3, 32], strides = [1, 1]} : vector<3x2237xf32> to vector<3x32xf32>
    %179 = vector.extract_strided_slice %150 {offsets = [0, 980], sizes = [3, 32], strides = [1, 1]} : vector<3x2237xf32> to vector<3x32xf32>
    %180 = vector.extract_strided_slice %150 {offsets = [0, 1015], sizes = [3, 32], strides = [1, 1]} : vector<3x2237xf32> to vector<3x32xf32>
    %181 = vector.extract_strided_slice %150 {offsets = [0, 1050], sizes = [3, 32], strides = [1, 1]} : vector<3x2237xf32> to vector<3x32xf32>
    %182 = vector.extract_strided_slice %150 {offsets = [0, 1085], sizes = [3, 32], strides = [1, 1]} : vector<3x2237xf32> to vector<3x32xf32>
    %183 = vector.extract_strided_slice %150 {offsets = [0, 1120], sizes = [3, 32], strides = [1, 1]} : vector<3x2237xf32> to vector<3x32xf32>
    %184 = vector.extract_strided_slice %150 {offsets = [0, 1155], sizes = [3, 32], strides = [1, 1]} : vector<3x2237xf32> to vector<3x32xf32>
    %185 = vector.extract_strided_slice %150 {offsets = [0, 1190], sizes = [3, 32], strides = [1, 1]} : vector<3x2237xf32> to vector<3x32xf32>
    %186 = vector.extract_strided_slice %150 {offsets = [0, 1225], sizes = [3, 32], strides = [1, 1]} : vector<3x2237xf32> to vector<3x32xf32>
    %187 = vector.extract_strided_slice %150 {offsets = [0, 1260], sizes = [3, 32], strides = [1, 1]} : vector<3x2237xf32> to vector<3x32xf32>
    %188 = vector.extract_strided_slice %150 {offsets = [0, 1295], sizes = [3, 32], strides = [1, 1]} : vector<3x2237xf32> to vector<3x32xf32>
    %189 = vector.extract_strided_slice %150 {offsets = [0, 1330], sizes = [3, 32], strides = [1, 1]} : vector<3x2237xf32> to vector<3x32xf32>
    %190 = vector.extract_strided_slice %150 {offsets = [0, 1365], sizes = [3, 32], strides = [1, 1]} : vector<3x2237xf32> to vector<3x32xf32>
    %191 = vector.extract_strided_slice %150 {offsets = [0, 1400], sizes = [3, 32], strides = [1, 1]} : vector<3x2237xf32> to vector<3x32xf32>
    %192 = vector.extract_strided_slice %150 {offsets = [0, 1435], sizes = [3, 32], strides = [1, 1]} : vector<3x2237xf32> to vector<3x32xf32>
    %193 = vector.extract_strided_slice %150 {offsets = [0, 1470], sizes = [3, 32], strides = [1, 1]} : vector<3x2237xf32> to vector<3x32xf32>
    %194 = vector.extract_strided_slice %150 {offsets = [0, 1505], sizes = [3, 32], strides = [1, 1]} : vector<3x2237xf32> to vector<3x32xf32>
    %195 = vector.extract_strided_slice %150 {offsets = [0, 1540], sizes = [3, 32], strides = [1, 1]} : vector<3x2237xf32> to vector<3x32xf32>
    %196 = vector.extract_strided_slice %150 {offsets = [0, 1575], sizes = [3, 32], strides = [1, 1]} : vector<3x2237xf32> to vector<3x32xf32>
    %197 = vector.extract_strided_slice %150 {offsets = [0, 1610], sizes = [3, 32], strides = [1, 1]} : vector<3x2237xf32> to vector<3x32xf32>
    %198 = vector.extract_strided_slice %150 {offsets = [0, 1645], sizes = [3, 32], strides = [1, 1]} : vector<3x2237xf32> to vector<3x32xf32>
    %199 = vector.extract_strided_slice %150 {offsets = [0, 1680], sizes = [3, 32], strides = [1, 1]} : vector<3x2237xf32> to vector<3x32xf32>
    %200 = vector.extract_strided_slice %150 {offsets = [0, 1715], sizes = [3, 32], strides = [1, 1]} : vector<3x2237xf32> to vector<3x32xf32>
    %201 = vector.extract_strided_slice %150 {offsets = [0, 1750], sizes = [3, 32], strides = [1, 1]} : vector<3x2237xf32> to vector<3x32xf32>
    %202 = vector.extract_strided_slice %150 {offsets = [0, 1785], sizes = [3, 32], strides = [1, 1]} : vector<3x2237xf32> to vector<3x32xf32>
    %203 = vector.extract_strided_slice %150 {offsets = [0, 1820], sizes = [3, 32], strides = [1, 1]} : vector<3x2237xf32> to vector<3x32xf32>
    %204 = vector.extract_strided_slice %150 {offsets = [0, 1855], sizes = [3, 32], strides = [1, 1]} : vector<3x2237xf32> to vector<3x32xf32>
    %205 = vector.extract_strided_slice %150 {offsets = [0, 1890], sizes = [3, 32], strides = [1, 1]} : vector<3x2237xf32> to vector<3x32xf32>
    %206 = vector.extract_strided_slice %150 {offsets = [0, 1925], sizes = [3, 32], strides = [1, 1]} : vector<3x2237xf32> to vector<3x32xf32>
    %207 = vector.extract_strided_slice %150 {offsets = [0, 1960], sizes = [3, 32], strides = [1, 1]} : vector<3x2237xf32> to vector<3x32xf32>
    %208 = vector.extract_strided_slice %150 {offsets = [0, 1995], sizes = [3, 32], strides = [1, 1]} : vector<3x2237xf32> to vector<3x32xf32>
    %209 = vector.extract_strided_slice %150 {offsets = [0, 2030], sizes = [3, 32], strides = [1, 1]} : vector<3x2237xf32> to vector<3x32xf32>
    %210 = vector.extract_strided_slice %150 {offsets = [0, 2065], sizes = [3, 32], strides = [1, 1]} : vector<3x2237xf32> to vector<3x32xf32>
    %211 = vector.extract_strided_slice %150 {offsets = [0, 2100], sizes = [3, 32], strides = [1, 1]} : vector<3x2237xf32> to vector<3x32xf32>
    %212 = vector.extract_strided_slice %150 {offsets = [0, 2135], sizes = [3, 32], strides = [1, 1]} : vector<3x2237xf32> to vector<3x32xf32>
    %213 = vector.extract_strided_slice %150 {offsets = [0, 2170], sizes = [3, 32], strides = [1, 1]} : vector<3x2237xf32> to vector<3x32xf32>
    %214 = vector.extract_strided_slice %150 {offsets = [0, 2205], sizes = [3, 32], strides = [1, 1]} : vector<3x2237xf32> to vector<3x32xf32>
    %215 = tpu.concatenate %151, %152, %153, %154, %155, %156, %157, %158, %159, %160, %161, %162, %163, %164, %165, %166 in 1 : vector<3x32xf32>, vector<3x32xf32>, vector<3x32xf32>, vector<3x32xf32>, vector<3x32xf32>, vector<3x32xf32>, vector<3x32xf32>, vector<3x32xf32>, vector<3x32xf32>, vector<3x32xf32>, vector<3x32xf32>, vector<3x32xf32>, vector<3x32xf32>, vector<3x32xf32>, vector<3x32xf32>, vector<3x32xf32> -> vector<3x512xf32>
    %216 = tpu.concatenate %167, %168, %169, %170, %171, %172, %173, %174, %175, %176, %177, %178, %179, %180, %181, %182 in 1 : vector<3x32xf32>, vector<3x32xf32>, vector<3x32xf32>, vector<3x32xf32>, vector<3x32xf32>, vector<3x32xf32>, vector<3x32xf32>, vector<3x32xf32>, vector<3x32xf32>, vector<3x32xf32>, vector<3x32xf32>, vector<3x32xf32>, vector<3x32xf32>, vector<3x32xf32>, vector<3x32xf32>, vector<3x32xf32> -> vector<3x512xf32>
    %217 = tpu.concatenate %183, %184, %185, %186, %187, %188, %189, %190, %191, %192, %193, %194, %195, %196, %197, %198 in 1 : vector<3x32xf32>, vector<3x32xf32>, vector<3x32xf32>, vector<3x32xf32>, vector<3x32xf32>, vector<3x32xf32>, vector<3x32xf32>, vector<3x32xf32>, vector<3x32xf32>, vector<3x32xf32>, vector<3x32xf32>, vector<3x32xf32>, vector<3x32xf32>, vector<3x32xf32>, vector<3x32xf32>, vector<3x32xf32> -> vector<3x512xf32>
    %218 = tpu.concatenate %199, %200, %201, %202, %203, %204, %205, %206, %207, %208, %209, %210, %211, %212, %213, %214 in 1 : vector<3x32xf32>, vector<3x32xf32>, vector<3x32xf32>, vector<3x32xf32>, vector<3x32xf32>, vector<3x32xf32>, vector<3x32xf32>, vector<3x32xf32>, vector<3x32xf32>, vector<3x32xf32>, vector<3x32xf32>, vector<3x32xf32>, vector<3x32xf32>, vector<3x32xf32>, vector<3x32xf32>, vector<3x32xf32> -> vector<3x512xf32>
    %219 = tpu.concatenate %215, %216, %217, %218 in 1 : vector<3x512xf32>, vector<3x512xf32>, vector<3x512xf32>, vector<3x512xf32> -> vector<3x2048xf32>
    %c0_28 = arith.constant 0 : index
    %c0_29 = arith.constant 0 : index
    %220 = vector.load %arg11[%c0_28, %c0_29] : memref<3x1xf32, #tpu.memory_space<vmem>>, vector<3x1xf32>
    %221 = vector.broadcast %220 : vector<3x1xf32> to vector<3x2048xf32>
    %222 = arith.addf %219, %221 : vector<3x2048xf32>
    %cst_30 = arith.constant 0.000000e+00 : f32
    %223 = vector.broadcast %cst_30 : f32 to vector<3x2048xf32>
    %224 = arith.subf %223, %222 : vector<3x2048xf32>
    %225 = math.exp %224 : vector<3x2048xf32>
    %cst_31 = arith.constant 1.000000e+00 : f32
    %226 = vector.broadcast %cst_31 : f32 to vector<3x2048xf32>
    %227 = arith.addf %226, %225 : vector<3x2048xf32>
    %228 = tpu.reciprocal %227 {approx = true} : vector<3x2048xf32> -> vector<3x2048xf32>
    %c0_32 = arith.constant 0 : index
    %c0_33 = arith.constant 0 : index
    %c0_34 = arith.constant 0 : index
    %229 = vector.load %arg12[%c0_32, %c0_33, %c0_34] : memref<1x3x2048xf32, #tpu.memory_space<vmem>>, vector<1x3x2048xf32>
    %230 = vector.shape_cast %229 : vector<1x3x2048xf32> to vector<3x2048xf32>
    %231 = vector.shape_cast %228 : vector<3x2048xf32> to vector<1x3x2048xf32>
    tpu.vector_store %arg12[%c0_32, %c0_33, %c0_34], %231 {strides = array<i32>} : memref<1x3x2048xf32, #tpu.memory_space<vmem>>, vector<1x3x2048xf32>,
    return
  }
  func.func @transform_0(%arg0: i32) -> (i32, i32, i32) {
    %c0_i32 = arith.constant 0 : i32
    %c0_i32_0 = arith.constant 0 : i32
    %c0_i32_1 = arith.constant 0 : i32
    return %arg0, %c0_i32, %c0_i32_0 : i32, i32, i32
  }
  func.func @transform_1(%arg0: i32) -> (i32, i32) {
    %c0_i32 = arith.constant 0 : i32
    %c0_i32_0 = arith.constant 0 : i32
    %c0_i32_1 = arith.constant 0 : i32
    return %c0_i32, %c0_i32_0 : i32, i32
  }
  func.func @transform_2(%arg0: i32) -> (i32, i32) {
    %c0_i32 = arith.constant 0 : i32
    %c0_i32_0 = arith.constant 0 : i32
    %c0_i32_1 = arith.constant 0 : i32
    return %c0_i32, %c0_i32_0 : i32, i32
  }
  func.func @transform_3(%arg0: i32) -> (i32, i32) {
    %c0_i32 = arith.constant 0 : i32
    %c0_i32_0 = arith.constant 0 : i32
    %c0_i32_1 = arith.constant 0 : i32
    return %c0_i32, %c0_i32_0 : i32, i32
  }
  func.func @transform_4(%arg0: i32) -> (i32, i32) {
    %c0_i32 = arith.constant 0 : i32
    %c0_i32_0 = arith.constant 0 : i32
    %c0_i32_1 = arith.constant 0 : i32
    return %c0_i32, %c0_i32_0 : i32, i32
  }
  func.func @transform_5(%arg0: i32) -> (i32, i32) {
    %c0_i32 = arith.constant 0 : i32
    %c0_i32_0 = arith.constant 0 : i32
    %c0_i32_1 = arith.constant 0 : i32
    return %c0_i32, %c0_i32_0 : i32, i32
  }
  func.func @transform_6(%arg0: i32) -> (i32, i32) {
    %c0_i32 = arith.constant 0 : i32
    %c0_i32_0 = arith.constant 0 : i32
    %c0_i32_1 = arith.constant 0 : i32
    return %c0_i32, %c0_i32_0 : i32, i32
  }
  func.func @transform_7(%arg0: i32) -> (i32, i32) {
    %c0_i32 = arith.constant 0 : i32
    %c0_i32_0 = arith.constant 0 : i32
    %c0_i32_1 = arith.constant 0 : i32
    return %c0_i32, %c0_i32_0 : i32, i32
  }
  func.func @transform_8(%arg0: i32) -> (i32, i32) {
    %c0_i32 = arith.constant 0 : i32
    %c0_i32_0 = arith.constant 0 : i32
    %c0_i32_1 = arith.constant 0 : i32
    return %c0_i32, %c0_i32_0 : i32, i32
  }
  func.func @transform_9(%arg0: i32) -> (i32, i32) {
    %c0_i32 = arith.constant 0 : i32
    %c0_i32_0 = arith.constant 0 : i32
    %c0_i32_1 = arith.constant 0 : i32
    return %c0_i32, %c0_i32_0 : i32, i32
  }
  func.func @transform_10(%arg0: i32) -> (i32, i32) {
    %c0_i32 = arith.constant 0 : i32
    %c0_i32_0 = arith.constant 0 : i32
    %c0_i32_1 = arith.constant 0 : i32
    return %c0_i32, %c0_i32_0 : i32, i32
  }
  func.func @transform_11(%arg0: i32) -> (i32, i32, i32) {
    %c0_i32 = arith.constant 0 : i32
    %c0_i32_0 = arith.constant 0 : i32
    %c0_i32_1 = arith.constant 0 : i32
    return %arg0, %c0_i32, %c0_i32_0 : i32, i32, i32
  }
}

</mosaic_0001>

<bundles_post_ra>
// kernel: auto_enc_critic_forward.1
= control target key start
LH: loop header
LB: loop body
LE: loop exit
PB: predicated region body
PF: predicated region fallthrough
CT: control target
= control target key end

     0   :  { %s20851_s0 = inlined_call_operand.hbm [shape: f32[4,1,32], index: 0, kind: input, shape index: {}]   ;;  %s20852_s1 = inlined_call_operand.hbm [shape: f32[32,768], index: 1, kind: input, shape index: {}]   ;;  %s20853_s2 = inlined_call_operand.vmem [shape: f32[1,768], index: 2, kind: input, shape index: {}]   ;;  %s20854_s3 = inlined_call_operand.vmem [shape: f32[16,192], index: 3, kind: input, shape index: {}]   ;;  %s20855_s4 = inlined_call_operand.vmem [shape: f32[16,1], index: 4, kind: input, shape index: {}]   ;;  %s20856_s5 = inlined_call_operand.vmem [shape: bf16[13,192], index: 5, kind: input, shape index: {}]   ;;  %s20857_s6 = inlined_call_operand.hbm [shape: f32[8,320], index: 6, kind: input, shape index: {}]   ;;  %s20858_s7 = inlined_call_operand.vmem [shape: f32[8,1], index: 7, kind: input, shape index: {}]   ;;  %s20859_s8 = inlined_call_operand.hbm [shape: bf16[105,2625], index: 8, kind: input, shape index: {}]   ;;  %s20860_s9 = inlined_call_operand.hbm [shape: f32[3,384], index: 9, kind: input, shape index: {}]   ;;  %s20861_s10 = inlined_call_operand.vmem [shape: f32[3,1], index: 10, kind: input, shape index: {}]   ;;  %s20862_s11 = inlined_call_operand.vmem [shape: f32[4,3,2048], index: 11, kind: output, shape index: {}]  }
   0x1   :  { %21695 = sst [smem:[#allocation343_spill]] %s20858_s7 }
   0x2   :  { %21696 = sst [smem:[#allocation344_spill]] %s20861_s10 }
   0x3   :  { %21697 = sst [smem:[#allocation345_spill]] %s20862_s11 }
   0x4   :  { %16 = vsyncpa [#allocation3], 0 }
   0x5   :  { %18 = vsyncpa [#allocation3 + $0x1], 0 }
   0x6   :  { %19 = vsyncpa [#allocation5], 0 }
   0x7   :  { %20 = vsyncpa [#allocation8], 0  ;;  %s13079_s17 = smov 0   ;;  %s13081_s18 = smov 0  }
   0x8   :  { %s13083_s19 = smov 0   ;;  %s13085_s20 = smov 0  }
   0x9 LB: > { %s12924_s21 = smov [#allocation4]   ;;  %s13100_s23 = sadd.s32 4294967295, %s12922_s20   ;;  %s12922_s20 = sphi %s13085_s20, %s23733_s20   ;;  %s12918_s19 = sphi %s13083_s19, %s23732_s19   ;;  %s12914_s18 = sphi %s13081_s18, %s23731_s18   ;;  %s12910_s17 = sphi %s13079_s17, %s23730_s17  }
   0xa   : > { %s305_s22 = sshll.u32 %s12924_s21, 4  ;;  %p8174_p0 = scmp.ge.s32.totalorder %s12922_s20, 1  ;;  %s13105_s22 = int_to_ptr.vmem [resolvable:$true] %s305_s22 }
   0xb   : > { %p20863_p1 = scmp.eq.s32.totalorder %s13100_s23, 0  ;;  %p293_p2 = scmp.lt.s32.totalorder %s12922_s20, 5 }
   0xc   : > { %s12925_s25 = smov [#allocation7]   ;;  %s12926_s28 = smov [#allocation6]  }
   0xd   : > { %p13107_p3 = pnand %p8174_p0, %p293_p2  ;;  %s344_s26 = sshll.u32 %s12925_s25, 4  ;;  %s13119_s26 = int_to_ptr.vmem [resolvable:$true] %s344_s26 }
   0xe   : > { %s13121_s29 = sshll.u32 %s12926_s28, 4  ;;  %s12738_s13 = scalar_lea.hbm %s20852_s1, 3072  ;;  %s332_s29 = int_to_ptr.vmem [resolvable:$true] %s13121_s29 }
   0xf   : > { %s21698_s24 = scalar_select %p13107_p3, 1, 0 }
  0x10   : > { %p9823_p4 = pneg %p13107_p3  ;;  %p12739_p6 = scmp.ne.s32.totalorder %s20852_s1, %s12738_s13 }
  0x11   : > { %p12745_p10 = scmp.lt.u32.totalorder %s12738_s13, %s20852_s1 }
  0x12   : > { %p13115_p5 = pnand %p9823_p4, %p20863_p1 }
  0x14   : > { %p13131_p7 = pneg %p13115_p5 }
  0x16   : > { %p12741_p8 = pnand %p13131_p7, %p12739_p6 }
  0x18   : > { %p12742_p9 = pneg %p12741_p8 }
  0x1a   : > { %p12747_p11 = pnand %p12745_p10, %p12742_p9 }
  0x1c   : > { %12750 = shalt.err (!%p12747_p11)
}
  0x1d   : > { %s12751_s28 = scalar_lea.vmem %s13105_s22, 3072  ;;  %p12759_p2 = scmp.lt.s32.totalorder %s13105_s22, %s13105_s22 }
  0x1e   : > { %p12752_p12 = scmp.ne.s32.totalorder %s13105_s22, %s12751_s28  ;;  %p12760_p4 = scmp.lt.s32.totalorder %s12751_s28, %s12751_s28 }
  0x20   : > { %p12754_p13 = pnand %p12752_p12, %p13131_p7  ;;  %p12761_p6 = por %p12760_p4, %p12759_p2 }
  0x22   : > { %p12755_p0 = pneg %p12754_p13 }
  0x24   : > { %p12762_p8 = pnand %p12761_p6, %p12755_p0 }
  0x26   : > { %12765 = shalt.err (!%p12762_p8)
}
  0x27   : > { %s12927_s30 = smov 768   ;;  %s12928_s12 = smov 48  }
  0x28   : > { %9826 = dma.hbm_to_vmem [thread:$0]  (!%p13115_p5), %s20852_s1, 3072, %s13105_s22, [#allocation5], %s12927_s30, %s12927_s30, %s12928_s12  }
  0x29   : > { %s12766_s25 = scalar_lea.hbm %s20859_s8, 18816 }
  0x2a   : > { %p12767_p9 = scmp.ne.s32.totalorder %s20859_s8, %s12766_s25  ;;  %p12773_p12 = scmp.lt.u32.totalorder %s12766_s25, %s20859_s8 }
  0x2c   : > { %p12769_p10 = pnand %p12767_p9, %p13131_p7 }
  0x2e   : > { %p12770_p11 = pneg %p12769_p10 }
  0x30   : > { %p12775_p13 = pnand %p12773_p12, %p12770_p11 }
  0x32   : > { %12778 = shalt.err (!%p12775_p13)
}
  0x33   : > { %s12779_s22 = scalar_lea.vmem %s13119_s26, 18816  ;;  %p12787_p6 = scmp.lt.s32.totalorder %s13119_s26, %s13119_s26 }
  0x34   : > { %p12780_p0 = scmp.ne.s32.totalorder %s13119_s26, %s12779_s22  ;;  %p12788_p8 = scmp.lt.s32.totalorder %s12779_s22, %s12779_s22 }
  0x36   : > { %p12782_p2 = pnand %p12780_p0, %p13131_p7  ;;  %p12789_p9 = por %p12788_p8, %p12787_p6 }
  0x38   : > { %p12783_p4 = pneg %p12782_p2 }
  0x3a   : > { %p12790_p10 = pnand %p12789_p9, %p12783_p4 }
  0x3c   : > { %12793 = shalt.err (!%p12790_p10)
}
  0x3d   : > { %s12929_s10 = smov 1344   ;;  %s12930_s7 = smov 84  }
  0x3e   : > { %9832 = dma.hbm_to_vmem [thread:$0]  (!%p13115_p5), %s20859_s8, 18816, %s13119_s26, [#allocation8], %s12929_s10, %s12929_s10, %s12930_s7  }
  0x3f   : > { %s12794_s14 = scalar_lea.hbm %s20857_s6, 384 }
  0x40   : > { %p12795_p11 = scmp.ne.s32.totalorder %s20857_s6, %s12794_s14  ;;  %p12801_p0 = scmp.lt.u32.totalorder %s12794_s14, %s20857_s6 }
  0x42   : > { %p12797_p12 = pnand %p12795_p11, %p13131_p7 }
  0x44   : > { %p12798_p13 = pneg %p12797_p12 }
  0x46   : > { %p12803_p2 = pnand %p12801_p0, %p12798_p13 }
  0x48   : > { %12806 = shalt.err (!%p12803_p2)
}
  0x49   : > { %s12807_s22 = scalar_lea.vmem %s332_s29, 384  ;;  %p12815_p9 = scmp.lt.s32.totalorder %s332_s29, %s332_s29 }
  0x4a   : > { %p12808_p4 = scmp.ne.s32.totalorder %s332_s29, %s12807_s22  ;;  %p12816_p10 = scmp.lt.s32.totalorder %s12807_s22, %s12807_s22 }
  0x4c   : > { %p12810_p6 = pnand %p12808_p4, %p13131_p7  ;;  %p12817_p1 = por %p12816_p10, %p12815_p9 }
  0x4e   : > { %p12811_p8 = pneg %p12810_p6 }
  0x50   : > { %p12818_p3 = pnand %p12817_p1, %p12811_p8 }
  0x52   : > { %12821 = shalt.err (!%p12818_p3)
}
  0x53   : > { %9829 = dma.hbm_to_vmem [thread:$0]  (!%p13115_p5), %s20857_s6, 384, %s332_s29, [#allocation5]  }
  0x54   : > { %s12931_s7 = smov [#allocation9]   ;;  %s12822_s13 = scalar_lea.hbm %s20860_s9, 192 }
  0x55   : > { %s358_s11 = sshll.u32 %s12931_s7, 4  ;;  %p12823_p11 = scmp.ne.s32.totalorder %s20860_s9, %s12822_s13  ;;  %s359_s11 = int_to_ptr.vmem [resolvable:$true] %s358_s11 }
  0x56   : > { %p12829_p12 = scmp.lt.u32.totalorder %s12822_s13, %s20860_s9 }
  0x57   : > { %p12825_p1 = pnand %p12823_p11, %p13131_p7 }
  0x59   : > { %p12826_p3 = pneg %p12825_p1 }
  0x5b   : > { %p12831_p13 = pnand %p12829_p12, %p12826_p3 }
  0x5d   : > { %12834 = shalt.err (!%p12831_p13)
}
  0x5e   : > { %s12835_s29 = scalar_lea.vmem %s359_s11, 192  ;;  %p12843_p6 = scmp.lt.s32.totalorder %s359_s11, %s359_s11 }
  0x5f   : > { %p12836_p0 = scmp.ne.s32.totalorder %s359_s11, %s12835_s29  ;;  %p12844_p8 = scmp.lt.s32.totalorder %s12835_s29, %s12835_s29 }
  0x61   : > { %p12838_p2 = pnand %p12836_p0, %p13131_p7  ;;  %p12845_p9 = por %p12844_p8, %p12843_p6 }
  0x63   : > { %p12839_p4 = pneg %p12838_p2 }
  0x65   : > { %p12846_p10 = pnand %p12845_p9, %p12839_p4 }
  0x67   : > { %12849 = shalt.err (!%p12846_p10)
}
  0x68   : > { %9835 = dma.hbm_to_vmem [thread:$0]  (!%p13115_p5), %s20860_s9, 192, %s359_s11, [#allocation8]  }
  0x69   : > { %s13213_s16 = sadd.s32 1, %s12922_s20   ;;  %s33_s27 = sadd.s32 1, %s12918_s19 }
  0x6a   : > { %s30_s26 = ssub.s32 %s12922_s20, %s13213_s16  ;;  %p40_p7 = scmp.ne.s32.totalorder %s12918_s19, %s12914_s18 }
  0x6b   : > { %p31_p11 = scmp.eq.s32.totalorder %s30_s26, 0  ;;  %p41_p1 = scmp.eq.s32.totalorder %s12922_s20, 0 }
  0x6c   : > { %p46_p3 = scmp.ne.s32.totalorder %s12914_s18, %s12910_s17  ;;  %p9844_p12 = scmp.lt.s32.totalorder %s12922_s20, 4 }
  0x6d   : > { %s13225_s10 = scalar_select %p31_p11, %s12918_s19, %s33_s27  }
  0x6e   : > { %p42_p13 = por %p41_p1, %p40_p7  ;;  %p21701_p0 = scmp.eq.s32.totalorder %s13100_s23, 0 }
  0x6f   : > { %s372_s30 = sand.u32 1, %s12918_s19   ;;  %s8180_s11 = sshll.u32 %s12922_s20, 4 }
  0x70   : > { %p13229_p2 = por %p21701_p0, %p46_p3  ;;  %s13238_s14 = scalar_lea.hbm %s20851_s0, %s8180_s11 }
  0x71   : > { %s375_s17 = scalar_lea.vmem [#allocation2], %s372_s30  ;;  %p13242_p5 = pnand %p9844_p12, %p42_p13 }
  0x72   : > { %s382_s15 = sshll.u32 %s375_s17, 4  ;;  %s373_s20 = scalar_lea.sflag [#allocation3], %s372_s30  ;;  %s13240_s15 = int_to_ptr.vmem [resolvable:$true] %s382_s15 }
  0x73   : > { %s12850_s25 = scalar_lea.hbm %s13238_s14, 16  ;;  %p12852_p6 = pneg %p13242_p5 }
  0x74   : > { %p12851_p4 = scmp.ne.s32.totalorder %s13238_s14, %s12850_s25  ;;  %s12855_s22 = scalar_lea.hbm %s20851_s0, 64 }
  0x75   : > { %p12856_p10 = scmp.lt.u32.totalorder %s13238_s14, %s20851_s0  ;;  %p12857_p7 = scmp.lt.u32.totalorder %s12855_s22, %s12850_s25 }
  0x76   : > { %p12853_p8 = pnand %p12852_p6, %p12851_p4  ;;  %p12859_p1 = scmp.lt.u32.totalorder %s12850_s25, %s13238_s14 }
  0x77   : > { %p12858_p11 = por %p12857_p7, %p12856_p10 }
  0x78   : > { %p12854_p9 = pneg %p12853_p8 }
  0x79   : > { %p12860_p3 = por %p12859_p1, %p12858_p11 }
  0x7b   : > { %p12861_p12 = pnand %p12860_p3, %p12854_p9 }
  0x7d   : > { %12864 = shalt.err (!%p12861_p12)
}
  0x7e   : > { %s12865_s30 = scalar_lea.vmem %s13240_s15, 16  ;;  %s12932_s11 = smov [#allocation2]  }
  0x7f   : > { %p12866_p13 = scmp.ne.s32.totalorder %s13240_s15, %s12865_s30  ;;  %s12870_s12 = sshll.u32 %s12932_s11, 4  ;;  %s12871_s12 = int_to_ptr.vmem [resolvable:$false] %s12870_s12 }
  0x80   : > { %s12872_s13 = scalar_lea.vmem %s12871_s12, 32  ;;  %p12873_p8 = scmp.lt.s32.totalorder %s13240_s15, %s12871_s12 }
  0x81   : > { %p12868_p0 = pnand %p12866_p13, %p12852_p6  ;;  %p12874_p10 = scmp.lt.s32.totalorder %s12872_s13, %s12865_s30 }
  0x83   : > { %p12869_p4 = pneg %p12868_p0  ;;  %p12875_p7 = por %p12874_p10, %p12873_p8 }
  0x85   : > { %p12876_p11 = pnand %p12875_p7, %p12869_p4 }
  0x87   : > { %12879 = shalt.err (!%p12876_p11)
}
  0x88   : > { %9839 = dma.hbm_to_vmem [thread:$0]  (!%p13242_p5), %s13238_s14, 16, %s13240_s15, %s373_s20  }
  0x89   : > { %p21704_p9 = scmp.ne.s32.totalorder %s21698_s24, 0 }
  0x8b   : > { %391 = sbr.rel (%p21704_p9) target bundleno = 3520 (0xdc0), region = 64 }
  0x92   : > { %s393_s17 = sand.u32 1, %s12914_s18  }
  0x93   : > { %s394_s25 = scalar_lea.sflag [#allocation3], %s393_s17  ;;  %s13274_s29 = scalar_lea.vmem [#allocation2], %s393_s17 }
  0x94   : > { %12897 = dma.done.wait (%p13229_p2), %s394_s25, 16  }
  0x95   : > { %12899 = vsyncadd (%p13229_p2), %s394_s25, 4294967280  ;;  %p21705_p6 = scmp.eq.s32.totalorder %s13100_s23, 0 }
  0x97   : > { %12901 = dma.done.wait (%p21705_p6), [#allocation5], 3456   ;;  %p21706_p1 = pmov %p21705_p6 }
  0x99   : > { %12903 = vsyncadd (%p21706_p1), [#allocation5], 4294963840  ;;  %p21707_p5 = pmov %p21706_p1 }
  0x9a   : > { %p21708_p3 = pmov %p21706_p1 }
  0x9b   : > { %12905 = dma.done.wait (%p21707_p5), [#allocation8], 19008  }
  0x9c   : > { %12907 = vsyncadd (%p21708_p3), [#allocation8], 4294948288  ;;  %v20895_v0 = vmov 0.0   ;;  %v457_v1 = vld [vmem:[#allocation4 + $0x8] sm:$0xff]  ;;  %v463_v2 = vld [vmem:[#allocation4 + $0x38] sm:$0xff]  ;;  %vm20929_vm0 = vcmask 261120   ;;  %v482_v38 = vlaneseq }
  0x9d   : > { %580 = vmatprep.mubr.f32.mxu1 %v20895_v0  ;;  %722 = vmatprep.mubr.f32.mxu0 %v20895_v0  ;;  %v461_v3 = vld [vmem:[#allocation4 + $0x28] sm:$0xff]  ;;  %v8342_v4 = vpack.c.bf16 %v463_v2, %v457_v1  ;;  %v467_v5 = vld [vmem:[#allocation4 + $0x58] sm:$0xff]  ;;  %v456_v6 = vld [vmem:[#allocation4] sm:$0xff]  ;;  %s12934_s14 = smov 64   ;;  %vm773_vm1 = vcmask 1040384   ;;  %vm775_vm2 = vcmask 1041408  }
  0x9e   : > { %v462_v7 = vld [vmem:[#allocation4 + $0x30] sm:$0xff]  ;;  %v8358_v8 = vpack.c.bf16 %v467_v5, %v461_v3  ;;  %v460_v10 = vld [vmem:[#allocation4 + $0x20] sm:$0xff]  ;;  %v469_v12 = vld [vmem:[#allocation4 + $0x68] sm:$0xff]  ;;  %v483_v39 = vshrl.u32 %v482_v38, 7  ;;  %vm777_vm3 = vcmask 1042432   ;;  %vm779_vm4 = vcmask 1043456  }
  0x9f   : > { %v8344_v9 = vpack.c.bf16 %v462_v7, %v456_v6  ;;  %v466_v11 = vld [vmem:[#allocation4 + $0x50] sm:$0xff]  ;;  %8343 = vmatprep.subr.bf16.mxu1 %v8342_v4  ;;  %v475_v14 = vld [vmem:[#allocation4 + $0x98] sm:$0xff]  ;;  %v473_v15 = vld [vmem:[#allocation4 + $0x88] sm:$0xff]  ;;  %vm781_vm5 = vcmask 1044480   ;;  %vm783_vm6 = vcmask 1045504   ;;  %vm785_vm7 = vcmask 1046528  }
  0xa0   : > { %v8360_v13 = vpack.c.bf16 %v466_v11, %v460_v10  ;;  %v479_v16 = vld [vmem:[#allocation4 + $0xb8] sm:$0xff]  ;;  %8359 = vmatprep.subr.bf16.mxu0 %v8358_v8  ;;  %v8346_v17 = vpack.c.bf16 %v475_v14, %v469_v12  ;;  %v468_v19 = vld [vmem:[#allocation4 + $0x60] sm:$0xff]  ;;  %v474_v20 = vld [vmem:[#allocation4 + $0x90] sm:$0xff]  ;;  %v484_v40 = vsub.s32 0, %v483_v39  ;;  %v500_v42 = vsub.s32 4, %v483_v39  ;;  %s20873_s15 = smov 126  }
  0xa1   : > { %8345 = vmatpush1.bf16.msra.mxu1 %v8344_v9  ;;  %v8362_v18 = vpack.c.bf16 %v479_v16, %v473_v15  ;;  %v472_v21 = vld [vmem:[#allocation4 + $0x80] sm:$0xff]  ;;  %v8348_v22 = vpack.c.bf16 %v474_v20, %v468_v19  ;;  %v478_v23 = vld [vmem:[#allocation4 + $0xb0] sm:$0xff]  ;;  %v459_v24 = vld [vmem:[#allocation4 + $0x18] sm:$0xff]  ;;  %v488_v43 = vsub.s32 1, %v483_v39  ;;  %v504_v44 = vsub.s32 5, %v483_v39  ;;  %s12937_s21 = smov 127  }
  0xa2   : > { %8361 = vmatpush1.bf16.msra.mxu0 %v8360_v13  ;;  %8347 = vmatprep.subr.bf16.mxu1 %v8346_v17  ;;  %v8364_v25 = vpack.c.bf16 %v478_v23, %v472_v21  ;;  %v465_v26 = vld [vmem:[#allocation4 + $0x48] sm:$0xff]  ;;  %v458_v27 = vld [vmem:[#allocation4 + $0x10] sm:$0xff]  ;;  %v464_v28 = vld [vmem:[#allocation4 + $0x40] sm:$0xff]  ;;  %v492_v53 = vsub.s32 2, %v483_v39  ;;  %v496_v57 = vsub.s32 3, %v483_v39  ;;  %v12935_v38 = vmov 0.0|0.0  }
  0xa3   : > { %8363 = vmatprep.subr.bf16.mxu0 %v8362_v18  ;;  %v455_v29 = vld [vmem:[%s13274_s29] sm:$0x1]  ;;  %v8350_v30 = vpack.c.bf16 %v465_v26, %v459_v24  ;;  %v477_v32 = vld [vmem:[#allocation4 + $0xa8] sm:$0xff]  ;;  %v8352_v33 = vpack.c.bf16 %v464_v28, %v458_v27  ;;  %v470_v34 = vld [vmem:[#allocation4 + $0x70] sm:$0xff]  ;;  %s20879_s20 = smov 112   ;;  %s20871_s28 = smov 125  }
  0xa4   : > { %v471_v31 = vld [vmem:[#allocation4 + $0x78] sm:$0xff]  ;;  %v476_v35 = vld [vmem:[#allocation4 + $0xa0] sm:$0xff]  ;;  %s20868_s22 = smov 110   ;;  %s12941_s27 = smov 111   ;;  %vm20923_vm8 = vcmask 523264   ;;  %vm12952_vm9 = vmmov 1  }
  0xa5   : > { %8349 = vmatpush1.bf16.msra.mxu1 %v8348_v22  ;;  %v8354_v36 = vpack.c.bf16 %v477_v32, %v471_v31  ;;  %v8356_v37 = vpack.c.bf16 %v476_v35, %v470_v34  ;;  %v480_v41 = vld [vmem:[%s20853_s2] sm:$0x3f]  ;;  %s12942_s26 = smov 96   ;;  %s20865_s30 = smov 109   ;;  %vm8403_vm10 = vmpackc.low %vm781_vm5, %vm12952_vm9  ;;  %vm999_vm12 = vcmask 105472   ;;  %vm20881_vm13 = vcmask 785408  }
  0xa6   : > { %8365 = vmatpush1.bf16.msra.mxu0 %v8364_v25  ;;  %8351 = vmatprep.subr.bf16.mxu1 %v8350_v30  ;;  %v485_v45 = vrot.slane %v480_v41, %v484_v40  ;;  %v501_v46 = vrot.slane %v480_v41, %v500_v42  ;;  %v489_v47 = vrot.slane %v480_v41, %v488_v43  ;;  %s20866_s11 = smov 94   ;;  %s20891_s12 = smov 95   ;;  %vm13352_vm11 = vmpackc.low %vm773_vm1, %vm12952_vm9  ;;  %vm1184_vm14 = vcmask 777216  }
  0xa7   : > { %v505_v48 = vrot.slane %v480_v41, %v504_v44  ;;  %v493_v1 = vrot.slane %v480_v41, %v492_v53  ;;  %v497_v4 = vrot.slane %v480_v41, %v496_v57  ;;  %s20889_s13 = smov 80   ;;  %s20869_s17 = smov 93   ;;  %vm1197_vm15 = vcmask 719872  }
  0xa8   : > { %8188 = vmatmul.mubr.msk.f32.vlgmr.msra.gmra.mrb[0].mxu1 %vm20929_vm0, %v455_v29  ;;  %s12948_s25 = smov 78   ;;  %s20875_s29 = smov 79   ;;  %vm1278_vm9 = vcmask 982016  }
  0xa9   : > { %8190 = vmatmul.mubr.msk.f32.vlgmr.msra.gmra.mrb[0].mxu0 %vm20929_vm0, %v455_v29  ;;  %8353 = vmatpush1.bf16.msra.mxu1 %v8352_v33  ;;  %s20890_s24 = smov 77   ;;  %s12954_s7 = smov 104  }
  0xaa   : > { %8355 = vmatprep.subr.bf16.mxu1 %v8354_v36  ;;  %651 = vmatprep.mubr.f32.mxu1 %v20895_v0  ;;  %p450_p2 = scmp.lt.s32.totalorder %s13100_s23, 3 }
  0xab   : > { %1076 = vmatprep.mubr.f32.mxu0 %v20895_v0 }
  0xac   : > { %s23735_s23 = smov (!%p450_p2, %s13100_s23), 3 }
  0xad   : > { %8357 = vmatpush1.bf16.msra.mxu1 %v8356_v37 }
  0xae   : > { %8366 = vmatprep.subr.bf16.mxu1 %v12935_v38 }
  0xb0   : > { %8189 = vmatmul.mubr.msk.f32.vlgmr.msra.gmra.mrb[2].mxu1 %vm20929_vm0, %v455_v29  ;;  %vm3938_vm0 = vcmask 162816  }
 0x17b   : > { %v582_v49 = vpop.f32.mrb[0].mxu1 }
 0x17c   : > { %v583_v50 = vadd.f32 %v582_v49, %v485_v45  ;;  %v724_v51 = vpop.f32.mrb[0].mxu0  ;;  %v584_v52 = vpop.f32.mrb[1].mxu1  ;;  %v12447_v49 = vld [vmem:[%s20856_s5 + $0x4] ss:$8 sps:$4 sm:$0x7f]  }
 0x17d   : > { %v725_v54 = vadd.f32 %v724_v51, %v501_v46  ;;  %v585_v55 = vadd.f32 %v584_v52, %v489_v47  ;;  %v726_v56 = vpop.f32.mrb[1].mxu0  ;;  %v894_v46 = vld [vmem:[%s20854_s3 + $0x8] sm:$0xff]  ;;  %v897_v47 = vld [vmem:[%s20855_s4] sm:$0xff]  ;;  %8404 = vmatprep.subr.msk.bf16.mxu0 %vm8403_vm10, %v12447_v49 }
 0x17e   : > { %v729_v58 = vmax.f32 %v583_v50, 0.0  ;;  %v727_v59 = vadd.f32 %v726_v56, %v505_v48  ;;  %8191 = vmatprep.mubr.msk.f32.mxu1 %vm20923_vm8, %v894_v46  ;;  %v898_v48 = vld [vmem:[%s20855_s4 + $0x8] sm:$0xff]  ;;  %v12951_v50 = vmov 0  }
 0x17f   : > { %v733_v60 = vmax.f32 %v725_v54, 0.0  ;;  %v730_v61 = vmax.f32 %v585_v55, 0.0  ;;  %10065 = vset.pattern.permute.xlu0 %v12951_v50  ;;  %10066 = vset.pattern.permute.xlu1 %v12951_v50  ;;  %v12449_v51 = vld [vmem:[%s20856_s5] ss:$8 sps:$4 sm:$0x7f]  }
 0x180   : > { %v736_v62 = vrot.slane %v729_v58, 7  ;;  %v734_v63 = vmax.f32 %v727_v59, 0.0  ;;  %8407 = vmatpush1.bf16.msk.msra.mxu0 %vm8403_vm10, %v12449_v51  ;;  %vm1249_vm10 = vcmask 588800  }
 0x181   : > { %v762_v2 = vrot.slane %v733_v60, 7  ;;  %v743_v3 = vrot.slane %v730_v61, 5  ;;  %v741_v20 = vrot.slane %v730_v61, 6  ;;  %8440 = vmatprep.subr.bf16.mxu0 %v12935_v38 }
 0x182   : > { %v769_v5 = vrot.slane %v734_v63, 5  ;;  %v767_v28 = vrot.slane %v734_v63, 6 }
 0x183   : > { %v653_v6 = vpop.f32.mrb[2].mxu1  ;;  %v9975_v7 = vpack.i.bf16 %v743_v3, %v736_v62 }
 0x184   : > { %v654_v8 = vadd.f32 %v653_v6, %v493_v1  ;;  %v655_v9 = vpop.f32.mrb[3].mxu1  ;;  %v9985_v10 = vpack.i.bf16 %v769_v5, %v762_v2 }
 0x185   : > { %v656_v11 = vadd.f32 %v655_v9, %v497_v4  ;;  %9976 = vrot.lane.b32.xlu0 %v9975_v7, %s12934_s14 }
 0x186   : > { %v731_v12 = vmax.f32 %v654_v8, 0.0  ;;  %9986 = vrot.lane.b32.xlu1 %v9985_v10, %s12934_s14 }
 0x187   : > { %v732_v13 = vmax.f32 %v656_v11, 0.0 }
 0x188   : > { %v750_v14 = vrot.slane %v731_v12, 3  ;;  %v748_v24 = vrot.slane %v731_v12, 4 }
 0x189   : > { %v757_v15 = vrot.slane %v732_v13, 1  ;;  %v755_v34 = vrot.slane %v732_v13, 2 }
 0x18b   : > { %v9980_v16 = vpack.i.bf16 %v757_v15, %v750_v14 }
 0x18d   : > { %9981 = vrot.lane.b32.xlu0 %v9980_v16, %s12934_s14 }
 0x1f7   : > { %v9977_v17 = vpop.permute.xlu0 %9976 }
 0x1f8   : > { %v9987_v18 = vpop.permute.xlu1 %9986  ;;  %v9978_v19 = vunpack.i.l.bf16 %v9977_v17  ;;  %v9979_v22 = vunpack.i.h.bf16 %v9977_v17 }
 0x1f9   : > { %v9988_v21 = vunpack.i.l.bf16 %v9987_v18  ;;  %v9989_v30 = vunpack.i.h.bf16 %v9987_v18 }
 0x1fa   : > { %v774_v23 = vsel %vm773_vm1, %v729_v58, %v9978_v19 }
 0x1fb   : > { %v776_v25 = vsel %vm775_vm2, %v774_v23, %v741_v20  ;;  %v787_v26 = vsel %vm773_vm1, %v733_v60, %v9988_v21  ;;  %vm1119_vm1 = vcmask 916480  }
 0x1fc   : > { %v778_v27 = vsel %vm777_vm3, %v776_v25, %v9979_v22  ;;  %v788_v31 = vsel %vm775_vm2, %v787_v26, %v767_v28  ;;  %vm1132_vm2 = vcmask 908288  }
 0x1fd   : > { %v780_v29 = vsel %vm779_vm4, %v778_v27, %v748_v24  ;;  %v13309_v35 = vsel %vm777_vm3, %v788_v31, %v9989_v30  ;;  %vm1210_vm3 = vcmask 711680  }
 0x1fe   : > { %v793_v43 = vrot.slane %v13309_v35, 4 }
 0x1ff   : > { %v9982_v32 = vpop.permute.xlu0 %9981 }
 0x200   : > { %v9983_v33 = vunpack.i.l.bf16 %v9982_v32  ;;  %v9984_v36 = vunpack.i.h.bf16 %v9982_v32 }
 0x202   : > { %v782_v37 = vsel %vm781_vm5, %v780_v29, %v9983_v33  ;;  %vm1271_vm5 = vcmask 1039360  }
 0x203   : > { %v784_v39 = vsel %vm783_vm6, %v782_v37, %v755_v34  ;;  %vm1236_vm6 = vcmask 646144  }
 0x204   : > { %v13313_v40 = vsel %vm785_vm7, %v784_v39, %v9984_v36  ;;  %vm1145_vm7 = vcmask 850944  }
 0x205   : > { %v792_v41 = vrot.slane %v13313_v40, 4  ;;  %v9995_v42 = vpack.i.bf16 %v13309_v35, %v13313_v40 }
 0x207   : > { %9996 = vrot.lane.b32.xlu0 %v9995_v42, %s20873_s15  ;;  %v794_v44 = vsel %vm779_vm4, %v792_v41, %v793_v43  ;;  %s20877_s15 = smov 103  }
 0x208   : > { %v9990_v45 = vpack.i.bf16 %v794_v44, %v792_v41 }
 0x20a   : > { %9991 = vrot.lane.b32.xlu1 %v9990_v45, %s12937_s21 }
 0x20b   : > { %10001 = vrot.lane.b32.xlu0 %v9995_v42, %s20879_s20 }
 0x20e   : > { %10006 = vrot.lane.b32.xlu1 %v9990_v45, %s20871_s28  ;;  %s20876_s28 = smov 88  }
 0x20f   : > { %10016 = vrot.lane.b32.xlu0 %v9995_v42, %s20868_s22  ;;  %s12957_s22 = smov 87  }
 0x212   : > { %10011 = vrot.lane.b32.xlu1 %v9990_v45, %s12941_s27 }
 0x213   : > { %10021 = vrot.lane.b32.xlu0 %v9995_v42, %s12942_s26 }
 0x216   : > { %10026 = vrot.lane.b32.xlu1 %v9990_v45, %s20865_s30  ;;  %s20892_s30 = smov 119  }
 0x217   : > { %10036 = vrot.lane.b32.xlu0 %v9995_v42, %s20866_s11  ;;  %s20888_s11 = smov 71  }
 0x21a   : > { %10031 = vrot.lane.b32.xlu1 %v9990_v45, %s20891_s12 }
 0x21b   : > { %10041 = vrot.lane.b32.xlu0 %v9995_v42, %s20889_s13 }
 0x21e   : > { %10046 = vrot.lane.b32.xlu1 %v9990_v45, %s20869_s17  ;;  %s21713_s17 = smov 125  }
 0x21f   : > { %10056 = vrot.lane.b32.xlu0 %v9995_v42, %s12948_s25  ;;  %s20894_s25 = smov 122  }
 0x222   : > { %10051 = vrot.lane.b32.xlu1 %v9990_v45, %s20875_s29 }
 0x223   : > { %901 = vperm.xlu0 %10065, %v897_v47  }
 0x226   : > { %10061 = vrot.lane.b32.xlu1 %v9990_v45, %s20890_s24  ;;  %s12978_s24 = smov 23  }
 0x22a   : > { %906 = vperm.xlu1 %10066, %v898_v48  }
 0x279   : > { %v9997_v55 = vpop.permute.xlu0 %9996 }
 0x27a   : > { %v9998_v61 = vunpack.i.l.bf16 %v9997_v55  ;;  %v9999_v62 = vunpack.i.h.bf16 %v9997_v55 }
 0x27c   : > { %v9992_v53 = vpop.permute.xlu1 %9991 }
 0x27d   : > { %v9993_v54 = vunpack.i.l.bf16 %v9992_v53  ;;  %v9994_v57 = vunpack.i.h.bf16 %v9992_v53  ;;  %v10002_v1 = vpop.permute.xlu0 %10001 }
 0x27e   : > { %v10004_v6 = vunpack.i.h.bf16 %v10002_v1  ;;  %v10003_v10 = vunpack.i.l.bf16 %v10002_v1 }
 0x27f   : > { %v885_v56 = vsel %vm779_vm4, %v13309_v35, %v9993_v54  ;;  %v8370_v63 = vpack.c.bf16 %v9998_v61, %v9994_v57  ;;  %v893_v57 = vld [vmem:[%s20854_s3] sm:$0xff] }
 0x280   : > { %v10007_v58 = vpop.permute.xlu1 %10006  ;;  %v8367_v59 = vpack.c.bf16 %v885_v56, %v13313_v40 }
 0x281   : > { %v10008_v60 = vunpack.i.l.bf16 %v10007_v58  ;;  %v10009_v2 = vunpack.i.h.bf16 %v10007_v58  ;;  %v10017_v11 = vpop.permute.xlu0 %10016  ;;  %v896_v58 = vld [vmem:[%s20854_s3 + $0x18] sm:$0xff] }
 0x282   : > { %8368 = vmatpush1.bf16.msra.mxu1 %v8367_v59  ;;  %v10018_v15 = vunpack.i.l.bf16 %v10017_v11  ;;  %v10019_v17 = vunpack.i.h.bf16 %v10017_v11  ;;  %v895_v59 = vld [vmem:[%s20854_s3 + $0x10] sm:$0xff] }
 0x283   : > { %8369 = vmatprep.subr.bf16.mxu1 %v12935_v38  ;;  %v886_v4 = vsel %vm779_vm4, %v9999_v62, %v10008_v60 }
 0x284   : > { %v10012_v3 = vpop.permute.xlu1 %10011  ;;  %v8373_v7 = vpack.c.bf16 %v10009_v2, %v886_v4 }
 0x285   : > { %v10013_v5 = vunpack.i.l.bf16 %v10012_v3  ;;  %v10014_v12 = vunpack.i.h.bf16 %v10012_v3  ;;  %v10022_v19 = vpop.permute.xlu0 %10021 }
 0x286   : > { %8371 = vmatpush1.bf16.msra.mxu1 %v8370_v63  ;;  %v10024_v23 = vunpack.i.h.bf16 %v10022_v19  ;;  %v10023_v27 = vunpack.i.l.bf16 %v10022_v19 }
 0x287   : > { %8372 = vmatprep.subr.bf16.mxu1 %v12935_v38  ;;  %v887_v9 = vsel %vm779_vm4, %v10004_v6, %v10013_v5  ;;  %v8379_v18 = vpack.c.bf16 %v10018_v15, %v10014_v12 }
 0x288   : > { %v10027_v8 = vpop.permute.xlu1 %10026  ;;  %v8376_v13 = vpack.c.bf16 %v887_v9, %v10003_v10 }
 0x289   : > { %v10028_v14 = vunpack.i.l.bf16 %v10027_v8  ;;  %v10029_v20 = vunpack.i.h.bf16 %v10027_v8  ;;  %v10037_v28 = vpop.permute.xlu0 %10036 }
 0x28a   : > { %8374 = vmatpush1.bf16.msra.mxu1 %v8373_v7  ;;  %v10038_v32 = vunpack.i.l.bf16 %v10037_v28  ;;  %v10039_v34 = vunpack.i.h.bf16 %v10037_v28 }
 0x28b   : > { %8375 = vmatprep.subr.bf16.mxu1 %v12935_v38  ;;  %v888_v21 = vsel %vm779_vm4, %v10019_v17, %v10028_v14 }
 0x28c   : > { %v10032_v16 = vpop.permute.xlu1 %10031  ;;  %v8382_v24 = vpack.c.bf16 %v10029_v20, %v888_v21 }
 0x28d   : > { %v10033_v22 = vunpack.i.l.bf16 %v10032_v16  ;;  %v10034_v29 = vunpack.i.h.bf16 %v10032_v16  ;;  %v10042_v36 = vpop.permute.xlu0 %10041 }
 0x28e   : > { %8377 = vmatpush1.bf16.msra.mxu1 %v8376_v13  ;;  %v10044_v41 = vunpack.i.h.bf16 %v10042_v36  ;;  %v10043_v44 = vunpack.i.l.bf16 %v10042_v36 }
 0x28f   : > { %8378 = vmatprep.subr.bf16.mxu1 %v12935_v38  ;;  %v889_v26 = vsel %vm779_vm4, %v10024_v23, %v10033_v22  ;;  %v8388_v35 = vpack.c.bf16 %v10038_v32, %v10034_v29 }
 0x290   : > { %v10047_v25 = vpop.permute.xlu1 %10046  ;;  %v8385_v30 = vpack.c.bf16 %v889_v26, %v10023_v27 }
 0x291   : > { %v10048_v31 = vunpack.i.l.bf16 %v10047_v25  ;;  %v10049_v37 = vunpack.i.h.bf16 %v10047_v25  ;;  %v10057_v46 = vpop.permute.xlu0 %10056 }
 0x292   : > { %8380 = vmatpush1.bf16.msra.mxu1 %v8379_v18  ;;  %v10058_v50 = vunpack.i.l.bf16 %v10057_v46  ;;  %v10059_v51 = vunpack.i.h.bf16 %v10057_v46 }
 0x293   : > { %8381 = vmatprep.subr.bf16.mxu1 %v12935_v38  ;;  %v890_v39 = vsel %vm779_vm4, %v10039_v34, %v10048_v31 }
 0x294   : > { %v10052_v33 = vpop.permute.xlu1 %10051  ;;  %v8391_v42 = vpack.c.bf16 %v10049_v37, %v890_v39 }
 0x295   : > { %v10053_v40 = vunpack.i.l.bf16 %v10052_v33  ;;  %v10054_v47 = vunpack.i.h.bf16 %v10052_v33 }
 0x296   : > { %8383 = vmatpush1.bf16.msra.mxu1 %v8382_v24 }
 0x297   : > { %8384 = vmatprep.subr.bf16.mxu1 %v12935_v38  ;;  %v891_v43 = vsel %vm779_vm4, %v10044_v41, %v10053_v40  ;;  %v8397_v53 = vpack.c.bf16 %v10058_v50, %v10054_v47 }
 0x298   : > { %v10062_v45 = vpop.permute.xlu1 %10061  ;;  %v8394_v48 = vpack.c.bf16 %v891_v43, %v10043_v44 }
 0x299   : > { %v10063_v49 = vunpack.i.l.bf16 %v10062_v45  ;;  %v10064_v54 = vunpack.i.h.bf16 %v10062_v45 }
 0x29a   : > { %8386 = vmatpush1.bf16.msra.mxu1 %v8385_v30 }
 0x29b   : > { %8387 = vmatprep.subr.bf16.mxu1 %v12935_v38  ;;  %v892_v55 = vsel %vm779_vm4, %v10059_v51, %v10063_v49  ;;  %vm1223_vm4 = vcmask 654336  }
 0x29c   : > { %v8400_v56 = vpack.c.bf16 %v10064_v54, %v892_v55 }
 0x29e   : > { %8389 = vmatpush1.bf16.msra.mxu1 %v8388_v35 }
 0x29f   : > { %8390 = vmatprep.subr.bf16.mxu1 %v12935_v38 }
 0x2a2   : > { %8392 = vmatpush1.bf16.msra.mxu1 %v8391_v42  ;;  %v902_v60 = vpop.permute.xlu0 %901 }
 0x2a3   : > { %8393 = vmatprep.subr.bf16.mxu1 %v12935_v38 }
 0x2a6   : > { %8395 = vmatpush1.bf16.msra.mxu1 %v8394_v48 }
 0x2a7   : > { %8396 = vmatprep.subr.bf16.mxu1 %v12935_v38 }
 0x2a9   : > { %v907_v1 = vpop.permute.xlu1 %906 }
 0x2aa   : > { %8398 = vmatpush1.bf16.msra.mxu1 %v8397_v53 }
 0x2ab   : > { %8399 = vmatprep.subr.bf16.mxu1 %v12935_v38 }
 0x2ae   : > { %8401 = vmatpush1.bf16.msra.mxu1 %v8400_v56 }
 0x2b1   : > { %981 = vmatmul.mubr.f32.vlgmr.msra.gmra.mrb[4].mxu1 %v893_v57 }
 0x2b2   : > { %8192 = vmatprep.mubr.msk.f32.mxu1 %vm20923_vm8, %v896_v58 }
 0x2b5   : > { %986 = vmatmul.mubr.f32.gmra.mrb[6].mxu1 %v895_v59 }
 0x384   : > { %v982_v61 = vpop.f32.mrb[4].mxu1 }
 0x385   : > { %v983_v62 = vadd.f32 %v982_v61, %v902_v60  ;;  %v984_v63 = vpop.f32.mrb[5].mxu1 }
 0x387   : > { %v991_v2 = vmax.f32 %v983_v62, 0.0 }
 0x388   : > { %v987_v3 = vpop.f32.mrb[6].mxu1 }
 0x389   : > { %v988_v4 = vadd.f32 %v987_v3, %v907_v1  ;;  %v989_v5 = vpop.f32.mrb[7].mxu1  ;;  %8195 = vmatmul.mubr.msk.f32.vlgmr.msra.gmra.mrb[2].mxu0 %vm999_vm12, %v991_v2 }
 0x38a   : > { %1082 = vmatprep.mubr.f32.mxu0 %v20895_v0 }
 0x38b   : > { %v992_v6 = vmax.f32 %v988_v4, 0.0 }
 0x38d   : > { %8196 = vmatmul.mubr.msk.f32.gmra.mrb[4].mxu0 %vm999_vm12, %v992_v6  ;;  %vm20882_vm12 = vcmask 973824  }
 0x45c   : > { %v13389_v7 = vpop.f32.mrb[2].mxu0 }
 0x45d   : > { %v1080_v8 = vpop.f32.mrb[3].mxu0 }
 0x45e   : > { %v10067_v9 = vpack.i.bf16 %v1080_v8, %v13389_v7 }
 0x460   : > { %10068 = vrot.lane.b32.xlu0 %v10067_v9, %s20879_s20  ;;  %v13393_v10 = vpop.f32.mrb[4].mxu0 }
 0x461   : > { %v1086_v11 = vpop.f32.mrb[5].mxu0  ;;  %v10127_v12 = vpack.i.bf16 %v13393_v10, %v13389_v7  ;;  %v8410_v15 = vpack.c.bf16 %v13393_v10, %v13389_v7 }
 0x462   : > { %v10142_v13 = vpack.i.bf16 %v1086_v11, %v13393_v10  ;;  %v10202_v14 = vpack.i.bf16 %v1086_v11, %v1080_v8 }
 0x463   : > { %10128 = vrot.lane.b32.xlu1 %v10127_v12, %s12937_s21 }
 0x464   : > { %10073 = vrot.lane.b32.xlu0 %v10067_v9, %s12941_s27 }
 0x467   : > { %10138 = vrot.lane.b32.xlu1 %v10127_v12, %s20892_s30 }
 0x468   : > { %10078 = vrot.lane.b32.xlu0 %v10067_v9, %s12954_s7 }
 0x46b   : > { %10143 = vrot.lane.b32.xlu1 %v10142_v13, %s20879_s20  ;;  %s20883_s20 = smov 115  }
 0x46c   : > { %10083 = vrot.lane.b32.xlu0 %v10067_v9, %s20877_s15 }
 0x46f   : > { %10148 = vrot.lane.b32.xlu1 %v10142_v13, %s12941_s27  ;;  %s12958_s27 = smov 72  }
 0x470   : > { %10088 = vrot.lane.b32.xlu0 %v10067_v9, %s12942_s26 }
 0x473   : > { %10153 = vrot.lane.b32.xlu1 %v10142_v13, %s12954_s7 }
 0x474   : > { %10093 = vrot.lane.b32.xlu0 %v10067_v9, %s20891_s12 }
 0x477   : > { %10158 = vrot.lane.b32.xlu1 %v10142_v13, %s20877_s15  ;;  %s12969_s15 = smov 114  }
 0x478   : > { %10098 = vrot.lane.b32.xlu0 %v10067_v9, %s20876_s28 }
 0x47b   : > { %10163 = vrot.lane.b32.xlu1 %v10142_v13, %s12942_s26  ;;  %s12960_s26 = smov 120  }
 0x47c   : > { %10103 = vrot.lane.b32.xlu0 %v10067_v9, %s12957_s22 }
 0x47f   : > { %10168 = vrot.lane.b32.xlu1 %v10142_v13, %s20891_s12  ;;  %s12979_s12 = smov 22  }
 0x480   : > { %10108 = vrot.lane.b32.xlu0 %v10067_v9, %s20889_s13 }
 0x483   : > { %10173 = vrot.lane.b32.xlu1 %v10142_v13, %s20876_s28  ;;  %s20885_s28 = smov 118  }
 0x484   : > { %10113 = vrot.lane.b32.xlu0 %v10067_v9, %s20875_s29 }
 0x487   : > { %10178 = vrot.lane.b32.xlu1 %v10142_v13, %s12957_s22  ;;  %s21711_s22 = sld [smem:[#allocation343_spill]] }
 0x488   : > { %10118 = vrot.lane.b32.xlu0 %v10067_v9, %s12958_s27 }
 0x48b   : > { %10183 = vrot.lane.b32.xlu1 %v10142_v13, %s20889_s13  ;;  %s12977_s13 = smov 55  }
 0x48c   : > { %10123 = vrot.lane.b32.xlu0 %v10067_v9, %s20888_s11 }
 0x48f   : > { %10188 = vrot.lane.b32.xlu1 %v10142_v13, %s20875_s29  ;;  %s20887_s29 = smov 121  }
 0x490   : > { %10133 = vrot.lane.b32.xlu0 %v10127_v12, %s12960_s26 }
 0x493   : > { %10193 = vrot.lane.b32.xlu1 %v10142_v13, %s12958_s27  ;;  %s20886_s27 = smov 124  }
 0x494   : > { %10203 = vrot.lane.b32.xlu0 %v10202_v14, %s12937_s21 }
 0x497   : > { %10198 = vrot.lane.b32.xlu1 %v10142_v13, %s20888_s11  ;;  %s12976_s11 = smov 56  }
 0x498   : > { %10213 = vrot.lane.b32.xlu0 %v10202_v14, %s20892_s30 }
 0x49b   : > { %10208 = vrot.lane.b32.xlu1 %v10202_v14, %s12960_s26 }
 0x49c   : > { %10223 = vrot.lane.b32.xlu0 %v10142_v13, %s12934_s14 }
 0x49f   : > { %10218 = vrot.lane.b32.xlu1 %v10067_v9, %s12934_s14 }
 0x4d2   : > { %v13427_v16 = vpop.permute.xlu0 %10068 }
 0x4d3   : > { %v10071_v6 = vunpack.i.h.bf16 %v13427_v16  ;;  %v10070_v7 = vunpack.i.l.bf16 %v13427_v16 }
 0x4d5   : > { %v13429_v17 = vpop.permute.xlu1 %10128 }
 0x4d6   : > { %v13431_v18 = vpop.permute.xlu0 %10073  ;;  %v10131_v42 = vunpack.i.h.bf16 %v13429_v17  ;;  %v10130_v43 = vunpack.i.l.bf16 %v13429_v17 }
 0x4d7   : > { %v10076_v8 = vunpack.i.h.bf16 %v13431_v18 }
 0x4d8   : > { %v8414_v54 = vpack.c.bf16 %v10131_v42, %v10130_v43 }
 0x4d9   : > { %v13433_v19 = vpop.permute.xlu1 %10138 }
 0x4da   : > { %v13435_v20 = vpop.permute.xlu0 %10078  ;;  %v10141_v9 = vunpack.i.h.bf16 %v13433_v19  ;;  %v10140_v11 = vunpack.i.l.bf16 %v13433_v19 }
 0x4dd   : > { %v13437_v21 = vpop.permute.xlu1 %10143 }
 0x4de   : > { %v13439_v22 = vpop.permute.xlu0 %10083  ;;  %v10146_v12 = vunpack.i.h.bf16 %v13437_v21  ;;  %v10145_v13 = vunpack.i.l.bf16 %v13437_v21 }
 0x4e1   : > { %v13441_v23 = vpop.permute.xlu1 %10148 }
 0x4e2   : > { %v10089_v24 = vpop.permute.xlu0 %10088  ;;  %v10151_v14 = vunpack.i.h.bf16 %v13441_v23 }
 0x4e3   : > { %v10091_v29 = vunpack.i.h.bf16 %v10089_v24  ;;  %v10090_v30 = vunpack.i.l.bf16 %v10089_v24  ;;  %v10150_v24 = vunpack.i.l.bf16 %v13441_v23 }
 0x4e5   : > { %v13443_v25 = vpop.permute.xlu1 %10153  ;;  %v1172_v37 = vsel %vm20881_vm13, %v10090_v30, %v10091_v29 }
 0x4e6   : > { %v10094_v26 = vpop.permute.xlu0 %10093 }
 0x4e7   : > { %v10096_v35 = vunpack.i.h.bf16 %v10094_v26  ;;  %v10095_v36 = vunpack.i.l.bf16 %v10094_v26 }
 0x4e9   : > { %v13445_v27 = vpop.permute.xlu1 %10158  ;;  %v1185_v49 = vsel %vm1184_vm14, %v10095_v36, %v10096_v35  ;;  %v10075_v36 = vunpack.i.l.bf16 %v13431_v18  ;;  %v10155_v18 = vunpack.i.l.bf16 %v13443_v25 }
 0x4ea   : > { %v10099_v28 = vpop.permute.xlu0 %10098 }
 0x4eb   : > { %v10101_v47 = vunpack.i.h.bf16 %v10099_v28  ;;  %v10100_v48 = vunpack.i.l.bf16 %v10099_v28 }
 0x4ed   : > { %v10164_v31 = vpop.permute.xlu1 %10163  ;;  %v1198_v58 = vsel %vm1197_vm15, %v10100_v48, %v10101_v47 }
 0x4ee   : > { %v10166_v32 = vunpack.i.h.bf16 %v10164_v31  ;;  %v10165_v33 = vunpack.i.l.bf16 %v10164_v31  ;;  %v13447_v34 = vpop.permute.xlu0 %10103 }
 0x4ef   : > { %v10106_v4 = vunpack.i.h.bf16 %v13447_v34  ;;  %v10105_v5 = vunpack.i.l.bf16 %v13447_v34 }
 0x4f0   : > { %v1173_v39 = vsel %vm20881_vm13, %v10165_v33, %v10166_v32  ;;  %vm1545_vm13 = vcmask 629760  }
 0x4f1   : > { %v10169_v40 = vpop.permute.xlu1 %10168  ;;  %v8408_v41 = vpack.c.bf16 %v1173_v39, %v1172_v37  ;;  %v1211_v32 = vsel %vm1210_vm3, %v10105_v5, %v10106_v4  ;;  %v8422_v37 = vpack.c.bf16 %v10141_v9, %v10140_v11  ;;  %v1121_v39 = vsel %vm1119_vm1, %v10145_v13, %v10146_v12  ;;  %v1337_v12 = vld [vmem:[#allocation6 + $0x8] sm:$0xff] }
 0x4f2   : > { %v10171_v44 = vunpack.i.h.bf16 %v10169_v40  ;;  %v10170_v45 = vunpack.i.l.bf16 %v10169_v40  ;;  %v13453_v46 = vpop.permute.xlu0 %10108  ;;  %1406 = vmatprep.mubr.f32.mxu1 %v1337_v12 }
 0x4f3   : > { %8409 = vmatprep.subr.bf16.mxu1 %v8408_v41  ;;  %v10111_v29 = vunpack.i.h.bf16 %v13453_v46  ;;  %v10110_v21 = vunpack.i.l.bf16 %v13453_v46 }
 0x4f4   : > { %8411 = vmatpush3.bf16.msra.mxu1 %v8410_v15  ;;  %v1186_v50 = vsel %vm1184_vm14, %v10170_v45, %v10171_v44  ;;  %v13498_v44 = vsel %vm1132_vm2, %v10150_v24, %v10151_v14  ;;  %v10156_v45 = vunpack.i.h.bf16 %v13443_v25  ;;  %vm1262_vm14 = vcmask 580608  }
 0x4f5   : > { %v10174_v51 = vpop.permute.xlu1 %10173  ;;  %v8412_v53 = vpack.c.bf16 %v1186_v50, %v1185_v49 }
 0x4f6   : > { %v10176_v55 = vunpack.i.h.bf16 %v10174_v51  ;;  %v10175_v56 = vunpack.i.l.bf16 %v10174_v51  ;;  %v13462_v57 = vpop.permute.xlu0 %10113  ;;  %v1147_v5 = vsel %vm1145_vm7, %v10155_v18, %v10156_v45  ;;  %v10085_v18 = vunpack.i.l.bf16 %v13439_v22 }
 0x4f7   : > { %8413 = vmatprep.subr.bf16.mxu1 %v8412_v53  ;;  %v10116_v48 = vunpack.i.h.bf16 %v13462_v57  ;;  %v10115_v49 = vunpack.i.l.bf16 %v13462_v57 }
 0x4f8   : > { %8415 = vmatpush3.bf16.msra.mxu1 %v8414_v54  ;;  %v1199_v59 = vsel %vm1197_vm15, %v10175_v56, %v10176_v55  ;;  %v1224_v55 = vsel %vm1223_vm4, %v10110_v21, %v10111_v29  ;;  %vm12961_vm15 = vmmov 0  }
 0x4f9   : > { %v10179_v60 = vpop.permute.xlu1 %10178  ;;  %v8416_v61 = vpack.c.bf16 %v1199_v59, %v1198_v58  ;;  %8308 = vmatprep.mubr.msk.f32.mxu0 %vm12961_vm15, %v20895_v0 }
 0x4fa   : > { %v13464_v62 = vpop.permute.xlu0 %10118  ;;  %v10181_v2 = vunpack.i.h.bf16 %v10179_v60  ;;  %v10180_v3 = vunpack.i.l.bf16 %v10179_v60 }
 0x4fb   : > { %8417 = vmatprep.subr.bf16.mxu1 %v8416_v61  ;;  %v1120_v61 = vsel %vm1119_vm1, %v10070_v7, %v10071_v6  ;;  %v10121_v6 = vunpack.i.h.bf16 %v13464_v62  ;;  %v10120_v7 = vunpack.i.l.bf16 %v13464_v62  ;;  %vm20880_vm1 = vcmask 842752  }
 0x4fc   : > { %v1212_v28 = vsel %vm1210_vm3, %v10180_v3, %v10181_v2  ;;  %v8426_v2 = vpack.c.bf16 %v1121_v39, %v1120_v61  ;;  %v1237_v3 = vsel %vm1236_vm6, %v10115_v49, %v10116_v48  ;;  %vm1527_vm3 = vcmask 113664  }
 0x4fd   : > { %v10184_v63 = vpop.permute.xlu1 %10183  ;;  %v8420_v41 = vpack.c.bf16 %v1212_v28, %v1211_v32 }
 0x4fe   : > { %v13466_v1 = vpop.permute.xlu0 %10123  ;;  %v10186_v30 = vunpack.i.h.bf16 %v10184_v63  ;;  %v10185_v31 = vunpack.i.l.bf16 %v10184_v63  ;;  %v1133_v63 = vsel %vm1132_vm2, %v10075_v36, %v10076_v8  ;;  %vm1525_vm2 = vcmask 56320  }
 0x4ff   : > { %v8430_v4 = vpack.c.bf16 %v13498_v44, %v1133_v63  ;;  %v10125_v39 = vunpack.i.l.bf16 %v13466_v1 }
 0x500   : > { %v1225_v50 = vsel %vm1223_vm4, %v10185_v31, %v10186_v30  ;;  %vm1529_vm4 = vcmask 171008  }
 0x501   : > { %v10189_v10 = vpop.permute.xlu1 %10188  ;;  %v8424_v17 = vpack.c.bf16 %v1225_v50, %v1224_v55 }
 0x502   : > { %v13478_v15 = vpop.permute.xlu0 %10133  ;;  %v10191_v33 = vunpack.i.h.bf16 %v10189_v10  ;;  %v10190_v34 = vunpack.i.l.bf16 %v10189_v10 }
 0x503   : > { %v10136_v26 = vunpack.i.h.bf16 %v13478_v15  ;;  %v10135_v16 = vunpack.i.l.bf16 %v13478_v15 }
 0x504   : > { %v1238_v25 = vsel %vm1236_vm6, %v10190_v34, %v10191_v33  ;;  %v10126_v34 = vunpack.i.h.bf16 %v13466_v1  ;;  %vm1531_vm6 = vcmask 228352  }
 0x505   : > { %v8418_v23 = vpack.c.bf16 %v10136_v26, %v10135_v16  ;;  %v10194_v35 = vpop.permute.xlu1 %10193  ;;  %v8428_v10 = vpack.c.bf16 %v1238_v25, %v1237_v3  ;;  %v1336_v25 = vld [vmem:[#allocation6] sm:$0xff] }
 0x506   : > { %v10204_v40 = vpop.permute.xlu0 %10203  ;;  %v10196_v56 = vunpack.i.h.bf16 %v10194_v35  ;;  %v10195_v58 = vunpack.i.l.bf16 %v10194_v35 }
 0x507   : > { %v10206_v46 = vunpack.i.h.bf16 %v10204_v40  ;;  %v10205_v47 = vunpack.i.l.bf16 %v10204_v40  ;;  %8419 = vmatpush3.bf16.msra.mxu1 %v8418_v23 }
 0x508   : > { %8421 = vmatprep.subr.bf16.mxu1 %v8420_v41  ;;  %v1251_v28 = vsel %vm1249_vm10, %v10195_v58, %v10196_v56 }
 0x509   : > { %v13505_v51 = vpop.permute.xlu1 %10198  ;;  %v1273_v53 = vsel %vm1271_vm5, %v10131_v42, %v10206_v46  ;;  %v1272_v54 = vsel %vm1271_vm5, %v10130_v43, %v10205_v47  ;;  %v10081_v42 = vunpack.i.h.bf16 %v13435_v20  ;;  %v10080_v43 = vunpack.i.l.bf16 %v13435_v20 }
 0x50a   : > { %v13515_v57 = vpop.permute.xlu0 %10213  ;;  %v10242_v59 = vpack.i.bf16 %v10206_v46, %v1273_v53  ;;  %v10227_v60 = vpack.i.bf16 %v10205_v47, %v1272_v54  ;;  %v10201_v29 = vunpack.i.h.bf16 %v13505_v51  ;;  %v10200_v30 = vunpack.i.l.bf16 %v13505_v51 }
 0x50b   : > { %8423 = vmatpush3.bf16.msra.mxu1 %v8422_v37  ;;  %v10216_v20 = vunpack.i.h.bf16 %v13515_v57  ;;  %v10215_v31 = vunpack.i.l.bf16 %v13515_v57  ;;  %v1250_v37 = vsel %vm1249_vm10, %v10120_v7, %v10121_v6  ;;  %v1146_v1 = vsel %vm1145_vm7, %v10080_v43, %v10081_v42 }
 0x50c   : > { %10243 = vrot.lane.b32.xlu0 %v10242_v59, %s12934_s14  ;;  %10228 = vrot.lane.b32.xlu1 %v10227_v60, %s12934_s14  ;;  %v8432_v44 = vpack.c.bf16 %v1251_v28, %v1250_v37  ;;  %v8434_v50 = vpack.c.bf16 %v1147_v5, %v1146_v1  ;;  %v12456_v37 = vld [vmem:[#allocation7 + $0xac] ss:$84 sps:$4 sm:$0xff]   ;;  %vm1535_vm10 = vcmask 343040  }
 0x50d   : > { %8425 = vmatprep.subr.bf16.mxu1 %v8424_v17  ;;  %v10209_v8 = vpop.permute.xlu1 %10208  ;;  %v1287_v15 = vsel %vm20882_vm12, %v10141_v9, %v10216_v20  ;;  %v1286_v45 = vsel %vm20882_vm12, %v10140_v11, %v10215_v31  ;;  %v1264_v9 = vsel %vm1262_vm14, %v10200_v30, %v10201_v29  ;;  %v1263_v11 = vsel %vm1262_vm14, %v10125_v39, %v10126_v34  ;;  %v12450_v34 = vld [vmem:[#allocation7 + $0x4] ss:$84 sps:$4 sm:$0xff]   ;;  %v12458_v39 = vld [vmem:[#allocation7 + $0xa8] ss:$84 sps:$4 sm:$0xff]  }
 0x50e   : > { %v10211_v13 = vunpack.i.h.bf16 %v10209_v8  ;;  %v10210_v14 = vunpack.i.l.bf16 %v10209_v8  ;;  %v10224_v24 = vpop.permute.xlu0 %10223  ;;  %v10252_v49 = vpack.i.bf16 %v10216_v20, %v1287_v15  ;;  %v10237_v19 = vpack.i.bf16 %v10215_v31, %v1286_v45  ;;  %v12462_v15 = vld [vmem:[#allocation7 + $0x154] ss:$84 sps:$4 sm:$0xff]  }
 0x50f   : > { %v10226_v32 = vunpack.i.h.bf16 %v10224_v24  ;;  %8427 = vmatpush3.bf16.msra.mxu1 %v8426_v2  ;;  %v10225_v62 = vunpack.i.l.bf16 %v10224_v24  ;;  %v8436_v53 = vpack.c.bf16 %v1264_v9, %v1263_v11  ;;  %v12470_v9 = vld [vmem:[#allocation7 + $0x1f8] ss:$84 sps:$4 sm:$0xff]   ;;  %vm1537_vm14 = vcmask 400384  }
 0x510   : > { %8429 = vmatprep.subr.bf16.mxu1 %v8428_v10  ;;  %v1280_v21 = vsel %vm1278_vm9, %v10136_v26, %v10211_v13  ;;  %v1279_v33 = vsel %vm1278_vm9, %v10135_v16, %v10210_v14  ;;  %v10161_v26 = vunpack.i.h.bf16 %v13445_v27  ;;  %v10160_v16 = vunpack.i.l.bf16 %v13445_v27  ;;  %v12480_v11 = vld [vmem:[#allocation7 + $0x34c] ss:$84 sps:$4 sm:$0xff]  }
 0x511   : > { %v10219_v23 = vpop.permute.xlu1 %10218  ;;  %v10247_v35 = vpack.i.bf16 %v10211_v13, %v1280_v21  ;;  %v10232_v36 = vpack.i.bf16 %v10210_v14, %v1279_v33  ;;  %v1321_v46 = vsel %vm20923_vm8, %v10225_v62, %v10226_v32  ;;  %v10086_v27 = vunpack.i.h.bf16 %v13439_v22  ;;  %v1553_v22 = vld [vmem:[%s21711_s22] sm:$0xff]  ;;  %v1338_v32 = vld [vmem:[#allocation6 + $0x10] sm:$0xff]  ;;  %s12964_s22 = smov 123  }
 0x512   : > { %v10221_v40 = vunpack.i.h.bf16 %v10219_v23  ;;  %v10220_v41 = vunpack.i.l.bf16 %v10219_v23  ;;  %v1160_v51 = vsel %vm20880_vm1, %v10160_v16, %v10161_v26  ;;  %v12452_v23 = vld [vmem:[#allocation7] ss:$84 sps:$4 sm:$0xff]   ;;  %v12464_v26 = vld [vmem:[#allocation7 + $0x150] ss:$84 sps:$4 sm:$0xff]   ;;  %vm1533_vm9 = vcmask 285696  }
 0x513   : > { %10248 = vrot.lane.b32.xlu0 %v10247_v35, %s12934_s14  ;;  %10233 = vrot.lane.b32.xlu1 %v10232_v36, %s12934_s14  ;;  %v1159_v54 = vsel %vm20880_vm1, %v10085_v18, %v10086_v27  ;;  %v12453_v35 = vld [vmem:[#allocation7 + $0xc] ss:$84 sps:$4 sm:$0xff]   ;;  %v12455_v36 = vld [vmem:[#allocation7 + $0x8] ss:$84 sps:$4 sm:$0xff]   ;;  %v12471_v27 = vld [vmem:[#allocation7 + $0x204] ss:$84 sps:$4 sm:$0xff]  }
 0x514   : > { %v1320_v47 = vsel %vm20923_vm8, %v10220_v41, %v10221_v40  ;;  %8431 = vmatpush3.bf16.msra.mxu1 %v8430_v4  ;;  %v8438_v55 = vpack.c.bf16 %v1160_v51, %v1159_v54  ;;  %v12459_v40 = vld [vmem:[#allocation7 + $0xb4] ss:$84 sps:$4 sm:$0xff]   ;;  %v12461_v41 = vld [vmem:[#allocation7 + $0xb0] ss:$84 sps:$4 sm:$0xff]   ;;  %vm1541_vm1 = vcmask 515072   ;;  %vm1551_vm12 = vcmask 801792  }
 0x515   : > { %8433 = vmatprep.subr.bf16.mxu1 %v8432_v44  ;;  %v8441_v48 = vpack.c.bf16 %v1321_v46, %v1320_v47  ;;  %v12465_v16 = vld [vmem:[#allocation7 + $0x15c] ss:$84 sps:$4 sm:$0xff]   ;;  %v12467_v44 = vld [vmem:[#allocation7 + $0x158] ss:$84 sps:$4 sm:$0xff]   ;;  %v12473_v18 = vld [vmem:[#allocation7 + $0x200] ss:$84 sps:$4 sm:$0xff]  }
 0x516   : > { %v12468_v47 = vld [vmem:[#allocation7 + $0x1fc] ss:$84 sps:$4 sm:$0xff]  }
 0x517   : > { %8442 = vmatpush3.bf16.msra.mxu0 %v8441_v48  ;;  %10253 = vrot.lane.b32.xlu0 %v10252_v49, %s12934_s14  ;;  %v12474_v48 = vld [vmem:[#allocation7 + $0x2a4] ss:$84 sps:$4 sm:$0xff]   ;;  %v12476_v49 = vld [vmem:[#allocation7 + $0x2a0] ss:$84 sps:$4 sm:$0xff]   ;;  %v12482_v51 = vld [vmem:[#allocation7 + $0x348] ss:$84 sps:$4 sm:$0xff]  }
 0x518   : > { %10238 = vrot.lane.b32.xlu1 %v10237_v19, %s12934_s14  ;;  %8435 = vmatpush3.bf16.msra.mxu1 %v8434_v50  ;;  %s21712_s14 = smov 126   ;;  %v12477_v19 = vld [vmem:[#allocation7 + $0x2ac] ss:$84 sps:$4 sm:$0xff]   ;;  %v12479_v50 = vld [vmem:[#allocation7 + $0x2a8] ss:$84 sps:$4 sm:$0xff]  }
 0x519   : > { %8437 = vmatprep.subr.bf16.mxu1 %v8436_v53  ;;  %8443 = vmatprep.subr.bf16.mxu0 %v12935_v38  ;;  %v12483_v53 = vld [vmem:[#allocation7 + $0x354] ss:$84 sps:$4 sm:$0xff]   ;;  %v12485_v54 = vld [vmem:[#allocation7 + $0x350] ss:$84 sps:$4 sm:$0xff]  }
 0x51c   : > { %1556 = vperm.xlu1 %10066, %v1553_v22   ;;  %8439 = vmatpush3.bf16.msra.mxu1 %v8438_v55  ;;  %v12486_v22 = vld [vmem:[#allocation7 + $0x3f4] ss:$84 sps:$4 sm:$0x1f]   ;;  %v12489_v55 = vld [vmem:[#allocation7 + $0x3fc] ss:$84 sps:$4 sm:$0x1f]  }
 0x51d   : > { %8453 = vmatprep.subr.bf16.mxu1 %v12450_v34 }
 0x51f   : > { %1407 = vmatmul.mubr.f32.vlgmr.msra.gmra.mrb[8].mxu1 %v1336_v25  ;;  %v12488_v25 = vld [vmem:[#allocation7 + $0x3f0] ss:$84 sps:$4 sm:$0x1f]  }
 0x520   : > { %2140 = vmatprep.mubr.f32.mxu1 %v20895_v0  ;;  %8455 = vmatpush1.bf16.msra.mxu1 %v12452_v23 }
 0x521   : > { %8457 = vmatprep.subr.bf16.mxu1 %v12456_v37 }
 0x524   : > { %8459 = vmatpush1.bf16.msra.mxu1 %v12458_v39  ;;  %v12498_v39 = vld [vmem:[#allocation7 + $0xbc] ss:$84 sps:$4 sm:$0xff]  }
 0x525   : > { %8461 = vmatprep.subr.bf16.mxu1 %v12462_v15  ;;  %v12503_v15 = vld [vmem:[#allocation7 + $0xc0] ss:$84 sps:$4 sm:$0xff]  }
 0x528   : > { %8463 = vmatpush1.bf16.msra.mxu1 %v12464_v26  ;;  %v12504_v26 = vld [vmem:[#allocation7 + $0x164] ss:$84 sps:$4 sm:$0xff]  }
 0x529   : > { %8465 = vmatprep.subr.bf16.mxu1 %v12468_v47  ;;  %v12512_v47 = vld [vmem:[#allocation7 + $0x208] ss:$84 sps:$4 sm:$0xff]  }
 0x52c   : > { %8467 = vmatpush1.bf16.msra.mxu1 %v12470_v9  ;;  %v12515_v9 = vld [vmem:[#allocation7 + $0x210] ss:$84 sps:$4 sm:$0xff]  }
 0x52d   : > { %8469 = vmatprep.subr.bf16.mxu1 %v12474_v48  ;;  %v12518_v48 = vld [vmem:[#allocation7 + $0x2b0] ss:$84 sps:$4 sm:$0xff]  }
 0x530   : > { %8471 = vmatpush1.bf16.msra.mxu1 %v12476_v49  ;;  %v12521_v49 = vld [vmem:[#allocation7 + $0x2b8] ss:$84 sps:$4 sm:$0xff]  }
 0x531   : > { %8473 = vmatprep.subr.bf16.mxu1 %v12480_v11  ;;  %v12524_v11 = vld [vmem:[#allocation7 + $0x358] ss:$84 sps:$4 sm:$0xff]  }
 0x534   : > { %8475 = vmatpush1.bf16.msra.mxu1 %v12482_v51  ;;  %v12527_v51 = vld [vmem:[#allocation7 + $0x360] ss:$84 sps:$4 sm:$0xff]  }
 0x535   : > { %8478 = vmatprep.subr.msk.bf16.mxu1 %vm13352_vm11, %v12486_v22  ;;  %v12530_v22 = vld [vmem:[#allocation7 + $0x400] ss:$84 sps:$4 sm:$0x1f]  }
 0x538   : > { %8481 = vmatpush1.bf16.msk.msra.mxu1 %vm13352_vm11, %v12488_v25  ;;  %v12534_v25 = vld [vmem:[#allocation7 + $0x24] ss:$84 sps:$4 sm:$0xff]  }
 0x57e   : > { %v10244_v56 = vpop.permute.xlu0 %10243  ;;  %v10229_v58 = vpop.permute.xlu1 %10228 }
 0x57f   : > { %v10246_v57 = vunpack.i.h.bf16 %v10244_v56  ;;  %v10245_v59 = vunpack.i.l.bf16 %v10244_v56  ;;  %v10231_v60 = vunpack.i.h.bf16 %v10229_v58  ;;  %v10230_v61 = vunpack.i.l.bf16 %v10229_v58  ;;  %v12491_v56 = vld [vmem:[#allocation7 + $0x3f8] ss:$84 sps:$4 sm:$0x1f]   ;;  %v12492_v58 = vld [vmem:[#allocation7 + $0x14] ss:$84 sps:$4 sm:$0xff]  }
 0x580   : > { %8513 = vmatprep.subr.bf16.mxu1 %v12492_v58  ;;  %v12536_v58 = vld [vmem:[#allocation7 + $0x20] ss:$84 sps:$4 sm:$0xff]  }
 0x581   : > { %v1323_v63 = vsel %vm20923_vm8, %v10245_v59, %v10246_v57  ;;  %v1322_v42 = vsel %vm20923_vm8, %v10230_v61, %v10231_v60  ;;  %v12495_v57 = vld [vmem:[#allocation7 + $0x1c] ss:$84 sps:$4 sm:$0xff]  }
 0x582   : > { %v8444_v17 = vpack.c.bf16 %v1323_v63, %v1322_v42 }
 0x584   : > { %8445 = vmatpush3.bf16.msra.mxu0 %v8444_v17 }
 0x585   : > { %v10249_v43 = vpop.permute.xlu0 %10248  ;;  %v10234_v2 = vpop.permute.xlu1 %10233  ;;  %8446 = vmatprep.subr.bf16.mxu0 %v12935_v38 }
 0x586   : > { %v10251_v3 = vunpack.i.h.bf16 %v10249_v43  ;;  %v10250_v4 = vunpack.i.l.bf16 %v10249_v43  ;;  %v10236_v5 = vunpack.i.h.bf16 %v10234_v2  ;;  %v10235_v6 = vunpack.i.l.bf16 %v10234_v2 }
 0x588   : > { %v1325_v7 = vsel %vm20923_vm8, %v10250_v4, %v10251_v3  ;;  %v1324_v8 = vsel %vm20923_vm8, %v10235_v6, %v10236_v5 }
 0x589   : > { %v10254_v10 = vpop.permute.xlu0 %10253  ;;  %v8447_v12 = vpack.c.bf16 %v1325_v7, %v1324_v8 }
 0x58a   : > { %v10256_v20 = vunpack.i.h.bf16 %v10254_v10  ;;  %v10255_v13 = vunpack.i.l.bf16 %v10254_v10  ;;  %v10239_v14 = vpop.permute.xlu1 %10238 }
 0x58b   : > { %v10241_v24 = vunpack.i.h.bf16 %v10239_v14  ;;  %v10240_v28 = vunpack.i.l.bf16 %v10239_v14  ;;  %8448 = vmatpush3.bf16.msra.mxu0 %v8447_v12 }
 0x58c   : > { %v1327_v29 = vsel %vm20923_vm8, %v10255_v13, %v10256_v20  ;;  %8449 = vmatprep.subr.bf16.mxu0 %v12935_v38 }
 0x58d   : > { %v1326_v30 = vsel %vm20923_vm8, %v10240_v28, %v10241_v24 }
 0x58e   : > { %v8450_v31 = vpack.c.bf16 %v1327_v29, %v1326_v30 }
 0x590   : > { %8451 = vmatpush3.bf16.msra.mxu0 %v8450_v31 }
 0x591   : > { %8483 = vmatprep.subr.bf16.mxu0 %v12453_v35  ;;  %v12494_v35 = vld [vmem:[#allocation7 + $0x10] ss:$84 sps:$4 sm:$0xff]  }
 0x593   : > { %8309 = vmatmul.mubr.msk.f32.vlgmr.msra.gmra.mrb[6].mxu0 %vm20923_vm8, %v1338_v32  ;;  %vm3789_vm8 = vcmask 179200  }
 0x594   : > { %2211 = vmatprep.mubr.f32.mxu0 %v20895_v0  ;;  %8485 = vmatpush1.bf16.msra.mxu0 %v12455_v36  ;;  %v12497_v36 = vld [vmem:[#allocation7 + $0x18] ss:$84 sps:$4 sm:$0xff]  }
 0x595   : > { %8487 = vmatprep.subr.bf16.mxu0 %v12459_v40  ;;  %v12501_v40 = vld [vmem:[#allocation7 + $0xc4] ss:$84 sps:$4 sm:$0xff]  }
 0x598   : > { %8489 = vmatpush1.bf16.msra.mxu0 %v12461_v41  ;;  %v12500_v41 = vld [vmem:[#allocation7 + $0xb8] ss:$84 sps:$4 sm:$0xff]  }
 0x599   : > { %8491 = vmatprep.subr.bf16.mxu0 %v12465_v16  ;;  %v12507_v16 = vld [vmem:[#allocation7 + $0x16c] ss:$84 sps:$4 sm:$0xff]  }
 0x59b   : > { %v1557_v59 = vpop.permute.xlu1 %1556 }
 0x59c   : > { %8493 = vmatpush1.bf16.msra.mxu0 %v12467_v44  ;;  %v12506_v44 = vld [vmem:[#allocation7 + $0x160] ss:$84 sps:$4 sm:$0xff]  }
 0x59d   : > { %8495 = vmatprep.subr.bf16.mxu0 %v12471_v27  ;;  %v12516_v27 = vld [vmem:[#allocation7 + $0x2b4] ss:$84 sps:$4 sm:$0xff]  }
 0x5a0   : > { %8497 = vmatpush1.bf16.msra.mxu0 %v12473_v18  ;;  %v12519_v18 = vld [vmem:[#allocation7 + $0x2bc] ss:$84 sps:$4 sm:$0xff]  }
 0x5a1   : > { %8499 = vmatprep.subr.bf16.mxu0 %v12477_v19  ;;  %v12522_v19 = vld [vmem:[#allocation7 + $0x35c] ss:$84 sps:$4 sm:$0xff]  }
 0x5a4   : > { %8501 = vmatpush1.bf16.msra.mxu0 %v12479_v50  ;;  %v12525_v50 = vld [vmem:[#allocation7 + $0x364] ss:$84 sps:$4 sm:$0xff]  }
 0x5a5   : > { %8503 = vmatprep.subr.bf16.mxu0 %v12483_v53  ;;  %v12528_v53 = vld [vmem:[#allocation7 + $0x404] ss:$84 sps:$4 sm:$0x1f]  }
 0x5a8   : > { %8505 = vmatpush1.bf16.msra.mxu0 %v12485_v54  ;;  %v12531_v54 = vld [vmem:[#allocation7 + $0x40c] ss:$84 sps:$4 sm:$0x1f]  }
 0x5a9   : > { %8508 = vmatprep.subr.msk.bf16.mxu0 %vm13352_vm11, %v12489_v55  ;;  %v12533_v55 = vld [vmem:[#allocation7 + $0x408] ss:$84 sps:$4 sm:$0x1f]  }
 0x5ac   : > { %8511 = vmatpush1.bf16.msk.msra.mxu0 %vm13352_vm11, %v12491_v56  ;;  %v12537_v56 = vld [vmem:[#allocation7 + $0x2c] ss:$84 sps:$4 sm:$0xff]  }
 0x5ad   : > { %8543 = vmatprep.subr.bf16.mxu0 %v12495_v57  ;;  %v12539_v57 = vld [vmem:[#allocation7 + $0x28] ss:$84 sps:$4 sm:$0xff]  }
 0x5f2   : > { %v8265_v62 = vpop.f32.mrb[8].mxu1 }
 0x5f3   : > { %v8266_v21 = vpop.f32.mrb[9].mxu1 }
 0x5f4   : > { %v8267_v33 = vadd.f32 %v8266_v21, %v8265_v62 }
 0x666   : > { %v1478_v45 = vpop.f32.mrb[6].mxu0 }
 0x667   : > { %v13580_v1 = vadd.f32 %v8267_v33, %v1478_v45  ;;  %v8310_v46 = vpop.f32.mrb[7].mxu0  ;;  %v12509_v45 = vld [vmem:[#allocation7 + $0x168] ss:$84 sps:$4 sm:$0xff]  }
 0x668   : > { %v12513_v46 = vld [vmem:[#allocation7 + $0x214] ss:$84 sps:$4 sm:$0xff]  }
 0x669   : > { %1486 = vrot.lane.b32.xlu0 %v13580_v1, %s21712_s14  ;;  %1483 = vrot.lane.b32.xlu1 %v13580_v1, %s12937_s21 }
 0x66d   : > { %1492 = vrot.lane.b32.xlu0 %v13580_v1, %s20886_s27  ;;  %1489 = vrot.lane.b32.xlu1 %v13580_v1, %s21713_s17  ;;  %s12974_s27 = smov 58  }
 0x671   : > { %1498 = vrot.lane.b32.xlu0 %v13580_v1, %s20894_s25  ;;  %1495 = vrot.lane.b32.xlu1 %v13580_v1, %s12964_s22  ;;  %s12968_s22 = smov 117   ;;  %s12981_s25 = smov 20  }
 0x675   : > { %1504 = vrot.lane.b32.xlu0 %v13580_v1, %s12960_s26  ;;  %1501 = vrot.lane.b32.xlu1 %v13580_v1, %s20887_s29  ;;  %s12967_s26 = smov 116   ;;  %s12975_s29 = smov 57  }
 0x679   : > { %1510 = vrot.lane.b32.xlu0 %v13580_v1, %s20885_s28  ;;  %1507 = vrot.lane.b32.xlu1 %v13580_v1, %s20892_s30  ;;  %s12973_s28 = smov 90   ;;  %s12980_s30 = smov 21  }
 0x67d   : > { %1516 = vrot.lane.b32.xlu0 %v13580_v1, %s12967_s26  ;;  %1513 = vrot.lane.b32.xlu1 %v13580_v1, %s12968_s22  ;;  %s12971_s22 = smov 92  }
 0x681   : > { %1522 = vrot.lane.b32.xlu0 %v13580_v1, %s12969_s15  ;;  %1519 = vrot.lane.b32.xlu1 %v13580_v1, %s20883_s20  ;;  %s21715_s15 = smov 93   ;;  %s12972_s20 = smov 91  }
 0x6db   : > { %v1487_v60 = vpop.permute.xlu0 %1486  ;;  %v1484_v61 = vpop.permute.xlu1 %1483 }
 0x6dc   : > { %v1526_v63 = vsel %vm1525_vm2, %v13580_v1, %v1484_v61  ;;  %vm1539_vm2 = vcmask 457728   ;;  %v12510_v1 = vld [vmem:[#allocation7 + $0x20c] ss:$84 sps:$4 sm:$0xff]   ;;  %v12542_v61 = vld [vmem:[#allocation7 + $0xc8] ss:$84 sps:$4 sm:$0xff]  }
 0x6dd   : > { %v1528_v17 = vsel %vm1527_vm3, %v1526_v63, %v1487_v60  ;;  %vm20916_vm3 = vcmask 572416   ;;  %v12543_v60 = vld [vmem:[#allocation7 + $0xd4] ss:$84 sps:$4 sm:$0xff]   ;;  %v12545_v63 = vld [vmem:[#allocation7 + $0xd0] ss:$84 sps:$4 sm:$0xff]  }
 0x6df   : > { %v1493_v42 = vpop.permute.xlu0 %1492  ;;  %v1490_v43 = vpop.permute.xlu1 %1489 }
 0x6e0   : > { %v1530_v2 = vsel %vm1529_vm4, %v1528_v17, %v1490_v43  ;;  %v12549_v17 = vld [vmem:[#allocation7 + $0x17c] ss:$84 sps:$4 sm:$0xff]  }
 0x6e1   : > { %v1532_v4 = vsel %vm1531_vm6, %v1530_v2, %v1493_v42  ;;  %vm1547_vm6 = vcmask 687104   ;;  %v12546_v42 = vld [vmem:[#allocation7 + $0x174] ss:$84 sps:$4 sm:$0xff]   ;;  %v12548_v43 = vld [vmem:[#allocation7 + $0x170] ss:$84 sps:$4 sm:$0xff]  }
 0x6e2   : > { %v12551_v2 = vld [vmem:[#allocation7 + $0x178] ss:$84 sps:$4 sm:$0xff]  }
 0x6e3   : > { %v1499_v3 = vpop.permute.xlu0 %1498  ;;  %v1496_v5 = vpop.permute.xlu1 %1495 }
 0x6e4   : > { %v1534_v6 = vsel %vm1533_vm9, %v1532_v4, %v1496_v5  ;;  %vm1549_vm9 = vcmask 744448   ;;  %v12555_v4 = vld [vmem:[#allocation7 + $0x224] ss:$84 sps:$4 sm:$0xff]  }
 0x6e5   : > { %v1536_v8 = vsel %vm1535_vm10, %v1534_v6, %v1499_v3  ;;  %v12552_v3 = vld [vmem:[#allocation7 + $0x21c] ss:$84 sps:$4 sm:$0xff]   ;;  %v12554_v5 = vld [vmem:[#allocation7 + $0x218] ss:$84 sps:$4 sm:$0xff]   ;;  %v12557_v6 = vld [vmem:[#allocation7 + $0x220] ss:$84 sps:$4 sm:$0xff]  }
 0x6e6   : > { %vm3340_vm10 = vcmask 736256  }
 0x6e7   : > { %v1505_v7 = vpop.permute.xlu0 %1504  ;;  %v1502_v10 = vpop.permute.xlu1 %1501 }
 0x6e8   : > { %v1538_v12 = vsel %vm1537_vm14, %v1536_v8, %v1502_v10  ;;  %v12561_v8 = vld [vmem:[#allocation7 + $0x2cc] ss:$84 sps:$4 sm:$0xff]   ;;  %vm3415_vm14 = vcmask 474112  }
 0x6e9   : > { %v1540_v13 = vsel %vm1539_vm2, %v1538_v12, %v1505_v7  ;;  %v12558_v7 = vld [vmem:[#allocation7 + $0x2c4] ss:$84 sps:$4 sm:$0xff]   ;;  %v12560_v10 = vld [vmem:[#allocation7 + $0x2c0] ss:$84 sps:$4 sm:$0xff]   ;;  %v12563_v12 = vld [vmem:[#allocation7 + $0x2c8] ss:$84 sps:$4 sm:$0xff]  }
 0x6eb   : > { %v1511_v20 = vpop.permute.xlu0 %1510  ;;  %v1508_v14 = vpop.permute.xlu1 %1507 }
 0x6ec   : > { %v1542_v24 = vsel %vm1541_vm1, %v1540_v13, %v1508_v14  ;;  %vm2009_vm1 = vcmask 859136   ;;  %v12567_v13 = vld [vmem:[#allocation7 + $0x374] ss:$84 sps:$4 sm:$0xff]  }
 0x6ed   : > { %v1544_v29 = vsel %vm20916_vm3, %v1542_v24, %v1511_v20  ;;  %v12564_v20 = vld [vmem:[#allocation7 + $0x36c] ss:$84 sps:$4 sm:$0xff]   ;;  %v12566_v14 = vld [vmem:[#allocation7 + $0x368] ss:$84 sps:$4 sm:$0xff]   ;;  %v12569_v24 = vld [vmem:[#allocation7 + $0x370] ss:$84 sps:$4 sm:$0xff]  }
 0x6ee   : > { %vm3714_vm3 = vcmask 187392  }
 0x6ef   : > { %v1517_v28 = vpop.permute.xlu0 %1516  ;;  %v1514_v30 = vpop.permute.xlu1 %1513 }
 0x6f0   : > { %v1546_v31 = vsel %vm1545_vm13, %v1544_v29, %v1514_v30  ;;  %v12573_v29 = vld [vmem:[#allocation7 + $0x41c] ss:$84 sps:$4 sm:$0x1f]   ;;  %vm3053_vm13 = vcmask 1022976  }
 0x6f1   : > { %v1548_v62 = vsel %vm1547_vm6, %v1546_v31, %v1517_v28  ;;  %v12570_v28 = vld [vmem:[#allocation7 + $0x414] ss:$84 sps:$4 sm:$0x1f]   ;;  %v12572_v30 = vld [vmem:[#allocation7 + $0x410] ss:$84 sps:$4 sm:$0x1f]  }
 0x6f2   : > { %v12575_v31 = vld [vmem:[#allocation7 + $0x418] ss:$84 sps:$4 sm:$0x1f]   ;;  %vm3490_vm6 = vcmask 465920  }
 0x6f3   : > { %v1523_v32 = vpop.permute.xlu0 %1522  ;;  %v1520_v21 = vpop.permute.xlu1 %1519 }
 0x6f4   : > { %v1550_v33 = vsel %vm1549_vm9, %v1548_v62, %v1520_v21  ;;  %v12579_v62 = vld [vmem:[#allocation7 + $0x3c] ss:$84 sps:$4 sm:$0xff]  }
 0x6f5   : > { %v1552_v34 = vsel %vm1551_vm12, %v1550_v33, %v1523_v32  ;;  %v12576_v32 = vld [vmem:[#allocation7 + $0x34] ss:$84 sps:$4 sm:$0xff]   ;;  %v12578_v21 = vld [vmem:[#allocation7 + $0x30] ss:$84 sps:$4 sm:$0xff]   ;;  %v12581_v33 = vld [vmem:[#allocation7 + $0x38] ss:$84 sps:$4 sm:$0xff]  }
 0x6f6   : > { %v1559_v23 = vadd.f32 %v1557_v59, %v1552_v34  ;;  %v12540_v59 = vld [vmem:[#allocation7 + $0xcc] ss:$84 sps:$4 sm:$0xff]   ;;  %v12582_v34 = vld [vmem:[#allocation7 + $0xdc] ss:$84 sps:$4 sm:$0xff]   ;;  %vm3125_vm12 = vcmask 760832  }
 0x6f8   : > { %v13620_v37 = vmax.f32 %v1559_v23, 0.0  ;;  %v12585_v23 = vld [vmem:[#allocation7 + $0xe4] ss:$84 sps:$4 sm:$0xff]  }
 0x6fa   : > { %8200 = vmatmul.mubr.msk.f32.vlgmr.msra.gmra.mrb[10].mxu1 %vm2009_vm1, %v13620_v37  ;;  %8203 = vmatmul.mubr.msk.f32.vlgmr.msra.gmra.mrb[8].mxu0 %vm2009_vm1, %v13620_v37 }
 0x6fb   : > { %8515 = vmatpush1.bf16.msra.mxu1 %v12494_v35  ;;  %8545 = vmatpush1.bf16.msra.mxu0 %v12497_v36  ;;  %v12584_v35 = vld [vmem:[#allocation7 + $0xd8] ss:$84 sps:$4 sm:$0xff]   ;;  %v12587_v36 = vld [vmem:[#allocation7 + $0xe0] ss:$84 sps:$4 sm:$0xff]  }
 0x6fc   : > { %8517 = vmatprep.subr.bf16.mxu1 %v12498_v39  ;;  %8547 = vmatprep.subr.bf16.mxu0 %v12501_v40  ;;  %v12588_v39 = vld [vmem:[#allocation7 + $0x184] ss:$84 sps:$4 sm:$0xff]   ;;  %v12591_v40 = vld [vmem:[#allocation7 + $0x18c] ss:$84 sps:$4 sm:$0xff]  }
 0x6fd   : > { %2282 = vmatprep.mubr.f32.mxu1 %v20895_v0  ;;  %2353 = vmatprep.mubr.f32.mxu0 %v20895_v0 }
 0x6ff   : > { %8519 = vmatpush1.bf16.msra.mxu1 %v12500_v41  ;;  %8549 = vmatpush1.bf16.msra.mxu0 %v12503_v15  ;;  %v12590_v41 = vld [vmem:[#allocation7 + $0x180] ss:$84 sps:$4 sm:$0xff]   ;;  %v12593_v15 = vld [vmem:[#allocation7 + $0x188] ss:$84 sps:$4 sm:$0xff]  }
 0x700   : > { %8521 = vmatprep.subr.bf16.mxu1 %v12504_v26  ;;  %8551 = vmatprep.subr.bf16.mxu0 %v12507_v16  ;;  %v12594_v26 = vld [vmem:[#allocation7 + $0x22c] ss:$84 sps:$4 sm:$0xff]   ;;  %v12597_v16 = vld [vmem:[#allocation7 + $0x234] ss:$84 sps:$4 sm:$0xff]  }
 0x703   : > { %8523 = vmatpush1.bf16.msra.mxu1 %v12506_v44  ;;  %8553 = vmatpush1.bf16.msra.mxu0 %v12509_v45  ;;  %v12596_v44 = vld [vmem:[#allocation7 + $0x228] ss:$84 sps:$4 sm:$0xff]   ;;  %v12599_v45 = vld [vmem:[#allocation7 + $0x230] ss:$84 sps:$4 sm:$0xff]  }
 0x704   : > { %8525 = vmatprep.subr.bf16.mxu1 %v12510_v1  ;;  %8555 = vmatprep.subr.bf16.mxu0 %v12513_v46  ;;  %v12600_v1 = vld [vmem:[#allocation7 + $0x2d4] ss:$84 sps:$4 sm:$0xff]   ;;  %v12603_v46 = vld [vmem:[#allocation7 + $0x2dc] ss:$84 sps:$4 sm:$0xff]  }
 0x707   : > { %8527 = vmatpush1.bf16.msra.mxu1 %v12512_v47  ;;  %8557 = vmatpush1.bf16.msra.mxu0 %v12515_v9  ;;  %v12602_v47 = vld [vmem:[#allocation7 + $0x2d0] ss:$84 sps:$4 sm:$0xff]   ;;  %v12605_v9 = vld [vmem:[#allocation7 + $0x2d8] ss:$84 sps:$4 sm:$0xff]  }
 0x708   : > { %8529 = vmatprep.subr.bf16.mxu1 %v12516_v27  ;;  %8559 = vmatprep.subr.bf16.mxu0 %v12519_v18  ;;  %v12606_v27 = vld [vmem:[#allocation7 + $0x37c] ss:$84 sps:$4 sm:$0xff]   ;;  %v12609_v18 = vld [vmem:[#allocation7 + $0x384] ss:$84 sps:$4 sm:$0xff]  }
 0x70b   : > { %8531 = vmatpush1.bf16.msra.mxu1 %v12518_v48  ;;  %8561 = vmatpush1.bf16.msra.mxu0 %v12521_v49  ;;  %v12608_v48 = vld [vmem:[#allocation7 + $0x378] ss:$84 sps:$4 sm:$0xff]   ;;  %v12611_v49 = vld [vmem:[#allocation7 + $0x380] ss:$84 sps:$4 sm:$0xff]  }
 0x70c   : > { %8533 = vmatprep.subr.bf16.mxu1 %v12522_v19  ;;  %8563 = vmatprep.subr.bf16.mxu0 %v12525_v50  ;;  %v12612_v19 = vld [vmem:[#allocation7 + $0x424] ss:$84 sps:$4 sm:$0x1f]   ;;  %v12615_v50 = vld [vmem:[#allocation7 + $0x42c] ss:$84 sps:$4 sm:$0x1f]  }
 0x70f   : > { %8535 = vmatpush1.bf16.msra.mxu1 %v12524_v11  ;;  %8565 = vmatpush1.bf16.msra.mxu0 %v12527_v51  ;;  %v12614_v11 = vld [vmem:[#allocation7 + $0x420] ss:$84 sps:$4 sm:$0x1f]   ;;  %v12617_v51 = vld [vmem:[#allocation7 + $0x428] ss:$84 sps:$4 sm:$0x1f]  }
 0x710   : > { %8538 = vmatprep.subr.msk.bf16.mxu1 %vm13352_vm11, %v12528_v53  ;;  %8568 = vmatprep.subr.msk.bf16.mxu0 %vm13352_vm11, %v12531_v54  ;;  %v12618_v53 = vld [vmem:[#allocation7 + $0x44] ss:$84 sps:$4 sm:$0xff]   ;;  %v12621_v54 = vld [vmem:[#allocation7 + $0x4c] ss:$84 sps:$4 sm:$0xff]  }
 0x713   : > { %8541 = vmatpush1.bf16.msk.msra.mxu1 %vm13352_vm11, %v12530_v22  ;;  %8571 = vmatpush1.bf16.msk.msra.mxu0 %vm13352_vm11, %v12533_v55  ;;  %v12620_v22 = vld [vmem:[#allocation7 + $0x40] ss:$84 sps:$4 sm:$0xff]   ;;  %v12623_v55 = vld [vmem:[#allocation7 + $0x48] ss:$84 sps:$4 sm:$0xff]  }
 0x714   : > { %8573 = vmatprep.subr.bf16.mxu1 %v12534_v25  ;;  %8603 = vmatprep.subr.bf16.mxu0 %v12537_v56  ;;  %v12624_v25 = vld [vmem:[#allocation7 + $0xec] ss:$84 sps:$4 sm:$0xff]   ;;  %v12627_v56 = vld [vmem:[#allocation7 + $0xf4] ss:$84 sps:$4 sm:$0xff]  }
 0x716   : > { %8206 = vmatmul.mubr.msk.f32.vlgmr.msra.gmra.mrb[12].mxu1 %vm2009_vm1, %v13620_v37  ;;  %8209 = vmatmul.mubr.msk.f32.vlgmr.msra.gmra.mrb[10].mxu0 %vm2009_vm1, %v13620_v37 }
 0x717   : > { %8575 = vmatpush1.bf16.msra.mxu1 %v12536_v58  ;;  %8605 = vmatpush1.bf16.msra.mxu0 %v12539_v57  ;;  %v12626_v58 = vld [vmem:[#allocation7 + $0xe8] ss:$84 sps:$4 sm:$0xff]   ;;  %v12629_v57 = vld [vmem:[#allocation7 + $0xf0] ss:$84 sps:$4 sm:$0xff]  }
 0x718   : > { %8577 = vmatprep.subr.bf16.mxu1 %v12540_v59  ;;  %8607 = vmatprep.subr.bf16.mxu0 %v12543_v60  ;;  %v12630_v59 = vld [vmem:[#allocation7 + $0x194] ss:$84 sps:$4 sm:$0xff]   ;;  %v12633_v60 = vld [vmem:[#allocation7 + $0x19c] ss:$84 sps:$4 sm:$0xff]  }
 0x719   : > { %2424 = vmatprep.mubr.f32.mxu1 %v20895_v0  ;;  %2495 = vmatprep.mubr.f32.mxu0 %v20895_v0 }
 0x71b   : > { %8579 = vmatpush1.bf16.msra.mxu1 %v12542_v61  ;;  %8609 = vmatpush1.bf16.msra.mxu0 %v12545_v63  ;;  %v12632_v61 = vld [vmem:[#allocation7 + $0x190] ss:$84 sps:$4 sm:$0xff]   ;;  %v12635_v63 = vld [vmem:[#allocation7 + $0x198] ss:$84 sps:$4 sm:$0xff]  }
 0x71c   : > { %8581 = vmatprep.subr.bf16.mxu1 %v12546_v42  ;;  %8611 = vmatprep.subr.bf16.mxu0 %v12549_v17  ;;  %v12636_v42 = vld [vmem:[#allocation7 + $0x23c] ss:$84 sps:$4 sm:$0xff]   ;;  %v12639_v17 = vld [vmem:[#allocation7 + $0x244] ss:$84 sps:$4 sm:$0xff]  }
 0x71f   : > { %8583 = vmatpush1.bf16.msra.mxu1 %v12548_v43  ;;  %8613 = vmatpush1.bf16.msra.mxu0 %v12551_v2  ;;  %v12638_v43 = vld [vmem:[#allocation7 + $0x238] ss:$84 sps:$4 sm:$0xff]   ;;  %v12641_v2 = vld [vmem:[#allocation7 + $0x240] ss:$84 sps:$4 sm:$0xff]  }
 0x720   : > { %8585 = vmatprep.subr.bf16.mxu1 %v12552_v3  ;;  %8615 = vmatprep.subr.bf16.mxu0 %v12555_v4  ;;  %v12642_v3 = vld [vmem:[#allocation7 + $0x2e4] ss:$84 sps:$4 sm:$0xff]   ;;  %v12645_v4 = vld [vmem:[#allocation7 + $0x2ec] ss:$84 sps:$4 sm:$0xff]  }
 0x723   : > { %8587 = vmatpush1.bf16.msra.mxu1 %v12554_v5  ;;  %8617 = vmatpush1.bf16.msra.mxu0 %v12557_v6  ;;  %v12644_v5 = vld [vmem:[#allocation7 + $0x2e0] ss:$84 sps:$4 sm:$0xff]   ;;  %v12647_v6 = vld [vmem:[#allocation7 + $0x2e8] ss:$84 sps:$4 sm:$0xff]  }
 0x724   : > { %8589 = vmatprep.subr.bf16.mxu1 %v12558_v7  ;;  %8619 = vmatprep.subr.bf16.mxu0 %v12561_v8  ;;  %v12648_v7 = vld [vmem:[#allocation7 + $0x38c] ss:$84 sps:$4 sm:$0xff]   ;;  %v12651_v8 = vld [vmem:[#allocation7 + $0x394] ss:$84 sps:$4 sm:$0xff]  }
 0x727   : > { %8591 = vmatpush1.bf16.msra.mxu1 %v12560_v10  ;;  %8621 = vmatpush1.bf16.msra.mxu0 %v12563_v12  ;;  %v12650_v10 = vld [vmem:[#allocation7 + $0x388] ss:$84 sps:$4 sm:$0xff]   ;;  %v12653_v12 = vld [vmem:[#allocation7 + $0x390] ss:$84 sps:$4 sm:$0xff]  }
 0x728   : > { %8593 = vmatprep.subr.bf16.mxu1 %v12564_v20  ;;  %8623 = vmatprep.subr.bf16.mxu0 %v12567_v13  ;;  %v12654_v20 = vld [vmem:[#allocation7 + $0x434] ss:$84 sps:$4 sm:$0x1f]   ;;  %v12657_v13 = vld [vmem:[#allocation7 + $0x43c] ss:$84 sps:$4 sm:$0x1f]  }
 0x72b   : > { %8595 = vmatpush1.bf16.msra.mxu1 %v12566_v14  ;;  %8625 = vmatpush1.bf16.msra.mxu0 %v12569_v24  ;;  %v12656_v14 = vld [vmem:[#allocation7 + $0x430] ss:$84 sps:$4 sm:$0x1f]   ;;  %v12659_v24 = vld [vmem:[#allocation7 + $0x438] ss:$84 sps:$4 sm:$0x1f]  }
 0x72c   : > { %8598 = vmatprep.subr.msk.bf16.mxu1 %vm13352_vm11, %v12570_v28  ;;  %8628 = vmatprep.subr.msk.bf16.mxu0 %vm13352_vm11, %v12573_v29  ;;  %v12660_v28 = vld [vmem:[#allocation7 + $0x50] ss:$84 sps:$4 sm:$0xff]   ;;  %v12661_v29 = vld [vmem:[#allocation7 + $0xf8] ss:$84 sps:$4 sm:$0xff]  }
 0x72f   : > { %8601 = vmatpush1.bf16.msk.msra.mxu1 %vm13352_vm11, %v12572_v30  ;;  %8631 = vmatpush1.bf16.msk.msra.mxu0 %vm13352_vm11, %v12575_v31  ;;  %v12662_v30 = vld [vmem:[#allocation7 + $0x1a0] ss:$84 sps:$4 sm:$0xff]   ;;  %v12663_v31 = vld [vmem:[#allocation7 + $0x248] ss:$84 sps:$4 sm:$0xff]  }
 0x730   : > { %8633 = vmatprep.subr.bf16.mxu1 %v12576_v32  ;;  %8663 = vmatprep.subr.bf16.mxu0 %v12579_v62  ;;  %v12664_v32 = vld [vmem:[#allocation7 + $0x2f0] ss:$84 sps:$4 sm:$0xff]   ;;  %v12665_v62 = vld [vmem:[#allocation7 + $0x398] ss:$84 sps:$4 sm:$0xff]  }
 0x732   : > { %8212 = vmatmul.mubr.msk.f32.vlgmr.msra.gmra.mrb[14].mxu1 %vm2009_vm1, %v13620_v37  ;;  %8215 = vmatmul.mubr.msk.f32.vlgmr.msra.gmra.mrb[12].mxu0 %vm2009_vm1, %v13620_v37 }
 0x733   : > { %8635 = vmatpush1.bf16.msra.mxu1 %v12578_v21  ;;  %8665 = vmatpush1.bf16.msra.mxu0 %v12581_v33  ;;  %v12666_v21 = vld [vmem:[#allocation7 + $0x440] ss:$84 sps:$4 sm:$0x1f]  }
 0x734   : > { %8637 = vmatprep.subr.bf16.mxu1 %v12582_v34  ;;  %8667 = vmatprep.subr.bf16.mxu0 %v12585_v23 }
 0x735   : > { %2566 = vmatprep.mubr.f32.mxu1 %v20895_v0  ;;  %2637 = vmatprep.mubr.f32.mxu0 %v20895_v0 }
 0x737   : > { %8639 = vmatpush1.bf16.msra.mxu1 %v12584_v35  ;;  %8669 = vmatpush1.bf16.msra.mxu0 %v12587_v36 }
 0x738   : > { %8641 = vmatprep.subr.bf16.mxu1 %v12588_v39  ;;  %8671 = vmatprep.subr.bf16.mxu0 %v12591_v40 }
 0x73b   : > { %8643 = vmatpush1.bf16.msra.mxu1 %v12590_v41  ;;  %8673 = vmatpush1.bf16.msra.mxu0 %v12593_v15 }
 0x73c   : > { %8645 = vmatprep.subr.bf16.mxu1 %v12594_v26  ;;  %8675 = vmatprep.subr.bf16.mxu0 %v12597_v16 }
 0x73f   : > { %8647 = vmatpush1.bf16.msra.mxu1 %v12596_v44  ;;  %8677 = vmatpush1.bf16.msra.mxu0 %v12599_v45 }
 0x740   : > { %8649 = vmatprep.subr.bf16.mxu1 %v12600_v1  ;;  %8679 = vmatprep.subr.bf16.mxu0 %v12603_v46 }
 0x743   : > { %8651 = vmatpush1.bf16.msra.mxu1 %v12602_v47  ;;  %8681 = vmatpush1.bf16.msra.mxu0 %v12605_v9 }
 0x744   : > { %8653 = vmatprep.subr.bf16.mxu1 %v12606_v27  ;;  %8683 = vmatprep.subr.bf16.mxu0 %v12609_v18 }
 0x747   : > { %8655 = vmatpush1.bf16.msra.mxu1 %v12608_v48  ;;  %8685 = vmatpush1.bf16.msra.mxu0 %v12611_v49 }
 0x748   : > { %8658 = vmatprep.subr.msk.bf16.mxu1 %vm13352_vm11, %v12612_v19  ;;  %8688 = vmatprep.subr.msk.bf16.mxu0 %vm13352_vm11, %v12615_v50 }
 0x74b   : > { %8661 = vmatpush1.bf16.msk.msra.mxu1 %vm13352_vm11, %v12614_v11  ;;  %8691 = vmatpush1.bf16.msk.msra.mxu0 %vm13352_vm11, %v12617_v51 }
 0x74c   : > { %8693 = vmatprep.subr.bf16.mxu1 %v12618_v53  ;;  %8723 = vmatprep.subr.bf16.mxu0 %v12621_v54 }
 0x74e   : > { %8218 = vmatmul.mubr.msk.f32.vlgmr.msra.gmra.mrb[16].mxu1 %vm2009_vm1, %v13620_v37  ;;  %8221 = vmatmul.mubr.msk.f32.vlgmr.msra.gmra.mrb[14].mxu0 %vm2009_vm1, %v13620_v37 }
 0x74f   : > { %8695 = vmatpush1.bf16.msra.mxu1 %v12620_v22  ;;  %8725 = vmatpush1.bf16.msra.mxu0 %v12623_v55 }
 0x750   : > { %8697 = vmatprep.subr.bf16.mxu1 %v12624_v25  ;;  %8727 = vmatprep.subr.bf16.mxu0 %v12627_v56 }
 0x751   : > { %2708 = vmatprep.mubr.f32.mxu1 %v20895_v0  ;;  %2779 = vmatprep.mubr.f32.mxu0 %v20895_v0 }
 0x753   : > { %8699 = vmatpush1.bf16.msra.mxu1 %v12626_v58  ;;  %8729 = vmatpush1.bf16.msra.mxu0 %v12629_v57 }
 0x754   : > { %8701 = vmatprep.subr.bf16.mxu1 %v12630_v59  ;;  %8731 = vmatprep.subr.bf16.mxu0 %v12633_v60 }
 0x757   : > { %8703 = vmatpush1.bf16.msra.mxu1 %v12632_v61  ;;  %8733 = vmatpush1.bf16.msra.mxu0 %v12635_v63 }
 0x758   : > { %8705 = vmatprep.subr.bf16.mxu1 %v12636_v42  ;;  %8735 = vmatprep.subr.bf16.mxu0 %v12639_v17 }
 0x75b   : > { %8707 = vmatpush1.bf16.msra.mxu1 %v12638_v43  ;;  %8737 = vmatpush1.bf16.msra.mxu0 %v12641_v2 }
 0x75c   : > { %8709 = vmatprep.subr.bf16.mxu1 %v12642_v3  ;;  %8739 = vmatprep.subr.bf16.mxu0 %v12645_v4 }
 0x75f   : > { %8711 = vmatpush1.bf16.msra.mxu1 %v12644_v5  ;;  %8741 = vmatpush1.bf16.msra.mxu0 %v12647_v6 }
 0x760   : > { %8713 = vmatprep.subr.bf16.mxu1 %v12648_v7  ;;  %8743 = vmatprep.subr.bf16.mxu0 %v12651_v8 }
 0x763   : > { %8715 = vmatpush1.bf16.msra.mxu1 %v12650_v10  ;;  %8745 = vmatpush1.bf16.msra.mxu0 %v12653_v12 }
 0x764   : > { %8718 = vmatprep.subr.msk.bf16.mxu1 %vm13352_vm11, %v12654_v20  ;;  %8748 = vmatprep.subr.msk.bf16.mxu0 %vm13352_vm11, %v12657_v13 }
 0x767   : > { %8721 = vmatpush1.bf16.msk.msra.mxu1 %vm13352_vm11, %v12656_v14  ;;  %8751 = vmatpush1.bf16.msk.msra.mxu0 %vm13352_vm11, %v12659_v24 }
 0x768   : > { %8752 = vmatprep.subr.bf16.mxu1 %v12935_v38 }
 0x76a   : > { %8224 = vmatmul.mubr.msk.f32.vlgmr.msra.gmra.mrb[18].mxu1 %vm2009_vm1, %v13620_v37  ;;  %8227 = vmatmul.mubr.msk.f32.vlgmr.msra.gmra.mrb[16].mxu0 %vm2009_vm1, %v13620_v37 }
 0x76b   : > { %8754 = vmatpush3.bf16.msra.mxu1 %v12660_v28  ;;  %8339 = vmatprep.mubr.msk.f32.mxu1 %vm12961_vm15, %v20895_v0  ;;  %vm3197_vm15 = vcmask 752640  }
 0x76c   : > { %8755 = vmatprep.subr.bf16.mxu1 %v12935_v38 }
 0x76f   : > { %8757 = vmatpush3.bf16.msra.mxu1 %v12661_v29 }
 0x770   : > { %8758 = vmatprep.subr.bf16.mxu1 %v12935_v38 }
 0x773   : > { %8760 = vmatpush3.bf16.msra.mxu1 %v12662_v30 }
 0x774   : > { %8761 = vmatprep.subr.bf16.mxu1 %v12935_v38 }
 0x777   : > { %8763 = vmatpush3.bf16.msra.mxu1 %v12663_v31 }
 0x778   : > { %8764 = vmatprep.subr.bf16.mxu1 %v12935_v38 }
 0x77b   : > { %8766 = vmatpush3.bf16.msra.mxu1 %v12664_v32 }
 0x77c   : > { %8767 = vmatprep.subr.bf16.mxu1 %v12935_v38 }
 0x77f   : > { %8769 = vmatpush3.bf16.msra.mxu1 %v12665_v62 }
 0x780   : > { %8770 = vmatprep.subr.bf16.mxu1 %v12935_v38 }
 0x783   : > { %8773 = vmatpush3.bf16.msk.msra.mxu1 %vm13352_vm11, %v12666_v21  ;;  %vm2981_vm11 = vcmask 1031168  }
 0x786   : > { %8340 = vmatmul.mubr.msk.f32.vlgmr.msra.gmra.mrb[20].mxu1 %vm2009_vm1, %v13620_v37  ;;  %vm3639_vm1 = vcmask 449536  }
 0x7cd   : > { %v13695_v33 = vpop.f32.mrb[10].mxu1  ;;  %v13697_v34 = vpop.f32.mrb[8].mxu0 }
 0x7ce   : > { %21714 = vst [vmem:[#allocation13_spill] sm:$0xff] %v13697_v34  ;;  %v13699_v23 = vpop.f32.mrb[11].mxu1  ;;  %v13701_v35 = vpop.f32.mrb[9].mxu0 }
 0x7cf   : > { %v10262_v36 = vpack.i.bf16 %v13701_v35, %v13697_v34  ;;  %v10257_v38 = vpack.i.bf16 %v13699_v23, %v13695_v33  ;;  %v10407_v52 = vpack.i.bf16 %v13697_v34, %v13699_v23 }
 0x7d1   : > { %10263 = vrot.lane.b32.xlu1 %v10262_v36, %s12937_s21  ;;  %10258 = vrot.lane.b32.xlu0 %v10257_v38, %s12937_s21 }
 0x7d5   : > { %10268 = vrot.lane.b32.xlu1 %v10257_v38, %s21712_s14  ;;  %10273 = vrot.lane.b32.xlu0 %v10262_v36, %s21712_s14 }
 0x7d9   : > { %10283 = vrot.lane.b32.xlu1 %v10262_v36, %s21713_s17  ;;  %10278 = vrot.lane.b32.xlu0 %v10257_v38, %s21713_s17 }
 0x7dd   : > { %10288 = vrot.lane.b32.xlu1 %v10257_v38, %s21715_s15  ;;  %10293 = vrot.lane.b32.xlu0 %v10262_v36, %s21715_s15 }
 0x7e1   : > { %10303 = vrot.lane.b32.xlu1 %v10262_v36, %s12971_s22  ;;  %10298 = vrot.lane.b32.xlu0 %v10257_v38, %s12971_s22 }
 0x7e5   : > { %10308 = vrot.lane.b32.xlu1 %v10257_v38, %s12972_s20  ;;  %10313 = vrot.lane.b32.xlu0 %v10262_v36, %s12972_s20 }
 0x7e9   : > { %v13721_v37 = vpop.f32.mrb[12].mxu1  ;;  %v13723_v39 = vpop.f32.mrb[10].mxu0  ;;  %10323 = vrot.lane.b32.xlu1 %v10262_v36, %s12973_s28  ;;  %10318 = vrot.lane.b32.xlu0 %v10257_v38, %s12973_s28 }
 0x7ea   : > { %21716 = vst [vmem:[#allocation14_spill] sm:$0xff] %v13721_v37  ;;  %21717 = vst [vmem:[#allocation15_spill] sm:$0xff] %v13723_v39  ;;  %v13727_v40 = vpop.f32.mrb[11].mxu0  ;;  %v13729_v41 = vpop.f32.mrb[13].mxu1  ;;  %v10412_v15 = vpack.i.bf16 %v13721_v37, %v13701_v35 }
 0x7eb   : > { %21718 = vst [vmem:[#allocation16_spill] sm:$0xff] %v13727_v40  ;;  %21719 = vst [vmem:[#allocation17_spill] sm:$0xff] %v13729_v41  ;;  %v13735_v26 = vpack.i.bf16 %v13729_v41, %v13721_v37  ;;  %v13739_v16 = vpack.i.bf16 %v13727_v40, %v13723_v39  ;;  %v13747_v44 = vpack.i.bf16 %v13723_v39, %v13729_v41 }
 0x7ed   : > { %10328 = vrot.lane.b32.xlu1 %v10257_v38, %s12974_s27  ;;  %10333 = vrot.lane.b32.xlu0 %v10262_v36, %s12974_s27 }
 0x7f1   : > { %10338 = vrot.lane.b32.xlu1 %v10257_v38, %s12975_s29  ;;  %10343 = vrot.lane.b32.xlu0 %v10262_v36, %s12975_s29 }
 0x7f5   : > { %10348 = vrot.lane.b32.xlu1 %v10257_v38, %s12976_s11  ;;  %10353 = vrot.lane.b32.xlu0 %v10262_v36, %s12976_s11 }
 0x7f9   : > { %10358 = vrot.lane.b32.xlu1 %v10257_v38, %s12977_s13  ;;  %10363 = vrot.lane.b32.xlu0 %v10262_v36, %s12977_s13 }
 0x7fd   : > { %10368 = vrot.lane.b32.xlu1 %v10257_v38, %s12978_s24  ;;  %10373 = vrot.lane.b32.xlu0 %v10262_v36, %s12978_s24 }
 0x801   : > { %10378 = vrot.lane.b32.xlu1 %v10257_v38, %s12979_s12  ;;  %10383 = vrot.lane.b32.xlu0 %v10262_v36, %s12979_s12 }
 0x805   : > { %v13757_v45 = vpop.f32.mrb[14].mxu1  ;;  %v13759_v1 = vpop.f32.mrb[12].mxu0  ;;  %10388 = vrot.lane.b32.xlu1 %v10257_v38, %s12980_s30  ;;  %10393 = vrot.lane.b32.xlu0 %v10262_v36, %s12980_s30 }
 0x806   : > { %21720 = vst [vmem:[#allocation18_spill] sm:$0xff] %v13757_v45  ;;  %21721 = vst [vmem:[#allocation19_spill] sm:$0xff] %v13759_v1  ;;  %v13763_v46 = vpop.f32.mrb[13].mxu0  ;;  %v13765_v47 = vpop.f32.mrb[15].mxu1  ;;  %v13769_v9 = vpack.i.bf16 %v13757_v45, %v13727_v40 }
 0x807   : > { %21722 = vst [vmem:[#allocation20_spill] sm:$0xff] %v13763_v46  ;;  %21723 = vst [vmem:[#allocation21_spill] sm:$0xff] %v13765_v47  ;;  %v13773_v27 = vpack.i.bf16 %v13765_v47, %v13757_v45  ;;  %v13777_v18 = vpack.i.bf16 %v13763_v46, %v13759_v1  ;;  %v13785_v48 = vpack.i.bf16 %v13759_v1, %v13765_v47 }
 0x809   : > { %10398 = vrot.lane.b32.xlu1 %v10257_v38, %s12981_s25  ;;  %10403 = vrot.lane.b32.xlu0 %v10262_v36, %s12981_s25 }
 0x80d   : > { %10408 = vrot.lane.b32.xlu0 %v10407_v52, %s12967_s26  ;;  %10413 = vrot.lane.b32.xlu1 %v10412_v15, %s12967_s26 }
 0x811   : > { %10418 = vrot.lane.b32.xlu1 %v10412_v15, %s12954_s7  ;;  %10423 = vrot.lane.b32.xlu0 %v13735_v26, %s12937_s21 }
 0x815   : > { %10428 = vrot.lane.b32.xlu1 %v13739_v16, %s12937_s21  ;;  %10438 = vrot.lane.b32.xlu0 %v13739_v16, %s21712_s14 }
 0x819   : > { %10433 = vrot.lane.b32.xlu1 %v13735_v26, %s21712_s14  ;;  %10443 = vrot.lane.b32.xlu0 %v13735_v26, %s21713_s17 }
 0x81d   : > { %10448 = vrot.lane.b32.xlu1 %v13739_v16, %s21713_s17  ;;  %10458 = vrot.lane.b32.xlu0 %v13739_v16, %s21715_s15 }
 0x821   : > { %v13802_v49 = vpop.f32.mrb[16].mxu1  ;;  %v13804_v19 = vpop.f32.mrb[14].mxu0  ;;  %10453 = vrot.lane.b32.xlu1 %v13735_v26, %s21715_s15  ;;  %10463 = vrot.lane.b32.xlu0 %v13735_v26, %s12971_s22 }
 0x822   : > { %21724 = vst [vmem:[#allocation22_spill] sm:$0xff] %v13802_v49  ;;  %21725 = vst [vmem:[#allocation23_spill] sm:$0xff] %v13804_v19  ;;  %v13810_v50 = vpop.f32.mrb[15].mxu0  ;;  %v13812_v11 = vpop.f32.mrb[17].mxu1  ;;  %v13816_v51 = vpack.i.bf16 %v13802_v49, %v13763_v46 }
 0x823   : > { %21726 = vst [vmem:[#allocation24_spill] sm:$0xff] %v13810_v50  ;;  %21727 = vst [vmem:[#allocation25_spill] sm:$0xff] %v13812_v11  ;;  %v13820_v53 = vpack.i.bf16 %v13812_v11, %v13802_v49  ;;  %v13824_v54 = vpack.i.bf16 %v13810_v50, %v13804_v19  ;;  %v13836_v22 = vpack.i.bf16 %v13804_v19, %v13812_v11 }
 0x825   : > { %10468 = vrot.lane.b32.xlu1 %v13739_v16, %s12971_s22  ;;  %10478 = vrot.lane.b32.xlu0 %v13739_v16, %s12972_s20  ;;  %21728 = vst [vmem:[#allocation26_spill] sm:$0xff] %v13836_v22 }
 0x829   : > { %10473 = vrot.lane.b32.xlu1 %v13735_v26, %s12972_s20  ;;  %10483 = vrot.lane.b32.xlu0 %v13735_v26, %s12973_s28 }
 0x82d   : > { %10488 = vrot.lane.b32.xlu1 %v13739_v16, %s12973_s28  ;;  %10498 = vrot.lane.b32.xlu0 %v13739_v16, %s12974_s27 }
 0x831   : > { %10493 = vrot.lane.b32.xlu1 %v13735_v26, %s12974_s27  ;;  %10508 = vrot.lane.b32.xlu0 %v13739_v16, %s12975_s29 }
 0x835   : > { %10503 = vrot.lane.b32.xlu1 %v13735_v26, %s12975_s29  ;;  %10518 = vrot.lane.b32.xlu0 %v13739_v16, %s12976_s11 }
 0x839   : > { %10513 = vrot.lane.b32.xlu1 %v13735_v26, %s12976_s11  ;;  %10528 = vrot.lane.b32.xlu0 %v13739_v16, %s12977_s13 }
 0x83d   : > { %v13854_v55 = vpop.f32.mrb[18].mxu1  ;;  %v2781_v25 = vpop.f32.mrb[16].mxu0  ;;  %10523 = vrot.lane.b32.xlu1 %v13735_v26, %s12977_s13  ;;  %10538 = vrot.lane.b32.xlu0 %v13739_v16, %s12978_s24 }
 0x83e   : > { %21729 = vst [vmem:[#allocation27_spill] sm:$0xff] %v13854_v55  ;;  %v13860_v56 = vpop.f32.mrb[17].mxu0  ;;  %v13862_v58 = vpop.f32.mrb[19].mxu1  ;;  %v13866_v57 = vpack.i.bf16 %v13854_v55, %v13810_v50 }
 0x83f   : > { %21730 = vst [vmem:[#allocation28_spill] sm:$0xff] %v13860_v56  ;;  %21731 = vst [vmem:[#allocation29_spill] sm:$0xff] %v13862_v58  ;;  %v13870_v59 = vpack.i.bf16 %v13862_v58, %v13854_v55  ;;  %v13877_v60 = vpack.i.bf16 %v13860_v56, %v2781_v25  ;;  %v13928_v38 = vpack.i.bf16 %v2781_v25, %v13862_v58 }
 0x840   : > { %21732 = vst [vmem:[#allocation30_spill] sm:$0xff] %v13866_v57 }
 0x841   : > { %10533 = vrot.lane.b32.xlu1 %v13735_v26, %s12978_s24  ;;  %10548 = vrot.lane.b32.xlu0 %v13739_v16, %s12979_s12  ;;  %21735 = vst [vmem:[#allocation33_spill] sm:$0xff] %v13928_v38 }
 0x843   : > { %v13879_v61 = vpop.permute.xlu1 %10263  ;;  %v10259_v63 = vpop.permute.xlu0 %10258 }
 0x844   : > { %v20903_v42 = vunpack.i.h.bf16 %v13879_v61  ;;  %v10265_v17 = vunpack.i.l.bf16 %v13879_v61  ;;  %v10261_v43 = vunpack.i.h.bf16 %v10259_v63  ;;  %v10260_v2 = vunpack.i.l.bf16 %v10259_v63 }
 0x845   : > { %10543 = vrot.lane.b32.xlu1 %v13735_v26, %s12979_s12  ;;  %10558 = vrot.lane.b32.xlu0 %v13739_v16, %s12980_s30 }
 0x846   : > { %v13890_v3 = vsel %vm1271_vm5, %v10265_v17, %v20903_v42  ;;  %v2910_v4 = vsel %vm1271_vm5, %v10260_v2, %v10261_v43  ;;  %v13894_v5 = vsel %vm1271_vm5, %v10261_v43, %v10265_v17 }
 0x847   : > { %21733 = vst [vmem:[#allocation31_spill] sm:$0xff] %v13894_v5  ;;  %v10269_v6 = vpop.permute.xlu1 %10268  ;;  %v13896_v7 = vpop.permute.xlu0 %10273  ;;  %v8774_v10 = vpack.c.bf16 %v13894_v5, %v13699_v23  ;;  %v8776_v12 = vpack.c.bf16 %v2910_v4, %v13695_v33 }
 0x848   : > { %v10271_v13 = vunpack.i.h.bf16 %v10269_v6  ;;  %v20902_v14 = vunpack.i.h.bf16 %v13896_v7  ;;  %v10275_v24 = vunpack.i.l.bf16 %v13896_v7  ;;  %v10270_v28 = vunpack.i.l.bf16 %v10269_v6 }
 0x849   : > { %8775 = vmatprep.subr.bf16.mxu0 %v8774_v10  ;;  %10553 = vrot.lane.b32.xlu1 %v13735_v26, %s12980_s30 }
 0x84a   : > { %v13912_v29 = vsel %vm2981_vm11, %v10275_v24, %v20902_v14  ;;  %10568 = vrot.lane.b32.xlu0 %v13739_v16, %s12981_s25  ;;  %8777 = vmatpush1.bf16.msra.mxu0 %v8776_v12  ;;  %v13917_v30 = vsel %vm2981_vm11, %v10271_v13, %v10275_v24  ;;  %v2982_v15 = vsel %vm2981_vm11, %v10270_v28, %v10271_v13 }
 0x84b   : > { %21734 = vst [vmem:[#allocation32_spill] sm:$0xff] %v13917_v30  ;;  %v13919_v31 = vpop.permute.xlu1 %10283  ;;  %v10279_v32 = vpop.permute.xlu0 %10278 }
 0x84c   : > { %v20900_v21 = vunpack.i.h.bf16 %v13919_v31  ;;  %v10285_v33 = vunpack.i.l.bf16 %v13919_v31  ;;  %v10281_v23 = vunpack.i.h.bf16 %v10279_v32  ;;  %v10280_v36 = vunpack.i.l.bf16 %v10279_v32 }
 0x84d   : > { %10563 = vrot.lane.b32.xlu1 %v13735_v26, %s12981_s25  ;;  %v21763_v39 = vunpack.i.h.bf16 %v13919_v31 }
 0x84e   : > { %v13936_v16 = vsel %vm3053_vm13, %v10285_v33, %v20900_v21  ;;  %v3054_v63 = vsel %vm3053_vm13, %v10280_v36, %v10281_v23  ;;  %10573 = vrot.lane.b32.xlu0 %v13747_v44, %s12967_s26  ;;  %v13942_v26 = vsel %vm3053_vm13, %v10281_v23, %v10285_v33 }
 0x84f   : > { %21736 = vst [vmem:[#allocation34_spill] sm:$0xff] %v13942_v26  ;;  %v10289_v25 = vpop.permute.xlu1 %10288  ;;  %v13944_v17 = vpop.permute.xlu0 %10293  ;;  %v8778_v2 = vpack.c.bf16 %v13942_v26, %v13917_v30  ;;  %v8780_v4 = vpack.c.bf16 %v3054_v63, %v2982_v15 }
 0x850   : > { %v10291_v10 = vunpack.i.h.bf16 %v10289_v25  ;;  %v20899_v12 = vunpack.i.h.bf16 %v13944_v17  ;;  %v10295_v13 = vunpack.i.l.bf16 %v13944_v17  ;;  %v10290_v28 = vunpack.i.l.bf16 %v10289_v25 }
 0x851   : > { %8779 = vmatprep.subr.bf16.mxu0 %v8778_v2  ;;  %10578 = vrot.lane.b32.xlu1 %v13747_v44, %s12954_s7 }
 0x852   : > { %v13961_v32 = vsel %vm3125_vm12, %v10295_v13, %v20899_v12  ;;  %10588 = vrot.lane.b32.xlu0 %v13769_v9, %s12954_s7  ;;  %8781 = vmatpush1.bf16.msra.mxu0 %v8780_v4  ;;  %v13966_v33 = vsel %vm3125_vm12, %v10291_v10, %v10295_v13  ;;  %v3126_v4 = vsel %vm3125_vm12, %v10290_v28, %v10291_v10 }
 0x853   : > { %21737 = vst [vmem:[#allocation35_spill] sm:$0xff] %v13966_v33  ;;  %v13968_v23 = vpop.permute.xlu1 %10303  ;;  %v10299_v44 = vpop.permute.xlu0 %10298 }
 0x854   : > { %v20898_v15 = vunpack.i.h.bf16 %v13968_v23  ;;  %v10305_v63 = vunpack.i.l.bf16 %v13968_v23  ;;  %v10301_v25 = vunpack.i.h.bf16 %v10299_v44  ;;  %v10300_v2 = vunpack.i.l.bf16 %v10299_v44 }
 0x855   : > { %10583 = vrot.lane.b32.xlu1 %v13769_v9, %s12967_s26 }
 0x856   : > { %v13980_v13 = vsel %vm3197_vm15, %v10305_v63, %v20898_v15  ;;  %v3198_v0 = vsel %vm3197_vm15, %v10300_v2, %v10301_v25  ;;  %10593 = vrot.lane.b32.xlu0 %v13773_v27, %s12937_s21  ;;  %v13986_v24 = vsel %vm3197_vm15, %v10301_v25, %v10305_v63 }
 0x857   : > { %21738 = vst [vmem:[#allocation36_spill] sm:$0xff] %v13986_v24  ;;  %v10309_v52 = vpop.permute.xlu1 %10308  ;;  %v13988_v44 = vpop.permute.xlu0 %10313  ;;  %v8782_v10 = vpack.c.bf16 %v13986_v24, %v13966_v33  ;;  %v8784_v28 = vpack.c.bf16 %v3198_v0, %v3126_v4 }
 0x858   : > { %v10311_v2 = vunpack.i.h.bf16 %v10309_v52  ;;  %v20897_v43 = vunpack.i.h.bf16 %v13988_v44  ;;  %v10315_v62 = vunpack.i.l.bf16 %v13988_v44  ;;  %v10310_v9 = vunpack.i.l.bf16 %v10309_v52 }
 0x859   : > { %v13998_v63 = vpop.f32.mrb[20].mxu1  ;;  %8783 = vmatprep.subr.bf16.mxu0 %v8782_v10  ;;  %10598 = vrot.lane.b32.xlu1 %v13777_v18, %s12937_s21 }
 0x85a   : > { %21739 = vst [vmem:[#allocation37_spill] sm:$0xff] %v13998_v63  ;;  %v14007_v0 = vsel %vm1549_vm9, %v10315_v62, %v20897_v43  ;;  %10608 = vrot.lane.b32.xlu0 %v13777_v18, %s21712_s14  ;;  %v8341_v4 = vpop.f32.mrb[21].mxu1  ;;  %8785 = vmatpush1.bf16.msra.mxu0 %v8784_v28  ;;  %v14012_v8 = vsel %vm1549_vm9, %v10311_v2, %v10315_v62 }
 0x85b   : > { %21740 = vst [vmem:[#allocation38_spill] sm:$0xff] %v14012_v8  ;;  %v14014_v10 = vpop.permute.xlu1 %10323  ;;  %v10319_v36 = vpop.permute.xlu0 %10318  ;;  %v3269_v62 = vsel %vm1549_vm9, %v10310_v9, %v10311_v2 }
 0x85c   : > { %v20901_v25 = vunpack.i.h.bf16 %v14014_v10  ;;  %v10325_v43 = vunpack.i.l.bf16 %v14014_v10  ;;  %v10321_v15 = vunpack.i.h.bf16 %v10319_v36  ;;  %v10320_v12 = vunpack.i.l.bf16 %v10319_v36 }
 0x85d   : > { %10603 = vrot.lane.b32.xlu1 %v13773_v27, %s21712_s14 }
 0x85e   : > { %v14026_v28 = vsel %vm3340_vm10, %v10325_v43, %v20901_v25  ;;  %v3341_v4 = vsel %vm3340_vm10, %v10320_v12, %v10321_v15  ;;  %10613 = vrot.lane.b32.xlu0 %v13773_v27, %s21713_s17  ;;  %v14032_v52 = vsel %vm3340_vm10, %v10321_v15, %v10325_v43 }
 0x85f   : > { %21741 = vst [vmem:[#allocation39_spill] sm:$0xff] %v14032_v52  ;;  %v10329_v36 = vpop.permute.xlu1 %10328  ;;  %v14034_v6 = vpop.permute.xlu0 %10333  ;;  %v8786_v9 = vpack.c.bf16 %v14032_v52, %v14012_v8  ;;  %v8788_v2 = vpack.c.bf16 %v3341_v4, %v3269_v62 }
 0x860   : > { %v10331_v12 = vunpack.i.h.bf16 %v10329_v36  ;;  %v20904_v14 = vunpack.i.h.bf16 %v14034_v6  ;;  %v10335_v20 = vunpack.i.l.bf16 %v14034_v6  ;;  %v10330_v15 = vunpack.i.l.bf16 %v10329_v36 }
 0x861   : > { %8787 = vmatprep.subr.bf16.mxu0 %v8786_v9  ;;  %10618 = vrot.lane.b32.xlu1 %v13777_v18, %s21713_s17 }
 0x862   : > { %v14051_v62 = vsel %vm3415_vm14, %v10335_v20, %v20904_v14  ;;  %10628 = vrot.lane.b32.xlu0 %v13777_v18, %s21715_s15  ;;  %8789 = vmatpush1.bf16.msra.mxu0 %v8788_v2  ;;  %v14056_v4 = vsel %vm3415_vm14, %v10331_v12, %v10335_v20  ;;  %v3416_v2 = vsel %vm3415_vm14, %v10330_v15, %v10331_v12 }
 0x863   : > { %21742 = vst [vmem:[#allocation40_spill] sm:$0xff] %v14056_v4  ;;  %v10339_v9 = vpop.permute.xlu1 %10338  ;;  %v14058_v21 = vpop.permute.xlu0 %10343 }
 0x864   : > { %v10341_v36 = vunpack.i.h.bf16 %v10339_v9  ;;  %v10340_v25 = vunpack.i.l.bf16 %v10339_v9  ;;  %v20910_v42 = vunpack.i.h.bf16 %v14058_v21  ;;  %v10345_v14 = vunpack.i.l.bf16 %v14058_v21 }
 0x865   : > { %10623 = vrot.lane.b32.xlu1 %v13773_v27, %s21715_s15 }
 0x866   : > { %v3491_v20 = vsel %vm3490_vm6, %v10340_v25, %v10341_v36  ;;  %v14071_v56 = vsel %vm3490_vm6, %v10345_v14, %v20910_v42  ;;  %10633 = vrot.lane.b32.xlu0 %v13773_v27, %s12971_s22  ;;  %v14076_v9 = vsel %vm3490_vm6, %v10341_v36, %v10345_v14 }
 0x867   : > { %21743 = vst [vmem:[#allocation41_spill] sm:$0xff] %v14076_v9  ;;  %v10349_v43 = vpop.permute.xlu1 %10348  ;;  %v14078_v55 = vpop.permute.xlu0 %10353  ;;  %v8790_v25 = vpack.c.bf16 %v14076_v9, %v14056_v4  ;;  %v8792_v12 = vpack.c.bf16 %v3491_v20, %v3416_v2 }
 0x868   : > { %v10351_v42 = vunpack.i.h.bf16 %v10349_v43  ;;  %v20915_v58 = vunpack.i.h.bf16 %v14078_v55  ;;  %v10355_v63 = vunpack.i.l.bf16 %v14078_v55  ;;  %v10350_v36 = vunpack.i.l.bf16 %v10349_v43 }
 0x869   : > { %8791 = vmatprep.subr.bf16.mxu0 %v8790_v25  ;;  %10638 = vrot.lane.b32.xlu1 %v13777_v18, %s12971_s22 }
 0x86a   : > { %v14095_v2 = vsel %vm1539_vm2, %v10355_v63, %v20915_v58  ;;  %10648 = vrot.lane.b32.xlu0 %v13777_v18, %s12972_s20  ;;  %8793 = vmatpush1.bf16.msra.mxu0 %v8792_v12  ;;  %v14100_v20 = vsel %vm1539_vm2, %v10351_v42, %v10355_v63  ;;  %v3565_v63 = vsel %vm1539_vm2, %v10350_v36, %v10351_v42 }
 0x86b   : > { %21744 = vst [vmem:[#allocation42_spill] sm:$0xff] %v14100_v20  ;;  %v10359_v25 = vpop.permute.xlu1 %10358  ;;  %v14102_v50 = vpop.permute.xlu0 %10363 }
 0x86c   : > { %v10361_v43 = vunpack.i.h.bf16 %v10359_v25  ;;  %v10360_v15 = vunpack.i.l.bf16 %v10359_v25  ;;  %v20920_v9 = vunpack.i.h.bf16 %v14102_v50  ;;  %v10365_v58 = vunpack.i.l.bf16 %v14102_v50 }
 0x86d   : > { %10643 = vrot.lane.b32.xlu1 %v13773_v27, %s12972_s20 }
 0x86e   : > { %v3640_v12 = vsel %vm3639_vm1, %v10360_v15, %v10361_v43  ;;  %v14115_v4 = vsel %vm3639_vm1, %v10365_v58, %v20920_v9  ;;  %10653 = vrot.lane.b32.xlu0 %v13773_v27, %s12973_s28  ;;  %v14120_v25 = vsel %vm3639_vm1, %v10361_v43, %v10365_v58 }
 0x86f   : > { %21745 = vst [vmem:[#allocation43_spill] sm:$0xff] %v14120_v25  ;;  %v10369_v14 = vpop.permute.xlu1 %10368  ;;  %v10374_v52 = vpop.permute.xlu0 %10373  ;;  %v8794_v42 = vpack.c.bf16 %v14120_v25, %v14100_v20  ;;  %v8796_v15 = vpack.c.bf16 %v3640_v12, %v3565_v63 }
 0x870   : > { %v10371_v9 = vunpack.i.h.bf16 %v10369_v14  ;;  %v14128_v24 = vunpack.i.h.bf16 %v10374_v52  ;;  %v10375_v33 = vunpack.i.l.bf16 %v10374_v52  ;;  %v10370_v43 = vunpack.i.l.bf16 %v10369_v14 }
 0x871   : > { %8795 = vmatprep.subr.bf16.mxu0 %v8794_v42  ;;  %10658 = vrot.lane.b32.xlu1 %v13777_v18, %s12973_s28 }
 0x872   : > { %10668 = vrot.lane.b32.xlu0 %v13777_v18, %s12974_s27  ;;  %8797 = vmatpush1.bf16.msra.mxu0 %v8796_v15  ;;  %v14137_v63 = vsel %vm3714_vm3, %v10371_v9, %v10375_v33  ;;  %v14141_v12 = vsel %vm3714_vm3, %v10375_v33, %v14128_v24  ;;  %v3715_v15 = vsel %vm3714_vm3, %v10370_v43, %v10371_v9 }
 0x873   : > { %21746 = vst [vmem:[#allocation44_spill] sm:$0xff] %v14137_v63  ;;  %v10379_v52 = vpop.permute.xlu1 %10378  ;;  %v10384_v42 = vpop.permute.xlu0 %10383 }
 0x874   : > { %v10381_v36 = vunpack.i.h.bf16 %v10379_v52  ;;  %v10380_v58 = vunpack.i.l.bf16 %v10379_v52  ;;  %v14145_v14 = vunpack.i.h.bf16 %v10384_v42  ;;  %v10385_v25 = vunpack.i.l.bf16 %v10384_v42 }
 0x875   : > { %10663 = vrot.lane.b32.xlu1 %v13773_v27, %s12974_s27 }
 0x876   : > { %v3790_v20 = vsel %vm3789_vm8, %v10380_v58, %v10381_v36  ;;  %10678 = vrot.lane.b32.xlu0 %v13777_v18, %s12975_s29  ;;  %v14154_v33 = vsel %vm3789_vm8, %v10381_v36, %v10385_v25  ;;  %v14158_v8 = vsel %vm3789_vm8, %v10385_v25, %v14145_v14 }
 0x877   : > { %21747 = vst [vmem:[#allocation45_spill] sm:$0xff] %v14154_v33  ;;  %v10389_v52 = vpop.permute.xlu1 %10388  ;;  %v10394_v26 = vpop.permute.xlu0 %10393  ;;  %v8798_v9 = vpack.c.bf16 %v14154_v33, %v14137_v63  ;;  %v8800_v43 = vpack.c.bf16 %v3790_v20, %v3715_v15 }
 0x878   : > { %v10391_v30 = vunpack.i.h.bf16 %v10389_v52  ;;  %v14166_v5 = vunpack.i.h.bf16 %v10394_v26  ;;  %v10395_v36 = vunpack.i.l.bf16 %v10394_v26  ;;  %v10390_v25 = vunpack.i.l.bf16 %v10389_v52 }
 0x879   : > { %8799 = vmatprep.subr.bf16.mxu0 %v8798_v9  ;;  %10673 = vrot.lane.b32.xlu1 %v13773_v27, %s12975_s29 }
 0x87a   : > { %10688 = vrot.lane.b32.xlu0 %v13777_v18, %s12976_s11  ;;  %8801 = vmatpush1.bf16.msra.mxu0 %v8800_v43  ;;  %v14173_v42 = vsel %vm1529_vm4, %v10391_v30, %v10395_v36  ;;  %v14177_v20 = vsel %vm1529_vm4, %v10395_v36, %v14166_v5  ;;  %v3864_v43 = vsel %vm1529_vm4, %v10390_v25, %v10391_v30 }
 0x87b   : > { %v10399_v15 = vpop.permute.xlu1 %10398  ;;  %v14179_v58 = vpop.permute.xlu0 %10403 }
 0x87c   : > { %v10401_v9 = vunpack.i.h.bf16 %v10399_v15  ;;  %v10400_v52 = vunpack.i.l.bf16 %v10399_v15  ;;  %v20935_v33 = vunpack.i.l.bf16 %v14179_v58 }
 0x87d   : > { %10683 = vrot.lane.b32.xlu1 %v13773_v27, %s12976_s11 }
 0x87e   : > { %v3939_v63 = vsel %vm3938_vm0, %v10400_v52, %v10401_v9  ;;  %10698 = vrot.lane.b32.xlu0 %v13777_v18, %s12977_s13  ;;  %v14193_v36 = vsel %vm3938_vm0, %v10401_v9, %v20935_v33 }
 0x87f   : > { %21748 = vst [vmem:[#allocation46_spill] sm:$0xff] %v14193_v36  ;;  %v14195_v26 = vpop.permute.xlu0 %10408  ;;  %v14197_v15 = vpop.permute.xlu1 %10413  ;;  %v8802_v38 = vpack.c.bf16 %v14193_v36, %v14173_v42  ;;  %v8804_v19 = vpack.c.bf16 %v3939_v63, %v3864_v43 }
 0x880   : > { %21749 = vst [vmem:[#allocation47_spill] sm:$0xff] %v14195_v26  ;;  %21750 = vst [vmem:[#allocation48_spill] sm:$0xff] %v14197_v15 }
 0x881   : > { %8803 = vmatprep.subr.bf16.mxu0 %v8802_v38  ;;  %10693 = vrot.lane.b32.xlu1 %v13773_v27, %s12977_s13  ;;  %v21753_v38 = vunpack.i.h.bf16 %v13879_v61 }
 0x882   : > { %10708 = vrot.lane.b32.xlu0 %v13777_v18, %s12978_s24  ;;  %8805 = vmatpush1.bf16.msra.mxu0 %v8804_v19 }
 0x883   : > { %v14205_v30 = vpop.permute.xlu1 %10418  ;;  %v10424_v25 = vpop.permute.xlu0 %10423 }
 0x884   : > { %21751 = vst [vmem:[#allocation49_spill] sm:$0xff] %v14205_v30  ;;  %v10426_v9 = vunpack.i.h.bf16 %v10424_v25  ;;  %v10425_v52 = vunpack.i.l.bf16 %v10424_v25 }
 0x885   : > { %10703 = vrot.lane.b32.xlu1 %v13773_v27, %s12978_s24 }
 0x886   : > { %v14210_v33 = vsel %vm1271_vm5, %v10425_v52, %v10426_v9  ;;  %10718 = vrot.lane.b32.xlu0 %v13777_v18, %s12979_s12  ;;  %v2913_v63 = vsel %vm1271_vm5, %v21753_v38, %v10425_v52  ;;  %v21757_v38 = vpack.c.bf16 %v13890_v3, %v13697_v34 }
 0x887   : > { %21752 = vst [vmem:[#allocation50_spill] sm:$0xff] %v14210_v33  ;;  %v14217_v43 = vpop.permute.xlu1 %10428  ;;  %v14219_v19 = vpop.permute.xlu0 %10438  ;;  %v8870_v30 = vpack.c.bf16 %v2913_v63, %v13701_v35  ;;  %v14223_v25 = vpack.i.bf16 %v14210_v33, %v2913_v63 }
 0x888   : > { %v20940_v26 = vunpack.i.h.bf16 %v14217_v43  ;;  %v10430_v36 = vunpack.i.l.bf16 %v14217_v43  ;;  %v21765_v41 = vunpack.i.h.bf16 %v14219_v19 }
 0x889   : > { %21754 = vst [vmem:[#allocation51_spill] sm:$0xff] %v14223_v25  ;;  %8871 = vmatprep.subr.bf16.mxu1 %v8870_v30  ;;  %10713 = vrot.lane.b32.xlu1 %v13773_v27, %s12979_s12  ;;  %v10440_v30 = vunpack.i.l.bf16 %v14219_v19 }
 0x88a   : > { %v14232_v61 = vsel %vm1271_vm5, %v10426_v9, %v10430_v36  ;;  %v14237_v35 = vsel %vm1271_vm5, %v10430_v36, %v20940_v26  ;;  %10728 = vrot.lane.b32.xlu0 %v13777_v18, %s12980_s30  ;;  %8873 = vmatpush1.bf16.msra.mxu1 %v21757_v38  ;;  %v21762_v26 = vunpack.i.h.bf16 %v13896_v7 }
 0x88b   : > { %21755 = vst [vmem:[#allocation52_spill] sm:$0xff] %v14232_v61  ;;  %21756 = vst [vmem:[#allocation53_spill] sm:$0xff] %v14237_v35  ;;  %v10434_v63 = vpop.permute.xlu1 %10433  ;;  %v10444_v15 = vpop.permute.xlu0 %10443  ;;  %v14248_v9 = vpack.i.bf16 %v14237_v35, %v14232_v61  ;;  %v14283_v61 = vsel %vm2981_vm11, %v10440_v30, %v21765_v41 }
 0x88c   : > { %v10436_v52 = vunpack.i.h.bf16 %v10434_v63  ;;  %v10435_v37 = vunpack.i.l.bf16 %v10434_v63  ;;  %v10446_v33 = vunpack.i.h.bf16 %v10444_v15  ;;  %v10445_v25 = vunpack.i.l.bf16 %v10444_v15  ;;  %21766 = vst [vmem:[#allocation59_spill] sm:$0xff] %v14283_v61 }
 0x88d   : > { %21758 = vst [vmem:[#allocation54_spill] sm:$0xff] %v14248_v9  ;;  %10723 = vrot.lane.b32.xlu1 %v13773_v27, %s12980_s30 }
 0x88e   : > { %v14257_v38 = vsel %vm2981_vm11, %v10435_v37, %v10436_v52  ;;  %v14260_v34 = vsel %vm2981_vm11, %v10436_v52, %v10440_v30  ;;  %v14263_v9 = vsel %vm3053_vm13, %v10445_v25, %v10446_v33  ;;  %10738 = vrot.lane.b32.xlu0 %v13777_v18, %s12981_s25  ;;  %v2985_v63 = vsel %vm2981_vm11, %v21762_v26, %v10435_v37 }
 0x88f   : > { %21759 = vst [vmem:[#allocation55_spill] sm:$0xff] %v14257_v38  ;;  %21760 = vst [vmem:[#allocation56_spill] sm:$0xff] %v14260_v34  ;;  %v14270_v15 = vpop.permute.xlu1 %10448  ;;  %v14272_v36 = vpop.permute.xlu0 %10458  ;;  %v3057_v35 = vsel %vm3053_vm13, %v21763_v39, %v10445_v25  ;;  %v14278_v52 = vpack.i.bf16 %v14257_v38, %v2985_v63  ;;  %v14294_v39 = vpack.i.bf16 %v14283_v61, %v14260_v34 }
 0x890   : > { %21761 = vst [vmem:[#allocation57_spill] sm:$0xff] %v14263_v9  ;;  %v20950_v18 = vunpack.i.h.bf16 %v14270_v15  ;;  %v10450_v37 = vunpack.i.l.bf16 %v14270_v15  ;;  %v8874_v7 = vpack.c.bf16 %v3057_v35, %v2985_v63  ;;  %v14290_v31 = vpack.i.bf16 %v14263_v9, %v3057_v35 }
 0x891   : > { %21764 = vst [vmem:[#allocation58_spill] sm:$0xff] %v14278_v52  ;;  %10733 = vrot.lane.b32.xlu1 %v13773_v27, %s12981_s25  ;;  %21768 = vst [vmem:[#allocation61_spill] sm:$0xff] %v14294_v39  ;;  %v10460_v35 = vunpack.i.l.bf16 %v14272_v36  ;;  %v21772_v25 = vpack.c.bf16 %v13936_v16, %v13912_v29 }
 0x892   : > { %21767 = vst [vmem:[#allocation60_spill] sm:$0xff] %v14290_v31  ;;  %v14297_v26 = vsel %vm3053_vm13, %v10446_v33, %v10450_v37  ;;  %v14302_v41 = vsel %vm3053_vm13, %v10450_v37, %v20950_v18  ;;  %10743 = vrot.lane.b32.xlu0 %v13785_v48, %s12967_s26  ;;  %8875 = vmatprep.subr.bf16.mxu1 %v8874_v7 }
 0x893   : > { %21769 = vst [vmem:[#allocation62_spill] sm:$0xff] %v14297_v26  ;;  %21770 = vst [vmem:[#allocation63_spill] sm:$0xff] %v14302_v41  ;;  %v10454_v30 = vpop.permute.xlu1 %10453  ;;  %v10464_v63 = vpop.permute.xlu0 %10463  ;;  %v14312_v33 = vpack.i.bf16 %v14302_v41, %v14297_v26  ;;  %8877 = vmatpush1.bf16.msra.mxu1 %v21772_v25  ;;  %v21776_v25 = vunpack.i.h.bf16 %v13944_v17  ;;  %v21779_v41 = vunpack.i.h.bf16 %v14272_v36 }
 0x894   : > { %v10456_v27 = vunpack.i.h.bf16 %v10454_v30  ;;  %v10455_v38 = vunpack.i.l.bf16 %v10454_v30  ;;  %v10466_v9 = vunpack.i.h.bf16 %v10464_v63  ;;  %v10465_v7 = vunpack.i.l.bf16 %v10464_v63 }
 0x895   : > { %21771 = vst [vmem:[#allocation64_spill] sm:$0xff] %v14312_v33  ;;  %10748 = vrot.lane.b32.xlu1 %v13785_v48, %s12954_s7  ;;  %v21777_v48 = vunpack.i.h.bf16 %v13968_v23  ;;  %v14350_v34 = vsel %vm3125_vm12, %v10460_v35, %v21779_v41 }
 0x896   : > { %v14324_v31 = vsel %vm3125_vm12, %v10455_v38, %v10456_v27  ;;  %v14327_v33 = vsel %vm3125_vm12, %v10456_v27, %v10460_v35  ;;  %v14330_v37 = vsel %vm3197_vm15, %v10465_v7, %v10466_v9  ;;  %10758 = vrot.lane.b32.xlu0 %v13816_v51, %s12954_s7  ;;  %v3129_v30 = vsel %vm3125_vm12, %v21776_v25, %v10455_v38 }
 0x897   : > { %21773 = vst [vmem:[#allocation65_spill] sm:$0xff] %v14324_v31  ;;  %21774 = vst [vmem:[#allocation66_spill] sm:$0xff] %v14327_v33  ;;  %v14337_v63 = vpop.permute.xlu1 %10468  ;;  %v14339_v18 = vpop.permute.xlu0 %10478  ;;  %v3201_v61 = vsel %vm3197_vm15, %v21777_v48, %v10465_v7  ;;  %v14345_v27 = vpack.i.bf16 %v14324_v31, %v3129_v30  ;;  %v14361_v7 = vpack.i.bf16 %v14350_v34, %v14327_v33 }
 0x898   : > { %21775 = vst [vmem:[#allocation67_spill] sm:$0xff] %v14330_v37  ;;  %21780 = vst [vmem:[#allocation69_spill] sm:$0xff] %v14350_v34  ;;  %v20959_v17 = vunpack.i.h.bf16 %v14337_v63  ;;  %v10470_v38 = vunpack.i.l.bf16 %v14337_v63  ;;  %v8878_v25 = vpack.c.bf16 %v3201_v61, %v3129_v30  ;;  %v14357_v23 = vpack.i.bf16 %v14330_v37, %v3201_v61 }
 0x899   : > { %21778 = vst [vmem:[#allocation68_spill] sm:$0xff] %v14345_v27  ;;  %10753 = vrot.lane.b32.xlu1 %v13816_v51, %s12967_s26  ;;  %21782 = vst [vmem:[#allocation71_spill] sm:$0xff] %v14361_v7  ;;  %v10480_v61 = vunpack.i.l.bf16 %v14339_v18  ;;  %v21786_v35 = vpack.c.bf16 %v13980_v13, %v13961_v32 }
 0x89a   : > { %21781 = vst [vmem:[#allocation70_spill] sm:$0xff] %v14357_v23  ;;  %v14364_v48 = vsel %vm3197_vm15, %v10466_v9, %v10470_v38  ;;  %v14369_v41 = vsel %vm3197_vm15, %v10470_v38, %v20959_v17  ;;  %10763 = vrot.lane.b32.xlu0 %v13820_v53, %s12937_s21  ;;  %8879 = vmatprep.subr.bf16.mxu1 %v8878_v25 }
 0x89b   : > { %21783 = vst [vmem:[#allocation72_spill] sm:$0xff] %v14364_v48  ;;  %21784 = vst [vmem:[#allocation73_spill] sm:$0xff] %v14369_v41  ;;  %v10474_v30 = vpop.permute.xlu1 %10473  ;;  %v10484_v26 = vpop.permute.xlu0 %10483  ;;  %v14379_v9 = vpack.i.bf16 %v14369_v41, %v14364_v48  ;;  %8881 = vmatpush1.bf16.msra.mxu1 %v21786_v35  ;;  %v21790_v35 = vunpack.i.h.bf16 %v13988_v44 }
 0x89c   : > { %v10476_v51 = vunpack.i.h.bf16 %v10474_v30  ;;  %v10475_v31 = vunpack.i.l.bf16 %v10474_v30  ;;  %v10486_v37 = vunpack.i.h.bf16 %v10484_v26  ;;  %v10485_v25 = vunpack.i.l.bf16 %v10484_v26 }
 0x89d   : > { %21785 = vst [vmem:[#allocation74_spill] sm:$0xff] %v14379_v9  ;;  %10768 = vrot.lane.b32.xlu1 %v13824_v54, %s12937_s21  ;;  %v21791_v26 = vunpack.i.h.bf16 %v14339_v18 }
 0x89e   : > { %v14391_v23 = vsel %vm1549_vm9, %v10475_v31, %v10476_v51  ;;  %v14394_v9 = vsel %vm1549_vm9, %v10476_v51, %v10480_v61  ;;  %v14397_v38 = vsel %vm3340_vm10, %v10485_v25, %v10486_v37  ;;  %10778 = vrot.lane.b32.xlu0 %v13824_v54, %s21712_s14  ;;  %v3272_v30 = vsel %vm1549_vm9, %v21790_v35, %v10475_v31 }
 0x89f   : > { %21787 = vst [vmem:[#allocation75_spill] sm:$0xff] %v14391_v23  ;;  %21788 = vst [vmem:[#allocation76_spill] sm:$0xff] %v14394_v9  ;;  %v14407_v17 = vsel %vm1549_vm9, %v10480_v61, %v21791_v26  ;;  %v14409_v34 = vpop.permute.xlu1 %10488  ;;  %v14411_v41 = vpop.permute.xlu0 %10498  ;;  %v21793_v51 = vunpack.i.h.bf16 %v14014_v10  ;;  %v14417_v48 = vpack.i.bf16 %v14391_v23, %v3272_v30 }
 0x8a0   : > { %21789 = vst [vmem:[#allocation77_spill] sm:$0xff] %v14397_v38  ;;  %21792 = vst [vmem:[#allocation78_spill] sm:$0xff] %v14407_v17  ;;  %v20970_v44 = vunpack.i.h.bf16 %v14409_v34  ;;  %v10490_v31 = vunpack.i.l.bf16 %v14409_v34  ;;  %v10500_v61 = vunpack.i.l.bf16 %v14411_v41  ;;  %v14430_v10 = vpack.i.bf16 %v14407_v17, %v14394_v9 }
 0x8a1   : > { %v3344_v33 = vsel %vm3340_vm10, %v21793_v51, %v10485_v25  ;;  %21794 = vst [vmem:[#allocation79_spill] sm:$0xff] %v14417_v48  ;;  %10773 = vrot.lane.b32.xlu1 %v13820_v53, %s21712_s14 }
 0x8a2   : > { %v8882_v26 = vpack.c.bf16 %v3344_v33, %v3272_v30  ;;  %v14426_v27 = vpack.i.bf16 %v14397_v38, %v3344_v33  ;;  %21796 = vst [vmem:[#allocation81_spill] sm:$0xff] %v14430_v10  ;;  %v14433_v25 = vsel %vm3340_vm10, %v10486_v37, %v10490_v31  ;;  %v14438_v51 = vsel %vm3340_vm10, %v10490_v31, %v20970_v44 }
 0x8a3   : > { %21797 = vst [vmem:[#allocation82_spill] sm:$0xff] %v14433_v25  ;;  %21798 = vst [vmem:[#allocation83_spill] sm:$0xff] %v14438_v51  ;;  %10783 = vrot.lane.b32.xlu0 %v13820_v53, %s21713_s17  ;;  %v10494_v33 = vpop.permute.xlu1 %10493  ;;  %v14444_v35 = vpop.permute.xlu0 %10508  ;;  %v21800_v44 = vpack.c.bf16 %v14026_v28, %v14007_v0  ;;  %v21801_v38 = vunpack.i.h.bf16 %v14411_v41 }
 0x8a4   : > { %21795 = vst [vmem:[#allocation80_spill] sm:$0xff] %v14426_v27  ;;  %8883 = vmatprep.subr.bf16.mxu1 %v8882_v26  ;;  %v14448_v27 = vpack.i.bf16 %v14438_v51, %v14433_v25  ;;  %v10496_v48 = vunpack.i.h.bf16 %v10494_v33  ;;  %v10495_v30 = vunpack.i.l.bf16 %v10494_v33  ;;  %v20978_v26 = vunpack.i.h.bf16 %v14444_v35 }
 0x8a5   : > { %8885 = vmatpush1.bf16.msra.mxu1 %v21800_v44  ;;  %v10510_v23 = vunpack.i.l.bf16 %v14444_v35  ;;  %10788 = vrot.lane.b32.xlu1 %v13824_v54, %s21713_s17 }
 0x8a6   : > { %21799 = vst [vmem:[#allocation84_spill] sm:$0xff] %v14448_v27  ;;  %v14462_v27 = vsel %vm3415_vm14, %v10500_v61, %v21801_v38  ;;  %v14467_v31 = vsel %vm3415_vm14, %v10495_v30, %v10496_v48  ;;  %v14470_v37 = vsel %vm3415_vm14, %v10496_v48, %v10500_v61  ;;  %v21806_v38 = vunpack.i.h.bf16 %v14034_v6 }
 0x8a7   : > { %21802 = vst [vmem:[#allocation85_spill] sm:$0xff] %v14462_v27  ;;  %21803 = vst [vmem:[#allocation86_spill] sm:$0xff] %v14467_v31  ;;  %v14475_v44 = vsel %vm3490_vm6, %v10510_v23, %v20978_v26  ;;  %10798 = vrot.lane.b32.xlu0 %v13824_v54, %s21715_s15  ;;  %v10504_v17 = vpop.permute.xlu1 %10503  ;;  %v14482_v51 = vpop.permute.xlu0 %10518  ;;  %v14489_v48 = vpack.i.bf16 %v14462_v27, %v14470_v37 }
 0x8a8   : > { %21804 = vst [vmem:[#allocation87_spill] sm:$0xff] %v14470_v37  ;;  %21805 = vst [vmem:[#allocation88_spill] sm:$0xff] %v14475_v44  ;;  %v3419_v33 = vsel %vm3415_vm14, %v21806_v38, %v10495_v30  ;;  %v10506_v61 = vunpack.i.h.bf16 %v10504_v17  ;;  %v10505_v26 = vunpack.i.l.bf16 %v10504_v17  ;;  %v10520_v10 = vunpack.i.l.bf16 %v14482_v51 }
 0x8a9   : > { %v14485_v9 = vpack.i.bf16 %v14467_v31, %v3419_v33  ;;  %21808 = vst [vmem:[#allocation90_spill] sm:$0xff] %v14489_v48  ;;  %10793 = vrot.lane.b32.xlu1 %v13820_v53, %s21715_s15  ;;  %v21811_v17 = vunpack.i.h.bf16 %v14058_v21 }
 0x8aa   : > { %v14498_v30 = vsel %vm3490_vm6, %v10505_v26, %v10506_v61  ;;  %v14501_v38 = vsel %vm3490_vm6, %v10506_v61, %v10510_v23 }
 0x8ab   : > { %21807 = vst [vmem:[#allocation89_spill] sm:$0xff] %v14485_v9  ;;  %21809 = vst [vmem:[#allocation91_spill] sm:$0xff] %v14498_v30  ;;  %10803 = vrot.lane.b32.xlu0 %v13820_v53, %s12971_s22  ;;  %v3494_v25 = vsel %vm3490_vm6, %v21811_v17, %v10505_v26  ;;  %v21812_v9 = vunpack.i.h.bf16 %v14482_v51  ;;  %v10514_v7 = vpop.permute.xlu1 %10513  ;;  %v14513_v6 = vpop.permute.xlu0 %10528  ;;  %v21819_v17 = vpack.c.bf16 %v14071_v56, %v14051_v62 }
 0x8ac   : > { %21810 = vst [vmem:[#allocation92_spill] sm:$0xff] %v14501_v38  ;;  %v8886_v27 = vpack.c.bf16 %v3494_v25, %v3419_v33  ;;  %v14516_v52 = vpack.i.bf16 %v14498_v30, %v3494_v25  ;;  %v10516_v23 = vunpack.i.h.bf16 %v10514_v7  ;;  %v10515_v61 = vunpack.i.l.bf16 %v10514_v7 }
 0x8ad   : > { %v14511_v48 = vsel %vm1539_vm2, %v10520_v10, %v21812_v9  ;;  %v20988_v39 = vunpack.i.h.bf16 %v14513_v6  ;;  %v10530_v21 = vunpack.i.l.bf16 %v14513_v6  ;;  %10808 = vrot.lane.b32.xlu1 %v13824_v54, %s12971_s22  ;;  %v14524_v9 = vpack.i.bf16 %v14475_v44, %v14501_v38 }
 0x8ae   : > { %21813 = vst [vmem:[#allocation93_spill] sm:$0xff] %v14511_v48  ;;  %21814 = vst [vmem:[#allocation94_spill] sm:$0xff] %v14516_v52  ;;  %8887 = vmatprep.subr.bf16.mxu1 %v8886_v27  ;;  %v14531_v7 = vsel %vm1539_vm2, %v10515_v61, %v10516_v23  ;;  %v14534_v33 = vsel %vm1539_vm2, %v10516_v23, %v10520_v10  ;;  %v21820_v44 = vunpack.i.h.bf16 %v14078_v55 }
 0x8af   : > { %21815 = vst [vmem:[#allocation95_spill] sm:$0xff] %v14524_v9  ;;  %21816 = vst [vmem:[#allocation96_spill] sm:$0xff] %v14531_v7  ;;  %v14539_v27 = vsel %vm3639_vm1, %v10530_v21, %v20988_v39  ;;  %10818 = vrot.lane.b32.xlu0 %v13824_v54, %s12972_s20  ;;  %8889 = vmatpush1.bf16.msra.mxu1 %v21819_v17  ;;  %v10524_v26 = vpop.permute.xlu1 %10523  ;;  %v14546_v25 = vpop.permute.xlu0 %10538  ;;  %v14553_v23 = vpack.i.bf16 %v14511_v48, %v14534_v33 }
 0x8b0   : > { %21817 = vst [vmem:[#allocation97_spill] sm:$0xff] %v14534_v33  ;;  %21818 = vst [vmem:[#allocation98_spill] sm:$0xff] %v14539_v27  ;;  %v3568_v10 = vsel %vm1539_vm2, %v21820_v44, %v10515_v61  ;;  %v10526_v31 = vunpack.i.h.bf16 %v10524_v26  ;;  %v10525_v30 = vunpack.i.l.bf16 %v10524_v26  ;;  %v20998_v37 = vunpack.i.h.bf16 %v14546_v25 }
 0x8b1   : > { %21821 = vst [vmem:[#allocation99_spill] sm:$0xff] %v14553_v23  ;;  %v10540_v17 = vunpack.i.l.bf16 %v14546_v25  ;;  %10813 = vrot.lane.b32.xlu1 %v13820_v53, %s12972_s20  ;;  %v14562_v55 = vpack.i.bf16 %v14531_v7, %v3568_v10  ;;  %v21825_v26 = vunpack.i.h.bf16 %v14102_v50 }
 0x8b2   : > { %v14565_v44 = vsel %vm3639_vm1, %v10525_v30, %v10526_v31  ;;  %v14568_v61 = vsel %vm3639_vm1, %v10526_v31, %v10530_v21 }
 0x8b3   : > { %21822 = vst [vmem:[#allocation100_spill] sm:$0xff] %v14562_v55  ;;  %21823 = vst [vmem:[#allocation101_spill] sm:$0xff] %v14565_v44  ;;  %10823 = vrot.lane.b32.xlu0 %v13820_v53, %s12973_s28  ;;  %v3643_v39 = vsel %vm3639_vm1, %v21825_v26, %v10525_v30  ;;  %v14578_v48 = vsel %vm3714_vm3, %v10540_v17, %v20998_v37  ;;  %v10534_v38 = vpop.permute.xlu1 %10533  ;;  %v14580_v55 = vpop.permute.xlu0 %10548  ;;  %v14591_v30 = vpack.i.bf16 %v14539_v27, %v14568_v61 }
 0x8b4   : > { %21824 = vst [vmem:[#allocation102_spill] sm:$0xff] %v14568_v61  ;;  %21826 = vst [vmem:[#allocation103_spill] sm:$0xff] %v14578_v48  ;;  %v8890_v23 = vpack.c.bf16 %v3643_v39, %v3568_v10  ;;  %v14583_v9 = vpack.i.bf16 %v14565_v44, %v3643_v39  ;;  %v10536_v31 = vunpack.i.h.bf16 %v10534_v38  ;;  %v10535_v21 = vunpack.i.l.bf16 %v10534_v38 }
 0x8b5   : > { %v21000_v52 = vunpack.i.h.bf16 %v14580_v55  ;;  %v10550_v50 = vunpack.i.l.bf16 %v14580_v55  ;;  %10828 = vrot.lane.b32.xlu1 %v13824_v54, %s12973_s28  ;;  %21828 = vst [vmem:[#allocation105_spill] sm:$0xff] %v14591_v30  ;;  %v21832_v10 = vpack.c.bf16 %v14115_v4, %v14095_v2 }
 0x8b6   : > { %21827 = vst [vmem:[#allocation104_spill] sm:$0xff] %v14583_v9  ;;  %8891 = vmatprep.subr.bf16.mxu1 %v8890_v23  ;;  %v14598_v38 = vsel %vm3714_vm3, %v10535_v21, %v10536_v31  ;;  %v14601_v26 = vsel %vm3714_vm3, %v10536_v31, %v10540_v17  ;;  %v3718_v27 = vsel %vm3714_vm3, %v14128_v24, %v10535_v21 }
 0x8b7   : > { %21829 = vst [vmem:[#allocation106_spill] sm:$0xff] %v14598_v38  ;;  %21830 = vst [vmem:[#allocation107_spill] sm:$0xff] %v14601_v26  ;;  %v14606_v23 = vsel %vm3789_vm8, %v10550_v50, %v21000_v52  ;;  %10838 = vrot.lane.b32.xlu0 %v13824_v54, %s12974_s27  ;;  %8893 = vmatpush1.bf16.msra.mxu1 %v21832_v10  ;;  %v10544_v37 = vpop.permute.xlu1 %10543  ;;  %v14613_v39 = vpop.permute.xlu0 %10558  ;;  %v14619_v17 = vpack.i.bf16 %v14578_v48, %v14601_v26 }
 0x8b8   : > { %21831 = vst [vmem:[#allocation108_spill] sm:$0xff] %v14606_v23  ;;  %v10546_v52 = vunpack.i.h.bf16 %v10544_v37  ;;  %v10545_v7 = vunpack.i.l.bf16 %v10544_v37  ;;  %v14626_v10 = vpack.i.bf16 %v14598_v38, %v3718_v27  ;;  %v10560_v31 = vunpack.i.l.bf16 %v14613_v39 }
 0x8b9   : > { %21833 = vst [vmem:[#allocation109_spill] sm:$0xff] %v14619_v17  ;;  %10833 = vrot.lane.b32.xlu1 %v13820_v53, %s12974_s27  ;;  %v21841_v33 = vunpack.i.h.bf16 %v14613_v39 }
 0x8ba   : > { %21834 = vst [vmem:[#allocation110_spill] sm:$0xff] %v14626_v10  ;;  %v14629_v44 = vsel %vm3789_vm8, %v10545_v7, %v10546_v52  ;;  %v14632_v21 = vsel %vm3789_vm8, %v10546_v52, %v10550_v50  ;;  %v3793_v37 = vsel %vm3789_vm8, %v14145_v14, %v10545_v7  ;;  %v14652_v7 = vunpack.i.h.bf16 %v14179_v58 }
 0x8bb   : > { %21835 = vst [vmem:[#allocation111_spill] sm:$0xff] %v14629_v44  ;;  %21836 = vst [vmem:[#allocation112_spill] sm:$0xff] %v14632_v21  ;;  %10848 = vrot.lane.b32.xlu0 %v13824_v54, %s12975_s29  ;;  %v10554_v48 = vpop.permute.xlu1 %10553  ;;  %v8894_v61 = vpack.c.bf16 %v3793_v37, %v3718_v27  ;;  %v14641_v10 = vpack.i.bf16 %v14629_v44, %v3793_v37  ;;  %v14647_v52 = vpack.i.bf16 %v14606_v23, %v14632_v21 }
 0x8bc   : > { %v10556_v17 = vunpack.i.h.bf16 %v10554_v48  ;;  %v10555_v30 = vunpack.i.l.bf16 %v10554_v48  ;;  %v14643_v9 = vpop.permute.xlu0 %10568  ;;  %v21840_v50 = vpack.c.bf16 %v14158_v8, %v14141_v12  ;;  %v14676_v48 = vsel %vm1529_vm4, %v10560_v31, %v21841_v33 }
 0x8bd   : > { %21837 = vst [vmem:[#allocation113_spill] sm:$0xff] %v14647_v52  ;;  %v10570_v27 = vunpack.i.l.bf16 %v14643_v9  ;;  %8895 = vmatprep.subr.bf16.mxu1 %v8894_v61  ;;  %10843 = vrot.lane.b32.xlu1 %v13820_v53, %s12975_s29  ;;  %21842 = vst [vmem:[#allocation116_spill] sm:$0xff] %v14676_v48  ;;  %v21843_v38 = vunpack.i.h.bf16 %v14643_v9 }
 0x8be   : > { %v14661_v37 = vsel %vm1529_vm4, %v10555_v30, %v10556_v17  ;;  %v14664_v23 = vsel %vm1529_vm4, %v10556_v17, %v10560_v31  ;;  %8897 = vmatpush1.bf16.msra.mxu1 %v21840_v50  ;;  %v3867_v61 = vsel %vm1529_vm4, %v14166_v5, %v10555_v30  ;;  %v21848_v31 = vunpack.i.l.bf16 %v14179_v58 }
 0x8bf   : > { %21838 = vst [vmem:[#allocation114_spill] sm:$0xff] %v14661_v37  ;;  %21839 = vst [vmem:[#allocation115_spill] sm:$0xff] %v14664_v23  ;;  %10858 = vrot.lane.b32.xlu0 %v13824_v54, %s12976_s11  ;;  %v14681_v17 = vsel %vm3938_vm0, %v10570_v27, %v21843_v38  ;;  %v10564_v44 = vpop.permute.xlu1 %10563  ;;  %v14684_v26 = vpack.i.bf16 %v14661_v37, %v3867_v61  ;;  %v14690_v30 = vpack.i.bf16 %v14676_v48, %v14664_v23 }
 0x8c0   : > { %21844 = vst [vmem:[#allocation117_spill] sm:$0xff] %v14681_v17  ;;  %v10566_v21 = vunpack.i.h.bf16 %v10564_v44  ;;  %v10565_v52 = vunpack.i.l.bf16 %v10564_v44  ;;  %v14686_v50 = vpop.permute.xlu0 %10573  ;;  %v14698_v38 = vsel %vm3938_vm0, %v21848_v31, %v14652_v7 }
 0x8c1   : > { %21845 = vst [vmem:[#allocation118_spill] sm:$0xff] %v14684_v26  ;;  %21846 = vst [vmem:[#allocation119_spill] sm:$0xff] %v14686_v50  ;;  %10853 = vrot.lane.b32.xlu1 %v13820_v53, %s12976_s11  ;;  %v8900_v17 = vpack.c.bf16 %v14698_v38, %v14177_v20 }
 0x8c2   : > { %21847 = vst [vmem:[#allocation120_spill] sm:$0xff] %v14690_v30  ;;  %v14703_v44 = vsel %vm3938_vm0, %v10565_v52, %v10566_v21  ;;  %v14709_v50 = vsel %vm3938_vm0, %v14652_v7, %v10565_v52  ;;  %v14712_v33 = vsel %vm3938_vm0, %v10566_v21, %v10570_v27 }
 0x8c3   : > { %21849 = vst [vmem:[#allocation121_spill] sm:$0xff] %v14703_v44  ;;  %10868 = vrot.lane.b32.xlu0 %v13824_v54, %s12977_s13  ;;  %21850 = vst [vmem:[#allocation122_spill] sm:$0xff] %v14712_v33  ;;  %v14714_v58 = vpop.permute.xlu1 %10578  ;;  %v8898_v31 = vpack.c.bf16 %v14709_v50, %v3867_v61 }
 0x8c4   : > { %21851 = vst [vmem:[#allocation123_spill] sm:$0xff] %v14714_v58  ;;  %v14717_v48 = vpop.permute.xlu0 %10588 }
 0x8c5   : > { %21852 = vst [vmem:[#allocation124_spill] sm:$0xff] %v14717_v48  ;;  %8899 = vmatprep.subr.bf16.mxu1 %v8898_v31  ;;  %10863 = vrot.lane.b32.xlu1 %v13820_v53, %s12977_s13  ;;  %v21854_v31 = vunpack.i.h.bf16 %v14217_v43  ;;  %v21860_v43 = vunpack.i.h.bf16 %v14219_v19 }
 0x8c6   : > { %8901 = vmatpush1.bf16.msra.mxu1 %v8900_v17 }
 0x8c7   : > { %10878 = vrot.lane.b32.xlu0 %v13824_v54, %s12978_s24  ;;  %v14729_v52 = vpop.permute.xlu1 %10583 }
 0x8c8   : > { %21853 = vst [vmem:[#allocation125_spill] sm:$0xff] %v14729_v52  ;;  %v10594_v61 = vpop.permute.xlu0 %10593 }
 0x8c9   : > { %v10596_v48 = vunpack.i.h.bf16 %v10594_v61  ;;  %v10595_v58 = vunpack.i.l.bf16 %v10594_v61  ;;  %10873 = vrot.lane.b32.xlu1 %v13820_v53, %s12978_s24 }
 0x8cb   : > { %10888 = vrot.lane.b32.xlu0 %v13824_v54, %s12979_s12  ;;  %v14740_v17 = vsel %vm1271_vm5, %v21854_v31, %v10595_v58  ;;  %v14743_v21 = vsel %vm1271_vm5, %v10595_v58, %v10596_v48  ;;  %v14745_v26 = vpop.permute.xlu1 %10598 }
 0x8cc   : > { %21855 = vst [vmem:[#allocation126_spill] sm:$0xff] %v14740_v17  ;;  %21856 = vst [vmem:[#allocation127_spill] sm:$0xff] %v14743_v21  ;;  %v21034_v27 = vunpack.i.h.bf16 %v14745_v26  ;;  %v10600_v61 = vunpack.i.l.bf16 %v14745_v26  ;;  %v14749_v37 = vpop.permute.xlu0 %10608  ;;  %v21863_v21 = vunpack.i.h.bf16 %v14270_v15 }
 0x8cd   : > { %10883 = vrot.lane.b32.xlu1 %v13820_v53, %s12979_s12  ;;  %v10610_v40 = vunpack.i.l.bf16 %v14749_v37 }
 0x8ce   : > { %v14758_v58 = vsel %vm1271_vm5, %v10596_v48, %v10600_v61  ;;  %v14763_v23 = vsel %vm1271_vm5, %v10600_v61, %v21034_v27 }
 0x8cf   : > { %21857 = vst [vmem:[#allocation128_spill] sm:$0xff] %v14758_v58  ;;  %21858 = vst [vmem:[#allocation129_spill] sm:$0xff] %v14763_v23  ;;  %10898 = vrot.lane.b32.xlu0 %v13824_v54, %s12980_s30  ;;  %v10604_v33 = vpop.permute.xlu1 %10603 }
 0x8d0   : > { %v10606_v31 = vunpack.i.h.bf16 %v10604_v33  ;;  %v10605_v45 = vunpack.i.l.bf16 %v10604_v33  ;;  %v10614_v48 = vpop.permute.xlu0 %10613 }
 0x8d1   : > { %v10616_v17 = vunpack.i.h.bf16 %v10614_v48  ;;  %v10615_v61 = vunpack.i.l.bf16 %v10614_v48  ;;  %10893 = vrot.lane.b32.xlu1 %v13820_v53, %s12980_s30 }
 0x8d2   : > { %v14776_v27 = vsel %vm2981_vm11, %v10606_v31, %v10610_v40  ;;  %v14783_v52 = vsel %vm2981_vm11, %v21860_v43, %v10605_v45  ;;  %v14786_v33 = vsel %vm2981_vm11, %v10605_v45, %v10606_v31 }
 0x8d3   : > { %21859 = vst [vmem:[#allocation130_spill] sm:$0xff] %v14776_v27  ;;  %10908 = vrot.lane.b32.xlu0 %v13824_v54, %s12981_s25  ;;  %21861 = vst [vmem:[#allocation131_spill] sm:$0xff] %v14783_v52  ;;  %v14791_v48 = vsel %vm3053_vm13, %v21863_v21, %v10615_v61  ;;  %v14794_v1 = vsel %vm3053_vm13, %v10615_v61, %v10616_v17  ;;  %v14796_v47 = vpop.permute.xlu1 %10618  ;;  %v21866_v54 = vunpack.i.h.bf16 %v14749_v37  ;;  %v21887_v52 = vunpack.i.h.bf16 %v14409_v34 }
 0x8d4   : > { %21862 = vst [vmem:[#allocation132_spill] sm:$0xff] %v14786_v33  ;;  %21864 = vst [vmem:[#allocation133_spill] sm:$0xff] %v14791_v48  ;;  %v21042_v43 = vunpack.i.h.bf16 %v14796_v47  ;;  %v10620_v45 = vunpack.i.l.bf16 %v14796_v47  ;;  %v14805_v31 = vpop.permute.xlu0 %10628 }
 0x8d5   : > { %21865 = vst [vmem:[#allocation134_spill] sm:$0xff] %v14794_v1  ;;  %v14801_v19 = vsel %vm2981_vm11, %v10610_v40, %v21866_v54  ;;  %10903 = vrot.lane.b32.xlu1 %v13820_v53, %s12981_s25  ;;  %v10630_v58 = vunpack.i.l.bf16 %v14805_v31 }
 0x8d6   : > { %21867 = vst [vmem:[#allocation135_spill] sm:$0xff] %v14801_v19  ;;  %v14811_v15 = vpack.i.bf16 %v14801_v19, %v14776_v27  ;;  %v14814_v21 = vsel %vm3053_vm13, %v10616_v17, %v10620_v45  ;;  %v14819_v40 = vsel %vm3053_vm13, %v10620_v45, %v21042_v43  ;;  %v21872_v17 = vunpack.i.h.bf16 %v14272_v36 }
 0x8d7   : > { %21869 = vst [vmem:[#allocation137_spill] sm:$0xff] %v14814_v21  ;;  %21870 = vst [vmem:[#allocation138_spill] sm:$0xff] %v14819_v40  ;;  %10913 = vrot.lane.b32.xlu0 %v13836_v22, %s12967_s26  ;;  %v10624_v23 = vpop.permute.xlu1 %10623  ;;  %v21875_v22 = vunpack.i.h.bf16 %v14337_v63  ;;  %v21878_v27 = vunpack.i.h.bf16 %v14805_v31 }
 0x8d8   : > { %21868 = vst [vmem:[#allocation136_spill] sm:$0xff] %v14811_v15  ;;  %v10626_v15 = vunpack.i.h.bf16 %v10624_v23  ;;  %v10625_v45 = vunpack.i.l.bf16 %v10624_v23  ;;  %v10634_v43 = vpop.permute.xlu0 %10633 }
 0x8d9   : > { %v10636_v44 = vunpack.i.h.bf16 %v10634_v43  ;;  %v10635_v30 = vunpack.i.l.bf16 %v10634_v43  ;;  %10918 = vrot.lane.b32.xlu1 %v13866_v57, %s12967_s26  ;;  %v14861_v36 = vsel %vm3125_vm12, %v10630_v58, %v21878_v27 }
 0x8da   : > { %v14836_v53 = vsel %vm3125_vm12, %v10626_v15, %v10630_v58  ;;  %v14843_v61 = vsel %vm3125_vm12, %v21872_v17, %v10625_v45  ;;  %v14846_v23 = vsel %vm3125_vm12, %v10625_v45, %v10626_v15  ;;  %21879 = vst [vmem:[#allocation144_spill] sm:$0xff] %v14861_v36 }
 0x8db   : > { %21871 = vst [vmem:[#allocation139_spill] sm:$0xff] %v14836_v53  ;;  %10923 = vrot.lane.b32.xlu0 %v13870_v59, %s12937_s21  ;;  %21873 = vst [vmem:[#allocation140_spill] sm:$0xff] %v14843_v61  ;;  %v14851_v43 = vsel %vm3197_vm15, %v21875_v22, %v10635_v30  ;;  %v14854_v54 = vsel %vm3197_vm15, %v10635_v30, %v10636_v44  ;;  %v14856_v19 = vpop.permute.xlu1 %10638  ;;  %v14871_v22 = vpack.i.bf16 %v14861_v36, %v14836_v53 }
 0x8dc   : > { %21874 = vst [vmem:[#allocation141_spill] sm:$0xff] %v14846_v23  ;;  %21876 = vst [vmem:[#allocation142_spill] sm:$0xff] %v14851_v43  ;;  %v21056_v17 = vunpack.i.h.bf16 %v14856_v19  ;;  %v10640_v15 = vunpack.i.l.bf16 %v14856_v19  ;;  %v14865_v45 = vpop.permute.xlu0 %10648 }
 0x8dd   : > { %21877 = vst [vmem:[#allocation143_spill] sm:$0xff] %v14854_v54  ;;  %10928 = vrot.lane.b32.xlu1 %v13870_v59, %s21712_s14  ;;  %21880 = vst [vmem:[#allocation145_spill] sm:$0xff] %v14871_v22  ;;  %v10650_v21 = vunpack.i.l.bf16 %v14865_v45  ;;  %v21890_v53 = vunpack.i.h.bf16 %v14865_v45 }
 0x8de   : > { %v14874_v63 = vsel %vm3197_vm15, %v10636_v44, %v10640_v15  ;;  %v14879_v30 = vsel %vm3197_vm15, %v10640_v15, %v21056_v17  ;;  %v21884_v44 = vunpack.i.h.bf16 %v14339_v18 }
 0x8df   : > { %21881 = vst [vmem:[#allocation146_spill] sm:$0xff] %v14874_v63  ;;  %21882 = vst [vmem:[#allocation147_spill] sm:$0xff] %v14879_v30  ;;  %10933 = vrot.lane.b32.xlu0 %v13870_v59, %s21713_s17  ;;  %v10644_v40 = vpop.permute.xlu1 %10643  ;;  %v14921_v18 = vsel %vm1549_vm9, %v10650_v21, %v21890_v53 }
 0x8e0   : > { %v10646_v33 = vunpack.i.h.bf16 %v10644_v40  ;;  %v10645_v15 = vunpack.i.l.bf16 %v10644_v40  ;;  %v10654_v17 = vpop.permute.xlu0 %10653  ;;  %21891 = vst [vmem:[#allocation153_spill] sm:$0xff] %v14921_v18 }
 0x8e1   : > { %v10656_v22 = vunpack.i.h.bf16 %v10654_v17  ;;  %v10655_v1 = vunpack.i.l.bf16 %v10654_v17  ;;  %10938 = vrot.lane.b32.xlu1 %v13870_v59, %s21715_s15 }
 0x8e2   : > { %v14896_v58 = vsel %vm1549_vm9, %v10646_v33, %v10650_v21  ;;  %v14903_v27 = vsel %vm1549_vm9, %v21884_v44, %v10645_v15  ;;  %v14906_v40 = vsel %vm1549_vm9, %v10645_v15, %v10646_v33 }
 0x8e3   : > { %21883 = vst [vmem:[#allocation148_spill] sm:$0xff] %v14896_v58  ;;  %10943 = vrot.lane.b32.xlu0 %v13870_v59, %s12971_s22  ;;  %21885 = vst [vmem:[#allocation149_spill] sm:$0xff] %v14903_v27  ;;  %v14911_v17 = vsel %vm3340_vm10, %v21887_v52, %v10655_v1  ;;  %v14914_v57 = vsel %vm3340_vm10, %v10655_v1, %v10656_v22  ;;  %v14916_v36 = vpop.permute.xlu1 %10658  ;;  %v14931_v34 = vpack.i.bf16 %v14921_v18, %v14896_v58 }
 0x8e4   : > { %21886 = vst [vmem:[#allocation150_spill] sm:$0xff] %v14906_v40  ;;  %21888 = vst [vmem:[#allocation151_spill] sm:$0xff] %v14911_v17  ;;  %v21072_v44 = vunpack.i.h.bf16 %v14916_v36  ;;  %v10660_v33 = vunpack.i.l.bf16 %v14916_v36  ;;  %v14925_v15 = vpop.permute.xlu0 %10668 }
 0x8e5   : > { %21889 = vst [vmem:[#allocation152_spill] sm:$0xff] %v14914_v57  ;;  %10948 = vrot.lane.b32.xlu1 %v13870_v59, %s12972_s20  ;;  %21892 = vst [vmem:[#allocation154_spill] sm:$0xff] %v14931_v34  ;;  %v21086_v30 = vunpack.i.h.bf16 %v14925_v15  ;;  %v10670_v63 = vunpack.i.l.bf16 %v14925_v15 }
 0x8e6   : > { %v14934_v1 = vsel %vm3340_vm10, %v10656_v22, %v10660_v33  ;;  %v14939_v52 = vsel %vm3340_vm10, %v10660_v33, %v21072_v44 }
 0x8e7   : > { %21893 = vst [vmem:[#allocation155_spill] sm:$0xff] %v14934_v1  ;;  %21894 = vst [vmem:[#allocation156_spill] sm:$0xff] %v14939_v52  ;;  %10953 = vrot.lane.b32.xlu0 %v13870_v59, %s12973_s28  ;;  %v10664_v22 = vpop.permute.xlu1 %10663  ;;  %v14967_v23 = vsel %vm3415_vm14, %v10670_v63, %v21086_v30 }
 0x8e8   : > { %v10666_v61 = vunpack.i.h.bf16 %v10664_v22  ;;  %v14951_v33 = vpop.permute.xlu0 %10678  ;;  %21896 = vst [vmem:[#allocation158_spill] sm:$0xff] %v14967_v23  ;;  %v10665_v58 = vunpack.i.l.bf16 %v10664_v22 }
 0x8e9   : > { %v21087_v34 = vunpack.i.h.bf16 %v14951_v33  ;;  %v10680_v21 = vunpack.i.l.bf16 %v14951_v33  ;;  %10958 = vrot.lane.b32.xlu1 %v13870_v59, %s12974_s27 }
 0x8ea   : > { %v14960_v53 = vsel %vm3415_vm14, %v10666_v61, %v10670_v63  ;;  %v21899_v63 = vunpack.i.h.bf16 %v14444_v35 }
 0x8eb   : > { %21895 = vst [vmem:[#allocation157_spill] sm:$0xff] %v14960_v53  ;;  %10963 = vrot.lane.b32.xlu0 %v13877_v60, %s12974_s27  ;;  %v14972_v44 = vsel %vm3490_vm6, %v10680_v21, %v21087_v34  ;;  %v10674_v18 = vpop.permute.xlu1 %10673  ;;  %v14978_v27 = vpack.i.bf16 %v14967_v23, %v14960_v53  ;;  %v21903_v34 = vunpack.i.h.bf16 %v14411_v41 }
 0x8ec   : > { %21897 = vst [vmem:[#allocation159_spill] sm:$0xff] %v14972_v44  ;;  %v10676_v52 = vunpack.i.h.bf16 %v10674_v18  ;;  %v10675_v1 = vunpack.i.l.bf16 %v10674_v18  ;;  %v14974_v40 = vpop.permute.xlu0 %10688  ;;  %v15005_v44 = vsel %vm3415_vm14, %v10665_v58, %v10666_v61 }
 0x8ed   : > { %21898 = vst [vmem:[#allocation160_spill] sm:$0xff] %v14978_v27  ;;  %10968 = vrot.lane.b32.xlu1 %v13870_v59, %s12975_s29  ;;  %v15000_v57 = vsel %vm3415_vm14, %v21903_v34, %v10665_v58  ;;  %v21103_v23 = vunpack.i.h.bf16 %v14974_v40  ;;  %v10690_v35 = vunpack.i.l.bf16 %v14974_v40  ;;  %21905 = vst [vmem:[#allocation165_spill] sm:$0xff] %v15005_v44 }
 0x8ee   : > { %v14987_v22 = vsel %vm3490_vm6, %v21899_v63, %v10675_v1  ;;  %v14990_v30 = vsel %vm3490_vm6, %v10675_v1, %v10676_v52  ;;  %v14993_v18 = vsel %vm3490_vm6, %v10676_v52, %v10680_v21  ;;  %21904 = vst [vmem:[#allocation164_spill] sm:$0xff] %v15000_v57 }
 0x8ef   : > { %21900 = vst [vmem:[#allocation161_spill] sm:$0xff] %v14987_v22  ;;  %21901 = vst [vmem:[#allocation162_spill] sm:$0xff] %v14990_v30  ;;  %10973 = vrot.lane.b32.xlu0 %v13877_v60, %s12975_s29  ;;  %v10684_v63 = vpop.permute.xlu1 %10683  ;;  %v15027_v52 = vsel %vm1539_vm2, %v10690_v35, %v21103_v23  ;;  %v21915_v23 = vunpack.i.h.bf16 %v14482_v51 }
 0x8f0   : > { %21902 = vst [vmem:[#allocation163_spill] sm:$0xff] %v14993_v18  ;;  %v10686_v1 = vunpack.i.h.bf16 %v10684_v63  ;;  %v15007_v27 = vpop.permute.xlu0 %10698  ;;  %21907 = vst [vmem:[#allocation167_spill] sm:$0xff] %v15027_v52  ;;  %v10685_v21 = vunpack.i.l.bf16 %v10684_v63 }
 0x8f1   : > { %v10700_v41 = vunpack.i.l.bf16 %v15007_v27  ;;  %10978 = vrot.lane.b32.xlu1 %v13870_v59, %s12976_s11  ;;  %v21908_v57 = vunpack.i.h.bf16 %v15007_v27 }
 0x8f2   : > { %v15020_v58 = vsel %vm1539_vm2, %v10686_v1, %v10690_v35  ;;  %v21911_v35 = vunpack.i.h.bf16 %v14513_v6  ;;  %v15060_v30 = vsel %vm1539_vm2, %v21915_v23, %v10685_v21 }
 0x8f3   : > { %21906 = vst [vmem:[#allocation166_spill] sm:$0xff] %v15020_v58  ;;  %10983 = vrot.lane.b32.xlu0 %v13877_v60, %s12976_s11  ;;  %v15032_v22 = vsel %vm3639_vm1, %v10700_v41, %v21908_v57  ;;  %v10694_v34 = vpop.permute.xlu1 %10693  ;;  %v15038_v44 = vpack.i.bf16 %v15027_v52, %v15020_v58  ;;  %21916 = vst [vmem:[#allocation173_spill] sm:$0xff] %v15060_v30 }
 0x8f4   : > { %21909 = vst [vmem:[#allocation168_spill] sm:$0xff] %v15032_v22  ;;  %v10696_v53 = vunpack.i.h.bf16 %v10694_v34  ;;  %v10695_v61 = vunpack.i.l.bf16 %v10694_v34  ;;  %v15034_v18 = vpop.permute.xlu0 %10708  ;;  %v15065_v22 = vsel %vm1539_vm2, %v10685_v21, %v10686_v1 }
 0x8f5   : > { %21910 = vst [vmem:[#allocation169_spill] sm:$0xff] %v15038_v44  ;;  %10988 = vrot.lane.b32.xlu1 %v13870_v59, %s12977_s13  ;;  %v21119_v52 = vunpack.i.h.bf16 %v15034_v18  ;;  %v10710_v6 = vunpack.i.l.bf16 %v15034_v18  ;;  %21917 = vst [vmem:[#allocation174_spill] sm:$0xff] %v15065_v22 }
 0x8f6   : > { %v15047_v57 = vsel %vm3639_vm1, %v21911_v35, %v10695_v61  ;;  %v15050_v63 = vsel %vm3639_vm1, %v10695_v61, %v10696_v53  ;;  %v15053_v34 = vsel %vm3639_vm1, %v10696_v53, %v10700_v41 }
 0x8f7   : > { %21912 = vst [vmem:[#allocation170_spill] sm:$0xff] %v15047_v57  ;;  %21913 = vst [vmem:[#allocation171_spill] sm:$0xff] %v15050_v63  ;;  %10993 = vrot.lane.b32.xlu0 %v13877_v60, %s12977_s13  ;;  %v10704_v35 = vpop.permute.xlu1 %10703  ;;  %v15087_v53 = vsel %vm3714_vm3, %v10710_v6, %v21119_v52  ;;  %v21927_v52 = vunpack.i.h.bf16 %v14546_v25 }
 0x8f8   : > { %21914 = vst [vmem:[#allocation172_spill] sm:$0xff] %v15053_v34  ;;  %v10706_v61 = vunpack.i.h.bf16 %v10704_v35  ;;  %v15067_v44 = vpop.permute.xlu0 %10718  ;;  %21919 = vst [vmem:[#allocation176_spill] sm:$0xff] %v15087_v53  ;;  %v10705_v41 = vunpack.i.l.bf16 %v10704_v35 }
 0x8f9   : > { %v10720_v51 = vunpack.i.l.bf16 %v15067_v44  ;;  %10998 = vrot.lane.b32.xlu1 %v13870_v59, %s12978_s24  ;;  %v21920_v30 = vunpack.i.h.bf16 %v15067_v44 }
 0x8fa   : > { %v15080_v21 = vsel %vm3714_vm3, %v10706_v61, %v10710_v6  ;;  %v21923_v6 = vunpack.i.h.bf16 %v14580_v55  ;;  %v15120_v63 = vsel %vm3714_vm3, %v21927_v52, %v10705_v41  ;;  %v21936_v52 = vunpack.i.h.bf16 %v14613_v39 }
 0x8fb   : > { %21918 = vst [vmem:[#allocation175_spill] sm:$0xff] %v15080_v21  ;;  %11003 = vrot.lane.b32.xlu0 %v13877_v60, %s12978_s24  ;;  %v15092_v57 = vsel %vm3789_vm8, %v10720_v51, %v21920_v30  ;;  %v10714_v23 = vpop.permute.xlu1 %10713  ;;  %v15098_v22 = vpack.i.bf16 %v15087_v53, %v15080_v21  ;;  %21928 = vst [vmem:[#allocation182_spill] sm:$0xff] %v15120_v63 }
 0x8fc   : > { %21921 = vst [vmem:[#allocation177_spill] sm:$0xff] %v15092_v57  ;;  %v10716_v58 = vunpack.i.h.bf16 %v10714_v23  ;;  %v10715_v1 = vunpack.i.l.bf16 %v10714_v23  ;;  %v15094_v34 = vpop.permute.xlu0 %10728  ;;  %v15125_v57 = vsel %vm3714_vm3, %v10705_v41, %v10706_v61 }
 0x8fd   : > { %21922 = vst [vmem:[#allocation178_spill] sm:$0xff] %v15098_v22  ;;  %11008 = vrot.lane.b32.xlu1 %v13870_v59, %s12979_s12  ;;  %v10730_v55 = vunpack.i.l.bf16 %v15094_v34  ;;  %21929 = vst [vmem:[#allocation183_spill] sm:$0xff] %v15125_v57  ;;  %v21932_v61 = vunpack.i.h.bf16 %v15094_v34 }
 0x8fe   : > { %v15107_v30 = vsel %vm3789_vm8, %v21923_v6, %v10715_v1  ;;  %v15110_v35 = vsel %vm3789_vm8, %v10715_v1, %v10716_v58  ;;  %v15113_v23 = vsel %vm3789_vm8, %v10716_v58, %v10720_v51 }
 0x8ff   : > { %21924 = vst [vmem:[#allocation179_spill] sm:$0xff] %v15107_v30  ;;  %21925 = vst [vmem:[#allocation180_spill] sm:$0xff] %v15110_v35  ;;  %11013 = vrot.lane.b32.xlu0 %v13877_v60, %s12979_s12  ;;  %v10724_v6 = vpop.permute.xlu1 %10723  ;;  %v15145_v41 = vsel %vm1529_vm4, %v10730_v55, %v21932_v61 }
 0x900   : > { %21926 = vst [vmem:[#allocation181_spill] sm:$0xff] %v15113_v23  ;;  %v10726_v1 = vunpack.i.h.bf16 %v10724_v6  ;;  %v15127_v22 = vpop.permute.xlu0 %10738  ;;  %v10725_v51 = vunpack.i.l.bf16 %v10724_v6  ;;  %21933 = vst [vmem:[#allocation186_spill] sm:$0xff] %v15145_v41 }
 0x901   : > { %21930 = vst [vmem:[#allocation184_spill] sm:$0xff] %v15127_v22  ;;  %11018 = vrot.lane.b32.xlu1 %v13870_v59, %s12980_s30  ;;  %v21132_v63 = vunpack.i.l.bf16 %v15127_v22 }
 0x902   : > { %v15138_v53 = vsel %vm1529_vm4, %v10726_v1, %v10730_v55  ;;  %v15159_v23 = vsel %vm1529_vm4, %v21936_v52, %v10725_v51  ;;  %v21938_v55 = vunpack.i.h.bf16 %v14643_v9  ;;  %v15181_v9 = vsel %vm1529_vm4, %v10725_v51, %v10726_v1 }
 0x903   : > { %21931 = vst [vmem:[#allocation185_spill] sm:$0xff] %v15138_v53  ;;  %11023 = vrot.lane.b32.xlu0 %v13877_v60, %s12980_s30  ;;  %v10734_v58 = vpop.permute.xlu1 %10733  ;;  %v15152_v6 = vpack.i.bf16 %v15145_v41, %v15138_v53  ;;  %21937 = vst [vmem:[#allocation189_spill] sm:$0xff] %v15159_v23  ;;  %v21945_v51 = vunpack.i.h.bf16 %v14745_v26 }
 0x904   : > { %v10736_v30 = vunpack.i.h.bf16 %v10734_v58  ;;  %v10735_v25 = vunpack.i.l.bf16 %v10734_v58  ;;  %v15148_v21 = vpop.permute.xlu0 %10743  ;;  %21942 = vst [vmem:[#allocation193_spill] sm:$0xff] %v15181_v9 }
 0x905   : > { %21934 = vst [vmem:[#allocation187_spill] sm:$0xff] %v15148_v21  ;;  %21935 = vst [vmem:[#allocation188_spill] sm:$0xff] %v15152_v6  ;;  %11028 = vrot.lane.b32.xlu1 %v13870_v59, %s12981_s25 }
 0x906   : > { %v15164_v61 = vsel %vm3938_vm0, %v21938_v55, %v10735_v25  ;;  %v15167_v58 = vsel %vm3938_vm0, %v10735_v25, %v10736_v30  ;;  %v15172_v41 = vsel %vm3938_vm0, %v10736_v30, %v21132_v63 }
 0x907   : > { %21939 = vst [vmem:[#allocation190_spill] sm:$0xff] %v15167_v58  ;;  %21940 = vst [vmem:[#allocation191_spill] sm:$0xff] %v15172_v41  ;;  %11033 = vrot.lane.b32.xlu0 %v13877_v60, %s12981_s25  ;;  %v15176_v59 = vpop.permute.xlu1 %10748 }
 0x908   : > { %21941 = vst [vmem:[#allocation192_spill] sm:$0xff] %v15176_v59  ;;  %v15183_v52 = vpop.permute.xlu0 %10758 }
 0x909   : > { %21943 = vst [vmem:[#allocation194_spill] sm:$0xff] %v15183_v52  ;;  %11038 = vrot.lane.b32.xlu1 %v13877_v60, %s12937_s21 }
 0x90b   : > { %11043 = vrot.lane.b32.xlu0 %v13877_v60, %s21712_s14  ;;  %v15193_v55 = vpop.permute.xlu1 %10753  ;;  %s12982_s14 = smov 113  }
 0x90c   : > { %21944 = vst [vmem:[#allocation195_spill] sm:$0xff] %v15193_v55  ;;  %v10764_v39 = vpop.permute.xlu0 %10763 }
 0x90d   : > { %v10766_v63 = vunpack.i.h.bf16 %v10764_v39  ;;  %v10765_v1 = vunpack.i.l.bf16 %v10764_v39  ;;  %11048 = vrot.lane.b32.xlu1 %v13877_v60, %s21713_s17 }
 0x90f   : > { %11053 = vrot.lane.b32.xlu0 %v13877_v60, %s21715_s15  ;;  %v15202_v30 = vsel %vm1271_vm5, %v21945_v51, %v10765_v1  ;;  %v15205_v25 = vsel %vm1271_vm5, %v10765_v1, %v10766_v63  ;;  %v15207_v53 = vpop.permute.xlu1 %10768  ;;  %v11077_v51 = vpack.i.bf16 %v14145_v14, %v14128_v24  ;;  %s23428_s15 = smov 95  }
 0x910   : > { %21946 = vst [vmem:[#allocation196_spill] sm:$0xff] %v15202_v30  ;;  %21947 = vst [vmem:[#allocation197_spill] sm:$0xff] %v15205_v25  ;;  %v21144_v52 = vunpack.i.h.bf16 %v15207_v53  ;;  %v10770_v39 = vunpack.i.l.bf16 %v15207_v53  ;;  %v15211_v55 = vpop.permute.xlu0 %10778 }
 0x911   : > { %11058 = vrot.lane.b32.xlu1 %v13877_v60, %s12971_s22  ;;  %v21960_v24 = vunpack.i.h.bf16 %v15211_v55 }
 0x912   : > { %v15220_v1 = vsel %vm1271_vm5, %v10766_v63, %v10770_v39  ;;  %v15225_v59 = vsel %vm1271_vm5, %v10770_v39, %v21144_v52  ;;  %v10780_v63 = vunpack.i.l.bf16 %v15211_v55 }
 0x913   : > { %21948 = vst [vmem:[#allocation198_spill] sm:$0xff] %v15220_v1  ;;  %21949 = vst [vmem:[#allocation199_spill] sm:$0xff] %v15225_v59  ;;  %11063 = vrot.lane.b32.xlu0 %v13877_v60, %s12972_s20  ;;  %v10774_v41 = vpop.permute.xlu1 %10773  ;;  %v15232_v26 = vpack.i.bf16 %v15225_v59, %v15220_v1 }
 0x914   : > { %v10776_v49 = vunpack.i.h.bf16 %v10774_v41  ;;  %v10775_v46 = vunpack.i.l.bf16 %v10774_v41  ;;  %v21954_v41 = vunpack.i.h.bf16 %v14749_v37  ;;  %v15269_v14 = vsel %vm2981_vm11, %v10780_v63, %v21960_v24  ;;  %v21969_v24 = vld [vmem:[#allocation32_spill] sm:$0xff] }
 0x915   : > { %21950 = vst [vmem:[#allocation200_spill] sm:$0xff] %v15232_v26  ;;  %v10784_v25 = vpop.permute.xlu0 %10783  ;;  %11068 = vrot.lane.b32.xlu1 %v13877_v60, %s12973_s28  ;;  %v21953_v26 = vld [vmem:[#allocation33_spill] sm:$0xff]  ;;  %21961 = vst [vmem:[#allocation206_spill] sm:$0xff] %v15269_v14  ;;  %s23382_s28 = smov 119  }
 0x916   : > { %v10786_v30 = vunpack.i.h.bf16 %v10784_v25  ;;  %v10785_v58 = vunpack.i.l.bf16 %v10784_v25  ;;  %v15242_v21 = vsel %vm2981_vm11, %v10776_v49, %v10780_v63  ;;  %v15251_v11 = vsel %vm2981_vm11, %v21954_v41, %v10775_v46 }
 0x917   : > { %21952 = vst [vmem:[#allocation201_spill] sm:$0xff] %v15242_v21  ;;  %11073 = vrot.lane.b32.xlu0 %v21953_v26, %s12967_s26  ;;  %21955 = vst [vmem:[#allocation202_spill] sm:$0xff] %v15251_v11  ;;  %v15254_v52 = vsel %vm2981_vm11, %v10775_v46, %v10776_v49  ;;  %v21957_v25 = vunpack.i.h.bf16 %v14796_v47  ;;  %v15264_v59 = vpop.permute.xlu1 %10788  ;;  %v11082_v47 = vpack.i.bf16 %v14652_v7, %v14166_v5  ;;  %v21966_v7 = vld [vmem:[#allocation31_spill] sm:$0xff]  ;;  %v21987_v11 = vld [vmem:[#allocation36_spill] sm:$0xff] }
 0x918   : > { %21956 = vst [vmem:[#allocation203_spill] sm:$0xff] %v15254_v52  ;;  %v15262_v39 = vsel %vm3053_vm13, %v10785_v58, %v10786_v30  ;;  %v21152_v37 = vunpack.i.h.bf16 %v15264_v59  ;;  %v10790_v46 = vunpack.i.l.bf16 %v15264_v59  ;;  %v21967_v52 = vpack.i.bf16 %v13890_v3, %v21966_v7 }
 0x919   : > { %v15259_v60 = vsel %vm3053_vm13, %v21957_v25, %v10785_v58  ;;  %21959 = vst [vmem:[#allocation205_spill] sm:$0xff] %v15262_v39  ;;  %v15273_v49 = vpop.permute.xlu0 %10798  ;;  %11078 = vrot.lane.b32.xlu1 %v11077_v51, %s12954_s7  ;;  %v15280_v58 = vpack.i.bf16 %v15269_v14, %v15242_v21  ;;  %v21970_v21 = vpack.i.bf16 %v13912_v29, %v21969_v24  ;;  %v21974_v25 = vunpack.i.h.bf16 %v14856_v19  ;;  %v21979_v19 = vld [vmem:[#allocation34_spill] sm:$0xff] }
 0x91a   : > { %21958 = vst [vmem:[#allocation204_spill] sm:$0xff] %v15259_v60  ;;  %v15283_v41 = vsel %vm3053_vm13, %v10786_v30, %v10790_v46  ;;  %v15288_v63 = vsel %vm3053_vm13, %v10790_v46, %v21152_v37  ;;  %v10800_v46 = vunpack.i.l.bf16 %v15273_v49 }
 0x91b   : > { %21962 = vst [vmem:[#allocation207_spill] sm:$0xff] %v15280_v58  ;;  %21963 = vst [vmem:[#allocation208_spill] sm:$0xff] %v15283_v41  ;;  %11083 = vrot.lane.b32.xlu0 %v11082_v47, %s12954_s7  ;;  %v10794_v51 = vpop.permute.xlu1 %10793  ;;  %v15298_v30 = vpack.i.bf16 %v15288_v63, %v15283_v41 }
 0x91c   : > { %21964 = vst [vmem:[#allocation209_spill] sm:$0xff] %v15288_v63  ;;  %v10796_v37 = vunpack.i.h.bf16 %v10794_v51  ;;  %v10795_v47 = vunpack.i.l.bf16 %v10794_v51  ;;  %v21971_v51 = vunpack.i.h.bf16 %v14805_v31 }
 0x91d   : > { %21965 = vst [vmem:[#allocation210_spill] sm:$0xff] %v15298_v30  ;;  %v10804_v1 = vpop.permute.xlu0 %10803  ;;  %11088 = vrot.lane.b32.xlu1 %v21967_v52, %s12967_s26 }
 0x91e   : > { %v10806_v26 = vunpack.i.h.bf16 %v10804_v1  ;;  %v10805_v5 = vunpack.i.l.bf16 %v10804_v1  ;;  %v15310_v30 = vsel %vm3125_vm12, %v10796_v37, %v10800_v46  ;;  %v15319_v41 = vsel %vm3125_vm12, %v21971_v51, %v10795_v47 }
 0x91f   : > { %21968 = vst [vmem:[#allocation31_spill] sm:$0xff] %v15310_v30  ;;  %11093 = vrot.lane.b32.xlu0 %v21970_v21, %s12967_s26  ;;  %21972 = vst [vmem:[#allocation32_spill] sm:$0xff] %v15319_v41  ;;  %v15322_v1 = vsel %vm3125_vm12, %v10795_v47, %v10796_v37  ;;  %v15332_v14 = vpop.permute.xlu1 %10808  ;;  %v21977_v21 = vunpack.i.h.bf16 %v15273_v49 }
 0x920   : > { %21973 = vst [vmem:[#allocation211_spill] sm:$0xff] %v15322_v1  ;;  %v15327_v52 = vsel %vm3197_vm15, %v21974_v25, %v10805_v5  ;;  %v15330_v7 = vsel %vm3197_vm15, %v10805_v5, %v10806_v26  ;;  %v21164_v24 = vunpack.i.h.bf16 %v15332_v14  ;;  %v10810_v37 = vunpack.i.l.bf16 %v15332_v14 }
 0x921   : > { %21975 = vst [vmem:[#allocation212_spill] sm:$0xff] %v15327_v52  ;;  %21976 = vst [vmem:[#allocation213_spill] sm:$0xff] %v15330_v7  ;;  %v15337_v31 = vsel %vm3125_vm12, %v10800_v46, %v21977_v21  ;;  %v15341_v47 = vpop.permute.xlu0 %10818  ;;  %v21980_v25 = vpack.i.bf16 %v13936_v16, %v21979_v19  ;;  %v21984_v21 = vld [vmem:[#allocation35_spill] sm:$0xff]  ;;  %v21988_v1 = vpack.i.bf16 %v13980_v13, %v21987_v11  ;;  %v21995_v19 = vunpack.i.h.bf16 %v14916_v36 }
 0x922   : > { %21978 = vst [vmem:[#allocation214_spill] sm:$0xff] %v15337_v31  ;;  %v15349_v5 = vpack.i.bf16 %v15337_v31, %v15310_v30  ;;  %v15352_v51 = vsel %vm3197_vm15, %v10806_v26, %v10810_v37  ;;  %v15357_v46 = vsel %vm3197_vm15, %v10810_v37, %v21164_v24  ;;  %v21985_v63 = vpack.i.bf16 %v13961_v32, %v21984_v21  ;;  %v21990_v37 = vld [vmem:[#allocation38_spill] sm:$0xff]  ;;  %v22000_v36 = vld [vmem:[#allocation39_spill] sm:$0xff] }
 0x923   : > { %11098 = vrot.lane.b32.xlu1 %v21980_v25, %s12967_s26  ;;  %21982 = vst [vmem:[#allocation215_spill] sm:$0xff] %v15352_v51  ;;  %21983 = vst [vmem:[#allocation216_spill] sm:$0xff] %v15357_v46  ;;  %v10814_v26 = vpop.permute.xlu1 %10813  ;;  %v10820_v24 = vunpack.i.l.bf16 %v15341_v47  ;;  %v21991_v30 = vpack.i.bf16 %v14007_v0, %v21990_v37 }
 0x924   : > { %21981 = vst [vmem:[#allocation34_spill] sm:$0xff] %v15349_v5  ;;  %11103 = vrot.lane.b32.xlu0 %v21985_v63, %s12967_s26  ;;  %v15370_v5 = vpack.i.bf16 %v15357_v46, %v15352_v51  ;;  %v10816_v21 = vunpack.i.h.bf16 %v10814_v26  ;;  %v10815_v63 = vunpack.i.l.bf16 %v10814_v26  ;;  %v21992_v26 = vunpack.i.h.bf16 %v14865_v45 }
 0x925   : > { %v10824_v39 = vpop.permute.xlu0 %10823 }
 0x926   : > { %21986 = vst [vmem:[#allocation35_spill] sm:$0xff] %v15370_v5  ;;  %v10826_v41 = vunpack.i.h.bf16 %v10824_v39  ;;  %v10825_v25 = vunpack.i.l.bf16 %v10824_v39  ;;  %v15382_v5 = vsel %vm1549_vm9, %v10816_v21, %v10820_v24  ;;  %v15391_v51 = vsel %vm1549_vm9, %v21992_v26, %v10815_v63 }
 0x927   : > { %11108 = vrot.lane.b32.xlu1 %v21988_v1, %s12967_s26  ;;  %21989 = vst [vmem:[#allocation36_spill] sm:$0xff] %v15382_v5  ;;  %21993 = vst [vmem:[#allocation38_spill] sm:$0xff] %v15391_v51  ;;  %v15394_v39 = vsel %vm1549_vm9, %v10815_v63, %v10816_v21  ;;  %v15404_v31 = vpop.permute.xlu1 %10828 }
 0x928   : > { %11113 = vrot.lane.b32.xlu0 %v21991_v30, %s12967_s26  ;;  %21994 = vst [vmem:[#allocation217_spill] sm:$0xff] %v15394_v39  ;;  %v15399_v11 = vsel %vm3340_vm10, %v21995_v19, %v10825_v25  ;;  %v15402_v1 = vsel %vm3340_vm10, %v10825_v25, %v10826_v41  ;;  %v21998_v30 = vunpack.i.h.bf16 %v15341_v47  ;;  %v21179_v37 = vunpack.i.h.bf16 %v15404_v31  ;;  %v22008_v39 = vld [vmem:[#allocation41_spill] sm:$0xff] }
 0x929   : > { %21996 = vst [vmem:[#allocation218_spill] sm:$0xff] %v15399_v11  ;;  %21997 = vst [vmem:[#allocation219_spill] sm:$0xff] %v15402_v1  ;;  %v10830_v21 = vunpack.i.l.bf16 %v15404_v31  ;;  %v15413_v63 = vpop.permute.xlu0 %10838  ;;  %v22001_v19 = vpack.i.bf16 %v14026_v28, %v22000_v36  ;;  %v22009_v51 = vpack.i.bf16 %v14071_v56, %v22008_v39 }
 0x92a   : > { %v15409_v45 = vsel %vm1549_vm9, %v10820_v24, %v21998_v30  ;;  %v22005_v30 = vld [vmem:[#allocation40_spill] sm:$0xff] }
 0x92b   : > { %21999 = vst [vmem:[#allocation220_spill] sm:$0xff] %v15409_v45  ;;  %11118 = vrot.lane.b32.xlu1 %v22001_v19, %s12967_s26  ;;  %v15421_v25 = vpack.i.bf16 %v15409_v45, %v15382_v5  ;;  %v15424_v26 = vsel %vm3340_vm10, %v10826_v41, %v10830_v21  ;;  %v15429_v24 = vsel %vm3340_vm10, %v10830_v21, %v21179_v37  ;;  %v10840_v41 = vunpack.i.l.bf16 %v15413_v63  ;;  %v10834_v7 = vpop.permute.xlu1 %10833  ;;  %v22011_v37 = vld [vmem:[#allocation42_spill] sm:$0xff] }
 0x92c   : > { %22003 = vst [vmem:[#allocation221_spill] sm:$0xff] %v15424_v26  ;;  %22004 = vst [vmem:[#allocation222_spill] sm:$0xff] %v15429_v24  ;;  %v22006_v46 = vpack.i.bf16 %v14051_v62, %v22005_v30  ;;  %v15443_v21 = vpack.i.bf16 %v15429_v24, %v15424_v26  ;;  %v10836_v30 = vunpack.i.h.bf16 %v10834_v7  ;;  %v22012_v5 = vpack.i.bf16 %v14095_v2, %v22011_v37 }
 0x92d   : > { %22002 = vst [vmem:[#allocation39_spill] sm:$0xff] %v15421_v25  ;;  %v22013_v26 = vunpack.i.h.bf16 %v15413_v63  ;;  %v10835_v19 = vunpack.i.l.bf16 %v10834_v7  ;;  %v22018_v7 = vld [vmem:[#allocation43_spill] sm:$0xff] }
 0x92e   : > { %11123 = vrot.lane.b32.xlu0 %v22006_v46, %s12967_s26  ;;  %22007 = vst [vmem:[#allocation40_spill] sm:$0xff] %v15443_v21  ;;  %v15447_v46 = vpop.permute.xlu0 %10848  ;;  %v15458_v21 = vsel %vm3415_vm14, %v10836_v30, %v10840_v41 }
 0x92f   : > { %v10850_v25 = vunpack.i.l.bf16 %v15447_v46  ;;  %11128 = vrot.lane.b32.xlu1 %v22009_v51, %s12967_s26  ;;  %22010 = vst [vmem:[#allocation41_spill] sm:$0xff] %v15458_v21  ;;  %v15467_v36 = vsel %vm3415_vm14, %v10840_v41, %v22013_v26  ;;  %v22015_v45 = vunpack.i.h.bf16 %v15447_v46  ;;  %v10844_v51 = vpop.permute.xlu1 %10843  ;;  %v22019_v26 = vpack.i.bf16 %v14115_v4, %v22018_v7 }
 0x930   : > { %22014 = vst [vmem:[#allocation42_spill] sm:$0xff] %v15467_v36  ;;  %v10846_v39 = vunpack.i.h.bf16 %v10844_v51  ;;  %v10845_v1 = vunpack.i.l.bf16 %v10844_v51  ;;  %v15478_v37 = vpack.i.bf16 %v15467_v36, %v15458_v21  ;;  %v22026_v36 = vunpack.i.h.bf16 %v14925_v15 }
 0x931   : > { %v15472_v24 = vsel %vm3490_vm6, %v10850_v25, %v22015_v45  ;;  %v22020_v45 = vunpack.i.h.bf16 %v14951_v33  ;;  %v22033_v15 = vpack.i.bf16 %v14177_v20, %v14173_v42  ;;  %v22045_v20 = vpack.i.bf16 %v13936_v16, %v13912_v29 }
 0x932   : > { %11133 = vrot.lane.b32.xlu0 %v22012_v5, %s12967_s26  ;;  %22016 = vst [vmem:[#allocation223_spill] sm:$0xff] %v15472_v24  ;;  %v15474_v11 = vpop.permute.xlu0 %10858  ;;  %22017 = vst [vmem:[#allocation224_spill] sm:$0xff] %v15478_v37  ;;  %v15492_v51 = vsel %vm3490_vm6, %v10845_v1, %v10846_v39  ;;  %v15495_v52 = vsel %vm3490_vm6, %v10846_v39, %v10850_v25  ;;  %v22024_v37 = vld [vmem:[#allocation44_spill] sm:$0xff]  ;;  %v15504_v7 = vsel %vm3415_vm14, %v22026_v36, %v10835_v19 }
 0x933   : > { %11138 = vrot.lane.b32.xlu1 %v22019_v26, %s12967_s26  ;;  %v15489_v41 = vsel %vm3490_vm6, %v22020_v45, %v10845_v1  ;;  %22022 = vst [vmem:[#allocation225_spill] sm:$0xff] %v15492_v51  ;;  %22023 = vst [vmem:[#allocation226_spill] sm:$0xff] %v15495_v52  ;;  %v22025_v5 = vpack.i.bf16 %v14141_v12, %v22024_v37  ;;  %v10860_v26 = vunpack.i.l.bf16 %v15474_v11  ;;  %v10854_v45 = vpop.permute.xlu1 %10853  ;;  %v22034_v36 = vunpack.i.h.bf16 %v15474_v11 }
 0x934   : > { %22021 = vst [vmem:[#allocation43_spill] sm:$0xff] %v15489_v41  ;;  %22027 = vst [vmem:[#allocation44_spill] sm:$0xff] %v15504_v7  ;;  %v15509_v1 = vsel %vm3415_vm14, %v10835_v19, %v10836_v30  ;;  %v10856_v25 = vunpack.i.h.bf16 %v10854_v45  ;;  %v15515_v12 = vpack.i.bf16 %v15472_v24, %v15495_v52  ;;  %v22052_v16 = vpack.i.bf16 %v14026_v28, %v14007_v0 }
 0x935   : > { %22028 = vst [vmem:[#allocation227_spill] sm:$0xff] %v15509_v1  ;;  %v22062_v28 = vpack.i.bf16 %v14115_v4, %v14095_v2 }
 0x936   : > { %11143 = vrot.lane.b32.xlu0 %v22025_v5, %s12967_s26  ;;  %v15511_v39 = vpop.permute.xlu0 %10868  ;;  %22029 = vst [vmem:[#allocation228_spill] sm:$0xff] %v15515_v12  ;;  %v22030_v5 = vld [vmem:[#allocation45_spill] sm:$0xff]  ;;  %v15530_v24 = vsel %vm1539_vm2, %v10856_v25, %v10860_v26  ;;  %v15539_v12 = vsel %vm1539_vm2, %v10860_v26, %v22034_v36 }
 0x937   : > { %v10870_v37 = vunpack.i.l.bf16 %v15511_v39  ;;  %v22031_v33 = vpack.i.bf16 %v14158_v8, %v22030_v5  ;;  %22032 = vst [vmem:[#allocation45_spill] sm:$0xff] %v15530_v24  ;;  %22035 = vst [vmem:[#allocation229_spill] sm:$0xff] %v15539_v12  ;;  %v10855_v8 = vunpack.i.l.bf16 %v10854_v45  ;;  %v10864_v30 = vpop.permute.xlu1 %10863  ;;  %v15550_v42 = vpack.i.bf16 %v15539_v12, %v15530_v24  ;;  %v22039_v26 = vld [vmem:[#allocation13_spill] sm:$0xff] }
 0x938   : > { %v10866_v19 = vunpack.i.h.bf16 %v10864_v30  ;;  %v10865_v21 = vunpack.i.l.bf16 %v10864_v30  ;;  %v22040_v45 = vpack.i.bf16 %v13890_v3, %v22039_v26  ;;  %v22046_v12 = vunpack.i.h.bf16 %v14974_v40 }
 0x939   : > { %11148 = vrot.lane.b32.xlu1 %v22031_v33, %s12967_s26  ;;  %v22036_v33 = vunpack.i.h.bf16 %v15511_v39  ;;  %22038 = vst [vmem:[#allocation231_spill] sm:$0xff] %v15550_v42 }
 0x93a   : > { %11153 = vrot.lane.b32.xlu0 %v22033_v15, %s12967_s26  ;;  %v15546_v52 = vpop.permute.xlu0 %10878  ;;  %v22041_v15 = vunpack.i.h.bf16 %v15007_v27  ;;  %v15564_v30 = vsel %vm3639_vm1, %v10865_v21, %v10866_v19  ;;  %v15576_v3 = vsel %vm1539_vm2, %v22046_v12, %v10855_v8 }
 0x93b   : > { %v15544_v5 = vsel %vm3639_vm1, %v10870_v37, %v22036_v33  ;;  %22043 = vst [vmem:[#allocation232_spill] sm:$0xff] %v15564_v30  ;;  %v15567_v33 = vsel %vm3639_vm1, %v10866_v19, %v10870_v37  ;;  %22047 = vst [vmem:[#allocation234_spill] sm:$0xff] %v15576_v3  ;;  %v21204_v27 = vunpack.i.h.bf16 %v15546_v52  ;;  %v10880_v26 = vunpack.i.l.bf16 %v15546_v52 }
 0x93c   : > { %22037 = vst [vmem:[#allocation230_spill] sm:$0xff] %v15544_v5  ;;  %v15561_v36 = vsel %vm3639_vm1, %v22041_v15, %v10865_v21  ;;  %22044 = vst [vmem:[#allocation233_spill] sm:$0xff] %v15567_v33  ;;  %v15581_v21 = vsel %vm1539_vm2, %v10855_v8, %v10856_v25  ;;  %v15587_v29 = vpack.i.bf16 %v15544_v5, %v15567_v33 }
 0x93d   : > { %11158 = vrot.lane.b32.xlu1 %v22040_v45, %s12954_s7  ;;  %22042 = vst [vmem:[#allocation13_spill] sm:$0xff] %v15561_v36  ;;  %v10874_v45 = vpop.permute.xlu1 %10873  ;;  %22048 = vst [vmem:[#allocation235_spill] sm:$0xff] %v15581_v21  ;;  %v15611_v40 = vsel %vm3714_vm3, %v10880_v26, %v21204_v27  ;;  %v22063_v27 = vunpack.i.h.bf16 %v15034_v18 }
 0x93e   : > { %11163 = vrot.lane.b32.xlu0 %v22045_v20, %s12954_s7  ;;  %v10876_v37 = vunpack.i.h.bf16 %v10874_v45  ;;  %v15583_v19 = vpop.permute.xlu0 %10888  ;;  %22049 = vst [vmem:[#allocation236_spill] sm:$0xff] %v15587_v29  ;;  %v22050_v20 = vpack.i.bf16 %v13980_v13, %v13961_v32  ;;  %22053 = vst [vmem:[#allocation238_spill] sm:$0xff] %v15611_v40  ;;  %v10875_v32 = vunpack.i.l.bf16 %v10874_v45  ;;  %v22058_v45 = vunpack.i.h.bf16 %v15067_v44 }
 0x93f   : > { %v10890_v12 = vunpack.i.l.bf16 %v15583_v19  ;;  %v22054_v13 = vunpack.i.h.bf16 %v15583_v19 }
 0x940   : > { %v15602_v15 = vsel %vm3714_vm3, %v10876_v37, %v10880_v26  ;;  %v22057_v26 = vpack.i.bf16 %v14071_v56, %v14051_v62  ;;  %v15648_v56 = vsel %vm3714_vm3, %v22063_v27, %v10875_v32  ;;  %v15651_v62 = vsel %vm3714_vm3, %v10875_v32, %v10876_v37  ;;  %v22067_v37 = vld [vmem:[#allocation37_spill] sm:$0xff] }
 0x941   : > { %11168 = vrot.lane.b32.xlu1 %v22050_v20, %s12954_s7  ;;  %22051 = vst [vmem:[#allocation237_spill] sm:$0xff] %v15602_v15  ;;  %v15616_v20 = vsel %vm3789_vm8, %v10890_v12, %v22054_v13  ;;  %v10884_v8 = vpop.permute.xlu1 %10883  ;;  %v15622_v0 = vpack.i.bf16 %v15611_v40, %v15602_v15  ;;  %22064 = vst [vmem:[#allocation244_spill] sm:$0xff] %v15648_v56 }
 0x942   : > { %11173 = vrot.lane.b32.xlu0 %v22052_v16, %s12954_s7  ;;  %22055 = vst [vmem:[#allocation239_spill] sm:$0xff] %v15616_v20  ;;  %v10886_v25 = vunpack.i.h.bf16 %v10884_v8  ;;  %v10885_v5 = vunpack.i.l.bf16 %v10884_v8  ;;  %v15618_v24 = vpop.permute.xlu0 %10898  ;;  %22065 = vst [vmem:[#allocation245_spill] sm:$0xff] %v15651_v62 }
 0x943   : > { %22056 = vst [vmem:[#allocation240_spill] sm:$0xff] %v15622_v0  ;;  %v22072_v32 = vunpack.i.h.bf16 %v15618_v24 }
 0x944   : > { %v15633_v16 = vsel %vm3789_vm8, %v22058_v45, %v10885_v5  ;;  %v15636_v8 = vsel %vm3789_vm8, %v10885_v5, %v10886_v25  ;;  %v15639_v13 = vsel %vm3789_vm8, %v10886_v25, %v10890_v12  ;;  %v10900_v5 = vunpack.i.l.bf16 %v15618_v24 }
 0x945   : > { %11178 = vrot.lane.b32.xlu1 %v22057_v26, %s12954_s7  ;;  %22059 = vst [vmem:[#allocation241_spill] sm:$0xff] %v15633_v16  ;;  %22060 = vst [vmem:[#allocation242_spill] sm:$0xff] %v15636_v8  ;;  %v10894_v26 = vpop.permute.xlu1 %10893  ;;  %v15659_v4 = vpack.i.bf16 %v15616_v20, %v15639_v13 }
 0x946   : > { %22061 = vst [vmem:[#allocation243_spill] sm:$0xff] %v15639_v13  ;;  %11183 = vrot.lane.b32.xlu0 %v22062_v28, %s12954_s7  ;;  %v10896_v12 = vunpack.i.h.bf16 %v10894_v26  ;;  %v10895_v25 = vunpack.i.l.bf16 %v10894_v26  ;;  %v15655_v45 = vpop.permute.xlu0 %10908  ;;  %v22068_v26 = vunpack.i.h.bf16 %v15094_v34  ;;  %v15688_v28 = vsel %vm1529_vm4, %v10900_v5, %v22072_v32 }
 0x947   : > { %22066 = vst [vmem:[#allocation246_spill] sm:$0xff] %v15659_v4  ;;  %v10910_v27 = vunpack.i.l.bf16 %v15655_v45  ;;  %22073 = vst [vmem:[#allocation249_spill] sm:$0xff] %v15688_v28  ;;  %v22074_v34 = vunpack.i.h.bf16 %v15655_v45  ;;  %v22077_v32 = vunpack.i.h.bf16 %v15127_v22 }
 0x948   : > { %v15674_v44 = vsel %vm1529_vm4, %v22068_v26, %v10895_v25  ;;  %v15677_v2 = vsel %vm1529_vm4, %v10895_v25, %v10896_v12  ;;  %v15680_v18 = vsel %vm1529_vm4, %v10896_v12, %v10900_v5 }
 0x949   : > { %4046 = vrot.lane.b32.xlu1 %v22067_v37, %s12975_s29  ;;  %22069 = vst [vmem:[#allocation37_spill] sm:$0xff] %v15674_v44  ;;  %22070 = vst [vmem:[#allocation247_spill] sm:$0xff] %v15677_v2  ;;  %v15693_v26 = vsel %vm3938_vm0, %v10910_v27, %v22074_v34  ;;  %v10904_v25 = vpop.permute.xlu1 %10903  ;;  %s23364_s29 = sld [smem:[#allocation344_spill]] }
 0x94a   : > { %22071 = vst [vmem:[#allocation248_spill] sm:$0xff] %v15680_v18  ;;  %4043 = vrot.lane.b32.xlu0 %v22067_v37, %s12974_s27  ;;  %22075 = vst [vmem:[#allocation250_spill] sm:$0xff] %v15693_v26  ;;  %v10906_v20 = vunpack.i.h.bf16 %v10904_v25  ;;  %v10905_v15 = vunpack.i.l.bf16 %v10904_v25  ;;  %v15697_v13 = vpop.permute.xlu0 %10913  ;;  %v22091_v18 = vunpack.i.h.bf16 %v15211_v55  ;;  %s23401_s27 = smov 110  }
 0x94b   : > { %22076 = vst [vmem:[#allocation251_spill] sm:$0xff] %v15697_v13  ;;  %v22083_v13 = vunpack.i.h.bf16 %v15207_v53 }
 0x94c   : > { %v15708_v34 = vsel %vm3938_vm0, %v22077_v32, %v10905_v15  ;;  %v15711_v12 = vsel %vm3938_vm0, %v10905_v15, %v10906_v20  ;;  %v15714_v25 = vsel %vm3938_vm0, %v10906_v20, %v10910_v27 }
 0x94d   : > { %4052 = vrot.lane.b32.xlu1 %v22067_v37, %s12977_s13  ;;  %22078 = vst [vmem:[#allocation252_spill] sm:$0xff] %v15708_v34  ;;  %22079 = vst [vmem:[#allocation253_spill] sm:$0xff] %v15711_v12  ;;  %v15718_v40 = vpop.permute.xlu1 %10918  ;;  %s12988_s13 = smov 83  }
 0x94e   : > { %22080 = vst [vmem:[#allocation254_spill] sm:$0xff] %v15714_v25  ;;  %4049 = vrot.lane.b32.xlu0 %v22067_v37, %s12976_s11  ;;  %22081 = vst [vmem:[#allocation255_spill] sm:$0xff] %v15718_v40  ;;  %v10924_v33 = vpop.permute.xlu0 %10923 }
 0x94f   : > { %v15726_v15 = vunpack.i.h.bf16 %v10924_v33  ;;  %v10925_v4 = vunpack.i.l.bf16 %v10924_v33 }
 0x951   : > { %22082 = vst [vmem:[#allocation256_spill] sm:$0xff] %v15726_v15  ;;  %4058 = vrot.lane.b32.xlu1 %v22067_v37, %s12979_s12  ;;  %v15739_v5 = vsel %vm1271_vm5, %v22083_v13, %v10925_v4  ;;  %v15743_v33 = vsel %vm1271_vm5, %v10925_v4, %v15726_v15  ;;  %v10929_v32 = vpop.permute.xlu1 %10928  ;;  %s12987_s12 = smov 86  }
 0x952   : > { %4055 = vrot.lane.b32.xlu0 %v22067_v37, %s12978_s24  ;;  %22084 = vst [vmem:[#allocation257_spill] sm:$0xff] %v15739_v5  ;;  %22085 = vst [vmem:[#allocation258_spill] sm:$0xff] %v15743_v33  ;;  %v15747_v20 = vunpack.i.h.bf16 %v10929_v32  ;;  %v10930_v28 = vunpack.i.l.bf16 %v10929_v32  ;;  %v10934_v29 = vpop.permute.xlu0 %10933  ;;  %v22094_v32 = vunpack.i.h.bf16 %v15264_v59 }
 0x953   : > { %v15749_v25 = vunpack.i.h.bf16 %v10934_v29  ;;  %v10935_v27 = vunpack.i.l.bf16 %v10934_v29 }
 0x954   : > { %22087 = vst [vmem:[#allocation259_spill] sm:$0xff] %v15747_v20  ;;  %v15760_v26 = vsel %vm2981_vm11, %v22091_v18, %v10930_v28  ;;  %v15766_v29 = vsel %vm2981_vm11, %v10930_v28, %v15747_v20  ;;  %v11187_v18 = vpack.i.bf16 %v14709_v50, %v14698_v38  ;;  %v22101_v38 = vld [vmem:[#allocation51_spill] sm:$0xff] }
 0x955   : > { %22088 = vst [vmem:[#allocation260_spill] sm:$0xff] %v15749_v25  ;;  %4064 = vrot.lane.b32.xlu1 %v22067_v37, %s12981_s25  ;;  %22092 = vst [vmem:[#allocation261_spill] sm:$0xff] %v15760_v26  ;;  %v15771_v40 = vsel %vm3053_vm13, %v22094_v32, %v10935_v27  ;;  %v15775_v4 = vsel %vm3053_vm13, %v10935_v27, %v15749_v25  ;;  %v10939_v55 = vpop.permute.xlu1 %10938  ;;  %v22099_v32 = vunpack.i.h.bf16 %v15273_v49 }
 0x956   : > { %4061 = vrot.lane.b32.xlu0 %v22067_v37, %s12980_s30  ;;  %22093 = vst [vmem:[#allocation262_spill] sm:$0xff] %v15766_v29  ;;  %22095 = vst [vmem:[#allocation263_spill] sm:$0xff] %v15771_v40  ;;  %v15779_v13 = vunpack.i.h.bf16 %v10939_v55  ;;  %v10940_v37 = vunpack.i.l.bf16 %v10939_v55  ;;  %v10944_v12 = vpop.permute.xlu0 %10943  ;;  %s23379_s30 = smov 122  }
 0x957   : > { %22096 = vst [vmem:[#allocation264_spill] sm:$0xff] %v15775_v4  ;;  %v15781_v53 = vunpack.i.h.bf16 %v10944_v12  ;;  %v10945_v28 = vunpack.i.l.bf16 %v10944_v12 }
 0x958   : > { %22097 = vst [vmem:[#allocation265_spill] sm:$0xff] %v15779_v13  ;;  %v15791_v33 = vsel %vm3125_vm12, %v22099_v32, %v10940_v37  ;;  %v15799_v12 = vsel %vm3125_vm12, %v10940_v37, %v15779_v13  ;;  %v22108_v37 = vld [vmem:[#allocation54_spill] sm:$0xff] }
 0x959   : > { %22098 = vst [vmem:[#allocation266_spill] sm:$0xff] %v15781_v53  ;;  %11188 = vrot.lane.b32.xlu1 %v11187_v18, %s12967_s26  ;;  %22100 = vst [vmem:[#allocation267_spill] sm:$0xff] %v15791_v33  ;;  %v22103_v18 = vunpack.i.h.bf16 %v15332_v14  ;;  %v15808_v49 = vsel %vm3197_vm15, %v10945_v28, %v15781_v53  ;;  %v10949_v32 = vpop.permute.xlu1 %10948  ;;  %v22113_v14 = vunpack.i.h.bf16 %v15404_v31 }
 0x95a   : > { %11193 = vrot.lane.b32.xlu0 %v22101_v38, %s12967_s26  ;;  %22102 = vst [vmem:[#allocation51_spill] sm:$0xff] %v15799_v12  ;;  %22105 = vst [vmem:[#allocation269_spill] sm:$0xff] %v15808_v49  ;;  %v15810_v27 = vunpack.i.h.bf16 %v10949_v32  ;;  %v10950_v26 = vunpack.i.l.bf16 %v10949_v32  ;;  %v10954_v40 = vpop.permute.xlu0 %10953  ;;  %v22111_v32 = vld [vmem:[#allocation61_spill] sm:$0xff] }
 0x95b   : > { %v15804_v59 = vsel %vm3197_vm15, %v22103_v18, %v10945_v28  ;;  %v15812_v5 = vunpack.i.h.bf16 %v10954_v40  ;;  %v10955_v55 = vunpack.i.l.bf16 %v10954_v40  ;;  %v22109_v28 = vunpack.i.h.bf16 %v15341_v47 }
 0x95c   : > { %22104 = vst [vmem:[#allocation268_spill] sm:$0xff] %v15804_v59  ;;  %22106 = vst [vmem:[#allocation270_spill] sm:$0xff] %v15810_v27  ;;  %v15831_v4 = vsel %vm1549_vm9, %v10950_v26, %v15810_v27 }
 0x95d   : > { %22107 = vst [vmem:[#allocation271_spill] sm:$0xff] %v15812_v5  ;;  %11198 = vrot.lane.b32.xlu1 %v22108_v37, %s12967_s26  ;;  %v15823_v29 = vsel %vm1549_vm9, %v22109_v28, %v10950_v26  ;;  %22112 = vst [vmem:[#allocation61_spill] sm:$0xff] %v15831_v4  ;;  %v15836_v33 = vsel %vm3340_vm10, %v22113_v14, %v10955_v55  ;;  %v15840_v47 = vsel %vm3340_vm10, %v10955_v55, %v15812_v5  ;;  %v10959_v28 = vpop.permute.xlu1 %10958  ;;  %v22117_v26 = vld [vmem:[#allocation58_spill] sm:$0xff]  ;;  %v22118_v55 = vld [vmem:[#allocation60_spill] sm:$0xff] }
 0x95e   : > { %22110 = vst [vmem:[#allocation54_spill] sm:$0xff] %v15823_v29  ;;  %11208 = vrot.lane.b32.xlu0 %v22111_v32, %s12967_s26  ;;  %22114 = vst [vmem:[#allocation272_spill] sm:$0xff] %v15836_v33  ;;  %v10961_v18 = vunpack.i.h.bf16 %v10959_v28  ;;  %v15842_v59 = vpop.permute.xlu0 %10963  ;;  %v10960_v21 = vunpack.i.l.bf16 %v10959_v28  ;;  %v22122_v4 = vld [vmem:[#allocation64_spill] sm:$0xff]  ;;  %v22125_v28 = vld [vmem:[#allocation71_spill] sm:$0xff] }
 0x95f   : > { %22115 = vst [vmem:[#allocation273_spill] sm:$0xff] %v15840_v47  ;;  %22116 = vst [vmem:[#allocation274_spill] sm:$0xff] %v15842_v59  ;;  %v21261_v2 = vunpack.i.h.bf16 %v15842_v59  ;;  %v10965_v40 = vunpack.i.l.bf16 %v15842_v59  ;;  %v22123_v59 = vunpack.i.h.bf16 %v15447_v46  ;;  %v22128_v47 = vunpack.i.h.bf16 %v15413_v63 }
 0x961   : > { %11203 = vrot.lane.b32.xlu1 %v22117_v26, %s12967_s26  ;;  %v15857_v49 = vsel %vm3415_vm14, %v10961_v18, %v10965_v40  ;;  %v3999_v62 = vsel %vm3415_vm14, %v10965_v40, %v21261_v2  ;;  %v10969_v56 = vpop.permute.xlu1 %10968  ;;  %v15890_v46 = vsel %vm3415_vm14, %v22128_v47, %v10960_v21 }
 0x962   : > { %11213 = vrot.lane.b32.xlu0 %v22118_v55, %s12967_s26  ;;  %22119 = vst [vmem:[#allocation58_spill] sm:$0xff] %v15857_v49  ;;  %v10971_v3 = vunpack.i.h.bf16 %v10969_v56  ;;  %v10970_v31 = vunpack.i.l.bf16 %v10969_v56  ;;  %v15862_v29 = vpop.permute.xlu0 %10973  ;;  %v15865_v14 = vpack.i.bf16 %v3999_v62, %v15857_v49  ;;  %22129 = vst [vmem:[#allocation277_spill] sm:$0xff] %v15890_v46 }
 0x963   : > { %22120 = vst [vmem:[#allocation60_spill] sm:$0xff] %v15862_v29  ;;  %v21270_v33 = vunpack.i.h.bf16 %v15862_v29  ;;  %v10975_v12 = vunpack.i.l.bf16 %v15862_v29 }
 0x964   : > { %22121 = vst [vmem:[#allocation275_spill] sm:$0xff] %v15865_v14  ;;  %v15874_v40 = vsel %vm3490_vm6, %v22123_v59, %v10970_v31  ;;  %v15879_v56 = vsel %vm3490_vm6, %v10970_v31, %v10971_v3  ;;  %v15893_v59 = vsel %vm3415_vm14, %v10960_v21, %v10961_v18  ;;  %v22134_v18 = vld [vmem:[#allocation70_spill] sm:$0xff] }
 0x965   : > { %11218 = vrot.lane.b32.xlu1 %v22122_v4, %s12967_s26  ;;  %22124 = vst [vmem:[#allocation64_spill] sm:$0xff] %v15874_v40  ;;  %22126 = vst [vmem:[#allocation71_spill] sm:$0xff] %v15879_v56  ;;  %v15882_v62 = vsel %vm3490_vm6, %v10971_v3, %v10975_v12  ;;  %v4002_v2 = vsel %vm3490_vm6, %v10975_v12, %v21270_v33  ;;  %v10979_v14 = vpop.permute.xlu1 %10978  ;;  %v22133_v12 = vld [vmem:[#allocation68_spill] sm:$0xff] }
 0x966   : > { %11228 = vrot.lane.b32.xlu0 %v22125_v28, %s12967_s26  ;;  %22127 = vst [vmem:[#allocation276_spill] sm:$0xff] %v15882_v62  ;;  %22130 = vst [vmem:[#allocation278_spill] sm:$0xff] %v15893_v59  ;;  %v10981_v1 = vunpack.i.h.bf16 %v10979_v14  ;;  %v15895_v7 = vpop.permute.xlu0 %10983  ;;  %v15898_v31 = vpack.i.bf16 %v4002_v2, %v15882_v62  ;;  %v10980_v8 = vunpack.i.l.bf16 %v10979_v14  ;;  %v22138_v62 = vld [vmem:[#allocation74_spill] sm:$0xff]  ;;  %v22141_v14 = vld [vmem:[#allocation81_spill] sm:$0xff] }
 0x967   : > { %22131 = vst [vmem:[#allocation279_spill] sm:$0xff] %v15895_v7  ;;  %v21281_v3 = vunpack.i.h.bf16 %v15895_v7  ;;  %v10985_v29 = vunpack.i.l.bf16 %v15895_v7  ;;  %v22139_v7 = vunpack.i.h.bf16 %v15511_v39 }
 0x968   : > { %22132 = vst [vmem:[#allocation280_spill] sm:$0xff] %v15898_v31 }
 0x969   : > { %11223 = vrot.lane.b32.xlu1 %v22133_v12, %s12967_s26  ;;  %v15913_v47 = vsel %vm1539_vm2, %v10981_v1, %v10985_v29  ;;  %v4005_v33 = vsel %vm1539_vm2, %v10985_v29, %v21281_v3  ;;  %v10989_v31 = vpop.permute.xlu1 %10988 }
 0x96a   : > { %11233 = vrot.lane.b32.xlu0 %v22134_v18, %s12967_s26  ;;  %22135 = vst [vmem:[#allocation68_spill] sm:$0xff] %v15913_v47  ;;  %v10991_v16 = vunpack.i.h.bf16 %v10989_v31  ;;  %v10990_v63 = vunpack.i.l.bf16 %v10989_v31  ;;  %v15918_v46 = vpop.permute.xlu0 %10993  ;;  %v15921_v21 = vpack.i.bf16 %v4005_v33, %v15913_v47 }
 0x96b   : > { %22136 = vst [vmem:[#allocation70_spill] sm:$0xff] %v15918_v46  ;;  %v21290_v49 = vunpack.i.h.bf16 %v15918_v46  ;;  %v10995_v2 = vunpack.i.l.bf16 %v15918_v46 }
 0x96c   : > { %22137 = vst [vmem:[#allocation281_spill] sm:$0xff] %v15921_v21  ;;  %v15930_v29 = vsel %vm3639_vm1, %v22139_v7, %v10990_v63  ;;  %v15935_v31 = vsel %vm3639_vm1, %v10990_v63, %v10991_v16  ;;  %v22144_v21 = vunpack.i.h.bf16 %v15474_v11  ;;  %v15949_v7 = vsel %vm1539_vm2, %v10980_v8, %v10981_v1 }
 0x96d   : > { %11238 = vrot.lane.b32.xlu1 %v22138_v62, %s12967_s26  ;;  %22140 = vst [vmem:[#allocation74_spill] sm:$0xff] %v15930_v29  ;;  %22142 = vst [vmem:[#allocation81_spill] sm:$0xff] %v15935_v31  ;;  %v15938_v33 = vsel %vm3639_vm1, %v10991_v16, %v10995_v2  ;;  %v4008_v3 = vsel %vm3639_vm1, %v10995_v2, %v21290_v49  ;;  %v10999_v59 = vpop.permute.xlu1 %10998  ;;  %v22149_v2 = vld [vmem:[#allocation79_spill] sm:$0xff] }
 0x96e   : > { %11248 = vrot.lane.b32.xlu0 %v22141_v14, %s12967_s26  ;;  %22143 = vst [vmem:[#allocation282_spill] sm:$0xff] %v15938_v33  ;;  %v15946_v39 = vsel %vm1539_vm2, %v22144_v21, %v10980_v8  ;;  %22146 = vst [vmem:[#allocation284_spill] sm:$0xff] %v15949_v7  ;;  %v11001_v56 = vunpack.i.h.bf16 %v10999_v59  ;;  %v15951_v40 = vpop.permute.xlu0 %11003  ;;  %v15954_v63 = vpack.i.bf16 %v4008_v3, %v15938_v33  ;;  %v22150_v8 = vld [vmem:[#allocation80_spill] sm:$0xff]  ;;  %v11000_v0 = vunpack.i.l.bf16 %v10999_v59 }
 0x96f   : > { %22145 = vst [vmem:[#allocation283_spill] sm:$0xff] %v15946_v39  ;;  %22147 = vst [vmem:[#allocation285_spill] sm:$0xff] %v15951_v40  ;;  %v21300_v16 = vunpack.i.h.bf16 %v15951_v40  ;;  %v11005_v46 = vunpack.i.l.bf16 %v15951_v40  ;;  %v22154_v3 = vld [vmem:[#allocation84_spill] sm:$0xff]  ;;  %v22155_v33 = vunpack.i.h.bf16 %v15583_v19 }
 0x970   : > { %22148 = vst [vmem:[#allocation286_spill] sm:$0xff] %v15954_v63  ;;  %v16005_v31 = vsel %vm3714_vm3, %v11000_v0, %v11001_v56 }
 0x971   : > { %11243 = vrot.lane.b32.xlu1 %v22149_v2, %s12967_s26  ;;  %v15969_v21 = vsel %vm3714_vm3, %v11001_v56, %v11005_v46  ;;  %v4011_v49 = vsel %vm3714_vm3, %v11005_v46, %v21300_v16  ;;  %v11009_v63 = vpop.permute.xlu1 %11008  ;;  %v22157_v46 = vld [vmem:[#allocation90_spill] sm:$0xff]  ;;  %v22160_v16 = vunpack.i.h.bf16 %v15546_v52  ;;  %22163 = vst [vmem:[#allocation291_spill] sm:$0xff] %v16005_v31  ;;  %v22165_v52 = vunpack.i.h.bf16 %v15618_v24 }
 0x972   : > { %11253 = vrot.lane.b32.xlu0 %v22150_v8, %s12967_s26  ;;  %22151 = vst [vmem:[#allocation79_spill] sm:$0xff] %v15969_v21  ;;  %v11011_v30 = vunpack.i.h.bf16 %v11009_v63  ;;  %v11010_v11 = vunpack.i.l.bf16 %v11009_v63  ;;  %v15974_v39 = vpop.permute.xlu0 %11013  ;;  %v15977_v1 = vpack.i.bf16 %v4011_v49, %v15969_v21 }
 0x973   : > { %22152 = vst [vmem:[#allocation80_spill] sm:$0xff] %v15974_v39  ;;  %v21306_v47 = vunpack.i.l.bf16 %v15974_v39  ;;  %v16000_v7 = vsel %vm3714_vm3, %v22160_v16, %v11000_v0  ;;  %v22168_v0 = vld [vmem:[#allocation94_spill] sm:$0xff] }
 0x974   : > { %22153 = vst [vmem:[#allocation287_spill] sm:$0xff] %v15977_v1  ;;  %v15985_v40 = vsel %vm3789_vm8, %v22155_v33, %v11010_v11  ;;  %v15990_v59 = vsel %vm3789_vm8, %v11010_v11, %v11011_v30  ;;  %22161 = vst [vmem:[#allocation289_spill] sm:$0xff] %v16000_v7  ;;  %v22164_v11 = vld [vmem:[#allocation89_spill] sm:$0xff] }
 0x975   : > { %11258 = vrot.lane.b32.xlu1 %v22154_v3, %s12967_s26  ;;  %22156 = vst [vmem:[#allocation84_spill] sm:$0xff] %v15985_v40  ;;  %22158 = vst [vmem:[#allocation90_spill] sm:$0xff] %v15990_v59  ;;  %v15995_v49 = vsel %vm3789_vm8, %v11011_v30, %v21306_v47  ;;  %v11019_v63 = vpop.permute.xlu1 %11018  ;;  %v22174_v30 = vld [vmem:[#allocation99_spill] sm:$0xff] }
 0x976   : > { %11268 = vrot.lane.b32.xlu0 %v22157_v46, %s12967_s26  ;;  %22159 = vst [vmem:[#allocation288_spill] sm:$0xff] %v15995_v49  ;;  %v11021_v19 = vunpack.i.h.bf16 %v11019_v63  ;;  %v11020_v33 = vunpack.i.l.bf16 %v11019_v63  ;;  %v16002_v1 = vpop.permute.xlu0 %11023  ;;  %v22171_v49 = vunpack.i.h.bf16 %v15655_v45 }
 0x977   : > { %22162 = vst [vmem:[#allocation290_spill] sm:$0xff] %v16002_v1  ;;  %v22179_v59 = vunpack.i.l.bf16 %v16002_v1 }
 0x978   : > { %v16016_v16 = vsel %vm1529_vm4, %v22165_v52, %v11020_v33  ;;  %v16019_v63 = vsel %vm1529_vm4, %v11020_v33, %v11021_v19  ;;  %v22170_v33 = vld [vmem:[#allocation95_spill] sm:$0xff] }
 0x979   : > { %11263 = vrot.lane.b32.xlu1 %v22164_v11, %s12967_s26  ;;  %22166 = vst [vmem:[#allocation89_spill] sm:$0xff] %v16016_v16  ;;  %22167 = vst [vmem:[#allocation292_spill] sm:$0xff] %v16019_v63  ;;  %v11029_v39 = vpop.permute.xlu1 %11028  ;;  %v16061_v29 = vsel %vm1529_vm4, %v11021_v19, %v22179_v59  ;;  %v22186_v19 = vld [vmem:[#allocation104_spill] sm:$0xff] }
 0x97a   : > { %11273 = vrot.lane.b32.xlu0 %v22168_v0, %s12967_s26  ;;  %v11031_v7 = vunpack.i.h.bf16 %v11029_v39  ;;  %v11030_v47 = vunpack.i.l.bf16 %v11029_v39  ;;  %v16027_v21 = vpop.permute.xlu0 %11033  ;;  %22180 = vst [vmem:[#allocation297_spill] sm:$0xff] %v16061_v29  ;;  %v22197_v29 = vld [vmem:[#allocation109_spill] sm:$0xff] }
 0x97b   : > { %22169 = vst [vmem:[#allocation94_spill] sm:$0xff] %v16027_v21  ;;  %v21322_v52 = vunpack.i.l.bf16 %v16027_v21  ;;  %v22182_v21 = vld [vmem:[#allocation100_spill] sm:$0xff] }
 0x97c   : > { %v16036_v40 = vsel %vm3938_vm0, %v22171_v49, %v11030_v47  ;;  %v16039_v56 = vsel %vm3938_vm0, %v11030_v47, %v11031_v7 }
 0x97d   : > { %11278 = vrot.lane.b32.xlu1 %v22170_v33, %s12967_s26  ;;  %22172 = vst [vmem:[#allocation95_spill] sm:$0xff] %v16036_v40  ;;  %22173 = vst [vmem:[#allocation293_spill] sm:$0xff] %v16039_v56  ;;  %v16046_v39 = vsel %vm3938_vm0, %v11031_v7, %v21322_v52  ;;  %v16048_v24 = vpop.permute.xlu1 %11038 }
 0x97e   : > { %11288 = vrot.lane.b32.xlu0 %v22174_v30, %s12967_s26  ;;  %22175 = vst [vmem:[#allocation99_spill] sm:$0xff] %v16046_v39  ;;  %22176 = vst [vmem:[#allocation294_spill] sm:$0xff] %v16048_v24  ;;  %v16054_v49 = vunpack.i.l.bf16 %v16048_v24  ;;  %v16056_v47 = vpop.permute.xlu0 %11043  ;;  %v22184_v1 = vunpack.i.h.bf16 %v16048_v24 }
 0x97f   : > { %22178 = vst [vmem:[#allocation296_spill] sm:$0xff] %v16056_v47  ;;  %v16065_v52 = vunpack.i.l.bf16 %v16056_v47 }
 0x980   : > { %22177 = vst [vmem:[#allocation295_spill] sm:$0xff] %v16054_v49  ;;  %v16074_v45 = vsel %vm1271_vm5, %v15726_v15, %v16054_v49  ;;  %v16080_v59 = vsel %vm1271_vm5, %v16054_v49, %v22184_v1  ;;  %v22188_v15 = vunpack.i.h.bf16 %v16056_v47  ;;  %v22194_v47 = vld [vmem:[#allocation105_spill] sm:$0xff] }
 0x981   : > { %22181 = vst [vmem:[#allocation298_spill] sm:$0xff] %v16065_v52  ;;  %11283 = vrot.lane.b32.xlu1 %v22182_v21, %s12967_s26  ;;  %22183 = vst [vmem:[#allocation100_spill] sm:$0xff] %v16074_v45  ;;  %v16089_v31 = vsel %vm2981_vm11, %v15747_v20, %v16065_v52  ;;  %v16097_v40 = vpop.permute.xlu1 %11048  ;;  %v22205_v45 = vld [vmem:[#allocation110_spill] sm:$0xff] }
 0x982   : > { %22185 = vst [vmem:[#allocation299_spill] sm:$0xff] %v16080_v59  ;;  %11293 = vrot.lane.b32.xlu0 %v22186_v19, %s12967_s26  ;;  %22187 = vst [vmem:[#allocation104_spill] sm:$0xff] %v16089_v31  ;;  %v16095_v24 = vsel %vm2981_vm11, %v16065_v52, %v22188_v15  ;;  %v21342_v49 = vunpack.i.h.bf16 %v16097_v40  ;;  %v16103_v7 = vunpack.i.l.bf16 %v16097_v40  ;;  %v16105_v39 = vpop.permute.xlu0 %11053  ;;  %vm7651_vm11 = vcmask 875520  }
 0x983   : > { %22189 = vst [vmem:[#allocation300_spill] sm:$0xff] %v16095_v24  ;;  %22190 = vst [vmem:[#allocation301_spill] sm:$0xff] %v16097_v40  ;;  %v16111_v15 = vunpack.i.l.bf16 %v16105_v39  ;;  %v22199_v1 = vunpack.i.h.bf16 %v16105_v39 }
 0x984   : > { %22191 = vst [vmem:[#allocation302_spill] sm:$0xff] %v16103_v7  ;;  %22192 = vst [vmem:[#allocation303_spill] sm:$0xff] %v16105_v39  ;;  %v16121_v59 = vsel %vm3053_vm13, %v16103_v7, %v21342_v49  ;;  %v16126_v20 = vsel %vm3053_vm13, %v15749_v25, %v16103_v7 }
 0x985   : > { %22193 = vst [vmem:[#allocation304_spill] sm:$0xff] %v16111_v15  ;;  %11298 = vrot.lane.b32.xlu1 %v22194_v47, %s12967_s26  ;;  %22195 = vst [vmem:[#allocation105_spill] sm:$0xff] %v16121_v59  ;;  %v16133_v24 = vsel %vm3125_vm12, %v15779_v13, %v16111_v15  ;;  %v16139_v56 = vsel %vm3125_vm12, %v16111_v15, %v22199_v1  ;;  %v16141_v49 = vpop.permute.xlu1 %11058  ;;  %v22223_v15 = vld [vmem:[#allocation122_spill] sm:$0xff] }
 0x986   : > { %22196 = vst [vmem:[#allocation305_spill] sm:$0xff] %v16126_v20  ;;  %11308 = vrot.lane.b32.xlu0 %v22197_v29, %s12967_s26  ;;  %22198 = vst [vmem:[#allocation109_spill] sm:$0xff] %v16133_v24  ;;  %v21354_v40 = vunpack.i.h.bf16 %v16141_v49  ;;  %v16147_v63 = vunpack.i.l.bf16 %v16141_v49  ;;  %v16149_v7 = vpop.permute.xlu0 %11063  ;;  %v22224_v24 = vld [vmem:[#allocation117_spill] sm:$0xff] }
 0x987   : > { %22200 = vst [vmem:[#allocation306_spill] sm:$0xff] %v16139_v56  ;;  %22201 = vst [vmem:[#allocation307_spill] sm:$0xff] %v16141_v49  ;;  %v21362_v39 = vunpack.i.h.bf16 %v16149_v7  ;;  %v16155_v1 = vunpack.i.l.bf16 %v16149_v7 }
 0x988   : > { %22202 = vst [vmem:[#allocation308_spill] sm:$0xff] %v16147_v63  ;;  %22203 = vst [vmem:[#allocation309_spill] sm:$0xff] %v16149_v7  ;;  %v16163_v25 = vsel %vm3197_vm15, %v16147_v63, %v21354_v40  ;;  %v16168_v59 = vsel %vm3197_vm15, %v15781_v53, %v16147_v63  ;;  %v22213_v7 = vld [vmem:[#allocation113_spill] sm:$0xff] }
 0x989   : > { %22204 = vst [vmem:[#allocation310_spill] sm:$0xff] %v16155_v1  ;;  %11303 = vrot.lane.b32.xlu1 %v22205_v45, %s12967_s26  ;;  %22206 = vst [vmem:[#allocation110_spill] sm:$0xff] %v16163_v25  ;;  %v16175_v13 = vsel %vm1549_vm9, %v15810_v27, %v16155_v1  ;;  %v16181_v56 = vsel %vm1549_vm9, %v16155_v1, %v21362_v39  ;;  %v16183_v40 = vpop.permute.xlu1 %11068  ;;  %v22216_v25 = vld [vmem:[#allocation120_spill] sm:$0xff]  ;;  %vm4643_vm9 = vcmask 949248  }
 0x98a   : > { %22207 = vst [vmem:[#allocation311_spill] sm:$0xff] %v16168_v59  ;;  %11313 = vrot.lane.b32.xlu0 %v14641_v10, %s12967_s26  ;;  %22208 = vst [vmem:[#allocation312_spill] sm:$0xff] %v16175_v13  ;;  %v21369_v49 = vunpack.i.h.bf16 %v16183_v40  ;;  %v16189_v63 = vunpack.i.l.bf16 %v16183_v40  ;;  %v16191_v20 = vpop.permute.xlu0 %11073  ;;  %v16212_v27 = vld [vmem:[#allocation9] sm:$0x77]  ;;  %v22218_v59 = vld [vmem:[#allocation46_spill] sm:$0xff] }
 0x98b   : > { %22209 = vst [vmem:[#allocation313_spill] sm:$0xff] %v16181_v56  ;;  %22210 = vst [vmem:[#allocation314_spill] sm:$0xff] %v16183_v40  ;;  %v16222_v13 = vcombine.high %v16212_v27, %v16212_v27 }
 0x98c   : > { %22211 = vst [vmem:[#allocation315_spill] sm:$0xff] %v16189_v63  ;;  %22212 = vst [vmem:[#allocation316_spill] sm:$0xff] %v16191_v20  ;;  %v16201_v39 = vsel %vm3340_vm10, %v16189_v63, %v21369_v49  ;;  %v16206_v53 = vsel %vm3340_vm10, %v15812_v5, %v16189_v63  ;;  %v22219_v49 = vld [vmem:[#allocation121_spill] sm:$0xff]  ;;  %v22221_v5 = vld [vmem:[#allocation118_spill] sm:$0xff] }
 0x98d   : > { %11318 = vrot.lane.b32.xlu1 %v22213_v7, %s12967_s26  ;;  %22214 = vst [vmem:[#allocation113_spill] sm:$0xff] %v16201_v39  ;;  %22215 = vst [vmem:[#allocation317_spill] sm:$0xff] %v16206_v53  ;;  %v16210_v20 = vpop.permute.xlu1 %11078  ;;  %v11332_v1 = vpack.i.bf16 %v22219_v49, %v22218_v59  ;;  %6409 = vmatprep.mubr.f32.mxu0 %v16222_v13 }
 0x98e   : > { %11328 = vrot.lane.b32.xlu0 %v22216_v25, %s12967_s26  ;;  %v16216_v40 = vpop.permute.xlu0 %11083  ;;  %22220 = vst [vmem:[#allocation46_spill] sm:$0xff] %v16222_v13  ;;  %6551 = vmatprep.mubr.f32.mxu1 %v16222_v13 }
 0x98f   : > { %22217 = vst [vmem:[#allocation120_spill] sm:$0xff] %v16216_v40 }
 0x991   : > { %11323 = vrot.lane.b32.xlu1 %v22221_v5, %s12967_s26  ;;  %v16228_v63 = vpop.permute.xlu1 %11088 }
 0x992   : > { %11333 = vrot.lane.b32.xlu0 %v11332_v1, %s12967_s26  ;;  %v16231_v56 = vpop.permute.xlu0 %11093 }
 0x995   : > { %11348 = vrot.lane.b32.xlu1 %v22118_v55, %s12954_s7  ;;  %v16237_v59 = vpop.permute.xlu1 %11098 }
 0x996   : > { %11338 = vrot.lane.b32.xlu0 %v22101_v38, %s12954_s7  ;;  %v16239_v39 = vpop.permute.xlu0 %11103 }
 0x999   : > { %11353 = vrot.lane.b32.xlu1 %v22133_v12, %s12954_s7  ;;  %v16245_v1 = vpop.permute.xlu1 %11108 }
 0x99a   : > { %11343 = vrot.lane.b32.xlu0 %v22117_v26, %s12954_s7  ;;  %v16247_v53 = vpop.permute.xlu0 %11113 }
 0x99d   : > { %11368 = vrot.lane.b32.xlu1 %v22150_v8, %s12954_s7  ;;  %v16253_v38 = vpop.permute.xlu1 %11118 }
 0x99e   : > { %11358 = vrot.lane.b32.xlu0 %v22134_v18, %s12954_s7 }
 0x9a0   : > { %v16255_v55 = vpop.permute.xlu0 %11123 }
 0x9a1   : > { %11373 = vrot.lane.b32.xlu1 %v22164_v11, %s12954_s7  ;;  %v16261_v26 = vpop.permute.xlu1 %11128 }
 0x9a2   : > { %11363 = vrot.lane.b32.xlu0 %v22149_v2, %s12954_s7 }
 0x9a4   : > { %v16263_v12 = vpop.permute.xlu0 %11133 }
 0x9a5   : > { %11388 = vrot.lane.b32.xlu1 %v22186_v19, %s12954_s7  ;;  %v16269_v18 = vpop.permute.xlu1 %11138  ;;  %v22222_v19 = vpack.i.bf16 %v22219_v49, %v14709_v50 }
 0x9a6   : > { %11378 = vrot.lane.b32.xlu0 %v22168_v0, %s12954_s7 }
 0x9a8   : > { %v16271_v8 = vpop.permute.xlu0 %11143 }
 0x9a9   : > { %11393 = vrot.lane.b32.xlu1 %v22205_v45, %s12954_s7  ;;  %v16291_v45 = vpack.i.bf16 %v22224_v24, %v22223_v15 }
 0x9aa   : > { %11383 = vrot.lane.b32.xlu0 %v22182_v21, %s12954_s7 }
 0x9ab   : > { %v16277_v2 = vpop.permute.xlu1 %11148 }
 0x9ac   : > { %v16279_v11 = vpop.permute.xlu0 %11153 }
 0x9ad   : > { %11408 = vrot.lane.b32.xlu1 %v22222_v19, %s12954_s7  ;;  %v22225_v19 = vld [vmem:[#allocation126_spill] sm:$0xff] }
 0x9ae   : > { %11398 = vrot.lane.b32.xlu0 %v14641_v10, %s12954_s7  ;;  %v22226_v10 = vld [vmem:[#allocation127_spill] sm:$0xff] }
 0x9af   : > { %v16287_v0 = vpop.permute.xlu1 %11158  ;;  %v16305_v31 = vpack.i.bf16 %v22226_v10, %v22225_v19  ;;  %v22230_v19 = vld [vmem:[#allocation134_spill] sm:$0xff] }
 0x9b0   : > { %v16293_v52 = vpop.permute.xlu0 %11163 }
 0x9b1   : > { %11413 = vrot.lane.b32.xlu1 %v16291_v45, %s12967_s26 }
 0x9b2   : > { %11403 = vrot.lane.b32.xlu0 %v22221_v5, %s12954_s7  ;;  %v22227_v5 = vld [vmem:[#allocation136_spill] sm:$0xff] }
 0x9b3   : > { %v16299_v21 = vpop.permute.xlu1 %11168 }
 0x9b4   : > { %v16301_v50 = vpop.permute.xlu0 %11173 }
 0x9b5   : > { %11418 = vrot.lane.b32.xlu1 %v22108_v37, %s12954_s7  ;;  %v16325_v37 = vpack.i.bf16 %v22230_v19, %v14791_v48  ;;  %v22240_v48 = vld [vmem:[#allocation48_spill] sm:$0xff] }
 0x9b6   : > { %11493 = vrot.lane.b32.xlu0 %v16305_v31, %s12967_s26  ;;  %v10416_v51 = vunpack.i.h.bf16 %v22240_v48 }
 0x9b7   : > { %v16311_v16 = vpop.permute.xlu1 %11178 }
 0x9b8   : > { %v16313_v24 = vpop.permute.xlu0 %11183 }
 0x9b9   : > { %11423 = vrot.lane.b32.xlu1 %v22111_v32, %s12954_s7 }
 0x9ba   : > { %11508 = vrot.lane.b32.xlu0 %v22227_v5, %s12967_s26 }
 0x9bb   : > { %v16319_v36 = vpop.permute.xlu1 %4046 }
 0x9bc   : > { %22228 = vst [vmem:[#allocation118_spill] sm:$0xff] %v16319_v36  ;;  %v16321_v10 = vpop.permute.xlu0 %4043  ;;  %v22233_v36 = vld [vmem:[#allocation145_spill] sm:$0xff] }
 0x9bd   : > { %22229 = vst [vmem:[#allocation318_spill] sm:$0xff] %v16321_v10  ;;  %11428 = vrot.lane.b32.xlu1 %v22122_v4, %s12954_s7  ;;  %v16345_v4 = vpack.i.bf16 %v14854_v54, %v14851_v43  ;;  %v22239_v54 = vld [vmem:[#allocation47_spill] sm:$0xff] }
 0x9be   : > { %11513 = vrot.lane.b32.xlu0 %v16325_v37, %s12967_s26  ;;  %v10411_v43 = vunpack.i.h.bf16 %v22239_v54 }
 0x9bf   : > { %v16331_v42 = vpop.permute.xlu1 %4052 }
 0x9c0   : > { %22231 = vst [vmem:[#allocation319_spill] sm:$0xff] %v16331_v42  ;;  %v16333_v32 = vpop.permute.xlu0 %4049  ;;  %v22238_v42 = vld [vmem:[#allocation154_spill] sm:$0xff] }
 0x9c1   : > { %22232 = vst [vmem:[#allocation320_spill] sm:$0xff] %v16333_v32  ;;  %11433 = vrot.lane.b32.xlu1 %v22125_v28, %s12954_s7 }
 0x9c2   : > { %11528 = vrot.lane.b32.xlu0 %v22233_v36, %s12967_s26 }
 0x9c3   : > { %v16339_v10 = vpop.permute.xlu1 %4058 }
 0x9c4   : > { %22234 = vst [vmem:[#allocation321_spill] sm:$0xff] %v16339_v10  ;;  %v16341_v19 = vpop.permute.xlu0 %4055  ;;  %v11091_v10 = vunpack.i.h.bf16 %v16228_v63 }
 0x9c5   : > { %22235 = vst [vmem:[#allocation322_spill] sm:$0xff] %v16341_v19  ;;  %11438 = vrot.lane.b32.xlu1 %v22138_v62, %s12954_s7  ;;  %v11090_v19 = vunpack.i.l.bf16 %v16228_v63  ;;  %v10410_v62 = vunpack.i.l.bf16 %v22239_v54  ;;  %v22242_v63 = vld [vmem:[#allocation119_spill] sm:$0xff] }
 0x9c6   : > { %11533 = vrot.lane.b32.xlu0 %v16345_v4, %s12967_s26  ;;  %v22245_v5 = vunpack.i.h.bf16 %v22242_v63 }
 0x9c7   : > { %v16351_v32 = vpop.permute.xlu1 %4064  ;;  %v4661_v54 = vsel %vm4643_vm9, %v11090_v19, %v11091_v10 }
 0x9c8   : > { %22236 = vst [vmem:[#allocation323_spill] sm:$0xff] %v16351_v32  ;;  %v16353_v28 = vpop.permute.xlu0 %4061  ;;  %v10415_v32 = vunpack.i.l.bf16 %v22240_v48  ;;  %v4644_v48 = vsel %vm4643_vm9, %v10410_v62, %v10411_v43 }
 0x9c9   : > { %22237 = vst [vmem:[#allocation324_spill] sm:$0xff] %v16353_v28  ;;  %11443 = vrot.lane.b32.xlu1 %v22141_v14, %s12954_s7  ;;  %v22241_v14 = vld [vmem:[#allocation152_spill] sm:$0xff] }
 0x9ca   : > { %11548 = vrot.lane.b32.xlu0 %v22238_v42, %s12967_s26  ;;  %v16369_v49 = vpack.i.bf16 %v22241_v14, %v14911_v17  ;;  %v10575_v42 = vunpack.i.l.bf16 %v22242_v63  ;;  %v4646_v58 = vsel %vm4643_vm9, %v10415_v32, %v10416_v51  ;;  %v4645_v15 = vsel %vm4643_vm9, %v10411_v43, %v10415_v32  ;;  %v22248_v63 = vld [vmem:[#allocation161_spill] sm:$0xff] }
 0x9cb   : > { %v16365_v41 = vpop.permute.xlu1 %11188  ;;  %v8808_v43 = vpack.c.bf16 %v4661_v54, %v4644_v48  ;;  %v11101_v32 = vunpack.i.h.bf16 %v16237_v59 }
 0x9cc   : > { %v11194_v28 = vpop.permute.xlu0 %11193  ;;  %v16391_v34 = vsel %vm4643_vm9, %v10575_v42, %v22245_v5  ;;  %v11095_v5 = vunpack.i.l.bf16 %v16231_v56 }
 0x9cd   : > { %v11196_v36 = vunpack.i.h.bf16 %v11194_v28  ;;  %v11195_v60 = vunpack.i.l.bf16 %v11194_v28  ;;  %11448 = vrot.lane.b32.xlu1 %v22154_v3, %s12954_s7  ;;  %v11100_v28 = vunpack.i.l.bf16 %v16237_v59  ;;  %v22252_v59 = vld [vmem:[#allocation171_spill] sm:$0xff] }
 0x9ce   : > { %11553 = vrot.lane.b32.xlu0 %v16369_v49, %s12967_s26 }
 0x9cf   : > { %v16380_v14 = vpop.permute.xlu1 %11198  ;;  %v4662_v17 = vsel %vm4643_vm9, %v11091_v10, %v11195_v60  ;;  %v4663_v62 = vsel %vm4643_vm9, %v11195_v60, %v11196_v36  ;;  %v4647_v10 = vsel %vm4643_vm9, %v10416_v51, %v10575_v42 }
 0x9d0   : > { %22243 = vst [vmem:[#allocation47_spill] sm:$0xff] %v16380_v14  ;;  %v11200_v13 = vunpack.i.l.bf16 %v16380_v14  ;;  %v16386_v3 = vpop.permute.xlu0 %11208  ;;  %v8806_v19 = vpack.c.bf16 %v4662_v17, %v4645_v15  ;;  %v22246_v22 = vunpack.i.h.bf16 %v16380_v14  ;;  %v22247_v15 = vld [vmem:[#allocation160_spill] sm:$0xff]  ;;  %v22249_v14 = vld [vmem:[#allocation162_spill] sm:$0xff] }
 0x9d1   : > { %22244 = vst [vmem:[#allocation48_spill] sm:$0xff] %v16386_v3  ;;  %11453 = vrot.lane.b32.xlu1 %v22157_v46, %s12954_s7  ;;  %v11096_v46 = vunpack.i.h.bf16 %v16231_v56 }
 0x9d2   : > { %v16402_v17 = vsel %vm4643_vm9, %v11200_v13, %v22246_v22  ;;  %11568 = vrot.lane.b32.xlu0 %v22247_v15, %s12967_s26  ;;  %8807 = vmatprep.subr.bf16.mxu0 %v8806_v19  ;;  %v4664_v60 = vsel %vm4643_vm9, %v11196_v36, %v11200_v13  ;;  %v16414_v15 = vpack.i.bf16 %v22249_v14, %v22248_v63  ;;  %v11210_v36 = vunpack.i.l.bf16 %v16386_v3 }
 0x9d3   : > { %8809 = vmatpush1.bf16.msra.mxu0 %v8808_v43  ;;  %v11204_v51 = vpop.permute.xlu1 %11203  ;;  %v8902_v42 = vpack.c.bf16 %v4664_v60, %v4647_v10  ;;  %v8904_v19 = vpack.c.bf16 %v4663_v62, %v4646_v58  ;;  %v4695_v43 = vsel %vm4643_vm9, %v11100_v28, %v11101_v32  ;;  %v4678_v60 = vsel %vm4643_vm9, %v11095_v5, %v11096_v46 }
 0x9d4   : > { %v11205_v22 = vunpack.i.l.bf16 %v11204_v51  ;;  %v11214_v48 = vpop.permute.xlu0 %11213  ;;  %v11206_v13 = vunpack.i.h.bf16 %v11204_v51  ;;  %v11111_v58 = vunpack.i.h.bf16 %v16245_v1  ;;  %v11110_v28 = vunpack.i.l.bf16 %v16245_v1 }
 0x9d5   : > { %v11216_v40 = vunpack.i.h.bf16 %v11214_v48  ;;  %v11215_v56 = vunpack.i.l.bf16 %v11214_v48  ;;  %11458 = vrot.lane.b32.xlu1 %v22170_v33, %s12954_s7  ;;  %8903 = vmatprep.subr.bf16.mxu1 %v8902_v42  ;;  %v22251_v48 = vld [vmem:[#allocation170_spill] sm:$0xff]  ;;  %v8812_v1 = vpack.c.bf16 %v4695_v43, %v4678_v60 }
 0x9d6   : > { %11573 = vrot.lane.b32.xlu0 %v16414_v15, %s12967_s26  ;;  %8905 = vmatpush1.bf16.msra.mxu1 %v8904_v19  ;;  %v4679_v10 = vsel %vm4643_vm9, %v11096_v46, %v11205_v22  ;;  %v16430_v33 = vpack.i.bf16 %v22252_v59, %v22251_v48  ;;  %v22254_v46 = vunpack.i.h.bf16 %v16386_v3 }
 0x9d7   : > { %v16425_v62 = vpop.permute.xlu1 %11218  ;;  %v4696_v51 = vsel %vm4643_vm9, %v11101_v32, %v11215_v56  ;;  %v4680_v32 = vsel %vm4643_vm9, %v11205_v22, %v11206_v13  ;;  %v4697_v63 = vsel %vm4643_vm9, %v11215_v56, %v11216_v40  ;;  %v11106_v22 = vunpack.i.h.bf16 %v16239_v39 }
 0x9d8   : > { %22250 = vst [vmem:[#allocation325_spill] sm:$0xff] %v16425_v62  ;;  %v21410_v42 = vunpack.i.h.bf16 %v16425_v62  ;;  %v11220_v19 = vunpack.i.l.bf16 %v16425_v62  ;;  %v16435_v54 = vpop.permute.xlu0 %11228  ;;  %v8810_v14 = vpack.c.bf16 %v4696_v51, %v4679_v10  ;;  %v16440_v5 = vsel %vm4643_vm9, %v11210_v36, %v22254_v46  ;;  %v22255_v10 = vld [vmem:[#allocation169_spill] sm:$0xff] }
 0x9d9   : > { %22253 = vst [vmem:[#allocation326_spill] sm:$0xff] %v16435_v54  ;;  %11463 = vrot.lane.b32.xlu1 %v22174_v30, %s12954_s7  ;;  %v4681_v51 = vsel %vm4643_vm9, %v11206_v13, %v11210_v36  ;;  %v11105_v56 = vunpack.i.l.bf16 %v16239_v39  ;;  %v21414_v48 = vunpack.i.h.bf16 %v16435_v54  ;;  %v8908_v3 = vpack.c.bf16 %v4697_v63, %v4680_v32 }
 0x9da   : > { %v16449_v59 = vsel %vm4643_vm9, %v11220_v19, %v21410_v42  ;;  %11588 = vrot.lane.b32.xlu0 %v22255_v10, %s12967_s26  ;;  %8811 = vmatprep.subr.bf16.mxu0 %v8810_v14  ;;  %v4698_v46 = vsel %vm4643_vm9, %v11216_v40, %v11220_v19  ;;  %v4729_v42 = vsel %vm4643_vm9, %v11110_v28, %v11111_v58  ;;  %v11230_v36 = vunpack.i.l.bf16 %v16435_v54 }
 0x9db   : > { %8813 = vmatpush1.bf16.msra.mxu0 %v8812_v1  ;;  %v11224_v30 = vpop.permute.xlu1 %11223  ;;  %v8906_v43 = vpack.c.bf16 %v4698_v46, %v4681_v51  ;;  %v4712_v28 = vsel %vm4643_vm9, %v11105_v56, %v11106_v22 }
 0x9dc   : > { %v11225_v62 = vunpack.i.l.bf16 %v11224_v30  ;;  %v11234_v14 = vpop.permute.xlu0 %11233  ;;  %v11226_v40 = vunpack.i.h.bf16 %v11224_v30  ;;  %v8816_v30 = vpack.c.bf16 %v4729_v42, %v4712_v28  ;;  %v11115_v28 = vunpack.i.l.bf16 %v16247_v53 }
 0x9dd   : > { %v11236_v13 = vunpack.i.h.bf16 %v11234_v14  ;;  %v11235_v19 = vunpack.i.l.bf16 %v11234_v14  ;;  %11468 = vrot.lane.b32.xlu1 %v22194_v47, %s12954_s7  ;;  %8907 = vmatprep.subr.bf16.mxu1 %v8906_v43  ;;  %v11121_v43 = vunpack.i.h.bf16 %v16253_v38  ;;  %v22260_v14 = vld [vmem:[#allocation178_spill] sm:$0xff] }
 0x9de   : > { %11593 = vrot.lane.b32.xlu0 %v16430_v33, %s12967_s26  ;;  %8909 = vmatpush1.bf16.msra.mxu1 %v8908_v3  ;;  %v4713_v39 = vsel %vm4643_vm9, %v11106_v22, %v11225_v62  ;;  %v16479_v3 = vsel %vm4643_vm9, %v11230_v36, %v21414_v48  ;;  %v4714_v22 = vsel %vm4643_vm9, %v11225_v62, %v11226_v40 }
 0x9df   : > { %v16468_v1 = vpop.permute.xlu1 %11238  ;;  %v4730_v63 = vsel %vm4643_vm9, %v11111_v58, %v11235_v19  ;;  %22258 = vst [vmem:[#allocation328_spill] sm:$0xff] %v16479_v3  ;;  %v4731_v56 = vsel %vm4643_vm9, %v11235_v19, %v11236_v13  ;;  %v11120_v58 = vunpack.i.l.bf16 %v16253_v38  ;;  %v11116_v19 = vunpack.i.h.bf16 %v16247_v53 }
 0x9e0   : > { %22256 = vst [vmem:[#allocation169_spill] sm:$0xff] %v16468_v1  ;;  %v21413_v32 = vunpack.i.h.bf16 %v16468_v1  ;;  %v11240_v51 = vunpack.i.l.bf16 %v16468_v1  ;;  %v16473_v46 = vpop.permute.xlu0 %11248  ;;  %v8814_v47 = vpack.c.bf16 %v4730_v63, %v4713_v39  ;;  %v4715_v39 = vsel %vm4643_vm9, %v11226_v40, %v11230_v36  ;;  %v22261_v1 = vld [vmem:[#allocation179_spill] sm:$0xff]  ;;  %v22263_v63 = vld [vmem:[#allocation129_spill] sm:$0xff] }
 0x9e1   : > { %22257 = vst [vmem:[#allocation327_spill] sm:$0xff] %v16473_v46  ;;  %11473 = vrot.lane.b32.xlu1 %v22197_v29, %s12954_s7  ;;  %v8912_v36 = vpack.c.bf16 %v4731_v56, %v4714_v22  ;;  %v11250_v40 = vunpack.i.l.bf16 %v16473_v46  ;;  %v4746_v56 = vsel %vm4643_vm9, %v11115_v28, %v11116_v19 }
 0x9e2   : > { %v16489_v42 = vsel %vm4643_vm9, %v11240_v51, %v21413_v32  ;;  %11608 = vrot.lane.b32.xlu0 %v22260_v14, %s12967_s26  ;;  %8815 = vmatprep.subr.bf16.mxu0 %v8814_v47  ;;  %v4732_v62 = vsel %vm4643_vm9, %v11236_v13, %v11240_v51  ;;  %v16502_v47 = vpack.i.bf16 %v15110_v35, %v22261_v1 }
 0x9e3   : > { %22259 = vst [vmem:[#allocation329_spill] sm:$0xff] %v16489_v42  ;;  %8817 = vmatpush1.bf16.msra.mxu0 %v8816_v30  ;;  %v11244_v29 = vpop.permute.xlu1 %11243  ;;  %v8910_v38 = vpack.c.bf16 %v4732_v62, %v4715_v39  ;;  %v4763_v30 = vsel %vm4643_vm9, %v11120_v58, %v11121_v43  ;;  %v22262_v62 = vld [vmem:[#allocation128_spill] sm:$0xff]  ;;  %v11130_v58 = vunpack.i.l.bf16 %v16261_v26 }
 0x9e4   : > { %v11245_v48 = vunpack.i.l.bf16 %v11244_v29  ;;  %v11254_v60 = vpop.permute.xlu0 %11253  ;;  %v11246_v13 = vunpack.i.h.bf16 %v11244_v29  ;;  %v16513_v22 = vpack.i.bf16 %v22263_v63, %v22262_v62  ;;  %v22266_v63 = vunpack.i.h.bf16 %v16473_v46  ;;  %v22318_v46 = vld [vmem:[#allocation177_spill] sm:$0xff] }
 0x9e5   : > { %v11256_v51 = vunpack.i.h.bf16 %v11254_v60  ;;  %v11255_v53 = vunpack.i.l.bf16 %v11254_v60  ;;  %11478 = vrot.lane.b32.xlu1 %v22213_v7, %s12954_s7  ;;  %8911 = vmatprep.subr.bf16.mxu1 %v8910_v38  ;;  %v11131_v60 = vunpack.i.h.bf16 %v16261_v26  ;;  %v8820_v26 = vpack.c.bf16 %v4763_v30, %v4746_v56 }
 0x9e6   : > { %11613 = vrot.lane.b32.xlu0 %v16502_v47, %s12967_s26  ;;  %8913 = vmatpush1.bf16.msra.mxu1 %v8912_v36  ;;  %v4747_v39 = vsel %vm4643_vm9, %v11116_v19, %v11245_v48  ;;  %v16528_v62 = vsel %vm4643_vm9, %v11250_v40, %v22266_v63  ;;  %v4748_v19 = vsel %vm4643_vm9, %v11245_v48, %v11246_v13  ;;  %v11126_v48 = vunpack.i.h.bf16 %v16255_v55 }
 0x9e7   : > { %v16517_v29 = vpop.permute.xlu1 %11258  ;;  %v4764_v7 = vsel %vm4643_vm9, %v11121_v43, %v11255_v53  ;;  %22267 = vst [vmem:[#allocation331_spill] sm:$0xff] %v16528_v62  ;;  %v4765_v28 = vsel %vm4643_vm9, %v11255_v53, %v11256_v51  ;;  %v4749_v63 = vsel %vm4643_vm9, %v11246_v13, %v11250_v40  ;;  %v11125_v53 = vunpack.i.l.bf16 %v16255_v55  ;;  %v22269_v55 = vld [vmem:[#allocation131_spill] sm:$0xff] }
 0x9e8   : > { %22264 = vst [vmem:[#allocation178_spill] sm:$0xff] %v16517_v29  ;;  %v21417_v38 = vunpack.i.h.bf16 %v16517_v29  ;;  %v11260_v36 = vunpack.i.l.bf16 %v16517_v29  ;;  %v16523_v32 = vpop.permute.xlu0 %11268  ;;  %v8818_v35 = vpack.c.bf16 %v4764_v7, %v4747_v39  ;;  %v4797_v7 = vsel %vm4643_vm9, %v11130_v58, %v11131_v60  ;;  %v22270_v58 = vld [vmem:[#allocation132_spill] sm:$0xff] }
 0x9e9   : > { %22265 = vst [vmem:[#allocation330_spill] sm:$0xff] %v16523_v32  ;;  %11483 = vrot.lane.b32.xlu1 %v22216_v25, %s12954_s7  ;;  %v8916_v1 = vpack.c.bf16 %v4765_v28, %v4748_v19  ;;  %v11270_v40 = vunpack.i.l.bf16 %v16523_v32  ;;  %v4780_v19 = vsel %vm4643_vm9, %v11125_v53, %v11126_v48 }
 0x9ea   : > { %v16537_v43 = vsel %vm4643_vm9, %v11260_v36, %v21417_v38  ;;  %11628 = vrot.lane.b32.xlu0 %v15152_v6, %s12967_s26  ;;  %8819 = vmatprep.subr.bf16.mxu0 %v8818_v35  ;;  %v4766_v39 = vsel %vm4643_vm9, %v11256_v51, %v11260_v36  ;;  %v8824_v38 = vpack.c.bf16 %v4797_v7, %v4780_v19 }
 0x9eb   : > { %22268 = vst [vmem:[#allocation332_spill] sm:$0xff] %v16537_v43  ;;  %8821 = vmatpush1.bf16.msra.mxu0 %v8820_v26  ;;  %v11264_v25 = vpop.permute.xlu1 %11263  ;;  %v8914_v30 = vpack.c.bf16 %v4766_v39, %v4749_v63  ;;  %v11637_v26 = vpack.i.bf16 %v22270_v58, %v22269_v55  ;;  %v11141_v58 = vunpack.i.h.bf16 %v16269_v18  ;;  %v22280_v43 = vld [vmem:[#allocation141_spill] sm:$0xff] }
 0x9ec   : > { %v11265_v6 = vunpack.i.l.bf16 %v11264_v25  ;;  %v11274_v35 = vpop.permute.xlu0 %11273  ;;  %v11266_v13 = vunpack.i.h.bf16 %v11264_v25  ;;  %v22272_v25 = vld [vmem:[#allocation137_spill] sm:$0xff] }
 0x9ed   : > { %v11276_v51 = vunpack.i.h.bf16 %v11274_v35  ;;  %v11275_v36 = vunpack.i.l.bf16 %v11274_v35  ;;  %11488 = vrot.lane.b32.xlu1 %v16291_v45, %s12954_s7  ;;  %8915 = vmatprep.subr.bf16.mxu1 %v8914_v30  ;;  %v22273_v35 = vld [vmem:[#allocation138_spill] sm:$0xff]  ;;  %v11140_v45 = vunpack.i.l.bf16 %v16269_v18 }
 0x9ee   : > { %11633 = vrot.lane.b32.xlu0 %v16305_v31, %s12954_s7  ;;  %8917 = vmatpush1.bf16.msra.mxu1 %v8916_v1  ;;  %v4781_v63 = vsel %vm4643_vm9, %v11126_v48, %v11265_v6  ;;  %v16563_v56 = vpack.i.bf16 %v22273_v35, %v22272_v25  ;;  %v22275_v48 = vunpack.i.h.bf16 %v16523_v32 }
 0x9ef   : > { %v16558_v28 = vpop.permute.xlu1 %11278  ;;  %v4798_v39 = vsel %vm4643_vm9, %v11131_v60, %v11275_v36  ;;  %v4782_v60 = vsel %vm4643_vm9, %v11265_v6, %v11266_v13  ;;  %v4799_v35 = vsel %vm4643_vm9, %v11275_v36, %v11276_v51  ;;  %v11136_v6 = vunpack.i.h.bf16 %v16263_v12 }
 0x9f0   : > { %22271 = vst [vmem:[#allocation131_spill] sm:$0xff] %v16558_v28  ;;  %v11280_v31 = vunpack.i.l.bf16 %v16558_v28  ;;  %v16567_v1 = vpop.permute.xlu0 %11288  ;;  %v8822_v30 = vpack.c.bf16 %v4798_v39, %v4781_v63  ;;  %v16573_v53 = vsel %vm4643_vm9, %v11270_v40, %v22275_v48  ;;  %v22277_v25 = vunpack.i.h.bf16 %v16558_v28 }
 0x9f1   : > { %22274 = vst [vmem:[#allocation333_spill] sm:$0xff] %v16567_v1  ;;  %22276 = vst [vmem:[#allocation334_spill] sm:$0xff] %v16573_v53  ;;  %11498 = vrot.lane.b32.xlu1 %v16513_v22, %s12967_s26  ;;  %v4783_v63 = vsel %vm4643_vm9, %v11266_v13, %v11270_v40  ;;  %v11135_v36 = vunpack.i.l.bf16 %v16263_v12  ;;  %v8920_v62 = vpack.c.bf16 %v4799_v35, %v4782_v60  ;;  %v11290_v13 = vunpack.i.l.bf16 %v16567_v1 }
 0x9f2   : > { %v16583_v7 = vsel %vm4643_vm9, %v11280_v31, %v22277_v25  ;;  %11638 = vrot.lane.b32.xlu0 %v11637_v26, %s12954_s7  ;;  %8823 = vmatprep.subr.bf16.mxu0 %v8822_v30  ;;  %v4800_v19 = vsel %vm4643_vm9, %v11276_v51, %v11280_v31  ;;  %v21424_v25 = vunpack.i.h.bf16 %v16567_v1  ;;  %v22279_v30 = vld [vmem:[#allocation140_spill] sm:$0xff]  ;;  %v4831_v12 = vsel %vm4643_vm9, %v11140_v45, %v11141_v58  ;;  %v22307_v1 = vld [vmem:[#allocation173_spill] sm:$0xff] }
 0x9f3   : > { %22278 = vst [vmem:[#allocation335_spill] sm:$0xff] %v16583_v7  ;;  %8825 = vmatpush1.bf16.msra.mxu0 %v8824_v38  ;;  %v11284_v39 = vpop.permute.xlu1 %11283  ;;  %v8918_v48 = vpack.c.bf16 %v4800_v19, %v4783_v63  ;;  %v11647_v40 = vpack.i.bf16 %v22280_v43, %v22279_v30  ;;  %v4814_v35 = vsel %vm4643_vm9, %v11135_v36, %v11136_v6  ;;  %v11151_v60 = vunpack.i.h.bf16 %v16277_v2 }
 0x9f4   : > { %v11285_v28 = vunpack.i.l.bf16 %v11284_v39  ;;  %v11294_v32 = vpop.permute.xlu0 %11293  ;;  %v11286_v51 = vunpack.i.h.bf16 %v11284_v39 }
 0x9f5   : > { %v11296_v31 = vunpack.i.h.bf16 %v11294_v32  ;;  %v11295_v29 = vunpack.i.l.bf16 %v11294_v32  ;;  %11503 = vrot.lane.b32.xlu1 %v11637_v26, %s12967_s26  ;;  %8919 = vmatprep.subr.bf16.mxu1 %v8918_v48  ;;  %v11150_v32 = vunpack.i.l.bf16 %v16277_v2  ;;  %v8828_v2 = vpack.c.bf16 %v4831_v12, %v4814_v35 }
 0x9f6   : > { %11643 = vrot.lane.b32.xlu0 %v16325_v37, %s12954_s7  ;;  %8921 = vmatpush1.bf16.msra.mxu1 %v8920_v62  ;;  %v4815_v38 = vsel %vm4643_vm9, %v11136_v6, %v11285_v28  ;;  %v16614_v62 = vsel %vm4643_vm9, %v11290_v13, %v21424_v25  ;;  %v4816_v6 = vsel %vm4643_vm9, %v11285_v28, %v11286_v51  ;;  %v11146_v28 = vunpack.i.h.bf16 %v16271_v8 }
 0x9f7   : > { %v16603_v63 = vpop.permute.xlu1 %11298  ;;  %v4832_v19 = vsel %vm4643_vm9, %v11141_v58, %v11295_v29  ;;  %22283 = vst [vmem:[#allocation337_spill] sm:$0xff] %v16614_v62  ;;  %v4833_v36 = vsel %vm4643_vm9, %v11295_v29, %v11296_v31  ;;  %v4817_v48 = vsel %vm4643_vm9, %v11286_v51, %v11290_v13  ;;  %v11145_v29 = vunpack.i.l.bf16 %v16271_v8  ;;  %v22285_v8 = vld [vmem:[#allocation49_spill] sm:$0xff] }
 0x9f8   : > { %22281 = vst [vmem:[#allocation140_spill] sm:$0xff] %v16603_v63  ;;  %v21425_v26 = vunpack.i.h.bf16 %v16603_v63  ;;  %v11300_v45 = vunpack.i.l.bf16 %v16603_v63  ;;  %v16609_v39 = vpop.permute.xlu0 %11308  ;;  %v8826_v37 = vpack.c.bf16 %v4832_v19, %v4815_v38  ;;  %v4865_v35 = vsel %vm4643_vm9, %v11150_v32, %v11151_v60  ;;  %v22286_v32 = vld [vmem:[#allocation146_spill] sm:$0xff] }
 0x9f9   : > { %22282 = vst [vmem:[#allocation336_spill] sm:$0xff] %v16609_v39  ;;  %11518 = vrot.lane.b32.xlu1 %v16563_v56, %s12967_s26  ;;  %v8924_v43 = vpack.c.bf16 %v4833_v36, %v4816_v6  ;;  %v11310_v13 = vunpack.i.l.bf16 %v16609_v39  ;;  %v4848_v36 = vsel %vm4643_vm9, %v11145_v29, %v11146_v28 }
 0x9fa   : > { %v16623_v58 = vsel %vm4643_vm9, %v11300_v45, %v21425_v26  ;;  %11648 = vrot.lane.b32.xlu0 %v11647_v40, %s12954_s7  ;;  %8827 = vmatprep.subr.bf16.mxu0 %v8826_v37  ;;  %v4834_v38 = vsel %vm4643_vm9, %v11296_v31, %v11300_v45 }
 0x9fb   : > { %22284 = vst [vmem:[#allocation338_spill] sm:$0xff] %v16623_v58  ;;  %8829 = vmatpush1.bf16.msra.mxu0 %v8828_v2  ;;  %v11304_v19 = vpop.permute.xlu1 %11303  ;;  %v8922_v25 = vpack.c.bf16 %v4834_v38, %v4817_v48  ;;  %v10421_v2 = vunpack.i.h.bf16 %v22285_v8  ;;  %v22287_v38 = vld [vmem:[#allocation147_spill] sm:$0xff]  ;;  %v22292_v58 = vunpack.i.h.bf16 %v16609_v39 }
 0x9fc   : > { %v11305_v18 = vunpack.i.l.bf16 %v11304_v19  ;;  %v11314_v37 = vpop.permute.xlu0 %11313  ;;  %v11306_v51 = vunpack.i.h.bf16 %v11304_v19  ;;  %v16642_v12 = vpack.i.bf16 %v22287_v38, %v22286_v32  ;;  %v8832_v38 = vpack.c.bf16 %v4865_v35, %v4848_v36 }
 0x9fd   : > { %v11316_v31 = vunpack.i.h.bf16 %v11314_v37  ;;  %v11315_v45 = vunpack.i.l.bf16 %v11314_v37  ;;  %11523 = vrot.lane.b32.xlu1 %v11647_v40, %s12967_s26  ;;  %8923 = vmatprep.subr.bf16.mxu1 %v8922_v25  ;;  %v22289_v40 = vld [vmem:[#allocation149_spill] sm:$0xff]  ;;  %v22290_v25 = vld [vmem:[#allocation150_spill] sm:$0xff] }
 0x9fe   : > { %11653 = vrot.lane.b32.xlu0 %v16345_v4, %s12954_s7  ;;  %8925 = vmatpush1.bf16.msra.mxu1 %v8924_v43  ;;  %v4849_v6 = vsel %vm4643_vm9, %v11146_v28, %v11305_v18  ;;  %v11657_v37 = vpack.i.bf16 %v22290_v25, %v22289_v40  ;;  %v16659_v28 = vsel %vm4643_vm9, %v11310_v13, %v22292_v58 }
 0x9ff   : > { %v16646_v19 = vpop.permute.xlu1 %11318  ;;  %v4866_v26 = vsel %vm4643_vm9, %v11151_v60, %v11315_v45  ;;  %22293 = vst [vmem:[#allocation340_spill] sm:$0xff] %v16659_v28  ;;  %v4850_v29 = vsel %vm4643_vm9, %v11305_v18, %v11306_v51  ;;  %v4867_v25 = vsel %vm4643_vm9, %v11315_v45, %v11316_v31  ;;  %v11190_v60 = vunpack.i.l.bf16 %v16365_v41 }
 0xa00   : > { %22288 = vst [vmem:[#allocation49_spill] sm:$0xff] %v16646_v19  ;;  %v21428_v48 = vunpack.i.h.bf16 %v16646_v19  ;;  %v11320_v4 = vunpack.i.l.bf16 %v16646_v19  ;;  %v16653_v43 = vpop.permute.xlu0 %11328  ;;  %v8830_v62 = vpack.c.bf16 %v4866_v26, %v4849_v6  ;;  %v4851_v58 = vsel %vm4643_vm9, %v11306_v51, %v11310_v13 }
 0xa01   : > { %22291 = vst [vmem:[#allocation339_spill] sm:$0xff] %v16653_v43  ;;  %11538 = vrot.lane.b32.xlu1 %v16642_v12, %s12967_s26  ;;  %v11156_v18 = vunpack.i.h.bf16 %v16279_v11  ;;  %v11155_v45 = vunpack.i.l.bf16 %v16279_v11  ;;  %v8928_v13 = vpack.c.bf16 %v4867_v25, %v4850_v29  ;;  %v22296_v11 = vld [vmem:[#allocation155_spill] sm:$0xff]  ;;  %v22298_v25 = vunpack.i.h.bf16 %v16365_v41 }
 0xa02   : > { %v16669_v26 = vsel %vm4643_vm9, %v11320_v4, %v21428_v48  ;;  %11658 = vrot.lane.b32.xlu0 %v11657_v37, %s12954_s7  ;;  %8831 = vmatprep.subr.bf16.mxu0 %v8830_v62  ;;  %v4868_v35 = vsel %vm4643_vm9, %v11316_v31, %v11320_v4  ;;  %v22295_v48 = vld [vmem:[#allocation123_spill] sm:$0xff] }
 0xa03   : > { %22294 = vst [vmem:[#allocation341_spill] sm:$0xff] %v16669_v26  ;;  %8833 = vmatpush1.bf16.msra.mxu0 %v8832_v38  ;;  %v16676_v6 = vpop.permute.xlu1 %11323  ;;  %v8926_v36 = vpack.c.bf16 %v4868_v35, %v4851_v58  ;;  %v10580_v19 = vunpack.i.l.bf16 %v22295_v48  ;;  %v22297_v38 = vld [vmem:[#allocation156_spill] sm:$0xff]  ;;  %v4900_v29 = vsel %vm4643_vm9, %v11190_v60, %v22298_v25  ;;  %v4882_v35 = vsel %vm4643_vm9, %v11155_v45, %v11156_v18 }
 0xa04   : > { %v21431_v39 = vunpack.i.l.bf16 %v16676_v6  ;;  %v16682_v62 = vpop.permute.xlu0 %11333  ;;  %v16691_v4 = vpack.i.bf16 %v22297_v38, %v22296_v11  ;;  %v22299_v38 = vld [vmem:[#allocation164_spill] sm:$0xff]  ;;  %v22301_v25 = vunpack.i.l.bf16 %v22285_v8  ;;  %v11161_v45 = vunpack.i.h.bf16 %v16287_v0 }
 0xa05   : > { %v11335_v31 = vunpack.i.l.bf16 %v16682_v62  ;;  %11543 = vrot.lane.b32.xlu1 %v11657_v37, %s12967_s26  ;;  %8927 = vmatprep.subr.bf16.mxu1 %v8926_v36  ;;  %v11160_v37 = vunpack.i.l.bf16 %v16287_v0  ;;  %v16705_v32 = vsel %vm1145_vm7, %v10421_v2, %v10580_v19  ;;  %v11166_v26 = vunpack.i.h.bf16 %v16293_v52 }
 0xa06   : > { %11663 = vrot.lane.b32.xlu0 %v16369_v49, %s12954_s7  ;;  %8929 = vmatpush1.bf16.msra.mxu1 %v8928_v13  ;;  %v4883_v58 = vsel %vm4643_vm9, %v11156_v18, %v21431_v39  ;;  %v22300_v39 = vld [vmem:[#allocation165_spill] sm:$0xff]  ;;  %v5781_v18 = vsel %vm1145_vm7, %v22301_v25, %v10421_v2  ;;  %v22303_v0 = vmov %v22301_v25 }
 0xa07   : > { %v4899_v36 = vsel %vm4643_vm9, %v11335_v31, %v11190_v60  ;;  %v16702_v49 = vpop.permute.xlu1 %11348  ;;  %v8834_v13 = vpack.c.bf16 %v4900_v29, %v4883_v58  ;;  %v11667_v11 = vpack.i.bf16 %v22300_v39, %v22299_v38  ;;  %v22302_v58 = vunpack.i.h.bf16 %v22295_v48  ;;  %v22306_v39 = vld [vmem:[#allocation159_spill] sm:$0xff] }
 0xa08   : > { %v16707_v51 = vpop.permute.xlu0 %11338  ;;  %v8836_v28 = vpack.c.bf16 %v4899_v36, %v4882_v35  ;;  %v11350_v36 = vunpack.i.l.bf16 %v16702_v49  ;;  %v5780_v2 = vsel %vm1145_vm7, %v11160_v37, %v22303_v0  ;;  %v22308_v37 = vld [vmem:[#allocation174_spill] sm:$0xff] }
 0xa09   : > { %v11340_v31 = vunpack.i.l.bf16 %v16707_v51  ;;  %11558 = vrot.lane.b32.xlu1 %v16691_v4, %s12967_s26  ;;  %8835 = vmatprep.subr.bf16.mxu0 %v8834_v13  ;;  %v16722_v29 = vsel %vm1145_vm7, %v10580_v19, %v22302_v58  ;;  %v22304_v13 = vunpack.i.h.bf16 %v16707_v51  ;;  %v22305_v58 = vld [vmem:[#allocation163_spill] sm:$0xff]  ;;  %v11677_v0 = vpack.i.bf16 %v22308_v37, %v22307_v1  ;;  %v22314_v37 = vld [vmem:[#allocation182_spill] sm:$0xff] }
 0xa0a   : > { %11668 = vrot.lane.b32.xlu0 %v11667_v11, %s12954_s7  ;;  %8837 = vmatpush1.bf16.msra.mxu0 %v8836_v28  ;;  %v16738_v35 = vpack.i.bf16 %v22306_v39, %v22305_v58  ;;  %v5831_v39 = vsel %vm1145_vm7, %v11166_v26, %v11350_v36  ;;  %v11170_v58 = vunpack.i.l.bf16 %v16299_v21 }
 0xa0b   : > { %v5797_v25 = vsel %vm1145_vm7, %v11161_v45, %v11340_v31  ;;  %v16731_v60 = vpop.permute.xlu1 %11353  ;;  %v5798_v19 = vsel %vm1145_vm7, %v11340_v31, %v22304_v13  ;;  %v11165_v45 = vunpack.i.l.bf16 %v16293_v52  ;;  %v22309_v31 = vld [vmem:[#allocation125_spill] sm:$0xff] }
 0xa0c   : > { %v16741_v63 = vpop.permute.xlu0 %11343  ;;  %v8838_v28 = vpack.c.bf16 %v5798_v19, %v5781_v18  ;;  %v8840_v8 = vpack.c.bf16 %v5797_v25, %v5780_v2  ;;  %v22310_v18 = vunpack.i.h.bf16 %v16702_v49  ;;  %v11355_v25 = vunpack.i.l.bf16 %v16731_v60 }
 0xa0d   : > { %v21438_v53 = vunpack.i.h.bf16 %v16741_v63  ;;  %v11345_v7 = vunpack.i.l.bf16 %v16741_v63  ;;  %11563 = vrot.lane.b32.xlu1 %v11667_v11, %s12967_s26  ;;  %6410 = vmatmul.mubr.f32.vlgmr.msra.gmra.mrb[18].mxu0 %v16212_v27  ;;  %v22311_v19 = vmov 0.0  }
 0xa0e   : > { %11673 = vrot.lane.b32.xlu0 %v16414_v15, %s12954_s7  ;;  %8839 = vmatprep.subr.bf16.mxu0 %v8838_v28  ;;  %v5832_v52 = vsel %vm1145_vm7, %v11350_v36, %v22310_v18  ;;  %v22312_v36 = vld [vmem:[#allocation172_spill] sm:$0xff] }
 0xa0f   : > { %v5814_v11 = vsel %vm1145_vm7, %v11165_v45, %v11345_v7  ;;  %8841 = vmatpush1.bf16.msra.mxu0 %v8840_v8  ;;  %v16760_v27 = vpop.permute.xlu1 %11368  ;;  %v5815_v26 = vsel %vm1145_vm7, %v11345_v7, %v21438_v53  ;;  %6480 = vmatprep.mubr.f32.mxu0 %v22311_v19  ;;  %v22313_v18 = vld [vmem:[#allocation168_spill] sm:$0xff]  ;;  %v16774_v45 = vpack.i.bf16 %v15125_v57, %v22314_v37  ;;  %v11171_v8 = vunpack.i.h.bf16 %v16299_v21 }
 0xa10   : > { %v16766_v15 = vpop.permute.xlu0 %11358  ;;  %v8842_v28 = vpack.c.bf16 %v5832_v52, %v5815_v26  ;;  %v8844_v13 = vpack.c.bf16 %v5831_v39, %v5814_v11  ;;  %v16770_v2 = vpack.i.bf16 %v22313_v18, %v22312_v36  ;;  %v11370_v52 = vunpack.i.l.bf16 %v16760_v27 }
 0xa11   : > { %v11360_v53 = vunpack.i.l.bf16 %v16766_v15  ;;  %11578 = vrot.lane.b32.xlu1 %v16738_v35, %s12967_s26  ;;  %v5848_v11 = vsel %vm1145_vm7, %v11170_v58, %v11355_v25  ;;  %v22315_v7 = vunpack.i.h.bf16 %v16731_v60  ;;  %v22316_v57 = vunpack.i.h.bf16 %v16766_v15  ;;  %v22317_v58 = vld [vmem:[#allocation181_spill] sm:$0xff] }
 0xa12   : > { %11678 = vrot.lane.b32.xlu0 %v11677_v0, %s12954_s7  ;;  %8843 = vmatprep.subr.bf16.mxu0 %v8842_v28  ;;  %v11176_v36 = vunpack.i.h.bf16 %v16301_v50 }
 0xa13   : > { %v5865_v26 = vsel %vm1145_vm7, %v11171_v8, %v11360_v53  ;;  %8845 = vmatpush1.bf16.msra.mxu0 %v8844_v13  ;;  %v16787_v21 = vpop.permute.xlu1 %11373  ;;  %v5849_v18 = vsel %vm1145_vm7, %v11355_v25, %v22315_v7  ;;  %v5866_v39 = vsel %vm1145_vm7, %v11360_v53, %v22316_v57  ;;  %v16800_v8 = vpack.i.bf16 %v22318_v46, %v22317_v58  ;;  %v22320_v46 = vld [vmem:[#allocation190_spill] sm:$0xff] }
 0xa14   : > { %v16796_v37 = vpop.permute.xlu0 %11363  ;;  %v8846_v28 = vpack.c.bf16 %v5866_v39, %v5849_v18  ;;  %v8848_v1 = vpack.c.bf16 %v5865_v26, %v5848_v11  ;;  %v11175_v13 = vunpack.i.l.bf16 %v16301_v50  ;;  %v16808_v57 = vpack.i.bf16 %v15181_v9, %v15159_v23 }
 0xa15   : > { %v21442_v38 = vunpack.i.h.bf16 %v16796_v37  ;;  %v11365_v25 = vunpack.i.l.bf16 %v16796_v37  ;;  %11583 = vrot.lane.b32.xlu1 %v11677_v0, %s12967_s26  ;;  %v5899_v18 = vsel %vm1145_vm7, %v11176_v36, %v11370_v52  ;;  %v22319_v50 = vunpack.i.h.bf16 %v16760_v27 }
 0xa16   : > { %11683 = vrot.lane.b32.xlu0 %v16430_v33, %s12954_s7  ;;  %8847 = vmatprep.subr.bf16.mxu0 %v8846_v28  ;;  %v11375_v0 = vunpack.i.l.bf16 %v16787_v21  ;;  %v11181_v9 = vunpack.i.h.bf16 %v16311_v16  ;;  %v22322_v39 = vunpack.i.h.bf16 %v16787_v21  ;;  %v11186_v23 = vunpack.i.h.bf16 %v16313_v24 }
 0xa17   : > { %v5900_v7 = vsel %vm1145_vm7, %v11370_v52, %v22319_v50  ;;  %v5882_v11 = vsel %vm1145_vm7, %v11175_v13, %v11365_v25  ;;  %8849 = vmatpush1.bf16.msra.mxu0 %v8848_v1  ;;  %v16820_v26 = vpop.permute.xlu1 %11388  ;;  %v5883_v36 = vsel %vm1145_vm7, %v11365_v25, %v21442_v38  ;;  %v22321_v50 = vld [vmem:[#allocation191_spill] sm:$0xff]  ;;  %v11180_v1 = vunpack.i.l.bf16 %v16311_v16 }
 0xa18   : > { %v16825_v53 = vpop.permute.xlu0 %11378  ;;  %v8850_v33 = vpack.c.bf16 %v5900_v7, %v5883_v36  ;;  %v8852_v28 = vpack.c.bf16 %v5899_v18, %v5882_v11  ;;  %v11081_v25 = vunpack.i.h.bf16 %v16210_v20  ;;  %v11390_v7 = vunpack.i.l.bf16 %v16820_v26 }
 0xa19   : > { %v21446_v13 = vunpack.i.h.bf16 %v16825_v53  ;;  %v11380_v58 = vunpack.i.l.bf16 %v16825_v53  ;;  %11598 = vrot.lane.b32.xlu1 %v16770_v2, %s12967_s26  ;;  %v5916_v11 = vsel %vm1145_vm7, %v11180_v1, %v11375_v0  ;;  %v5917_v52 = vsel %vm1145_vm7, %v11375_v0, %v22322_v39 }
 0xa1a   : > { %11688 = vrot.lane.b32.xlu0 %v16774_v45, %s12954_s7  ;;  %8851 = vmatprep.subr.bf16.mxu0 %v8850_v33  ;;  %v11080_v33 = vunpack.i.l.bf16 %v16210_v20  ;;  %v11326_v20 = vunpack.i.h.bf16 %v16676_v6  ;;  %v5967_v0 = vsel %vm1145_vm7, %v11186_v23, %v11390_v7 }
 0xa1b   : > { %v5933_v36 = vsel %vm1145_vm7, %v11181_v9, %v11380_v58  ;;  %8853 = vmatpush1.bf16.msra.mxu0 %v8852_v28  ;;  %v16846_v38 = vpop.permute.xlu1 %11393  ;;  %v5934_v18 = vsel %vm1145_vm7, %v11380_v58, %v21446_v13  ;;  %v11185_v9 = vunpack.i.l.bf16 %v16313_v24  ;;  %v11330_v58 = vunpack.i.l.bf16 %v16653_v43  ;;  %v22324_v13 = vld [vmem:[#allocation120_spill] sm:$0xff] }
 0xa1c   : > { %v16856_v16 = vpop.permute.xlu0 %11383  ;;  %v8854_v1 = vpack.c.bf16 %v5934_v18, %v5917_v52  ;;  %v8856_v3 = vpack.c.bf16 %v5933_v36, %v5916_v11  ;;  %v22323_v24 = vunpack.i.h.bf16 %v16820_v26  ;;  %v11395_v11 = vunpack.i.l.bf16 %v16846_v38 }
 0xa1d   : > { %v21447_v42 = vunpack.i.h.bf16 %v16856_v16  ;;  %v11385_v39 = vunpack.i.l.bf16 %v16856_v16  ;;  %11603 = vrot.lane.b32.xlu1 %v16774_v45, %s12967_s26  ;;  %v11336_v18 = vunpack.i.h.bf16 %v16682_v62 }
 0xa1e   : > { %11693 = vrot.lane.b32.xlu0 %v16502_v47, %s12954_s7  ;;  %8855 = vmatprep.subr.bf16.mxu0 %v8854_v1  ;;  %v5968_v52 = vsel %vm1145_vm7, %v11390_v7, %v22323_v24  ;;  %v11086_v47 = vunpack.i.h.bf16 %v22324_v13  ;;  %v11085_v1 = vunpack.i.l.bf16 %v22324_v13  ;;  %v22327_v13 = vunpack.i.l.bf16 %v16676_v6 }
 0xa1f   : > { %v5950_v45 = vsel %vm1145_vm7, %v11185_v9, %v11385_v39  ;;  %8857 = vmatpush1.bf16.msra.mxu0 %v8856_v3  ;;  %v16875_v36 = vpop.permute.xlu1 %11408  ;;  %v5951_v23 = vsel %vm1145_vm7, %v11385_v39, %v21447_v42  ;;  %v22325_v39 = vunpack.i.h.bf16 %v16653_v43 }
 0xa20   : > { %v16882_v28 = vpop.permute.xlu0 %11398  ;;  %v8858_v7 = vpack.c.bf16 %v5968_v52, %v5951_v23  ;;  %v8860_v24 = vpack.c.bf16 %v5967_v0, %v5950_v45  ;;  %v11410_v40 = vunpack.i.l.bf16 %v16875_v36  ;;  %v4884_v0 = vsel %vm4643_vm9, %v22327_v13, %v11326_v20 }
 0xa21   : > { %v11400_v9 = vunpack.i.l.bf16 %v16882_v28  ;;  %11618 = vrot.lane.b32.xlu1 %v16800_v8, %s12967_s26  ;;  %v16893_v42 = vsel %vm4643_vm9, %v11330_v58, %v22325_v39  ;;  %v4885_v52 = vsel %vm4643_vm9, %v11326_v20, %v11330_v58  ;;  %v5984_v45 = vsel %vm1145_vm7, %v11080_v33, %v11395_v11 }
 0xa22   : > { %22326 = vst [vmem:[#allocation123_spill] sm:$0xff] %v16893_v42  ;;  %11698 = vrot.lane.b32.xlu0 %v16808_v57, %s12954_s7  ;;  %8859 = vmatprep.subr.bf16.mxu0 %v8858_v7  ;;  %v22329_v39 = vunpack.i.h.bf16 %v16846_v38  ;;  %v22330_v13 = vunpack.i.h.bf16 %v16882_v28  ;;  %v6035_v54 = vsel %vm1145_vm7, %v11086_v47, %v11410_v40  ;;  %v22334_v47 = vunpack.i.h.bf16 %v16875_v36 }
 0xa23   : > { %v6001_v23 = vsel %vm1145_vm7, %v11081_v25, %v11400_v9  ;;  %8861 = vmatpush1.bf16.msra.mxu0 %v8860_v24  ;;  %v16904_v3 = vpop.permute.xlu1 %11413  ;;  %v22331_v25 = vunpack.i.h.bf16 %v16365_v41  ;;  %v22333_v41 = vpack.i.bf16 %v22320_v46, %v15164_v61 }
 0xa24   : > { %22328 = vst [vmem:[#allocation125_spill] sm:$0xff] %v16904_v3  ;;  %v5985_v6 = vsel %vm1145_vm7, %v11395_v11, %v22329_v39  ;;  %v6002_v62 = vsel %vm1145_vm7, %v11400_v9, %v22330_v13  ;;  %v21450_v43 = vunpack.i.h.bf16 %v16904_v3  ;;  %v11415_v7 = vunpack.i.l.bf16 %v16904_v3  ;;  %v16914_v58 = vpop.permute.xlu0 %11403  ;;  %v22404_v3 = vld [vmem:[#allocation107_spill] sm:$0xff] }
 0xa25   : > { %v8862_v33 = vpack.c.bf16 %v6002_v62, %v5985_v6  ;;  %v8864_v20 = vpack.c.bf16 %v6001_v23, %v5984_v45  ;;  %v4901_v24 = vsel %vm4643_vm9, %v22331_v25, %v11336_v18  ;;  %v21453_v11 = vunpack.i.h.bf16 %v16914_v58  ;;  %11623 = vrot.lane.b32.xlu1 %v16808_v57, %s12967_s26 }
 0xa26   : > { %v11405_v39 = vunpack.i.l.bf16 %v16914_v58  ;;  %v16927_v9 = vsel %vm4643_vm9, %v11415_v7, %v21450_v43  ;;  %11703 = vrot.lane.b32.xlu0 %v22333_v41, %s12954_s7  ;;  %v6036_v62 = vsel %vm1145_vm7, %v11410_v40, %v22334_v47  ;;  %v4902_v45 = vsel %vm4643_vm9, %v11336_v18, %v11415_v7 }
 0xa27   : > { %22332 = vst [vmem:[#allocation191_spill] sm:$0xff] %v16927_v9  ;;  %8863 = vmatprep.subr.bf16.mxu0 %v8862_v33  ;;  %v16938_v57 = vpop.permute.xlu1 %11418  ;;  %v8930_v13 = vpack.c.bf16 %v4902_v45, %v4885_v52  ;;  %v22338_v45 = vpack.i.bf16 %v22321_v50, %v22320_v46  ;;  %v8932_v25 = vpack.c.bf16 %v4901_v24, %v4884_v0  ;;  %v22365_v46 = vld [vmem:[#allocation72_spill] sm:$0xff]  ;;  %v22385_v9 = vld [vmem:[#allocation87_spill] sm:$0xff] }
 0xa28   : > { %v6018_v23 = vsel %vm1145_vm7, %v11085_v1, %v11405_v39  ;;  %8865 = vmatpush1.bf16.msra.mxu0 %v8864_v20  ;;  %v6019_v6 = vsel %vm1145_vm7, %v11405_v39, %v21453_v11  ;;  %v21452_v33 = vunpack.i.h.bf16 %v16938_v57  ;;  %v11420_v41 = vunpack.i.l.bf16 %v16938_v57  ;;  %v16947_v40 = vpop.permute.xlu0 %11493  ;;  %v22357_v11 = vld [vmem:[#allocation197_spill] sm:$0xff] }
 0xa29   : > { %v8866_v18 = vpack.c.bf16 %v6036_v62, %v6019_v6  ;;  %v8868_v7 = vpack.c.bf16 %v6035_v54, %v6018_v23  ;;  %v22335_v1 = vunpack.i.h.bf16 %v22309_v31  ;;  %v22336_v20 = vunpack.i.l.bf16 %v22309_v31  ;;  %11708 = vrot.lane.b32.xlu1 %v22338_v45, %s12967_s26  ;;  %8931 = vmatprep.subr.bf16.mxu1 %v8930_v13 }
 0xa2a   : > { %v21451_v52 = vunpack.i.h.bf16 %v16947_v40  ;;  %v21454_v39 = vunpack.i.l.bf16 %v16947_v40  ;;  %v22339_v54 = vunpack.i.h.bf16 %v16707_v51  ;;  %v22340_v23 = vpack.i.bf16 %v15674_v44, %v15164_v61  ;;  %8933 = vmatpush1.bf16.msra.mxu1 %v8932_v25  ;;  %v22353_v25 = vld [vmem:[#allocation62_spill] sm:$0xff] }
 0xa2b   : > { %v16954_v47 = vsel %vm4643_vm9, %v22336_v20, %v22335_v1  ;;  %8867 = vmatprep.subr.bf16.mxu0 %v8866_v18  ;;  %v5800_v6 = vsel %vm1145_vm7, %v11420_v41, %v21452_v33  ;;  %v22341_v1 = vld [vmem:[#allocation184_spill] sm:$0xff]  ;;  %v16986_v24 = vpop.permute.xlu1 %11423 }
 0xa2c   : > { %22337 = vst [vmem:[#allocation120_spill] sm:$0xff] %v16954_v47  ;;  %v5799_v62 = vsel %vm1145_vm7, %v22339_v54, %v11420_v41  ;;  %11778 = vrot.lane.b32.xlu0 %v22340_v23, %s12967_s26  ;;  %v22342_v20 = vunpack.i.h.bf16 %v22341_v1  ;;  %v22343_v45 = vunpack.i.l.bf16 %v22341_v1  ;;  %v16984_v51 = vsel %vm4643_vm9, %v21454_v39, %v21451_v52  ;;  %8869 = vmatpush1.bf16.msra.mxu0 %v8868_v7  ;;  %v16989_v41 = vld [vmem:[#allocation9 + $0x8] sm:$0x7]  ;;  %v16991_v18 = vpop.permute.xlu0 %11508  ;;  %v22347_v23 = vld [vmem:[#allocation17_spill] sm:$0xff] }
 0xa2d   : > { %22345 = vst [vmem:[#allocation342_spill] sm:$0xff] %v16984_v51  ;;  %v8934_v13 = vpack.c.bf16 %v5800_v6, %v16722_v29  ;;  %v22346_v54 = vld [vmem:[#allocation52_spill] sm:$0xff]  ;;  %v8936_v43 = vpack.c.bf16 %v5799_v62, %v16705_v32  ;;  %v11425_v7 = vunpack.i.l.bf16 %v16986_v24  ;;  %11713 = vrot.lane.b32.xlu1 %v16513_v22, %s12954_s7  ;;  %v21459_v29 = vunpack.i.h.bf16 %v16986_v24 }
 0xa2e   : > { %v16977_v0 = vsel %vm3938_vm0, %v22343_v45, %v22342_v20  ;;  %v22348_v1 = vpack.c.bf16 %v22346_v54, %v22347_v23  ;;  %v22349_v20 = vld [vmem:[#allocation252_spill] sm:$0xff]  ;;  %v22350_v54 = vld [vmem:[#allocation50_spill] sm:$0xff]  ;;  %v22422_v47 = vunpack.i.h.bf16 %v16787_v21 }
 0xa2f   : > { %22344 = vst [vmem:[#allocation184_spill] sm:$0xff] %v16977_v0  ;;  %v11782_v45 = vpack.i.bf16 %v22349_v20, %v16977_v0  ;;  %8935 = vmatprep.subr.bf16.mxu1 %v8934_v13  ;;  %6481 = vmatmul.mubr.f32.vlgmr.msra.gmra.mrb[18].mxu0 %v16989_v41  ;;  %v12732_v6 = vld [vmem:[#allocation9] sm:$0x77]  ;;  %v22351_v23 = vld [vmem:[#allocation14_spill] sm:$0xff]  ;;  %v17010_v62 = vpop.permute.xlu1 %11428 }
 0xa30   : > { %8967 = vmatprep.subr.bf16.mxu0 %v22348_v1  ;;  %6552 = vmatmul.mubr.f32.vlgmr.msra.gmra.mrb[22].mxu1 %v12732_v6  ;;  %v22352_v32 = vpack.c.bf16 %v22350_v54, %v22351_v23  ;;  %v21458_v1 = vunpack.i.h.bf16 %v17010_v62  ;;  %v11430_v22 = vunpack.i.l.bf16 %v17010_v62  ;;  %v17014_v13 = vpop.permute.xlu0 %11513  ;;  %v22354_v52 = vld [vmem:[#allocation56_spill] sm:$0xff]  ;;  %v22358_v54 = vunpack.i.h.bf16 %v16741_v63 }
 0xa31   : > { %11783 = vrot.lane.b32.xlu0 %v11782_v45, %s12967_s26  ;;  %8937 = vmatpush1.bf16.msra.mxu1 %v8936_v43  ;;  %v22355_v45 = vpack.c.bf16 %v22353_v25, %v22354_v52  ;;  %v22356_v33 = vld [vmem:[#allocation196_spill] sm:$0xff]  ;;  %v5817_v52 = vsel %vm1145_vm7, %v11425_v7, %v21459_v29  ;;  %v22361_v25 = vld [vmem:[#allocation46_spill] sm:$0xff] }
 0xa32   : > { %8969 = vmatpush1.bf16.msra.mxu0 %v22352_v32  ;;  %v17021_v6 = vpack.i.bf16 %v22357_v11, %v22356_v33  ;;  %v5816_v23 = vsel %vm1145_vm7, %v22358_v54, %v11425_v7  ;;  %v22359_v43 = vld [vmem:[#allocation136_spill] sm:$0xff]  ;;  %6622 = vmatprep.mubr.f32.mxu1 %v22311_v19  ;;  %v22360_v32 = vunpack.i.h.bf16 %v16702_v49  ;;  %v5834_v63 = vsel %vm1145_vm7, %v11430_v22, %v21458_v1  ;;  %v22363_v54 = vld [vmem:[#allocation55_spill] sm:$0xff]  ;;  %v22366_v19 = vld [vmem:[#allocation66_spill] sm:$0xff] }
 0xa33   : > { %8971 = vmatprep.subr.bf16.mxu0 %v22355_v45  ;;  %11718 = vrot.lane.b32.xlu1 %v22359_v43, %s12954_s7  ;;  %v22362_v45 = vld [vmem:[#allocation57_spill] sm:$0xff]  ;;  %v17044_v49 = vpop.permute.xlu1 %11433  ;;  %v22367_v42 = vpack.c.bf16 %v22365_v46, %v22366_v19  ;;  %v22372_v19 = vld [vmem:[#allocation82_spill] sm:$0xff] }
 0xa34   : > { %v5833_v39 = vsel %vm1145_vm7, %v22360_v32, %v11430_v22  ;;  %6693 = vmatprep.mubr.f32.mxu0 %v22361_v25  ;;  %v22364_v43 = vpack.c.bf16 %v22362_v45, %v22363_v54  ;;  %v8938_v32 = vpack.c.bf16 %v5834_v63, %v5817_v52  ;;  %v17046_v33 = vpop.permute.xlu0 %11528  ;;  %v21461_v7 = vunpack.i.h.bf16 %v17044_v49  ;;  %v22368_v45 = vld [vmem:[#allocation207_spill] sm:$0xff]  ;;  %v22373_v54 = vld [vmem:[#allocation76_spill] sm:$0xff]  ;;  %v22376_v1 = vld [vmem:[#allocation205_spill] sm:$0xff] }
 0xa35   : > { %11788 = vrot.lane.b32.xlu0 %v17021_v6, %s12967_s26  ;;  %v8940_v11 = vpack.c.bf16 %v5833_v39, %v5816_v23  ;;  %v11435_v22 = vunpack.i.l.bf16 %v17044_v49  ;;  %v22369_v52 = vld [vmem:[#allocation67_spill] sm:$0xff]  ;;  %v22370_v39 = vld [vmem:[#allocation65_spill] sm:$0xff] }
 0xa36   : > { %8973 = vmatpush1.bf16.msra.mxu0 %v22364_v43  ;;  %8939 = vmatprep.subr.bf16.mxu1 %v8938_v32  ;;  %v22371_v23 = vpack.c.bf16 %v22369_v52, %v22370_v39  ;;  %v22374_v43 = vpack.c.bf16 %v22372_v19, %v22373_v54  ;;  %v22375_v32 = vld [vmem:[#allocation204_spill] sm:$0xff]  ;;  %v22378_v52 = vunpack.i.h.bf16 %v16731_v60 }
 0xa37   : > { %8975 = vmatprep.subr.bf16.mxu0 %v22367_v42  ;;  %11723 = vrot.lane.b32.xlu1 %v16563_v56, %s12954_s7  ;;  %v17060_v63 = vpop.permute.xlu1 %11438  ;;  %v17071_v29 = vpack.i.bf16 %v22376_v1, %v22375_v32  ;;  %v5851_v19 = vsel %vm1145_vm7, %v11435_v22, %v21461_v7  ;;  %v22382_v1 = vld [vmem:[#allocation75_spill] sm:$0xff] }
 0xa38   : > { %8941 = vmatpush1.bf16.msra.mxu1 %v8940_v11  ;;  %v11440_v42 = vunpack.i.l.bf16 %v17060_v63  ;;  %v17064_v56 = vpop.permute.xlu0 %11533  ;;  %v22377_v11 = vld [vmem:[#allocation145_spill] sm:$0xff]  ;;  %v5850_v39 = vsel %vm1145_vm7, %v22378_v52, %v11435_v22  ;;  %v22380_v54 = vunpack.i.h.bf16 %v17060_v63 }
 0xa39   : > { %11803 = vrot.lane.b32.xlu0 %v22368_v45, %s12967_s26  ;;  %v22384_v45 = vld [vmem:[#allocation92_spill] sm:$0xff] }
 0xa3a   : > { %8977 = vmatpush1.bf16.msra.mxu0 %v22371_v23  ;;  %v22379_v23 = vunpack.i.h.bf16 %v16766_v15  ;;  %v22386_v20 = vpack.c.bf16 %v22384_v45, %v22385_v9  ;;  %v22391_v45 = vld [vmem:[#allocation102_spill] sm:$0xff] }
 0xa3b   : > { %8979 = vmatprep.subr.bf16.mxu0 %v22374_v43  ;;  %11728 = vrot.lane.b32.xlu1 %v22377_v11, %s12954_s7  ;;  %v5868_v43 = vsel %vm1145_vm7, %v11440_v42, %v22380_v54  ;;  %v22381_v11 = vld [vmem:[#allocation77_spill] sm:$0xff]  ;;  %v17092_v52 = vpop.permute.xlu1 %11443 }
 0xa3c   : > { %v5867_v46 = vsel %vm1145_vm7, %v22379_v23, %v11440_v42  ;;  %v22383_v60 = vpack.c.bf16 %v22381_v11, %v22382_v1  ;;  %v8942_v15 = vpack.c.bf16 %v5868_v43, %v5851_v19  ;;  %v17094_v23 = vpop.permute.xlu0 %11548  ;;  %v21465_v22 = vunpack.i.h.bf16 %v17092_v52  ;;  %v22387_v1 = vld [vmem:[#allocation34_spill] sm:$0xff]  ;;  %v22388_v19 = vld [vmem:[#allocation91_spill] sm:$0xff]  ;;  %v22392_v43 = vld [vmem:[#allocation97_spill] sm:$0xff] }
 0xa3d   : > { %11808 = vrot.lane.b32.xlu0 %v17071_v29, %s12967_s26  ;;  %v8944_v32 = vpack.c.bf16 %v5867_v46, %v5850_v39  ;;  %v11445_v42 = vunpack.i.l.bf16 %v17092_v52  ;;  %v22389_v46 = vld [vmem:[#allocation86_spill] sm:$0xff]  ;;  %v22393_v11 = vpack.c.bf16 %v22391_v45, %v22392_v43 }
 0xa3e   : > { %8981 = vmatpush1.bf16.msra.mxu0 %v22383_v60  ;;  %8943 = vmatprep.subr.bf16.mxu1 %v8942_v15  ;;  %v22390_v39 = vpack.c.bf16 %v22388_v19, %v22389_v46  ;;  %v22394_v60 = vld [vmem:[#allocation212_spill] sm:$0xff]  ;;  %v22395_v15 = vld [vmem:[#allocation213_spill] sm:$0xff]  ;;  %v22397_v19 = vunpack.i.h.bf16 %v16796_v37 }
 0xa3f   : > { %8983 = vmatprep.subr.bf16.mxu0 %v22386_v20  ;;  %11733 = vrot.lane.b32.xlu1 %v16642_v12, %s12954_s7  ;;  %v17108_v54 = vpop.permute.xlu1 %11448  ;;  %v17119_v7 = vpack.i.bf16 %v22395_v15, %v22394_v60  ;;  %v5885_v45 = vsel %vm1145_vm7, %v11445_v42, %v21465_v22  ;;  %v22401_v15 = vld [vmem:[#allocation96_spill] sm:$0xff] }
 0xa40   : > { %8945 = vmatpush1.bf16.msra.mxu1 %v8944_v32  ;;  %v11450_v20 = vunpack.i.l.bf16 %v17108_v54  ;;  %v17112_v12 = vpop.permute.xlu0 %11553  ;;  %v22396_v32 = vld [vmem:[#allocation154_spill] sm:$0xff]  ;;  %v5884_v46 = vsel %vm1145_vm7, %v22397_v19, %v11445_v42  ;;  %v22399_v43 = vunpack.i.h.bf16 %v17108_v54 }
 0xa41   : > { %11823 = vrot.lane.b32.xlu0 %v22387_v1, %s12967_s26  ;;  %v22403_v1 = vld [vmem:[#allocation112_spill] sm:$0xff]  ;;  %v22416_v42 = vld [vmem:[#allocation218_spill] sm:$0xff] }
 0xa42   : > { %8985 = vmatpush1.bf16.msra.mxu0 %v22390_v39  ;;  %v22398_v39 = vunpack.i.h.bf16 %v16760_v27  ;;  %v22405_v44 = vpack.c.bf16 %v22403_v1, %v22404_v3  ;;  %v22410_v3 = vld [vmem:[#allocation111_spill] sm:$0xff] }
 0xa43   : > { %8987 = vmatprep.subr.bf16.mxu0 %v22393_v11  ;;  %11738 = vrot.lane.b32.xlu1 %v22396_v32, %s12954_s7  ;;  %v5902_v11 = vsel %vm1145_vm7, %v11450_v20, %v22399_v43  ;;  %v22400_v32 = vld [vmem:[#allocation101_spill] sm:$0xff]  ;;  %v17140_v19 = vpop.permute.xlu1 %11453 }
 0xa44   : > { %v5901_v9 = vsel %vm1145_vm7, %v22398_v39, %v11450_v20  ;;  %v22402_v37 = vpack.c.bf16 %v22400_v32, %v22401_v15  ;;  %v8946_v27 = vpack.c.bf16 %v5902_v11, %v5885_v45  ;;  %v17142_v39 = vpop.permute.xlu0 %11568  ;;  %v11455_v20 = vunpack.i.l.bf16 %v17140_v19  ;;  %v22406_v15 = vld [vmem:[#allocation39_spill] sm:$0xff] }
 0xa45   : > { %11828 = vrot.lane.b32.xlu0 %v17119_v7, %s12967_s26  ;;  %v8948_v60 = vpack.c.bf16 %v5901_v9, %v5884_v46  ;;  %v22407_v9 = vunpack.i.l.bf16 %v16947_v40  ;;  %v22408_v46 = vld [vmem:[#allocation47_spill] sm:$0xff] }
 0xa46   : > { %8989 = vmatpush1.bf16.msra.mxu0 %v22402_v37  ;;  %8947 = vmatprep.subr.bf16.mxu1 %v8946_v27  ;;  %v22409_v45 = vunpack.i.h.bf16 %v22408_v46  ;;  %v22413_v27 = vld [vmem:[#allocation122_spill] sm:$0xff]  ;;  %v22417_v46 = vld [vmem:[#allocation219_spill] sm:$0xff]  ;;  %v5918_v51 = vsel %vm1145_vm7, %v22422_v47, %v11455_v20 }
 0xa47   : > { %8991 = vmatprep.subr.bf16.mxu0 %v22405_v44  ;;  %11743 = vrot.lane.b32.xlu1 %v16691_v4, %s12954_s7  ;;  %v22411_v44 = vld [vmem:[#allocation106_spill] sm:$0xff]  ;;  %v17161_v4 = vpop.permute.xlu1 %11458 }
 0xa48   : > { %8949 = vmatpush1.bf16.msra.mxu1 %v8948_v60  ;;  %v4666_v43 = vsel %vm4643_vm9, %v22409_v45, %v22407_v9  ;;  %v22412_v1 = vpack.c.bf16 %v22410_v3, %v22411_v44  ;;  %v11460_v32 = vunpack.i.l.bf16 %v17161_v4  ;;  %v17165_v37 = vpop.permute.xlu0 %11573  ;;  %v22414_v60 = vld [vmem:[#allocation115_spill] sm:$0xff]  ;;  %v22418_v9 = vunpack.i.l.bf16 %v22309_v31 }
 0xa49   : > { %11843 = vrot.lane.b32.xlu0 %v22406_v15, %s12967_s26  ;;  %v22415_v22 = vpack.c.bf16 %v22413_v27, %v22414_v60  ;;  %v17172_v15 = vpack.i.bf16 %v22417_v46, %v22416_v42  ;;  %v22419_v45 = vld [vmem:[#allocation119_spill] sm:$0xff]  ;;  %v22424_v60 = vunpack.i.h.bf16 %v17140_v19 }
 0xa4a   : > { %8993 = vmatpush1.bf16.msra.mxu0 %v22412_v1  ;;  %v22420_v3 = vunpack.i.h.bf16 %v22419_v45  ;;  %v22421_v1 = vld [vmem:[#allocation160_spill] sm:$0xff] }
 0xa4b   : > { %8995 = vmatprep.subr.bf16.mxu0 %v22415_v22  ;;  %11748 = vrot.lane.b32.xlu1 %v22421_v1, %s12954_s7  ;;  %v22423_v22 = vunpack.i.h.bf16 %v16825_v53  ;;  %v5919_v45 = vsel %vm1145_vm7, %v11455_v20, %v22424_v60  ;;  %v17198_v47 = vpop.permute.xlu1 %11463 }
 0xa4c   : > { %v4649_v44 = vsel %vm4643_vm9, %v22420_v3, %v22418_v9  ;;  %v22425_v9 = vunpack.i.h.bf16 %v17161_v4  ;;  %v21468_v20 = vunpack.i.h.bf16 %v17198_v47  ;;  %v11465_v60 = vunpack.i.l.bf16 %v17198_v47 }
 0xa4d   : > { %v8998_v11 = vpack.c.bf16 %v4666_v43, %v4649_v44  ;;  %v5935_v27 = vsel %vm1145_vm7, %v22423_v22, %v11460_v32  ;;  %11848 = vrot.lane.b32.xlu0 %v17172_v15, %s12967_s26  ;;  %v22426_v43 = vld [vmem:[#allocation121_spill] sm:$0xff]  ;;  %v22427_v44 = vld [vmem:[#allocation114_spill] sm:$0xff]  ;;  %v17200_v22 = vpop.permute.xlu0 %11588 }
 0xa4e   : > { %v5936_v3 = vsel %vm1145_vm7, %v11460_v32, %v22425_v9  ;;  %v22428_v21 = vpack.c.bf16 %v22426_v43, %v22427_v44  ;;  %v8952_v1 = vpack.c.bf16 %v5935_v27, %v5918_v51  ;;  %22429 = vst [vmem:[#allocation52_spill] sm:$0xff] %v17200_v22  ;;  %v22430_v32 = vld [vmem:[#allocation224_spill] sm:$0xff]  ;;  %v22431_v9 = vpack.c.bf16 %v16402_v17, %v16391_v34 }
 0xa4f   : > { %v8950_v53 = vpack.c.bf16 %v5936_v3, %v5919_v45  ;;  %11753 = vrot.lane.b32.xlu1 %v16738_v35, %s12954_s7  ;;  %v17211_v51 = vpop.permute.xlu1 %11468  ;;  %v22432_v45 = vld [vmem:[#allocation43_spill] sm:$0xff]  ;;  %v22433_v3 = vld [vmem:[#allocation225_spill] sm:$0xff]  ;;  %v22434_v44 = vunpack.i.h.bf16 %v16856_v16  ;;  %v22435_v17 = vunpack.i.h.bf16 %v16820_v26 }
 0xa50   : > { %8997 = vmatpush1.bf16.msra.mxu0 %v22428_v21  ;;  %v11470_v27 = vunpack.i.l.bf16 %v17211_v51  ;;  %v17219_v43 = vpack.i.bf16 %v22433_v3, %v22432_v45 }
 0xa51   : > { %8999 = vmatprep.subr.bf16.mxu0 %v8998_v11  ;;  %8951 = vmatprep.subr.bf16.mxu1 %v8950_v53  ;;  %v21469_v11 = vunpack.i.h.bf16 %v17211_v51  ;;  %v17215_v35 = vpop.permute.xlu0 %11593  ;;  %v5952_v34 = vsel %vm1145_vm7, %v22434_v44, %v11465_v60  ;;  %v5953_v53 = vsel %vm1145_vm7, %v11465_v60, %v21468_v20  ;;  %v22437_v60 = vld [vmem:[#allocation231_spill] sm:$0xff] }
 0xa52   : > { %11863 = vrot.lane.b32.xlu0 %v22430_v32, %s12967_s26  ;;  %8953 = vmatpush1.bf16.msra.mxu1 %v8952_v1  ;;  %v5969_v21 = vsel %vm1145_vm7, %v22435_v17, %v11470_v27 }
 0xa53   : > { %11758 = vrot.lane.b32.xlu1 %v22255_v10, %s12954_s7  ;;  %v5970_v1 = vsel %vm1145_vm7, %v11470_v27, %v21469_v11  ;;  %v17237_v10 = vpop.permute.xlu1 %11473 }
 0xa54   : > { %9001 = vmatpush1.bf16.msra.mxu0 %v22431_v9  ;;  %v8954_v16 = vpack.c.bf16 %v5970_v1, %v5953_v53  ;;  %v8956_v9 = vpack.c.bf16 %v5969_v21, %v5952_v34  ;;  %v11475_v17 = vunpack.i.l.bf16 %v17237_v10  ;;  %v22438_v53 = vld [vmem:[#allocation13_spill] sm:$0xff]  ;;  %v22439_v1 = vld [vmem:[#allocation232_spill] sm:$0xff]  ;;  %v22442_v27 = vunpack.i.h.bf16 %v17237_v10 }
 0xa55   : > { %v17239_v44 = vpop.permute.xlu0 %11608 }
 0xa56   : > { %11868 = vrot.lane.b32.xlu0 %v17219_v43, %s12967_s26  ;;  %22436 = vst [vmem:[#allocation17_spill] sm:$0xff] %v17239_v44  ;;  %8955 = vmatprep.subr.bf16.mxu1 %v8954_v16  ;;  %v22440_v16 = vunpack.i.h.bf16 %v16846_v38  ;;  %v5987_v3 = vsel %vm1145_vm7, %v11475_v17, %v22442_v27  ;;  %v22447_v27 = vld [vmem:[#allocation30_spill] sm:$0xff] }
 0xa57   : > { %11763 = vrot.lane.b32.xlu1 %v16770_v2, %s12954_s7  ;;  %8957 = vmatpush1.bf16.msra.mxu1 %v8956_v9  ;;  %v17247_v20 = vpop.permute.xlu1 %11478  ;;  %v17255_v2 = vpack.i.bf16 %v22439_v1, %v22438_v53  ;;  %v22441_v9 = vunpack.i.h.bf16 %v16882_v28  ;;  %v22446_v28 = vld [vmem:[#allocation124_spill] sm:$0xff] }
 0xa58   : > { %v11480_v34 = vunpack.i.l.bf16 %v17247_v20  ;;  %v5986_v11 = vsel %vm1145_vm7, %v22440_v16, %v11475_v17  ;;  %v22443_v1 = vunpack.i.h.bf16 %v17247_v20  ;;  %v21470_v45 = vunpack.i.l.bf16 %v22446_v28 }
 0xa59   : > { %v17251_v21 = vpop.permute.xlu0 %11613 }
 0xa5a   : > { %11883 = vrot.lane.b32.xlu0 %v22437_v60, %s12967_s26  ;;  %v6003_v26 = vsel %vm1145_vm7, %v22441_v9, %v11480_v34  ;;  %v6004_v46 = vsel %vm1145_vm7, %v11480_v34, %v22443_v1  ;;  %v22451_v1 = vld [vmem:[#allocation187_spill] sm:$0xff]  ;;  %v22452_v9 = vld [vmem:[#allocation200_spill] sm:$0xff]  ;;  %v22454_v60 = vunpack.i.h.bf16 %v16875_v36 }
 0xa5b   : > { %11768 = vrot.lane.b32.xlu1 %v22260_v14, %s12954_s7  ;;  %v17273_v14 = vpop.permute.xlu1 %11483  ;;  %v8958_v38 = vpack.c.bf16 %v6004_v46, %v5987_v3  ;;  %v8960_v53 = vpack.c.bf16 %v6003_v26, %v5986_v11  ;;  %v22453_v46 = vunpack.i.h.bf16 %v16914_v58  ;;  %v22459_v58 = vunpack.i.h.bf16 %v16938_v57  ;;  %v22469_v57 = vld [vmem:[#allocation126_spill] sm:$0xff] }
 0xa5c   : > { %22444 = vst [vmem:[#allocation50_spill] sm:$0xff] %v17273_v14  ;;  %v11485_v17 = vunpack.i.l.bf16 %v17273_v14 }
 0xa5d   : > { %v17275_v16 = vpop.permute.xlu0 %11628  ;;  %8959 = vmatprep.subr.bf16.mxu1 %v8958_v38 }
 0xa5e   : > { %11888 = vrot.lane.b32.xlu0 %v17255_v2, %s12967_s26  ;;  %22445 = vst [vmem:[#allocation14_spill] sm:$0xff] %v17275_v16  ;;  %8961 = vmatpush1.bf16.msra.mxu1 %v8960_v53  ;;  %v6020_v42 = vsel %vm1145_vm7, %v22453_v46, %v11485_v17 }
 0xa5f   : > { %11773 = vrot.lane.b32.xlu1 %v16800_v8, %s12954_s7  ;;  %v17284_v34 = vpop.permute.xlu1 %11488  ;;  %v22450_v8 = vunpack.i.h.bf16 %v22295_v48 }
 0xa60   : > { %22448 = vst [vmem:[#allocation62_spill] sm:$0xff] %v17284_v34  ;;  %v11490_v11 = vunpack.i.l.bf16 %v17284_v34  ;;  %v22457_v38 = vunpack.i.h.bf16 %v17284_v34 }
 0xa61   : > { %v17288_v3 = vpop.permute.xlu0 %11633  ;;  %v17295_v26 = vsel %vm1145_vm7, %v22450_v8, %v21470_v45  ;;  %v22455_v8 = vld [vmem:[#allocation240_spill] sm:$0xff]  ;;  %v22456_v45 = vunpack.i.h.bf16 %v17273_v14 }
 0xa62   : > { %11918 = vrot.lane.b32.xlu0 %v22447_v27, %s12954_s7  ;;  %22449 = vst [vmem:[#allocation56_spill] sm:$0xff] %v17288_v3  ;;  %v6037_v48 = vsel %vm1145_vm7, %v22454_v60, %v11490_v11  ;;  %v6038_v53 = vsel %vm1145_vm7, %v11490_v11, %v22457_v38  ;;  %v22458_v32 = vunpack.i.l.bf16 %v17288_v3  ;;  %v22461_v60 = vld [vmem:[#allocation202_spill] sm:$0xff]  ;;  %v22463_v11 = vld [vmem:[#allocation241_spill] sm:$0xff] }
 0xa63   : > { %11793 = vrot.lane.b32.xlu1 %v22452_v9, %s12967_s26  ;;  %v6021_v27 = vsel %vm1145_vm7, %v11485_v17, %v22456_v45  ;;  %v17323_v36 = vpop.permute.xlu1 %11498  ;;  %v22462_v9 = vld [vmem:[#allocation203_spill] sm:$0xff]  ;;  %v8964_v14 = vpack.c.bf16 %v6037_v48, %v6020_v42  ;;  %v22464_v38 = vld [vmem:[#allocation242_spill] sm:$0xff]  ;;  %v22466_v42 = vunpack.i.l.bf16 %v22451_v1 }
 0xa64   : > { %v17321_v46 = vsel %vm1145_vm7, %v22459_v58, %v22458_v32  ;;  %22460 = vst [vmem:[#allocation136_spill] sm:$0xff] %v17323_v36  ;;  %v8962_v16 = vpack.c.bf16 %v6038_v53, %v6021_v27  ;;  %v21476_v45 = vunpack.i.h.bf16 %v17323_v36  ;;  %v21477_v17 = vunpack.i.l.bf16 %v17323_v36  ;;  %v22476_v53 = vld [vmem:[#allocation48_spill] sm:$0xff] }
 0xa65   : > { %v17329_v34 = vpop.permute.xlu0 %11638  ;;  %v17333_v3 = vpack.i.bf16 %v22464_v38, %v22463_v11  ;;  %v22465_v32 = vunpack.i.h.bf16 %v22451_v1 }
 0xa66   : > { %11923 = vrot.lane.b32.xlu0 %v22455_v8, %s12967_s26  ;;  %v11797_v8 = vpack.i.bf16 %v22462_v9, %v22461_v60  ;;  %8963 = vmatprep.subr.bf16.mxu1 %v8962_v16  ;;  %v17351_v48 = vsel %vm4643_vm9, %v21477_v17, %v21476_v45  ;;  %v22472_v17 = vld [vmem:[#allocation210_spill] sm:$0xff]  ;;  %v22477_v45 = vunpack.i.h.bf16 %v22476_v53  ;;  %v22478_v60 = vunpack.i.l.bf16 %v17014_v13 }
 0xa67   : > { %v17343_v27 = vsel %vm4643_vm9, %v22466_v42, %v22465_v32  ;;  %22468 = vst [vmem:[#allocation55_spill] sm:$0xff] %v17351_v48  ;;  %8965 = vmatpush1.bf16.msra.mxu1 %v8964_v14  ;;  %v17356_v58 = vpop.permute.xlu1 %11503  ;;  %v22470_v32 = vld [vmem:[#allocation16_spill] sm:$0xff]  ;;  %v22481_v16 = vunpack.i.l.bf16 %v17329_v34 }
 0xa68   : > { %11798 = vrot.lane.b32.xlu1 %v11797_v8, %s12967_s26  ;;  %22467 = vst [vmem:[#allocation57_spill] sm:$0xff] %v17343_v27  ;;  %v22471_v42 = vpack.c.bf16 %v22469_v57, %v22470_v32  ;;  %v21480_v38 = vunpack.i.l.bf16 %v17356_v58  ;;  %v22473_v57 = vld [vmem:[#allocation53_spill] sm:$0xff]  ;;  %v22474_v32 = vld [vmem:[#allocation15_spill] sm:$0xff] }
 0xa69   : > { %v17364_v9 = vpop.permute.xlu0 %11643 }
 0xa6a   : > { %11928 = vrot.lane.b32.xlu0 %v17333_v3, %s12967_s26  ;;  %9063 = vmatprep.subr.bf16.mxu1 %v22471_v42  ;;  %v22475_v42 = vpack.c.bf16 %v22473_v57, %v22474_v32  ;;  %v4683_v11 = vsel %vm4643_vm9, %v22477_v45, %v21480_v38  ;;  %v22484_v57 = vunpack.i.l.bf16 %v17364_v9  ;;  %v22485_v32 = vunpack.i.h.bf16 %v17010_v62 }
 0xa6b   : > { %6623 = vmatmul.mubr.f32.vlgmr.msra.gmra.mrb[22].mxu1 %v16989_v41  ;;  %v22479_v41 = vld [vmem:[#allocation325_spill] sm:$0xff]  ;;  %v17401_v45 = vpop.permute.xlu1 %11518 }
 0xa6c   : > { %11813 = vrot.lane.b32.xlu1 %v22472_v17, %s12967_s26  ;;  %9065 = vmatpush1.bf16.msra.mxu1 %v22475_v42  ;;  %v22480_v27 = vunpack.i.h.bf16 %v22479_v41  ;;  %v17399_v53 = vsel %vm1145_vm7, %v22485_v32, %v22484_v57  ;;  %v22487_v42 = vld [vmem:[#allocation133_spill] sm:$0xff]  ;;  %v22492_v57 = vunpack.i.l.bf16 %v16991_v18 }
 0xa6d   : > { %22486 = vst [vmem:[#allocation66_spill] sm:$0xff] %v17399_v53  ;;  %v22488_v41 = vpack.c.bf16 %v22487_v42, %v22269_v55  ;;  %v17410_v17 = vpop.permute.xlu0 %11648  ;;  %6835 = vmatprep.mubr.f32.mxu1 %v22361_v25  ;;  %v22491_v55 = vunpack.i.h.bf16 %v16991_v18  ;;  %v22495_v42 = vpack.c.bf16 %v16449_v59, %v16440_v5  ;;  %v10591_v59 = vunpack.i.h.bf16 %v22446_v28 }
 0xa6e   : > { %11938 = vrot.lane.b32.xlu0 %v17021_v6, %s12954_s7  ;;  %v4700_v14 = vsel %vm4643_vm9, %v22480_v27, %v22478_v60  ;;  %v22482_v6 = vunpack.i.h.bf16 %v16986_v24  ;;  %v22489_v60 = vld [vmem:[#allocation32_spill] sm:$0xff]  ;;  %v22490_v27 = vld [vmem:[#allocation211_spill] sm:$0xff] }
 0xa6f   : > { %9067 = vmatprep.subr.bf16.mxu1 %v22488_v41  ;;  %v11817_v38 = vpack.i.bf16 %v22490_v27, %v22489_v60  ;;  %v9002_v24 = vpack.c.bf16 %v4700_v14, %v4683_v11  ;;  %v17421_v11 = vsel %vm4643_vm9, %v22492_v57, %v22491_v55  ;;  %v22497_v55 = vld [vmem:[#allocation59_spill] sm:$0xff]  ;;  %v17439_v62 = vpop.permute.xlu1 %11523  ;;  %v22507_v60 = vunpack.i.l.bf16 %v17410_v17 }
 0xa70   : > { %v17392_v48 = vsel %vm1145_vm7, %v22482_v6, %v22481_v16  ;;  %v21481_v16 = vunpack.i.h.bf16 %v17401_v45  ;;  %v21482_v6 = vunpack.i.l.bf16 %v17401_v45  ;;  %22493 = vst [vmem:[#allocation67_spill] sm:$0xff] %v17421_v11  ;;  %v22511_v11 = vunpack.i.h.bf16 %v17060_v63  ;;  %v22519_v63 = vld [vmem:[#allocation151_spill] sm:$0xff] }
 0xa71   : > { %22483 = vst [vmem:[#allocation72_spill] sm:$0xff] %v17392_v48  ;;  %11818 = vrot.lane.b32.xlu1 %v11817_v38, %s12967_s26  ;;  %9003 = vmatprep.subr.bf16.mxu0 %v9002_v24  ;;  %v22496_v24 = vld [vmem:[#allocation63_spill] sm:$0xff]  ;;  %v22520_v48 = vld [vmem:[#allocation149_spill] sm:$0xff] }
 0xa72   : > { %v17429_v32 = vsel %vm4643_vm9, %v21482_v6, %v21481_v16  ;;  %11943 = vrot.lane.b32.xlu0 %v11797_v8, %s12954_s7  ;;  %9005 = vmatpush1.bf16.msra.mxu0 %v22495_v42  ;;  %v22498_v57 = vpack.c.bf16 %v22496_v24, %v22497_v55  ;;  %v21484_v16 = vunpack.i.l.bf16 %v17439_v62  ;;  %v17444_v6 = vpop.permute.xlu0 %11653  ;;  %v22499_v8 = vld [vmem:[#allocation142_spill] sm:$0xff]  ;;  %v22501_v42 = vld [vmem:[#allocation35_spill] sm:$0xff]  ;;  %v22508_v24 = vunpack.i.h.bf16 %v17044_v49 }
 0xa73   : > { %22494 = vst [vmem:[#allocation65_spill] sm:$0xff] %v17429_v32  ;;  %v22500_v27 = vpack.c.bf16 %v22499_v8, %v22279_v30  ;;  %v22505_v8 = vld [vmem:[#allocation169_spill] sm:$0xff] }
 0xa74   : > { %9069 = vmatpush1.bf16.msra.mxu1 %v22498_v57  ;;  %v22502_v57 = vld [vmem:[#allocation326_spill] sm:$0xff]  ;;  %v22506_v5 = vunpack.i.h.bf16 %v22505_v8  ;;  %v17472_v55 = vsel %vm1145_vm7, %v22508_v24, %v22507_v60  ;;  %v17484_v8 = vpop.permute.xlu1 %11538 }
 0xa75   : > { %9071 = vmatprep.subr.bf16.mxu1 %v22500_v27  ;;  %11833 = vrot.lane.b32.xlu1 %v22501_v42, %s12967_s26  ;;  %v22503_v14 = vunpack.i.h.bf16 %v22502_v57  ;;  %v22504_v27 = vunpack.i.l.bf16 %v17064_v56  ;;  %22509 = vst [vmem:[#allocation82_spill] sm:$0xff] %v17472_v55  ;;  %v21489_v60 = vunpack.i.h.bf16 %v17484_v8  ;;  %v22539_v55 = vld [vmem:[#allocation40_spill] sm:$0xff] }
 0xa76   : > { %11948 = vrot.lane.b32.xlu0 %v17071_v29, %s12954_s7  ;;  %v22510_v29 = vunpack.i.l.bf16 %v17444_v6  ;;  %v17490_v42 = vpop.permute.xlu0 %11658 }
 0xa77   : > { %v4717_v30 = vsel %vm4643_vm9, %v22503_v14, %v21484_v16  ;;  %v4734_v41 = vsel %vm4643_vm9, %v22506_v5, %v22504_v27  ;;  %v22513_v14 = vld [vmem:[#allocation73_spill] sm:$0xff]  ;;  %v22516_v5 = vld [vmem:[#allocation38_spill] sm:$0xff]  ;;  %22518 = vst [vmem:[#allocation145_spill] sm:$0xff] %v17490_v42 }
 0xa78   : > { %v17479_v57 = vsel %vm1145_vm7, %v22511_v11, %v22510_v29  ;;  %v22514_v16 = vld [vmem:[#allocation69_spill] sm:$0xff]  ;;  %v9006_v49 = vpack.c.bf16 %v4734_v41, %v4717_v30  ;;  %v22521_v11 = vpack.c.bf16 %v22519_v63, %v22520_v48  ;;  %v22523_v41 = vunpack.i.h.bf16 %v17046_v33  ;;  %v17522_v24 = vpop.permute.xlu1 %11543 }
 0xa79   : > { %22512 = vst [vmem:[#allocation76_spill] sm:$0xff] %v17479_v57  ;;  %v22515_v32 = vpack.c.bf16 %v22513_v14, %v22514_v16  ;;  %v22517_v27 = vld [vmem:[#allocation217_spill] sm:$0xff]  ;;  %v22524_v30 = vunpack.i.l.bf16 %v17046_v33  ;;  %v22526_v48 = vunpack.i.l.bf16 %v17484_v8 }
 0xa7a   : > { %v11837_v25 = vpack.i.bf16 %v22517_v27, %v22516_v5  ;;  %9007 = vmatprep.subr.bf16.mxu0 %v9006_v49  ;;  %11953 = vrot.lane.b32.xlu0 %v11817_v38, %s12954_s7  ;;  %v22529_v49 = vld [vmem:[#allocation328_spill] sm:$0xff]  ;;  %v22531_v5 = vld [vmem:[#allocation83_spill] sm:$0xff]  ;;  %v17528_v38 = vpop.permute.xlu0 %11663  ;;  %v22534_v57 = vld [vmem:[#allocation161_spill] sm:$0xff]  ;;  %v22541_v27 = vunpack.i.h.bf16 %v22309_v31  ;;  %v22544_v31 = vunpack.i.l.bf16 %v17112_v12 }
 0xa7b   : > { %9073 = vmatpush1.bf16.msra.mxu1 %v22515_v32  ;;  %v22522_v32 = vld [vmem:[#allocation192_spill] sm:$0xff]  ;;  %v17504_v14 = vsel %vm4643_vm9, %v22524_v30, %v22523_v41  ;;  %v17512_v63 = vsel %vm4643_vm9, %v22526_v48, %v21489_v60  ;;  %v22532_v41 = vld [vmem:[#allocation78_spill] sm:$0xff]  ;;  %v21492_v60 = vunpack.i.l.bf16 %v17522_v24  ;;  %v22540_v48 = vunpack.i.l.bf16 %v22451_v1 }
 0xa7c   : > { %9075 = vmatprep.subr.bf16.mxu1 %v22521_v11  ;;  %v10750_v29 = vunpack.i.l.bf16 %v22522_v32  ;;  %11838 = vrot.lane.b32.xlu1 %v11837_v25, %s12967_s26  ;;  %22525 = vst [vmem:[#allocation77_spill] sm:$0xff] %v17504_v14  ;;  %22527 = vst [vmem:[#allocation75_spill] sm:$0xff] %v17512_v63  ;;  %v22528_v11 = vld [vmem:[#allocation329_spill] sm:$0xff]  ;;  %v22533_v30 = vpack.c.bf16 %v22531_v5, %v22532_v41  ;;  %v22551_v14 = vunpack.i.h.bf16 %v17108_v54  ;;  %v22559_v54 = vld [vmem:[#allocation170_spill] sm:$0xff] }
 0xa7d   : > { %v22530_v16 = vpack.c.bf16 %v22528_v11, %v22529_v49  ;;  %v22535_v11 = vld [vmem:[#allocation164_spill] sm:$0xff]  ;;  %v22537_v49 = vunpack.i.l.bf16 %v22446_v28  ;;  %v22547_v28 = vunpack.i.l.bf16 %v17490_v42 }
 0xa7e   : > { %v17539_v41 = vsel %vm1145_vm7, %v10591_v59, %v10750_v29  ;;  %11958 = vrot.lane.b32.xlu0 %v17119_v7, %s12954_s7  ;;  %v22550_v7 = vunpack.i.l.bf16 %v17528_v38  ;;  %v17590_v53 = vpop.permute.xlu0 %11668 }
 0xa7f   : > { %9009 = vmatpush1.bf16.msra.mxu0 %v22530_v16  ;;  %9077 = vmatpush1.bf16.msra.mxu1 %v22533_v30  ;;  %v22536_v16 = vpack.c.bf16 %v22534_v57, %v22535_v11  ;;  %v17536_v5 = vsel %vm1145_vm7, %v22537_v49, %v10591_v59  ;;  %22538 = vst [vmem:[#allocation92_spill] sm:$0xff] %v17539_v41  ;;  %v22548_v11 = vunpack.i.h.bf16 %v17092_v52  ;;  %22558 = vst [vmem:[#allocation86_spill] sm:$0xff] %v17590_v53  ;;  %v22560_v41 = vld [vmem:[#allocation173_spill] sm:$0xff] }
 0xa80   : > { %11853 = vrot.lane.b32.xlu1 %v22539_v55, %s12967_s26  ;;  %v17549_v57 = vsel %vm4643_vm9, %v22541_v27, %v22540_v48  ;;  %v22545_v27 = vld [vmem:[#allocation178_spill] sm:$0xff] }
 0xa81   : > { %9079 = vmatprep.subr.bf16.mxu1 %v22536_v16  ;;  %v22542_v16 = vld [vmem:[#allocation327_spill] sm:$0xff]  ;;  %v22546_v48 = vunpack.i.h.bf16 %v22545_v27  ;;  %v17572_v59 = vsel %vm1145_vm7, %v22548_v11, %v22547_v28  ;;  %v17584_v27 = vpop.permute.xlu1 %11558 }
 0xa82   : > { %v22543_v49 = vunpack.i.h.bf16 %v22542_v16  ;;  %22549 = vst [vmem:[#allocation87_spill] sm:$0xff] %v17572_v59  ;;  %v17579_v16 = vsel %vm1145_vm7, %v22551_v14, %v22550_v7  ;;  %v21497_v28 = vunpack.i.h.bf16 %v17584_v27  ;;  %v21498_v11 = vunpack.i.l.bf16 %v17584_v27  ;;  %11963 = vrot.lane.b32.xlu0 %v11837_v25, %s12954_s7 }
 0xa83   : > { %v4768_v55 = vsel %vm4643_vm9, %v22546_v48, %v22544_v31  ;;  %22552 = vst [vmem:[#allocation91_spill] sm:$0xff] %v17579_v16  ;;  %v22556_v31 = vld [vmem:[#allocation44_spill] sm:$0xff]  ;;  %v22557_v48 = vld [vmem:[#allocation227_spill] sm:$0xff]  ;;  %v22561_v14 = vpack.c.bf16 %v22559_v54, %v22560_v41  ;;  %v22564_v7 = vunpack.i.l.bf16 %v17094_v23  ;;  %v22592_v59 = vunpack.i.h.bf16 %v17161_v4 }
 0xa84   : > { %v4751_v30 = vsel %vm4643_vm9, %v22543_v49, %v21492_v60  ;;  %v22553_v49 = vld [vmem:[#allocation88_spill] sm:$0xff]  ;;  %v22554_v60 = vld [vmem:[#allocation85_spill] sm:$0xff]  ;;  %v11857_v1 = vpack.i.bf16 %v22557_v48, %v22556_v31  ;;  %v22568_v54 = vld [vmem:[#allocation331_spill] sm:$0xff]  ;;  %v22605_v4 = vunpack.i.h.bf16 %v17142_v39 }
 0xa85   : > { %v22555_v63 = vpack.c.bf16 %v22553_v49, %v22554_v60  ;;  %v9010_v52 = vpack.c.bf16 %v4768_v55, %v4751_v30  ;;  %v22563_v30 = vunpack.i.h.bf16 %v17094_v23  ;;  %v22570_v60 = vld [vmem:[#allocation98_spill] sm:$0xff]  ;;  %v17626_v41 = vpop.permute.xlu1 %11563  ;;  %v22574_v31 = vld [vmem:[#allocation235_spill] sm:$0xff] }
 0xa86   : > { %11858 = vrot.lane.b32.xlu1 %v11857_v1, %s12967_s26  ;;  %v22573_v48 = vld [vmem:[#allocation234_spill] sm:$0xff]  ;;  %11968 = vrot.lane.b32.xlu0 %v17172_v15, %s12954_s7 }
 0xa87   : > { %9081 = vmatpush1.bf16.msra.mxu1 %v22555_v63  ;;  %9011 = vmatprep.subr.bf16.mxu0 %v9010_v52  ;;  %v22562_v63 = vunpack.i.h.bf16 %v22522_v32  ;;  %v17608_v49 = vsel %vm4643_vm9, %v22564_v7, %v22563_v30  ;;  %v17616_v52 = vsel %vm4643_vm9, %v21498_v11, %v21497_v28  ;;  %v22571_v30 = vld [vmem:[#allocation93_spill] sm:$0xff]  ;;  %v17630_v32 = vpack.i.bf16 %v22574_v31, %v22573_v48  ;;  %v17635_v11 = vpop.permute.xlu0 %11673 }
 0xa88   : > { %9083 = vmatprep.subr.bf16.mxu1 %v22561_v14  ;;  %22565 = vst [vmem:[#allocation102_spill] sm:$0xff] %v17608_v49  ;;  %22566 = vst [vmem:[#allocation97_spill] sm:$0xff] %v17616_v52  ;;  %v22572_v7 = vpack.c.bf16 %v22570_v60, %v22571_v30  ;;  %v11516_v60 = vunpack.i.h.bf16 %v17014_v13  ;;  %v22581_v31 = vld [vmem:[#allocation245_spill] sm:$0xff]  ;;  %v22585_v49 = vunpack.i.l.bf16 %v17165_v37  ;;  %v22589_v28 = vunpack.i.h.bf16 %v17140_v19 }
 0xa89   : > { %v17601_v55 = vsel %vm1145_vm7, %v10750_v29, %v22562_v63  ;;  %v22567_v29 = vld [vmem:[#allocation332_spill] sm:$0xff]  ;;  %22575 = vst [vmem:[#allocation154_spill] sm:$0xff] %v17635_v11  ;;  %v22591_v15 = vunpack.i.l.bf16 %v17635_v11  ;;  %v22598_v19 = vunpack.i.h.bf16 %v16947_v40  ;;  %v22601_v40 = vld [vmem:[#allocation247_spill] sm:$0xff] }
 0xa8a   : > { %v22569_v14 = vpack.c.bf16 %v22567_v29, %v22568_v54  ;;  %v22576_v29 = vld [vmem:[#allocation179_spill] sm:$0xff]  ;;  %v22577_v54 = vld [vmem:[#allocation182_spill] sm:$0xff]  ;;  %v22580_v63 = vld [vmem:[#allocation244_spill] sm:$0xff]  ;;  %11973 = vrot.lane.b32.xlu0 %v11857_v1, %s12954_s7  ;;  %v22617_v1 = vunpack.i.l.bf16 %v17401_v45 }
 0xa8b   : > { %9085 = vmatpush1.bf16.msra.mxu1 %v22572_v7  ;;  %v22579_v7 = vld [vmem:[#allocation228_spill] sm:$0xff]  ;;  %v17646_v48 = vpack.i.bf16 %v22581_v31, %v22580_v63  ;;  %v22588_v63 = vunpack.i.l.bf16 %v17590_v53  ;;  %v17688_v53 = vpop.permute.xlu0 %11678 }
 0xa8c   : > { %9013 = vmatpush1.bf16.msra.mxu0 %v22569_v14  ;;  %v22578_v14 = vpack.c.bf16 %v22576_v29, %v22577_v54  ;;  %11873 = vrot.lane.b32.xlu1 %v22579_v7, %s12967_s26  ;;  %v22582_v29 = vunpack.i.l.bf16 %v17626_v41  ;;  %v22583_v54 = vld [vmem:[#allocation330_spill] sm:$0xff]  ;;  %v22586_v7 = vld [vmem:[#allocation131_spill] sm:$0xff]  ;;  %v22615_v11 = vld [vmem:[#allocation116_spill] sm:$0xff] }
 0xa8d   : > { %v22587_v52 = vunpack.i.h.bf16 %v22586_v7  ;;  %v17667_v25 = vsel %vm1145_vm7, %v22589_v28, %v22588_v63  ;;  %v17679_v7 = vpop.permute.xlu1 %11578 }
 0xa8e   : > { %9087 = vmatprep.subr.bf16.mxu1 %v22578_v14  ;;  %v22584_v14 = vunpack.i.h.bf16 %v22583_v54  ;;  %22590 = vst [vmem:[#allocation101_spill] sm:$0xff] %v17667_v25  ;;  %v17674_v54 = vsel %vm1145_vm7, %v22592_v59, %v22591_v15  ;;  %v21512_v63 = vunpack.i.h.bf16 %v17679_v7  ;;  %v22599_v59 = vld [vmem:[#allocation189_spill] sm:$0xff]  ;;  %11978 = vrot.lane.b32.xlu0 %v17219_v43, %s12954_s7 }
 0xa8f   : > { %v4802_v31 = vsel %vm4643_vm9, %v22587_v52, %v22585_v49  ;;  %22593 = vst [vmem:[#allocation96_spill] sm:$0xff] %v17674_v54  ;;  %v22597_v52 = vunpack.i.l.bf16 %v17323_v36  ;;  %v22600_v15 = vpack.c.bf16 %v15164_v61, %v22599_v59  ;;  %v22606_v61 = vunpack.i.l.bf16 %v17142_v39  ;;  %v22614_v54 = vld [vmem:[#allocation117_spill] sm:$0xff] }
 0xa90   : > { %v4785_v30 = vsel %vm4643_vm9, %v22584_v14, %v22582_v29  ;;  %v22594_v29 = vld [vmem:[#allocation108_spill] sm:$0xff]  ;;  %v22595_v14 = vld [vmem:[#allocation103_spill] sm:$0xff]  ;;  %11878 = vrot.lane.b32.xlu1 %v17630_v32, %s12967_s26  ;;  %v22616_v42 = vpack.c.bf16 %v22614_v54, %v22615_v11  ;;  %v11526_v11 = vunpack.i.h.bf16 %v17439_v62 }
 0xa91   : > { %v22596_v16 = vpack.c.bf16 %v22594_v29, %v22595_v14  ;;  %v9014_v49 = vpack.c.bf16 %v4802_v31, %v4785_v30  ;;  %v4668_v28 = vsel %vm4643_vm9, %v22598_v19, %v22597_v52  ;;  %v11506_v31 = vunpack.i.h.bf16 %v17356_v58  ;;  %v22602_v30 = vld [vmem:[#allocation248_spill] sm:$0xff]  ;;  %v22603_v14 = vld [vmem:[#allocation253_spill] sm:$0xff]  ;;  %v22604_v52 = vld [vmem:[#allocation254_spill] sm:$0xff] }
 0xa92   : > { %v17707_v59 = vsel %vm4643_vm9, %v22606_v61, %v22605_v4  ;;  %v22610_v29 = vld [vmem:[#allocation335_spill] sm:$0xff]  ;;  %v22611_v19 = vld [vmem:[#allocation334_spill] sm:$0xff]  ;;  %v9094_v25 = vpack.c.bf16 %v4668_v28, %v17549_v57  ;;  %v22613_v4 = vunpack.i.l.bf16 %v17014_v13  ;;  %v11536_v57 = vunpack.i.h.bf16 %v17064_v56  ;;  %v22618_v54 = vld [vmem:[#allocation236_spill] sm:$0xff]  ;;  %11983 = vrot.lane.b32.xlu0 %v17630_v32, %s12954_s7 }
 0xa93   : > { %9089 = vmatpush1.bf16.msra.mxu1 %v22596_v16  ;;  %9015 = vmatprep.subr.bf16.mxu0 %v9014_v49  ;;  %22607 = vst [vmem:[#allocation112_spill] sm:$0xff] %v17707_v59  ;;  %v22608_v16 = vunpack.i.l.bf16 %v17679_v7  ;;  %v22612_v36 = vpack.c.bf16 %v22610_v29, %v22611_v19  ;;  %v11556_v13 = vunpack.i.h.bf16 %v17112_v12  ;;  %v17740_v19 = vpop.permute.xlu0 %11683  ;;  %v22624_v59 = vld [vmem:[#allocation140_spill] sm:$0xff] }
 0xa94   : > { %9091 = vmatprep.subr.bf16.mxu1 %v22600_v15  ;;  %v4701_v61 = vsel %vm4643_vm9, %v22613_v4, %v11516_v60  ;;  %11893 = vrot.lane.b32.xlu1 %v22618_v54, %s12967_s26  ;;  %v22619_v4 = vunpack.i.l.bf16 %v16991_v18  ;;  %v22623_v54 = vunpack.i.l.bf16 %v17215_v35  ;;  %v22628_v43 = vunpack.i.l.bf16 %v17740_v19 }
 0xa95   : > { %v17715_v49 = vsel %vm4643_vm9, %v22608_v16, %v21512_v63  ;;  %9017 = vmatpush1.bf16.msra.mxu0 %v22612_v36  ;;  %v17729_v16 = vpop.permute.xlu1 %11583  ;;  %v4702_v63 = vsel %vm4643_vm9, %v11516_v60, %v22617_v1  ;;  %v22620_v36 = vunpack.i.l.bf16 %v17356_v58  ;;  %v22626_v58 = vunpack.i.l.bf16 %v17688_v53 }
 0xa96   : > { %22609 = vst [vmem:[#allocation107_spill] sm:$0xff] %v17715_v49  ;;  %v21515_v29 = vunpack.i.l.bf16 %v17729_v16  ;;  %v4685_v1 = vsel %vm4643_vm9, %v11506_v31, %v22619_v4  ;;  %v22625_v49 = vunpack.i.h.bf16 %v22624_v59  ;;  %11988 = vrot.lane.b32.xlu0 %v17255_v2, %s12954_s7 }
 0xa97   : > { %9093 = vmatpush1.bf16.msra.mxu1 %v22616_v42  ;;  %v4684_v28 = vsel %vm4643_vm9, %v22620_v36, %v11506_v31  ;;  %v22621_v42 = vld [vmem:[#allocation333_spill] sm:$0xff]  ;;  %v22627_v31 = vunpack.i.h.bf16 %v17198_v47 }
 0xa98   : > { %9095 = vmatprep.subr.bf16.mxu1 %v9094_v25  ;;  %v9098_v25 = vpack.c.bf16 %v4702_v63, %v4685_v1  ;;  %v22622_v15 = vunpack.i.h.bf16 %v22621_v42  ;;  %v4836_v4 = vsel %vm4643_vm9, %v22625_v49, %v22623_v54  ;;  %v22629_v63 = vunpack.i.h.bf16 %v17211_v51  ;;  %v22631_v1 = vld [vmem:[#allocation120_spill] sm:$0xff]  ;;  %11898 = vrot.lane.b32.xlu1 %v17646_v48, %s12967_s26 }
 0xa99   : > { %v17770_v36 = vsel %vm1145_vm7, %v22627_v31, %v22626_v58  ;;  %v17782_v59 = vpop.permute.xlu1 %11598  ;;  %v22634_v54 = vunpack.i.l.bf16 %v17484_v8  ;;  %v22635_v58 = vunpack.i.l.bf16 %v17064_v56  ;;  %v11546_v56 = vunpack.i.h.bf16 %v17522_v24 }
 0xa9a   : > { %v4819_v60 = vsel %vm4643_vm9, %v22622_v15, %v21515_v29  ;;  %v17777_v42 = vsel %vm1145_vm7, %v22629_v63, %v22628_v43  ;;  %v22630_v15 = vld [vmem:[#allocation342_spill] sm:$0xff]  ;;  %22633 = vst [vmem:[#allocation47_spill] sm:$0xff] %v17782_v59  ;;  %v21516_v51 = vunpack.i.h.bf16 %v17782_v59  ;;  %v21517_v43 = vunpack.i.l.bf16 %v17782_v59  ;;  %v17792_v63 = vpop.permute.xlu0 %11688  ;;  %11993 = vrot.lane.b32.xlu0 %v17646_v48, %s12954_s7 }
 0xa9b   : > { %v22632_v29 = vpack.c.bf16 %v22630_v15, %v22631_v1  ;;  %v9018_v49 = vpack.c.bf16 %v4836_v4, %v4819_v60  ;;  %v4736_v47 = vsel %vm4643_vm9, %v11536_v57, %v22634_v54  ;;  %v4735_v31 = vsel %vm4643_vm9, %v22635_v58, %v11536_v57  ;;  %v22679_v48 = vld [vmem:[#allocation26_spill] sm:$0xff] }
 0xa9c   : > { %v22636_v60 = vunpack.i.h.bf16 %v17200_v22  ;;  %v22637_v4 = vunpack.i.l.bf16 %v17200_v22  ;;  %v9100_v57 = vpack.c.bf16 %v4701_v61, %v4684_v28  ;;  %v22639_v1 = vunpack.i.l.bf16 %v17046_v33  ;;  %v22642_v61 = vld [vmem:[#allocation338_spill] sm:$0xff]  ;;  %v22643_v28 = vld [vmem:[#allocation337_spill] sm:$0xff] }
 0xa9d   : > { %9097 = vmatpush1.bf16.msra.mxu1 %v22632_v29  ;;  %9019 = vmatprep.subr.bf16.mxu0 %v9018_v49  ;;  %v22640_v58 = vunpack.i.l.bf16 %v17439_v62  ;;  %v22644_v49 = vpack.c.bf16 %v22642_v61, %v22643_v28  ;;  %v11576_v61 = vunpack.i.h.bf16 %v17165_v37 }
 0xa9e   : > { %9099 = vmatprep.subr.bf16.mxu1 %v9098_v25  ;;  %v17801_v15 = vsel %vm4643_vm9, %v22637_v4, %v22636_v60  ;;  %v4719_v25 = vsel %vm4643_vm9, %v11526_v11, %v22639_v1  ;;  %v17818_v60 = vsel %vm4643_vm9, %v21517_v43, %v21516_v51  ;;  %v22645_v1 = vunpack.i.l.bf16 %v17112_v12  ;;  %v17840_v28 = vpop.permute.xlu0 %11693  ;;  %11998 = vrot.lane.b32.xlu0 %v17333_v3, %s12954_s7 }
 0xa9f   : > { %22638 = vst [vmem:[#allocation111_spill] sm:$0xff] %v17801_v15  ;;  %v4718_v29 = vsel %vm4643_vm9, %v22640_v58, %v11526_v11  ;;  %22641 = vst [vmem:[#allocation106_spill] sm:$0xff] %v17818_v60  ;;  %9021 = vmatpush1.bf16.msra.mxu0 %v22644_v49  ;;  %v9102_v4 = vpack.c.bf16 %v4736_v47, %v4719_v25  ;;  %v17829_v58 = vpop.permute.xlu1 %11603  ;;  %v22646_v51 = vunpack.i.l.bf16 %v17584_v27  ;;  %v22649_v47 = vunpack.i.l.bf16 %v17522_v24  ;;  %v22650_v11 = vld [vmem:[#allocation336_spill] sm:$0xff] }
 0xaa0   : > { %v4769_v62 = vsel %vm4643_vm9, %v22645_v1, %v11556_v13  ;;  %v21518_v25 = vunpack.i.l.bf16 %v17829_v58  ;;  %v22648_v1 = vunpack.i.l.bf16 %v17094_v23  ;;  %v22651_v49 = vunpack.i.h.bf16 %v22650_v11 }
 0xaa1   : > { %9101 = vmatpush1.bf16.msra.mxu1 %v9100_v57  ;;  %v4770_v43 = vsel %vm4643_vm9, %v11556_v13, %v22646_v51  ;;  %v11566_v57 = vunpack.i.h.bf16 %v17626_v41  ;;  %v22647_v13 = vld [vmem:[#allocation188_spill] sm:$0xff]  ;;  %v9104_v51 = vpack.c.bf16 %v4735_v31, %v4718_v29  ;;  %v4752_v12 = vsel %vm4643_vm9, %v22649_v47, %v11546_v56  ;;  %v22653_v29 = vld [vmem:[#allocation49_spill] sm:$0xff] }
 0xaa2   : > { %9103 = vmatprep.subr.bf16.mxu1 %v9102_v4  ;;  %11903 = vrot.lane.b32.xlu1 %v22647_v13, %s12954_s7  ;;  %v4753_v32 = vsel %vm4643_vm9, %v11546_v56, %v22648_v1  ;;  %v4853_v54 = vsel %vm4643_vm9, %v22651_v49, %v21518_v25  ;;  %v22652_v31 = vunpack.i.l.bf16 %v17251_v21  ;;  %v22654_v13 = vunpack.i.h.bf16 %v22653_v29  ;;  %v22666_v25 = vld [vmem:[#allocation195_spill] sm:$0xff] }
 0xaa3   : > { %v9106_v4 = vpack.c.bf16 %v4770_v43, %v4753_v32  ;;  %v22655_v24 = vunpack.i.l.bf16 %v17792_v63  ;;  %v22656_v56 = vunpack.i.h.bf16 %v17237_v10  ;;  %v22657_v2 = vunpack.i.l.bf16 %v17840_v28  ;;  %v17878_v32 = vpop.permute.xlu1 %11618 }
 0xaa4   : > { %v4870_v1 = vsel %vm4643_vm9, %v22654_v13, %v22652_v31  ;;  %v22658_v43 = vunpack.i.h.bf16 %v17247_v20  ;;  %22659 = vst [vmem:[#allocation122_spill] sm:$0xff] %v17878_v32  ;;  %v22660_v31 = vunpack.i.l.bf16 %v17679_v7  ;;  %v11596_v10 = vunpack.i.h.bf16 %v17215_v35 }
 0xaa5   : > { %v17869_v47 = vsel %vm1145_vm7, %v22656_v56, %v22655_v24  ;;  %9105 = vmatpush1.bf16.msra.mxu1 %v9104_v51  ;;  %v9022_v49 = vpack.c.bf16 %v4870_v1, %v4853_v54  ;;  %v11620_v24 = vunpack.i.l.bf16 %v17878_v32  ;;  %v17886_v56 = vpop.permute.xlu0 %11698  ;;  %v22661_v51 = vunpack.i.h.bf16 %v17239_v44 }
 0xaa6   : > { %v17876_v11 = vsel %vm1145_vm7, %v22658_v43, %v22657_v2  ;;  %v4804_v29 = vsel %vm4643_vm9, %v11576_v61, %v22660_v31  ;;  %9107 = vmatprep.subr.bf16.mxu1 %v9106_v4  ;;  %v22662_v54 = vunpack.i.l.bf16 %v17239_v44  ;;  %v11586_v2 = vunpack.i.h.bf16 %v17729_v16 }
 0xaa7   : > { %v22664_v43 = vpack.i.bf16 %v16977_v0, %v22321_v50  ;;  %9023 = vmatprep.subr.bf16.mxu0 %v9022_v49  ;;  %v9108_v31 = vpack.c.bf16 %v4769_v62, %v4752_v12  ;;  %v22665_v4 = vunpack.i.l.bf16 %v17142_v39  ;;  %v22667_v15 = vunpack.i.l.bf16 %v17626_v41  ;;  %v22670_v49 = vld [vmem:[#allocation341_spill] sm:$0xff]  ;;  %v22671_v62 = vld [vmem:[#allocation340_spill] sm:$0xff]  ;;  %v17920_v13 = vpop.permute.xlu1 %11623 }
 0xaa8   : > { %v17895_v1 = vsel %vm4643_vm9, %v22662_v54, %v22661_v51  ;;  %v22668_v54 = vunpack.i.h.bf16 %v17878_v32  ;;  %v22672_v12 = vpack.c.bf16 %v22670_v49, %v22671_v62  ;;  %v22673_v41 = vunpack.i.l.bf16 %v17782_v59  ;;  %v22678_v62 = vld [vmem:[#allocation14_spill] sm:$0xff] }
 0xaa9   : > { %22663 = vst [vmem:[#allocation115_spill] sm:$0xff] %v17895_v1  ;;  %11908 = vrot.lane.b32.xlu1 %v22664_v43, %s12954_s7  ;;  %v4787_v20 = vsel %vm4643_vm9, %v11566_v57, %v22665_v4  ;;  %v4786_v51 = vsel %vm4643_vm9, %v22667_v15, %v11566_v57  ;;  %9109 = vmatpush1.bf16.msra.mxu1 %v9108_v31  ;;  %v22674_v57 = vld [vmem:[#allocation249_spill] sm:$0xff]  ;;  %v22676_v32 = vunpack.i.l.bf16 %v17165_v37  ;;  %v11616_v31 = vunpack.i.h.bf16 %v17251_v21  ;;  %v17937_v4 = vpop.permute.xlu0 %11703 }
 0xaaa   : > { %v17912_v60 = vsel %vm4643_vm9, %v11620_v24, %v22668_v54  ;;  %9025 = vmatpush1.bf16.msra.mxu0 %v22672_v12  ;;  %v9110_v43 = vpack.c.bf16 %v4804_v29, %v4787_v20  ;;  %v4838_v15 = vsel %vm4643_vm9, %v11596_v10, %v22673_v41  ;;  %v22675_v54 = vld [vmem:[#allocation89_spill] sm:$0xff]  ;;  %v22677_v29 = vunpack.i.l.bf16 %v17215_v35 }
 0xaab   : > { %22669 = vst [vmem:[#allocation119_spill] sm:$0xff] %v17912_v60  ;;  %v4803_v49 = vsel %vm4643_vm9, %v22676_v32, %v11576_v61  ;;  %v11606_v41 = vunpack.i.h.bf16 %v17829_v58  ;;  %v22680_v61 = vunpack.i.l.bf16 %v17200_v22  ;;  %v11630_v32 = vunpack.i.l.bf16 %v22678_v62 }
 0xaac   : > { %v4837_v20 = vsel %vm4643_vm9, %v22677_v29, %v11596_v10  ;;  %9111 = vmatprep.subr.bf16.mxu1 %v9110_v43  ;;  %v9112_v37 = vpack.c.bf16 %v4803_v49, %v4786_v51  ;;  %v22681_v10 = vld [vmem:[#allocation56_spill] sm:$0xff]  ;;  %v22682_v12 = vunpack.i.l.bf16 %v17729_v16  ;;  %v22683_v1 = vunpack.i.l.bf16 %v17886_v56  ;;  %v22687_v29 = vld [vmem:[#allocation62_spill] sm:$0xff] }
 0xaad   : > { %11913 = vrot.lane.b32.xlu1 %v22679_v48, %s12954_s7  ;;  %v4821_v35 = vsel %vm4643_vm9, %v11586_v2, %v22680_v61  ;;  %v22684_v48 = vld [vmem:[#allocation50_spill] sm:$0xff]  ;;  %v11625_v61 = vunpack.i.l.bf16 %v17920_v13  ;;  %v22686_v60 = vunpack.i.l.bf16 %v17937_v4  ;;  %v22688_v59 = vunpack.i.h.bf16 %v22687_v29 }
 0xaae   : > { %v4820_v43 = vsel %vm4643_vm9, %v22682_v12, %v11586_v2  ;;  %v9114_v0 = vpack.c.bf16 %v4838_v15, %v4821_v35  ;;  %v22685_v51 = vunpack.i.h.bf16 %v22684_v48  ;;  %9113 = vmatpush1.bf16.msra.mxu1 %v9112_v37  ;;  %v11709_v2 = vpop.permute.xlu1 %11708  ;;  %v4872_v3 = vsel %vm4643_vm9, %v11616_v31, %v11620_v24  ;;  %v17970_v48 = vpop.permute.xlu0 %11778 }
 0xaaf   : > { %v17966_v16 = vsel %vm1145_vm7, %v22688_v59, %v22686_v60  ;;  %v11711_v12 = vunpack.i.h.bf16 %v11709_v2  ;;  %v11710_v35 = vunpack.i.l.bf16 %v11709_v2  ;;  %22689 = vst [vmem:[#allocation160_spill] sm:$0xff] %v17970_v48  ;;  %v11780_v29 = vunpack.i.l.bf16 %v17970_v48  ;;  %v22690_v59 = vld [vmem:[#allocation246_spill] sm:$0xff] }
 0xab0   : > { %v17958_v49 = vsel %vm1145_vm7, %v22685_v51, %v22683_v1  ;;  %9115 = vmatprep.subr.bf16.mxu1 %v9114_v0  ;;  %v11626_v51 = vunpack.i.h.bf16 %v17920_v13  ;;  %v9116_v60 = vpack.c.bf16 %v4837_v20, %v4820_v43  ;;  %v22691_v24 = vunpack.i.l.bf16 %v17239_v44  ;;  %v22694_v13 = vld [vmem:[#allocation37_spill] sm:$0xff] }
 0xab1   : > { %11933 = vrot.lane.b32.xlu1 %v22690_v59, %s12967_s26  ;;  %v22692_v2 = vunpack.i.l.bf16 %v17251_v21  ;;  %v22693_v0 = vunpack.i.l.bf16 %v17829_v58  ;;  %v22695_v48 = vpack.i.bf16 %v22601_v40, %v22694_v13  ;;  %v22696_v20 = vunpack.i.h.bf16 %v22681_v10  ;;  %v22698_v58 = vld [vmem:[#allocation339_spill] sm:$0xff] }
 0xab2   : > { %v4855_v37 = vsel %vm4643_vm9, %v11606_v41, %v22691_v24  ;;  %v22697_v43 = vunpack.i.l.bf16 %v22681_v10  ;;  %9117 = vmatpush1.bf16.msra.mxu1 %v9116_v60  ;;  %v4889_v21 = vsel %vm4643_vm9, %v11626_v51, %v11630_v32 }
 0xab3   : > { %v4871_v15 = vsel %vm4643_vm9, %v22692_v2, %v11616_v31  ;;  %v4854_v1 = vsel %vm4643_vm9, %v22693_v0, %v11606_v41  ;;  %12003 = vrot.lane.b32.xlu0 %v22695_v48, %s12954_s7  ;;  %v9118_v22 = vpack.c.bf16 %v4872_v3, %v4855_v37  ;;  %v17997_v31 = vpop.permute.xlu1 %11713  ;;  %v22699_v2 = vunpack.i.h.bf16 %v22698_v58  ;;  %v22700_v0 = vld [vmem:[#allocation125_spill] sm:$0xff] }
 0xab4   : > { %v5802_v24 = vsel %vm1145_vm7, %v22697_v43, %v22696_v20  ;;  %v22701_v59 = vunpack.i.h.bf16 %v22700_v0  ;;  %v4906_v3 = vsel %vm4643_vm9, %v11710_v35, %v11711_v12  ;;  %v22702_v37 = vunpack.i.h.bf16 %v22678_v62  ;;  %v18013_v43 = vpop.permute.xlu0 %11783 }
 0xab5   : > { %v4887_v41 = vsel %vm4643_vm9, %v22699_v2, %v11625_v61  ;;  %v11715_v60 = vunpack.i.l.bf16 %v17997_v31  ;;  %22703 = vst [vmem:[#allocation121_spill] sm:$0xff] %v18013_v43  ;;  %9119 = vmatprep.subr.bf16.mxu1 %v9118_v22  ;;  %v21531_v2 = vunpack.i.l.bf16 %v18013_v43  ;;  %v9120_v0 = vpack.c.bf16 %v4871_v15, %v4854_v1 }
 0xab6   : > { %v4904_v48 = vsel %vm4643_vm9, %v22701_v59, %v11780_v29  ;;  %v18009_v13 = vsel %vm4643_vm9, %v11630_v32, %v22702_v37  ;;  %v22704_v59 = vpack.i.bf16 %v22602_v30, %v22601_v40  ;;  %v22705_v37 = vunpack.i.h.bf16 %v17364_v9 }
 0xab7   : > { %v9026_v58 = vpack.c.bf16 %v4904_v48, %v4887_v41  ;;  %v22706_v20 = vunpack.i.l.bf16 %v17364_v9  ;;  %v4905_v22 = vsel %vm4643_vm9, %v11780_v29, %v11710_v35  ;;  %v22707_v41 = vld [vmem:[#allocation252_spill] sm:$0xff]  ;;  %v9030_v15 = vpack.c.bf16 %v5802_v24, %v17536_v5  ;;  %9121 = vmatpush1.bf16.msra.mxu1 %v9120_v0  ;;  %v18042_v35 = vpop.permute.xlu1 %11718 }
 0xab8   : > { %12013 = vrot.lane.b32.xlu1 %v22704_v59, %s12967_s26  ;;  %v22708_v48 = vpack.i.bf16 %v22603_v14, %v22707_v41  ;;  %v9122_v1 = vpack.c.bf16 %v4906_v3, %v4889_v21  ;;  %v21532_v32 = vunpack.i.l.bf16 %v22666_v25  ;;  %v18037_v59 = vsel %vm4643_vm9, %v11711_v12, %v21531_v2  ;;  %v22732_v0 = vld [vmem:[#allocation200_spill] sm:$0xff] }
 0xab9   : > { %v5836_v62 = vsel %vm1145_vm7, %v22706_v20, %v22705_v37  ;;  %9027 = vmatprep.subr.bf16.mxu0 %v9026_v58  ;;  %v22709_v20 = vld [vmem:[#allocation191_spill] sm:$0xff]  ;;  %v22712_v29 = vunpack.i.h.bf16 %v17329_v34  ;;  %v22713_v58 = vunpack.i.l.bf16 %v17329_v34  ;;  %v22714_v24 = vunpack.i.h.bf16 %v17997_v31 }
 0xaba   : > { %12008 = vrot.lane.b32.xlu0 %v22708_v48, %s12954_s7  ;;  %v22710_v37 = vld [vmem:[#allocation123_spill] sm:$0xff]  ;;  %v21538_v12 = vunpack.i.h.bf16 %v17410_v17  ;;  %v4888_v3 = vsel %vm4643_vm9, %v11625_v61, %v11626_v51  ;;  %v18054_v48 = vpop.permute.xlu0 %11788  ;;  %9123 = vmatprep.subr.bf16.mxu1 %v9122_v1  ;;  %v22717_v51 = vunpack.i.h.bf16 %v22681_v10  ;;  %v22718_v1 = vpack.i.bf16 %v22675_v54, %v22674_v57 }
 0xabb   : > { %v22711_v44 = vpack.c.bf16 %v22709_v20, %v22710_v37  ;;  %v5819_v5 = vsel %vm1145_vm7, %v22713_v58, %v22712_v29  ;;  %v5804_v21 = vsel %vm1145_vm7, %v11715_v60, %v22714_v24  ;;  %22715 = vst [vmem:[#allocation114_spill] sm:$0xff] %v18054_v48  ;;  %v11720_v20 = vunpack.i.l.bf16 %v18042_v35 }
 0xabc   : > { %v21533_v37 = vunpack.i.h.bf16 %v18054_v48  ;;  %v21534_v29 = vunpack.i.l.bf16 %v18054_v48  ;;  %v22716_v58 = vpack.i.bf16 %v22604_v52, %v22603_v14  ;;  %v9124_v61 = vpack.c.bf16 %v4905_v22, %v4888_v3  ;;  %v22735_v14 = vld [vmem:[#allocation154_spill] sm:$0xff] }
 0xabd   : > { %9029 = vmatpush1.bf16.msra.mxu0 %v22711_v44  ;;  %v9034_v44 = vpack.c.bf16 %v5836_v62, %v5819_v5  ;;  %v18073_v5 = vld [vmem:[#allocation9] sm:$0x77]  ;;  %v9126_v24 = vpack.c.bf16 %v5804_v21, %v17601_v55  ;;  %v22721_v22 = vunpack.i.l.bf16 %v17444_v6  ;;  %v22725_v21 = vpack.c.bf16 %v17321_v46, %v17295_v26 }
 0xabe   : > { %9031 = vmatprep.subr.bf16.mxu0 %v9030_v15  ;;  %12018 = vrot.lane.b32.xlu1 %v22716_v58, %s12967_s26  ;;  %v5803_v15 = vsel %vm1145_vm7, %v22717_v51, %v11715_v60  ;;  %22719 = vst [vmem:[#allocation124_spill] sm:$0xff] %v18073_v5  ;;  %v22720_v58 = vunpack.i.h.bf16 %v17444_v6  ;;  %v22722_v60 = vunpack.i.h.bf16 %v22666_v25  ;;  %v18095_v55 = vsel %vm4643_vm9, %v21534_v29, %v21533_v37 }
 0xabf   : > { %12053 = vrot.lane.b32.xlu0 %v22718_v1, %s12967_s26  ;;  %22724 = vst [vmem:[#allocation126_spill] sm:$0xff] %v18095_v55  ;;  %9125 = vmatpush1.bf16.msra.mxu1 %v9124_v61  ;;  %v18100_v1 = vpop.permute.xlu1 %11723  ;;  %v22729_v37 = vunpack.i.l.bf16 %v17410_v17  ;;  %v22730_v61 = vld [vmem:[#allocation145_spill] sm:$0xff]  ;;  %v22731_v29 = vunpack.i.h.bf16 %v17329_v34  ;;  %v22734_v40 = vmov 0.0   ;;  %v22737_v34 = vunpack.i.h.bf16 %v18042_v35 }
 0xac0   : > { %6694 = vmatmul.mubr.f32.vlgmr.msra.gmra.mrb[20].mxu0 %v18073_v5  ;;  %v5870_v10 = vsel %vm1145_vm7, %v22721_v22, %v22720_v58  ;;  %v18087_v3 = vsel %vm4643_vm9, %v21532_v32, %v22722_v60  ;;  %v22726_v58 = vld [vmem:[#allocation250_spill] sm:$0xff]  ;;  %v22727_v22 = vld [vmem:[#allocation95_spill] sm:$0xff]  ;;  %v11725_v2 = vunpack.i.l.bf16 %v18100_v1  ;;  %v18106_v32 = vpop.permute.xlu0 %11803  ;;  %9127 = vmatprep.subr.bf16.mxu1 %v9126_v24 }
 0xac1   : > { %22723 = vst [vmem:[#allocation30_spill] sm:$0xff] %v18087_v3  ;;  %9033 = vmatpush1.bf16.msra.mxu0 %v22725_v21  ;;  %v12057_v60 = vpack.i.bf16 %v22727_v22, %v22726_v58  ;;  %22728 = vst [vmem:[#allocation16_spill] sm:$0xff] %v18106_v32  ;;  %v5853_v26 = vsel %vm1145_vm7, %v22729_v37, %v21538_v12  ;;  %v5820_v51 = vsel %vm1145_vm7, %v22731_v29, %v11720_v20  ;;  %v22866_v58 = vld [vmem:[#allocation163_spill] sm:$0xff] }
 0xac2   : > { %9035 = vmatprep.subr.bf16.mxu0 %v9034_v44  ;;  %12023 = vrot.lane.b32.xlu1 %v22732_v0, %s12954_s7  ;;  %v22733_v44 = vld [vmem:[#allocation92_spill] sm:$0xff]  ;;  %v9038_v62 = vpack.c.bf16 %v5870_v10, %v5853_v26  ;;  %v22736_v37 = vunpack.i.h.bf16 %v17364_v9  ;;  %v5821_v29 = vsel %vm1145_vm7, %v11720_v20, %v22737_v34  ;;  %v22738_v0 = vunpack.i.h.bf16 %v18100_v1  ;;  %v22739_v10 = vld [vmem:[#allocation66_spill] sm:$0xff] }
 0xac3   : > { %v9128_v24 = vpack.c.bf16 %v5803_v15, %v22733_v44  ;;  %6764 = vmatprep.mubr.f32.mxu0 %v22734_v40  ;;  %12058 = vrot.lane.b32.xlu0 %v12057_v60, %s12967_s26  ;;  %v22740_v26 = vld [vmem:[#allocation72_spill] sm:$0xff]  ;;  %v18138_v9 = vpop.permute.xlu1 %11728  ;;  %v22742_v60 = vunpack.i.h.bf16 %v17528_v38  ;;  %v22743_v32 = vunpack.i.l.bf16 %v17528_v38  ;;  %v22744_v20 = vld [vmem:[#allocation86_spill] sm:$0xff] }
 0xac4   : > { %v5837_v46 = vsel %vm1145_vm7, %v22736_v37, %v11725_v2  ;;  %6836 = vmatmul.mubr.f32.vlgmr.msra.gmra.mrb[24].mxu1 %v18073_v5  ;;  %v5838_v15 = vsel %vm1145_vm7, %v11725_v2, %v22738_v0  ;;  %v22741_v44 = vpack.c.bf16 %v22739_v10, %v22740_v26  ;;  %v18146_v3 = vpop.permute.xlu0 %11808  ;;  %v22746_v2 = vld [vmem:[#allocation257_spill] sm:$0xff]  ;;  %v22747_v0 = vld [vmem:[#allocation258_spill] sm:$0xff]  ;;  %v22751_v26 = vunpack.i.h.bf16 %v22735_v14 }
 0xac5   : > { %9129 = vmatpush1.bf16.msra.mxu1 %v9128_v24  ;;  %v9130_v37 = vpack.c.bf16 %v5838_v15, %v5821_v29  ;;  %v9132_v12 = vpack.c.bf16 %v5837_v46, %v5820_v51  ;;  %v5904_v21 = vsel %vm1145_vm7, %v22743_v32, %v22742_v60  ;;  %22745 = vst [vmem:[#allocation53_spill] sm:$0xff] %v18146_v3  ;;  %v22748_v24 = vld [vmem:[#allocation207_spill] sm:$0xff]  ;;  %v22749_v51 = vunpack.i.h.bf16 %v22730_v61  ;;  %v22754_v34 = vld [vmem:[#allocation82_spill] sm:$0xff] }
 0xac6   : > { %9037 = vmatpush1.bf16.msra.mxu0 %v22741_v44  ;;  %v18150_v10 = vpack.i.bf16 %v22747_v0, %v22746_v2  ;;  %6906 = vmatprep.mubr.f32.mxu1 %v22734_v40  ;;  %v22750_v46 = vunpack.i.l.bf16 %v22730_v61  ;;  %v22752_v44 = vunpack.i.l.bf16 %v22735_v14  ;;  %v22758_v2 = vld [vmem:[#allocation298_spill] sm:$0xff] }
 0xac7   : > { %9039 = vmatprep.subr.bf16.mxu0 %v9038_v62  ;;  %12028 = vrot.lane.b32.xlu1 %v22748_v24, %s12954_s7  ;;  %v11730_v62 = vunpack.i.l.bf16 %v18138_v9  ;;  %v22753_v24 = vld [vmem:[#allocation76_spill] sm:$0xff]  ;;  %v22869_v40 = vld [vmem:[#allocation74_spill] sm:$0xff] }
 0xac8   : > { %9131 = vmatprep.subr.bf16.mxu1 %v9130_v37  ;;  %v5887_v32 = vsel %vm1145_vm7, %v22750_v46, %v22749_v51  ;;  %12063 = vrot.lane.b32.xlu0 %v18150_v10, %s12967_s26  ;;  %v5938_v37 = vsel %vm1145_vm7, %v22752_v44, %v22751_v26  ;;  %v22755_v0 = vpack.c.bf16 %v22753_v24, %v22754_v34  ;;  %v18173_v51 = vpop.permute.xlu1 %11733  ;;  %v22759_v26 = vunpack.i.h.bf16 %v22744_v20  ;;  %v22761_v24 = vld [vmem:[#allocation210_spill] sm:$0xff] }
 0xac9   : > { %v9042_v15 = vpack.c.bf16 %v5904_v21, %v5887_v32  ;;  %9133 = vmatpush1.bf16.msra.mxu1 %v9132_v12  ;;  %v11735_v29 = vunpack.i.l.bf16 %v18173_v51  ;;  %v18177_v21 = vpop.permute.xlu0 %11823  ;;  %v22757_v32 = vld [vmem:[#allocation104_spill] sm:$0xff]  ;;  %v22760_v44 = vunpack.i.l.bf16 %v22744_v20  ;;  %v22762_v46 = vunpack.i.h.bf16 %v17410_v17  ;;  %v22897_v5 = vld [vmem:[#allocation90_spill] sm:$0xff] }
 0xaca   : > { %9041 = vmatpush1.bf16.msra.mxu0 %v22755_v0  ;;  %22756 = vst [vmem:[#allocation15_spill] sm:$0xff] %v18177_v21  ;;  %v12077_v55 = vpack.i.bf16 %v22758_v2, %v22757_v32  ;;  %v22763_v2 = vunpack.i.h.bf16 %v17444_v6  ;;  %v22765_v0 = vunpack.i.h.bf16 %v18173_v51 }
 0xacb   : > { %9043 = vmatprep.subr.bf16.mxu0 %v9042_v15  ;;  %v5921_v34 = vsel %vm1145_vm7, %v22760_v44, %v22759_v26  ;;  %12033 = vrot.lane.b32.xlu1 %v22761_v24, %s12954_s7  ;;  %v5854_v15 = vsel %vm1145_vm7, %v22762_v46, %v11730_v62  ;;  %v22764_v26 = vunpack.i.h.bf16 %v18138_v9  ;;  %v22766_v24 = vld [vmem:[#allocation91_spill] sm:$0xff] }
 0xacc   : > { %v9046_v60 = vpack.c.bf16 %v5938_v37, %v5921_v34  ;;  %v5871_v21 = vsel %vm1145_vm7, %v22763_v2, %v11735_v29  ;;  %12078 = vrot.lane.b32.xlu0 %v12077_v55, %s12967_s26  ;;  %v5872_v12 = vsel %vm1145_vm7, %v11735_v29, %v22765_v0  ;;  %v22767_v37 = vld [vmem:[#allocation87_spill] sm:$0xff]  ;;  %v18206_v17 = vpop.permute.xlu1 %11738  ;;  %v22769_v2 = vunpack.i.h.bf16 %v17740_v19  ;;  %v22773_v0 = vld [vmem:[#allocation264_spill] sm:$0xff] }
 0xacd   : > { %v5855_v44 = vsel %vm1145_vm7, %v11730_v62, %v22764_v26  ;;  %v22768_v34 = vpack.c.bf16 %v22766_v24, %v22767_v37  ;;  %v9136_v6 = vpack.c.bf16 %v5871_v21, %v5854_v15  ;;  %v22770_v55 = vunpack.i.l.bf16 %v17740_v19  ;;  %v18214_v26 = vpop.permute.xlu0 %11828  ;;  %v22772_v29 = vld [vmem:[#allocation263_spill] sm:$0xff]  ;;  %v22774_v24 = vld [vmem:[#allocation34_spill] sm:$0xff]  ;;  %v22780_v62 = vld [vmem:[#allocation101_spill] sm:$0xff] }
 0xace   : > { %v9134_v46 = vpack.c.bf16 %v5872_v12, %v5855_v44  ;;  %22771 = vst [vmem:[#allocation48_spill] sm:$0xff] %v18214_v26  ;;  %v18218_v41 = vpack.i.bf16 %v22773_v0, %v22772_v29  ;;  %v22775_v21 = vunpack.i.h.bf16 %v17688_v53  ;;  %v22776_v12 = vunpack.i.l.bf16 %v17688_v53 }
 0xacf   : > { %9045 = vmatpush1.bf16.msra.mxu0 %v22768_v34  ;;  %v5972_v32 = vsel %vm1145_vm7, %v22770_v55, %v22769_v2  ;;  %12038 = vrot.lane.b32.xlu1 %v22774_v24, %s12954_s7  ;;  %v11740_v37 = vunpack.i.l.bf16 %v18206_v17  ;;  %v22777_v34 = vunpack.i.h.bf16 %v17840_v28  ;;  %v22778_v2 = vunpack.i.l.bf16 %v17840_v28  ;;  %v22779_v24 = vld [vmem:[#allocation96_spill] sm:$0xff] }
 0xad0   : > { %9047 = vmatprep.subr.bf16.mxu0 %v9046_v60  ;;  %9135 = vmatprep.subr.bf16.mxu1 %v9134_v46  ;;  %v5955_v15 = vsel %vm1145_vm7, %v22776_v12, %v22775_v21  ;;  %v22781_v21 = vpack.c.bf16 %v22779_v24, %v22780_v62  ;;  %v18240_v12 = vpop.permute.xlu1 %11743  ;;  %v22787_v24 = vld [vmem:[#allocation35_spill] sm:$0xff]  ;;  %v22788_v44 = vunpack.i.h.bf16 %v22730_v61 }
 0xad1   : > { %12083 = vrot.lane.b32.xlu0 %v18218_v41, %s12967_s26  ;;  %9137 = vmatpush1.bf16.msra.mxu1 %v9136_v6  ;;  %v9050_v60 = vpack.c.bf16 %v5972_v32, %v5955_v15  ;;  %v6006_v46 = vsel %vm1145_vm7, %v22778_v2, %v22777_v34  ;;  %v11745_v0 = vunpack.i.l.bf16 %v18240_v12  ;;  %v18244_v6 = vpop.permute.xlu0 %11843  ;;  %v22783_v32 = vld [vmem:[#allocation109_spill] sm:$0xff]  ;;  %v22784_v15 = vld [vmem:[#allocation304_spill] sm:$0xff]  ;;  %v22785_v34 = vunpack.i.h.bf16 %v17792_v63 }
 0xad2   : > { %22782 = vst [vmem:[#allocation325_spill] sm:$0xff] %v18244_v6  ;;  %v12097_v29 = vpack.i.bf16 %v22784_v15, %v22783_v32  ;;  %v22786_v2 = vunpack.i.l.bf16 %v17792_v63  ;;  %v5888_v6 = vsel %vm1145_vm7, %v22788_v44, %v11740_v37  ;;  %v22790_v32 = vunpack.i.h.bf16 %v18206_v17 }
 0xad3   : > { %9049 = vmatpush1.bf16.msra.mxu0 %v22781_v21  ;;  %12043 = vrot.lane.b32.xlu1 %v22787_v24, %s12954_s7 }
 0xad4   : > { %9051 = vmatprep.subr.bf16.mxu0 %v9050_v60  ;;  %v5989_v55 = vsel %vm1145_vm7, %v22786_v2, %v22785_v34  ;;  %v22789_v60 = vunpack.i.h.bf16 %v17528_v38  ;;  %v5889_v34 = vsel %vm1145_vm7, %v11740_v37, %v22790_v32  ;;  %v22791_v2 = vunpack.i.h.bf16 %v18240_v12  ;;  %v18272_v61 = vpop.permute.xlu1 %11748  ;;  %v22795_v37 = vld [vmem:[#allocation268_spill] sm:$0xff]  ;;  %v22796_v32 = vld [vmem:[#allocation269_spill] sm:$0xff] }
 0xad5   : > { %v9054_v21 = vpack.c.bf16 %v6006_v46, %v5989_v55  ;;  %12098 = vrot.lane.b32.xlu0 %v12097_v29, %s12967_s26  ;;  %v22792_v46 = vpack.c.bf16 %v17777_v42, %v17770_v36  ;;  %v22793_v55 = vunpack.i.h.bf16 %v17937_v4  ;;  %v22794_v29 = vunpack.i.l.bf16 %v17937_v4  ;;  %v22797_v36 = vld [vmem:[#allocation39_spill] sm:$0xff] }
 0xad6   : > { %v5905_v15 = vsel %vm1145_vm7, %v22789_v60, %v11745_v0  ;;  %v5906_v62 = vsel %vm1145_vm7, %v11745_v0, %v22791_v2  ;;  %v18279_v60 = vpop.permute.xlu0 %11848  ;;  %v18283_v0 = vpack.i.bf16 %v22796_v32, %v22795_v37  ;;  %v22798_v42 = vunpack.i.h.bf16 %v17886_v56  ;;  %v22805_v32 = vld [vmem:[#allocation310_spill] sm:$0xff] }
 0xad7   : > { %9053 = vmatpush1.bf16.msra.mxu0 %v22792_v46  ;;  %v9138_v44 = vpack.c.bf16 %v5906_v62, %v5889_v34  ;;  %v9140_v38 = vpack.c.bf16 %v5905_v15, %v5888_v6  ;;  %v6040_v24 = vsel %vm1145_vm7, %v22794_v29, %v22793_v55  ;;  %12048 = vrot.lane.b32.xlu1 %v22797_v36, %s12954_s7  ;;  %v22799_v6 = vunpack.i.l.bf16 %v17886_v56  ;;  %v22802_v55 = vld [vmem:[#allocation295_spill] sm:$0xff]  ;;  %v22804_v15 = vld [vmem:[#allocation312_spill] sm:$0xff] }
 0xad8   : > { %9055 = vmatprep.subr.bf16.mxu0 %v9054_v21  ;;  %v11750_v34 = vunpack.i.l.bf16 %v18272_v61  ;;  %v22800_v2 = vpack.c.bf16 %v17876_v11, %v17869_v47  ;;  %v18299_v46 = vpop.permute.xlu1 %11753  ;;  %v22806_v47 = vunpack.i.h.bf16 %v22744_v20 }
 0xad9   : > { %9139 = vmatprep.subr.bf16.mxu1 %v9138_v44  ;;  %v6023_v62 = vsel %vm1145_vm7, %v22799_v6, %v22798_v42  ;;  %12103 = vrot.lane.b32.xlu0 %v18283_v0, %s12967_s26  ;;  %v22801_v44 = vld [vmem:[#allocation100_spill] sm:$0xff]  ;;  %v21544_v36 = vunpack.i.h.bf16 %v18299_v46  ;;  %v11755_v42 = vunpack.i.l.bf16 %v18299_v46 }
 0xada   : > { %9141 = vmatpush1.bf16.msra.mxu1 %v9140_v38  ;;  %v9058_v21 = vpack.c.bf16 %v6040_v24, %v6023_v62  ;;  %v12067_v29 = vpack.i.bf16 %v22802_v55, %v22801_v44  ;;  %v18305_v6 = vpop.permute.xlu0 %11863  ;;  %v12117_v38 = vpack.i.bf16 %v22805_v32, %v22804_v15  ;;  %v5922_v11 = vsel %vm1145_vm7, %v22806_v47, %v11750_v34  ;;  %v22815_v15 = vld [vmem:[#allocation272_spill] sm:$0xff]  ;;  %v22837_v44 = vld [vmem:[#allocation51_spill] sm:$0xff] }
 0xadb   : > { %9057 = vmatpush1.bf16.msra.mxu0 %v22800_v2  ;;  %22803 = vst [vmem:[#allocation133_spill] sm:$0xff] %v18305_v6  ;;  %v22807_v24 = vunpack.i.h.bf16 %v22735_v14  ;;  %v22808_v2 = vunpack.i.h.bf16 %v18272_v61  ;;  %v5940_v32 = vsel %vm1145_vm7, %v11755_v42, %v21544_v36  ;;  %v22811_v14 = vld [vmem:[#allocation262_spill] sm:$0xff]  ;;  %v22812_v6 = vld [vmem:[#allocation128_spill] sm:$0xff] }
 0xadc   : > { %9059 = vmatprep.subr.bf16.mxu0 %v9058_v21  ;;  %12068 = vrot.lane.b32.xlu1 %v12067_v29, %s12967_s26  ;;  %v22809_v21 = vpack.c.bf16 %v17966_v16, %v17958_v49  ;;  %v18326_v20 = vpop.permute.xlu1 %11758  ;;  %v22810_v29 = vld [vmem:[#allocation261_spill] sm:$0xff] }
 0xadd   : > { %v5939_v62 = vsel %vm1145_vm7, %v22807_v24, %v11755_v42  ;;  %12118 = vrot.lane.b32.xlu0 %v12117_v38, %s12967_s26  ;;  %v5923_v55 = vsel %vm1145_vm7, %v11750_v34, %v22808_v2  ;;  %v18330_v47 = vpack.i.bf16 %v22811_v14, %v22810_v29  ;;  %v22813_v34 = vld [vmem:[#allocation21_spill] sm:$0xff]  ;;  %v11760_v16 = vunpack.i.l.bf16 %v18326_v20 }
 0xade   : > { %v9142_v24 = vpack.c.bf16 %v5940_v32, %v5923_v55  ;;  %v9144_v38 = vpack.c.bf16 %v5939_v62, %v5922_v11  ;;  %v18332_v37 = vpop.permute.xlu0 %11868  ;;  %v22814_v2 = vpack.c.bf16 %v22812_v6, %v22813_v34  ;;  %v22816_v42 = vld [vmem:[#allocation273_spill] sm:$0xff]  ;;  %v18347_v11 = vld [vmem:[#allocation9 + $0x8] sm:$0x7]  ;;  %v22818_v6 = vld [vmem:[#allocation127_spill] sm:$0xff] }
 0xadf   : > { %9061 = vmatpush1.bf16.msra.mxu0 %v22809_v21  ;;  %v18339_v36 = vpack.i.bf16 %v22816_v42, %v22815_v15  ;;  %22817 = vst [vmem:[#allocation63_spill] sm:$0xff] %v18347_v11  ;;  %v22819_v62 = vld [vmem:[#allocation18_spill] sm:$0xff]  ;;  %v22821_v21 = vld [vmem:[#allocation305_spill] sm:$0xff] }
 0xae0   : > { %9159 = vmatprep.subr.bf16.mxu0 %v22814_v2  ;;  %12073 = vrot.lane.b32.xlu1 %v18330_v47, %s12967_s26  ;;  %v22820_v55 = vpack.c.bf16 %v22818_v6, %v22819_v62  ;;  %v18353_v32 = vpop.permute.xlu1 %11763  ;;  %v22824_v14 = vld [vmem:[#allocation137_spill] sm:$0xff]  ;;  %v22825_v15 = vld [vmem:[#allocation130_spill] sm:$0xff]  ;;  %v22828_v6 = vunpack.i.h.bf16 %v17688_v53  ;;  %v22830_v2 = vld [vmem:[#allocation275_spill] sm:$0xff] }
 0xae1   : > { %9143 = vmatprep.subr.bf16.mxu1 %v9142_v24  ;;  %12123 = vrot.lane.b32.xlu0 %v18339_v36, %s12967_s26  ;;  %v22822_v24 = vld [vmem:[#allocation302_spill] sm:$0xff]  ;;  %v11765_v49 = vunpack.i.l.bf16 %v18353_v32  ;;  %v22826_v29 = vpack.c.bf16 %v22824_v14, %v22825_v15 }
 0xae2   : > { %6765 = vmatmul.mubr.f32.vlgmr.msra.gmra.mrb[20].mxu0 %v18347_v11  ;;  %9145 = vmatpush1.bf16.msra.mxu1 %v9144_v38  ;;  %v12087_v34 = vpack.i.bf16 %v22822_v24, %v22821_v21  ;;  %v18359_v42 = vpop.permute.xlu0 %11883  ;;  %v22827_v38 = vld [vmem:[#allocation46_spill] sm:$0xff]  ;;  %v5956_v62 = vsel %vm1145_vm7, %v22828_v6, %v11760_v16  ;;  %v22834_v21 = vld [vmem:[#allocation132_spill] sm:$0xff] }
 0xae3   : > { %9161 = vmatpush1.bf16.msra.mxu0 %v22820_v55  ;;  %22823 = vst [vmem:[#allocation59_spill] sm:$0xff] %v18359_v42  ;;  %6977 = vmatprep.mubr.f32.mxu0 %v22827_v38  ;;  %v22829_v55 = vunpack.i.h.bf16 %v17740_v19  ;;  %v22831_v42 = vunpack.i.h.bf16 %v18326_v20  ;;  %v22836_v19 = vld [vmem:[#allocation267_spill] sm:$0xff]  ;;  %v22839_v38 = vld [vmem:[#allocation146_spill] sm:$0xff]  ;;  %v22842_v11 = vld [vmem:[#allocation64_spill] sm:$0xff] }
 0xae4   : > { %9163 = vmatprep.subr.bf16.mxu0 %v22826_v29  ;;  %12088 = vrot.lane.b32.xlu1 %v12087_v34, %s12967_s26  ;;  %v22832_v29 = vunpack.i.h.bf16 %v18353_v32  ;;  %v22833_v34 = vld [vmem:[#allocation134_spill] sm:$0xff]  ;;  %v18383_v6 = vpop.permute.xlu1 %11768 }
 0xae5   : > { %v5973_v24 = vsel %vm1145_vm7, %v22829_v55, %v11765_v49  ;;  %12138 = vrot.lane.b32.xlu0 %v22830_v2, %s12967_s26  ;;  %v5957_v15 = vsel %vm1145_vm7, %v11760_v16, %v22831_v42  ;;  %v22835_v53 = vpack.c.bf16 %v22833_v34, %v22834_v21  ;;  %v18387_v55 = vpack.i.bf16 %v22837_v44, %v22836_v19  ;;  %v22840_v42 = vld [vmem:[#allocation139_spill] sm:$0xff]  ;;  %v22852_v44 = vld [vmem:[#allocation148_spill] sm:$0xff] }
 0xae6   : > { %v5974_v14 = vsel %vm1145_vm7, %v11765_v49, %v22832_v29  ;;  %v9148_v2 = vpack.c.bf16 %v5973_v24, %v5956_v62  ;;  %v18389_v54 = vpop.permute.xlu0 %11888  ;;  %v22841_v16 = vpack.c.bf16 %v22839_v38, %v22840_v42  ;;  %v22843_v49 = vld [vmem:[#allocation71_spill] sm:$0xff]  ;;  %v11770_v34 = vunpack.i.l.bf16 %v18383_v6  ;;  %v22845_v24 = vld [vmem:[#allocation141_spill] sm:$0xff] }
 0xae7   : > { %9165 = vmatpush1.bf16.msra.mxu0 %v22835_v53  ;;  %v9146_v22 = vpack.c.bf16 %v5974_v14, %v5957_v15  ;;  %22838 = vst [vmem:[#allocation142_spill] sm:$0xff] %v18389_v54  ;;  %v18396_v29 = vpack.i.bf16 %v22843_v49, %v22842_v11  ;;  %v22844_v62 = vld [vmem:[#allocation143_spill] sm:$0xff]  ;;  %v22849_v53 = vld [vmem:[#allocation308_spill] sm:$0xff] }
 0xae8   : > { %9167 = vmatprep.subr.bf16.mxu0 %v22841_v16  ;;  %12093 = vrot.lane.b32.xlu1 %v18387_v55, %s12967_s26  ;;  %v22846_v38 = vpack.c.bf16 %v22844_v62, %v22845_v24  ;;  %v18407_v15 = vpop.permute.xlu1 %11773  ;;  %v22848_v14 = vld [vmem:[#allocation311_spill] sm:$0xff]  ;;  %v22855_v24 = vunpack.i.h.bf16 %v17840_v28  ;;  %v22857_v16 = vunpack.i.h.bf16 %v18383_v6  ;;  %v22863_v28 = vld [vmem:[#allocation54_spill] sm:$0xff] }
 0xae9   : > { %9147 = vmatprep.subr.bf16.mxu1 %v9146_v22  ;;  %12143 = vrot.lane.b32.xlu0 %v18396_v29, %s12967_s26  ;;  %22847 = vst [vmem:[#allocation326_spill] sm:$0xff] %v18407_v15  ;;  %v12107_v42 = vpack.i.bf16 %v22849_v53, %v22848_v14  ;;  %v11775_v22 = vunpack.i.l.bf16 %v18407_v15  ;;  %v22851_v49 = vld [vmem:[#allocation155_spill] sm:$0xff]  ;;  %v22856_v53 = vld [vmem:[#allocation281_spill] sm:$0xff] }
 0xaea   : > { %9149 = vmatpush1.bf16.msra.mxu1 %v9148_v2  ;;  %v18413_v21 = vpop.permute.xlu0 %11918  ;;  %v22853_v11 = vpack.c.bf16 %v22851_v49, %v22852_v44  ;;  %v22854_v2 = vunpack.i.h.bf16 %v17792_v63  ;;  %v5991_v19 = vsel %vm1145_vm7, %v11770_v34, %v22857_v16  ;;  %v22858_v44 = vunpack.i.h.bf16 %v18407_v15  ;;  %v22859_v49 = vld [vmem:[#allocation152_spill] sm:$0xff] }
 0xaeb   : > { %9169 = vmatpush1.bf16.msra.mxu0 %v22846_v38  ;;  %22850 = vst [vmem:[#allocation169_spill] sm:$0xff] %v18413_v21  ;;  %v6007_v38 = vsel %vm1145_vm7, %v22855_v24, %v11775_v22  ;;  %v22864_v21 = vld [vmem:[#allocation61_spill] sm:$0xff] }
 0xaec   : > { %9171 = vmatprep.subr.bf16.mxu0 %v22853_v11  ;;  %12108 = vrot.lane.b32.xlu1 %v12107_v42, %s12967_s26  ;;  %v5990_v62 = vsel %vm1145_vm7, %v22854_v2, %v11770_v34  ;;  %v6008_v11 = vsel %vm1145_vm7, %v11775_v22, %v22858_v44  ;;  %v22860_v42 = vld [vmem:[#allocation150_spill] sm:$0xff]  ;;  %v18436_v2 = vpop.permute.xlu1 %11793  ;;  %v18440_v24 = vpack.i.bf16 %v22864_v21, %v22863_v28  ;;  %v22867_v34 = vld [vmem:[#allocation157_spill] sm:$0xff]  ;;  %v22896_v28 = vld [vmem:[#allocation84_spill] sm:$0xff] }
 0xaed   : > { %12158 = vrot.lane.b32.xlu0 %v22856_v53, %s12967_s26  ;;  %v22861_v63 = vpack.c.bf16 %v22859_v49, %v22860_v42  ;;  %22862 = vst [vmem:[#allocation73_spill] sm:$0xff] %v18436_v2  ;;  %v9150_v14 = vpack.c.bf16 %v6008_v11, %v5991_v19  ;;  %v9152_v53 = vpack.c.bf16 %v6007_v38, %v5990_v62  ;;  %v22870_v22 = vld [vmem:[#allocation81_spill] sm:$0xff]  ;;  %v11810_v42 = vunpack.i.l.bf16 %v18146_v3  ;;  %v22871_v19 = vld [vmem:[#allocation162_spill] sm:$0xff]  ;;  %v22894_v2 = vld [vmem:[#allocation175_spill] sm:$0xff] }
 0xaee   : > { %v18442_v52 = vpop.permute.xlu0 %11923  ;;  %v22868_v16 = vpack.c.bf16 %v22866_v58, %v22867_v34  ;;  %v18449_v44 = vpack.i.bf16 %v22870_v22, %v22869_v40  ;;  %v22872_v62 = vld [vmem:[#allocation165_spill] sm:$0xff]  ;;  %v22878_v22 = vld [vmem:[#allocation172_spill] sm:$0xff]  ;;  %v22879_v21 = vld [vmem:[#allocation166_spill] sm:$0xff]  ;;  %v18503_v15 = vpack.i.bf16 %v22897_v5, %v22896_v28  ;;  %v22902_v5 = vunpack.i.h.bf16 %v17997_v31 }
 0xaef   : > { %9173 = vmatpush1.bf16.msra.mxu0 %v22861_v63  ;;  %22865 = vst [vmem:[#allocation69_spill] sm:$0xff] %v18442_v52  ;;  %9151 = vmatprep.subr.bf16.mxu1 %v9150_v14  ;;  %v22873_v58 = vpack.c.bf16 %v22871_v19, %v22872_v62  ;;  %v22875_v11 = vld [vmem:[#allocation317_spill] sm:$0xff]  ;;  %v22876_v63 = vld [vmem:[#allocation315_spill] sm:$0xff]  ;;  %v22880_v40 = vpack.c.bf16 %v22878_v22, %v22879_v21  ;;  %v22887_v21 = vld [vmem:[#allocation174_spill] sm:$0xff] }
 0xaf0   : > { %9175 = vmatprep.subr.bf16.mxu0 %v22868_v16  ;;  %12113 = vrot.lane.b32.xlu1 %v18440_v24, %s12967_s26  ;;  %v18460_v38 = vpop.permute.xlu1 %11798  ;;  %v12127_v34 = vpack.i.bf16 %v22876_v63, %v22875_v11  ;;  %v22885_v63 = vld [vmem:[#allocation194_spill] sm:$0xff]  ;;  %v22886_v52 = vld [vmem:[#allocation171_spill] sm:$0xff]  ;;  %22898 = vst [vmem:[#allocation161_spill] sm:$0xff] %v18503_v15 }
 0xaf1   : > { %12163 = vrot.lane.b32.xlu0 %v18449_v44, %s12967_s26  ;;  %9153 = vmatpush1.bf16.msra.mxu1 %v9152_v53  ;;  %22874 = vst [vmem:[#allocation151_spill] sm:$0xff] %v18460_v38  ;;  %v21554_v16 = vunpack.i.h.bf16 %v18460_v38  ;;  %v11800_v14 = vunpack.i.l.bf16 %v18460_v38  ;;  %v22881_v53 = vunpack.i.h.bf16 %v18146_v3  ;;  %v22891_v11 = vld [vmem:[#allocation278_spill] sm:$0xff]  ;;  %v22893_v3 = vld [vmem:[#allocation181_spill] sm:$0xff]  ;;  %v22899_v38 = vunpack.i.l.bf16 %v22885_v63  ;;  %v22904_v28 = vld [vmem:[#allocation183_spill] sm:$0xff] }
 0xaf2   : > { %v18466_v49 = vpop.permute.xlu0 %11928 }
 0xaf3   : > { %9177 = vmatpush1.bf16.msra.mxu0 %v22873_v58  ;;  %22877 = vst [vmem:[#allocation149_spill] sm:$0xff] %v18466_v49  ;;  %v18475_v19 = vsel %vm4643_vm9, %v11810_v42, %v22881_v53  ;;  %v18480_v62 = vsel %vm4643_vm9, %v11800_v14, %v21554_v16  ;;  %v22884_v58 = vld [vmem:[#allocation287_spill] sm:$0xff] }
 0xaf4   : > { %9179 = vmatprep.subr.bf16.mxu0 %v22880_v40  ;;  %12128 = vrot.lane.b32.xlu1 %v12127_v34, %s12967_s26  ;;  %22882 = vst [vmem:[#allocation329_spill] sm:$0xff] %v18475_v19  ;;  %22883 = vst [vmem:[#allocation328_spill] sm:$0xff] %v18480_v62  ;;  %v22888_v40 = vpack.c.bf16 %v22886_v52, %v22887_v21  ;;  %v18488_v22 = vpop.permute.xlu1 %11813  ;;  %v22890_v34 = vld [vmem:[#allocation277_spill] sm:$0xff]  ;;  %v22903_v21 = vld [vmem:[#allocation180_spill] sm:$0xff]  ;;  %v22907_v19 = vunpack.i.l.bf16 %v18054_v48 }
 0xaf5   : > { %12223 = vrot.lane.b32.xlu0 %v22884_v58, %s12967_s26  ;;  %22889 = vst [vmem:[#allocation83_spill] sm:$0xff] %v18488_v22  ;;  %v18492_v53 = vpack.i.bf16 %v22891_v11, %v22890_v34  ;;  %v22895_v58 = vpack.c.bf16 %v22893_v3, %v22894_v2  ;;  %v22900_v3 = vld [vmem:[#allocation192_spill] sm:$0xff]  ;;  %v22905_v34 = vpack.c.bf16 %v22903_v21, %v22904_v28  ;;  %v22914_v21 = vld [vmem:[#allocation187_spill] sm:$0xff] }
 0xaf6   : > { %v18496_v16 = vpop.permute.xlu0 %11938  ;;  %v22901_v2 = vunpack.i.h.bf16 %v22900_v3  ;;  %v22908_v22 = vld [vmem:[#allocation136_spill] sm:$0xff] }
 0xaf7   : > { %9181 = vmatpush1.bf16.msra.mxu0 %v22888_v40  ;;  %22892 = vst [vmem:[#allocation78_spill] sm:$0xff] %v18496_v16  ;;  %v21563_v52 = vunpack.i.l.bf16 %v18496_v16  ;;  %v11830_v40 = vunpack.i.l.bf16 %v18214_v26  ;;  %v22909_v3 = vunpack.i.h.bf16 %v22908_v22  ;;  %v22913_v22 = vunpack.i.l.bf16 %v22666_v25 }
 0xaf8   : > { %9183 = vmatprep.subr.bf16.mxu0 %v22895_v58  ;;  %12133 = vrot.lane.b32.xlu1 %v18492_v53, %s12967_s26  ;;  %v18517_v58 = vsel %vm1145_vm7, %v22901_v2, %v22899_v38  ;;  %v18529_v62 = vpop.permute.xlu1 %11818  ;;  %v22916_v2 = vunpack.i.h.bf16 %v18214_v26 }
 0xaf9   : > { %12228 = vrot.lane.b32.xlu0 %v18503_v15, %s12967_s26  ;;  %v18524_v11 = vsel %vm1145_vm7, %v22902_v5, %v21563_v52  ;;  %22906 = vst [vmem:[#allocation164_spill] sm:$0xff] %v18529_v62  ;;  %v4670_v38 = vsel %vm4643_vm9, %v22909_v3, %v22907_v19  ;;  %v11820_v15 = vunpack.i.l.bf16 %v18529_v62  ;;  %v22910_v5 = vld [vmem:[#allocation185_spill] sm:$0xff]  ;;  %v22915_v19 = vunpack.i.h.bf16 %v22914_v21 }
 0xafa   : > { %v18538_v31 = vpop.permute.xlu0 %11943  ;;  %v22911_v52 = vpack.c.bf16 %v22321_v50, %v22910_v5  ;;  %v18555_v48 = vsel %vm4643_vm9, %v11830_v40, %v22916_v2  ;;  %v22917_v50 = vunpack.i.h.bf16 %v18529_v62  ;;  %v22919_v21 = vld [vmem:[#allocation193_spill] sm:$0xff]  ;;  %v22922_v2 = vld [vmem:[#allocation284_spill] sm:$0xff]  ;;  %v22923_v62 = vunpack.i.h.bf16 %v16991_v18 }
 0xafb   : > { %9185 = vmatpush1.bf16.msra.mxu0 %v22905_v34  ;;  %v22912_v34 = vld [vmem:[#allocation280_spill] sm:$0xff]  ;;  %v4653_v3 = vsel %vm4643_vm9, %v22915_v19, %v22913_v22  ;;  %v21568_v28 = vunpack.i.l.bf16 %v18538_v31  ;;  %v22921_v19 = vld [vmem:[#allocation283_spill] sm:$0xff]  ;;  %v11850_v18 = vunpack.i.l.bf16 %v18279_v60 }
 0xafc   : > { %9187 = vmatprep.subr.bf16.mxu0 %v22911_v52  ;;  %12148 = vrot.lane.b32.xlu1 %v22912_v34, %s12967_s26  ;;  %v18560_v52 = vsel %vm4643_vm9, %v11820_v15, %v22917_v50  ;;  %v9190_v5 = vpack.c.bf16 %v4670_v38, %v4653_v3  ;;  %v22918_v34 = vld [vmem:[#allocation190_spill] sm:$0xff]  ;;  %v18568_v22 = vpop.permute.xlu1 %11833  ;;  %v18572_v26 = vpack.i.bf16 %v22922_v2, %v22921_v19  ;;  %v22940_v19 = vunpack.i.h.bf16 %v17094_v23 }
 0xafd   : > { %12238 = vrot.lane.b32.xlu0 %v18150_v10, %s12954_s7  ;;  %v22920_v25 = vpack.c.bf16 %v22918_v34, %v22919_v21  ;;  %v4687_v50 = vsel %vm4643_vm9, %v22923_v62, %v11800_v14  ;;  %v22925_v62 = vunpack.i.h.bf16 %v18042_v35  ;;  %v22928_v10 = vld [vmem:[#allocation57_spill] sm:$0xff]  ;;  %v11870_v23 = vunpack.i.l.bf16 %v18332_v37 }
 0xafe   : > { %v18579_v38 = vpop.permute.xlu0 %11948 }
 0xaff   : > { %9189 = vmatpush1.bf16.msra.mxu0 %v22920_v25  ;;  %v21569_v3 = vunpack.i.l.bf16 %v18579_v38  ;;  %v22924_v25 = vunpack.i.h.bf16 %v17401_v45  ;;  %v22926_v45 = vunpack.i.h.bf16 %v18100_v1  ;;  %v22935_v1 = vld [vmem:[#allocation65_spill] sm:$0xff] }
 0xb00   : > { %9191 = vmatprep.subr.bf16.mxu0 %v9190_v5  ;;  %12153 = vrot.lane.b32.xlu1 %v18572_v26, %s12967_s26  ;;  %v18596_v5 = vsel %vm1145_vm7, %v22925_v62, %v21568_v28 }
 0xb01   : > { %v4704_v34 = vsel %vm4643_vm9, %v22924_v25, %v11810_v42  ;;  %12243 = vrot.lane.b32.xlu0 %v18330_v47, %s12954_s7  ;;  %v18603_v42 = vsel %vm1145_vm7, %v22926_v45, %v21569_v3  ;;  %v22927_v25 = vld [vmem:[#allocation55_spill] sm:$0xff]  ;;  %v18608_v47 = vpop.permute.xlu1 %11838  ;;  %v22931_v45 = vld [vmem:[#allocation286_spill] sm:$0xff] }
 0xb02   : > { %v9194_v14 = vpack.c.bf16 %v4704_v34, %v4687_v50  ;;  %v22929_v21 = vpack.c.bf16 %v22927_v25, %v22928_v10  ;;  %v22930_v50 = vunpack.i.h.bf16 %v17046_v33  ;;  %v21570_v34 = vunpack.i.h.bf16 %v18608_v47  ;;  %v18615_v28 = vpop.permute.xlu0 %11953 }
 0xb03   : > { %v11840_v62 = vunpack.i.l.bf16 %v18608_v47  ;;  %v22932_v10 = vunpack.i.h.bf16 %v17484_v8  ;;  %v22933_v33 = vunpack.i.h.bf16 %v18279_v60  ;;  %v22936_v8 = vld [vmem:[#allocation67_spill] sm:$0xff] }
 0xb04   : > { %9193 = vmatpush1.bf16.msra.mxu0 %v22929_v21  ;;  %v4721_v35 = vsel %vm4643_vm9, %v22930_v50, %v11820_v15  ;;  %12168 = vrot.lane.b32.xlu1 %v22931_v45, %s12967_s26  ;;  %v21571_v50 = vunpack.i.l.bf16 %v18615_v28  ;;  %v22937_v3 = vpack.c.bf16 %v22935_v1, %v22936_v8 }
 0xb05   : > { %9195 = vmatprep.subr.bf16.mxu0 %v9194_v14  ;;  %v4738_v21 = vsel %vm4643_vm9, %v22932_v10, %v11830_v40  ;;  %v18627_v15 = vsel %vm4643_vm9, %v11850_v18, %v22933_v33  ;;  %v18632_v25 = vsel %vm4643_vm9, %v11840_v62, %v21570_v34  ;;  %12248 = vrot.lane.b32.xlu0 %v18218_v41, %s12954_s7  ;;  %v18640_v40 = vpop.permute.xlu1 %11853  ;;  %v22938_v10 = vld [vmem:[#allocation289_spill] sm:$0xff]  ;;  %v22939_v33 = vld [vmem:[#allocation291_spill] sm:$0xff] }
 0xb06   : > { %22934 = vst [vmem:[#allocation327_spill] sm:$0xff] %v18632_v25  ;;  %v9198_v14 = vpack.c.bf16 %v4738_v21, %v4721_v35  ;;  %v18644_v2 = vpack.i.bf16 %v22939_v33, %v22938_v10  ;;  %v4755_v34 = vsel %vm4643_vm9, %v22940_v19, %v11840_v62  ;;  %v18651_v35 = vpop.permute.xlu0 %11958  ;;  %v22942_v62 = vunpack.i.h.bf16 %v18138_v9  ;;  %v22945_v41 = vld [vmem:[#allocation77_spill] sm:$0xff] }
 0xb07   : > { %v21572_v21 = vunpack.i.l.bf16 %v18651_v35 }
 0xb08   : > { %9197 = vmatpush1.bf16.msra.mxu0 %v22937_v3  ;;  %12173 = vrot.lane.b32.xlu1 %v18644_v2, %s12967_s26  ;;  %v22941_v3 = vunpack.i.h.bf16 %v17584_v27  ;;  %v22943_v27 = vunpack.i.h.bf16 %v18173_v51  ;;  %v22948_v51 = vld [vmem:[#allocation40_spill] sm:$0xff] }
 0xb09   : > { %9199 = vmatprep.subr.bf16.mxu0 %v9198_v14  ;;  %12253 = vrot.lane.b32.xlu0 %v18387_v55, %s12954_s7  ;;  %v18668_v14 = vsel %vm1145_vm7, %v22942_v62, %v21571_v50  ;;  %v18680_v55 = vpop.permute.xlu1 %11858  ;;  %v22953_v62 = vunpack.i.h.bf16 %v17679_v7  ;;  %v22958_v7 = vld [vmem:[#allocation224_spill] sm:$0xff] }
 0xb0a   : > { %v4772_v1 = vsel %vm4643_vm9, %v22941_v3, %v11850_v18  ;;  %v18675_v18 = vsel %vm1145_vm7, %v22943_v27, %v21572_v21  ;;  %v22944_v3 = vld [vmem:[#allocation75_spill] sm:$0xff]  ;;  %v11860_v9 = vunpack.i.l.bf16 %v18680_v55  ;;  %v22949_v27 = vunpack.i.h.bf16 %v18332_v37  ;;  %v22955_v21 = vld [vmem:[#allocation102_spill] sm:$0xff] }
 0xb0b   : > { %v9202_v19 = vpack.c.bf16 %v4772_v1, %v4755_v34  ;;  %v22946_v8 = vpack.c.bf16 %v22944_v3, %v22945_v41  ;;  %v21573_v34 = vunpack.i.h.bf16 %v18680_v55  ;;  %v18684_v1 = vpop.permute.xlu0 %11963 }
 0xb0c   : > { %22947 = vst [vmem:[#allocation178_spill] sm:$0xff] %v18684_v1  ;;  %12178 = vrot.lane.b32.xlu1 %v22948_v51, %s12954_s7  ;;  %v18693_v41 = vsel %vm4643_vm9, %v11870_v23, %v22949_v27  ;;  %v4806_v51 = vsel %vm4643_vm9, %v22953_v62, %v11870_v23  ;;  %v21575_v50 = vunpack.i.l.bf16 %v18684_v1  ;;  %v22954_v27 = vld [vmem:[#allocation97_spill] sm:$0xff]  ;;  %v21577_v23 = vunpack.i.h.bf16 %v18389_v54 }
 0xb0d   : > { %9201 = vmatpush1.bf16.msra.mxu0 %v22946_v8  ;;  %22950 = vst [vmem:[#allocation88_spill] sm:$0xff] %v18693_v41  ;;  %v18698_v8 = vsel %vm4643_vm9, %v11860_v9, %v21573_v34  ;;  %12258 = vrot.lane.b32.xlu0 %v18283_v0, %s12954_s7  ;;  %v22956_v33 = vpack.c.bf16 %v22954_v27, %v22955_v21  ;;  %v18712_v10 = vpop.permute.xlu1 %11873  ;;  %v22960_v62 = vunpack.i.h.bf16 %v18240_v12  ;;  %v22966_v12 = vld [vmem:[#allocation228_spill] sm:$0xff] }
 0xb0e   : > { %9203 = vmatprep.subr.bf16.mxu0 %v9202_v19  ;;  %22951 = vst [vmem:[#allocation85_spill] sm:$0xff] %v18698_v8  ;;  %v22952_v19 = vunpack.i.h.bf16 %v17142_v39 }
 0xb0f   : > { %v18716_v25 = vpop.permute.xlu0 %11968 }
 0xb10   : > { %v4789_v3 = vsel %vm4643_vm9, %v22952_v19, %v11860_v9  ;;  %22957 = vst [vmem:[#allocation170_spill] sm:$0xff] %v18716_v25  ;;  %v21576_v39 = vunpack.i.l.bf16 %v18716_v25  ;;  %12183 = vrot.lane.b32.xlu1 %v22958_v7, %s12954_s7  ;;  %v11890_v9 = vunpack.i.l.bf16 %v18389_v54  ;;  %v22961_v19 = vld [vmem:[#allocation107_spill] sm:$0xff] }
 0xb11   : > { %9205 = vmatpush1.bf16.msra.mxu0 %v22956_v33  ;;  %v9206_v34 = vpack.c.bf16 %v4806_v51, %v4789_v3  ;;  %12263 = vrot.lane.b32.xlu0 %v18440_v24, %s12954_s7  ;;  %v22959_v33 = vunpack.i.h.bf16 %v18206_v17  ;;  %v22962_v3 = vld [vmem:[#allocation112_spill] sm:$0xff]  ;;  %v18742_v27 = vpop.permute.xlu1 %11878 }
 0xb12   : > { %v22963_v51 = vpack.c.bf16 %v22961_v19, %v22962_v3  ;;  %22964 = vst [vmem:[#allocation173_spill] sm:$0xff] %v18742_v27  ;;  %v21579_v24 = vunpack.i.h.bf16 %v18742_v27  ;;  %v11880_v17 = vunpack.i.l.bf16 %v18742_v27  ;;  %v22969_v3 = vld [vmem:[#allocation52_spill] sm:$0xff]  ;;  %v22993_v27 = vld [vmem:[#allocation122_spill] sm:$0xff] }
 0xb13   : > { %9207 = vmatprep.subr.bf16.mxu0 %v9206_v34  ;;  %v18730_v21 = vsel %vm1145_vm7, %v22959_v33, %v21575_v50  ;;  %v18737_v34 = vsel %vm1145_vm7, %v22960_v62, %v21576_v39  ;;  %v18746_v7 = vpop.permute.xlu0 %11973  ;;  %v18755_v62 = vsel %vm4643_vm9, %v11890_v9, %v21577_v23  ;;  %v22971_v33 = vld [vmem:[#allocation47_spill] sm:$0xff] }
 0xb14   : > { %22965 = vst [vmem:[#allocation332_spill] sm:$0xff] %v18746_v7  ;;  %12188 = vrot.lane.b32.xlu1 %v22966_v12, %s12954_s7  ;;  %22967 = vst [vmem:[#allocation331_spill] sm:$0xff] %v18755_v62  ;;  %v18760_v19 = vsel %vm4643_vm9, %v11880_v17, %v21579_v24  ;;  %v22972_v50 = vunpack.i.h.bf16 %v22971_v33  ;;  %v21581_v39 = vunpack.i.l.bf16 %v18746_v7 }
 0xb15   : > { %9209 = vmatpush1.bf16.msra.mxu0 %v22963_v51  ;;  %22968 = vst [vmem:[#allocation98_spill] sm:$0xff] %v18760_v19  ;;  %12268 = vrot.lane.b32.xlu0 %v18339_v36, %s12954_s7  ;;  %v22970_v51 = vunpack.i.h.bf16 %v22969_v3  ;;  %v18771_v23 = vpop.permute.xlu1 %11893  ;;  %v22979_v36 = vunpack.i.h.bf16 %v18299_v46  ;;  %v23000_v19 = vld [vmem:[#allocation240_spill] sm:$0xff] }
 0xb16   : > { %v4840_v12 = vsel %vm4643_vm9, %v22972_v50, %v11890_v9  ;;  %v22974_v50 = vld [vmem:[#allocation231_spill] sm:$0xff] }
 0xb17   : > { %v4823_v0 = vsel %vm4643_vm9, %v22970_v51, %v11880_v17  ;;  %v18775_v41 = vpop.permute.xlu0 %11978  ;;  %v11930_v17 = vunpack.i.l.bf16 %v18466_v49  ;;  %v22976_v9 = vld [vmem:[#allocation111_spill] sm:$0xff] }
 0xb18   : > { %v9210_v8 = vpack.c.bf16 %v4840_v12, %v4823_v0  ;;  %22973 = vst [vmem:[#allocation93_spill] sm:$0xff] %v18775_v41  ;;  %v21582_v33 = vunpack.i.l.bf16 %v18775_v41  ;;  %12193 = vrot.lane.b32.xlu1 %v22974_v50, %s12954_s7  ;;  %v22975_v0 = vld [vmem:[#allocation106_spill] sm:$0xff]  ;;  %v22978_v12 = vunpack.i.h.bf16 %v18272_v61 }
 0xb19   : > { %12273 = vrot.lane.b32.xlu0 %v18492_v53, %s12954_s7  ;;  %v22977_v51 = vpack.c.bf16 %v22975_v0, %v22976_v9  ;;  %v18802_v50 = vpop.permute.xlu1 %11898  ;;  %v22981_v53 = vld [vmem:[#allocation160_spill] sm:$0xff]  ;;  %v18823_v0 = vpop.f32.mrb[18].mxu0 }
 0xb1a   : > { %9211 = vmatprep.subr.bf16.mxu0 %v9210_v8  ;;  %v18793_v24 = vsel %vm1145_vm7, %v22978_v12, %v21581_v39  ;;  %v18800_v8 = vsel %vm1145_vm7, %v22979_v36, %v21582_v33  ;;  %22980 = vst [vmem:[#allocation179_spill] sm:$0xff] %v18802_v50  ;;  %v11900_v9 = vunpack.i.l.bf16 %v18802_v50  ;;  %v22983_v12 = vunpack.i.h.bf16 %v18466_v49  ;;  %v22985_v36 = vld [vmem:[#allocation236_spill] sm:$0xff]  ;;  %22988 = vst [vmem:[#allocation131_spill] sm:$0xff] %v18823_v0  ;;  %v23002_v0 = vld [vmem:[#allocation115_spill] sm:$0xff] }
 0xb1b   : > { %9213 = vmatpush1.bf16.msra.mxu0 %v22977_v51  ;;  %v18807_v51 = vpop.permute.xlu0 %11983  ;;  %v22986_v39 = vunpack.i.h.bf16 %v18013_v43  ;;  %v22987_v33 = vunpack.i.l.bf16 %v18013_v43  ;;  %v22989_v61 = vunpack.i.h.bf16 %v18802_v50  ;;  %v22994_v43 = vunpack.i.h.bf16 %v22993_v27 }
 0xb1c   : > { %22982 = vst [vmem:[#allocation182_spill] sm:$0xff] %v18807_v51  ;;  %v18814_v46 = vsel %vm4643_vm9, %v11930_v17, %v22983_v12  ;;  %12198 = vrot.lane.b32.xlu1 %v22985_v36, %s12954_s7  ;;  %v22991_v12 = vld [vmem:[#allocation17_spill] sm:$0xff] }
 0xb1d   : > { %22984 = vst [vmem:[#allocation330_spill] sm:$0xff] %v18814_v46  ;;  %v4908_v3 = vsel %vm4643_vm9, %v22987_v33, %v22986_v39  ;;  %v18829_v62 = vsel %vm4643_vm9, %v11900_v9, %v22989_v61  ;;  %12278 = vrot.lane.b32.xlu0 %v18396_v29, %s12954_s7  ;;  %v22992_v36 = vunpack.i.h.bf16 %v22991_v12  ;;  %v4874_v39 = vsel %vm4643_vm9, %v22994_v43, %v11930_v17  ;;  %v18839_v33 = vpop.f32.mrb[19].mxu0  ;;  %v18843_v50 = vpop.permute.xlu1 %11903  ;;  %v22998_v12 = vld [vmem:[#allocation14_spill] sm:$0xff]  ;;  %v23001_v29 = vld [vmem:[#allocation119_spill] sm:$0xff] }
 0xb1e   : > { %22990 = vst [vmem:[#allocation108_spill] sm:$0xff] %v18829_v62  ;;  %22995 = vst [vmem:[#allocation103_spill] sm:$0xff] %v18839_v33  ;;  %v22999_v27 = vunpack.i.h.bf16 %v22998_v12  ;;  %v11905_v17 = vunpack.i.l.bf16 %v18843_v50  ;;  %v23003_v33 = vpack.c.bf16 %v23001_v29, %v23002_v0  ;;  %v23005_v12 = vunpack.i.l.bf16 %v18496_v16 }
 0xb1f   : > { %v4857_v49 = vsel %vm4643_vm9, %v22992_v36, %v11900_v9  ;;  %v18847_v54 = vpop.permute.xlu0 %11988  ;;  %v22997_v9 = vunpack.i.h.bf16 %v22981_v53  ;;  %v23006_v36 = vunpack.i.l.bf16 %v18807_v51  ;;  %v23010_v29 = vunpack.i.h.bf16 %v22885_v63 }
 0xb20   : > { %v9214_v61 = vpack.c.bf16 %v4874_v39, %v4857_v49  ;;  %22996 = vst [vmem:[#allocation189_spill] sm:$0xff] %v18847_v54  ;;  %12203 = vrot.lane.b32.xlu1 %v23000_v19, %s12954_s7  ;;  %v23007_v19 = vunpack.i.h.bf16 %v18326_v20  ;;  %v23016_v20 = vunpack.i.h.bf16 %v17937_v4 }
 0xb21   : > { %v4891_v43 = vsel %vm4643_vm9, %v22999_v27, %v22997_v9  ;;  %12283 = vrot.lane.b32.xlu0 %v18572_v26, %s12954_s7  ;;  %v23004_v9 = vunpack.i.h.bf16 %v18496_v16  ;;  %v23009_v26 = vunpack.i.h.bf16 %v18353_v32  ;;  %v23017_v32 = vpack.c.bf16 %v18037_v59, %v18009_v13 }
 0xb22   : > { %9215 = vmatprep.subr.bf16.mxu0 %v9214_v61  ;;  %v9218_v49 = vpack.c.bf16 %v4908_v3, %v4891_v43  ;;  %v18874_v3 = vsel %vm1145_vm7, %v23007_v19, %v23006_v36  ;;  %v23008_v61 = vunpack.i.l.bf16 %v18847_v54  ;;  %v23011_v43 = vunpack.i.l.bf16 %v22885_v63  ;;  %v23015_v63 = vld [vmem:[#allocation246_spill] sm:$0xff] }
 0xb23   : > { %9217 = vmatpush1.bf16.msra.mxu0 %v23003_v33  ;;  %v5806_v27 = vsel %vm1145_vm7, %v23005_v12, %v23004_v9  ;;  %v18883_v33 = vpop.permute.xlu1 %11908  ;;  %v18893_v19 = vpop.permute.xlu0 %11993  ;;  %v23021_v13 = vunpack.i.h.bf16 %v18579_v38  ;;  %v23022_v59 = vunpack.i.l.bf16 %v18579_v38 }
 0xb24   : > { %v18881_v0 = vsel %vm1145_vm7, %v23009_v26, %v23008_v61  ;;  %9219 = vmatprep.subr.bf16.mxu0 %v9218_v49  ;;  %v5789_v9 = vsel %vm1145_vm7, %v23011_v43, %v23010_v29  ;;  %v11910_v12 = vunpack.i.l.bf16 %v18883_v33  ;;  %23012 = vst [vmem:[#allocation248_spill] sm:$0xff] %v18893_v19  ;;  %v23013_v61 = vld [vmem:[#allocation80_spill] sm:$0xff]  ;;  %v23014_v49 = vunpack.i.h.bf16 %v17886_v56  ;;  %12208 = vrot.lane.b32.xlu1 %v23015_v63, %s12954_s7 }
 0xb25   : > { %v9222_v29 = vpack.c.bf16 %v5806_v27, %v5789_v9  ;;  %12288 = vrot.lane.b32.xlu0 %v18449_v44, %s12954_s7  ;;  %v23018_v56 = vunpack.i.h.bf16 %v18843_v50  ;;  %v23019_v63 = vunpack.i.h.bf16 %v18883_v33  ;;  %v21593_v9 = vunpack.i.l.bf16 %v18893_v19 }
 0xb26   : > { %v6024_v39 = vsel %vm1145_vm7, %v23014_v49, %v11905_v17  ;;  %v6041_v36 = vsel %vm1145_vm7, %v23016_v20, %v11910_v12  ;;  %v21594_v44 = vunpack.i.h.bf16 %v18651_v35  ;;  %v23132_v46 = vpack.c.bf16 %v18881_v0, %v18874_v3 }
 0xb27   : > { %9221 = vmatpush1.bf16.msra.mxu0 %v23017_v32  ;;  %v6025_v49 = vsel %vm1145_vm7, %v11905_v17, %v23018_v56  ;;  %v6042_v27 = vsel %vm1145_vm7, %v11910_v12, %v23019_v63  ;;  %v18919_v4 = vpop.permute.xlu1 %11913  ;;  %v9156_v43 = vpack.c.bf16 %v6041_v36, %v6024_v39  ;;  %v18922_v26 = vpop.permute.xlu0 %11998  ;;  %v5840_v17 = vsel %vm1145_vm7, %v23022_v59, %v23021_v13  ;;  %v23029_v59 = vld [vmem:[#allocation326_spill] sm:$0xff] }
 0xb28   : > { %9223 = vmatprep.subr.bf16.mxu0 %v9222_v29  ;;  %v9154_v20 = vpack.c.bf16 %v6042_v27, %v6025_v49  ;;  %23020 = vst [vmem:[#allocation335_spill] sm:$0xff] %v18922_v26  ;;  %v21595_v32 = vunpack.i.l.bf16 %v18922_v26  ;;  %v23023_v12 = vpack.i.bf16 %v22674_v57, %v22602_v30  ;;  %v23024_v39 = vunpack.i.h.bf16 %v23013_v61  ;;  %v23049_v57 = vld [vmem:[#allocation288_spill] sm:$0xff] }
 0xb29   : > { %v23025_v36 = vunpack.i.l.bf16 %v23013_v61  ;;  %12293 = vrot.lane.b32.xlu0 %v18644_v2, %s12954_s7  ;;  %v23026_v49 = vunpack.i.h.bf16 %v18538_v31  ;;  %v23027_v63 = vunpack.i.l.bf16 %v18538_v31  ;;  %v23139_v3 = vunpack.i.h.bf16 %v18538_v31 }
 0xb2a   : > { %12213 = vrot.lane.b32.xlu1 %v23023_v12, %s12954_s7  ;;  %9155 = vmatprep.subr.bf16.mxu1 %v9154_v20  ;;  %v23028_v20 = vunpack.i.h.bf16 %v18383_v6  ;;  %v23030_v12 = vunpack.i.h.bf16 %v23029_v59  ;;  %v23037_v59 = vunpack.i.l.bf16 %v18651_v35  ;;  %v23143_v31 = vunpack.i.h.bf16 %v18883_v33  ;;  %v23149_v33 = vld [vmem:[#allocation244_spill] sm:$0xff] }
 0xb2b   : > { %v4014_v29 = vsel %vm3789_vm8, %v23025_v36, %v23024_v39  ;;  %9157 = vmatpush1.bf16.msra.mxu1 %v9156_v43  ;;  %v5823_v27 = vsel %vm1145_vm7, %v23027_v63, %v23026_v49  ;;  %v23031_v43 = vld [vmem:[#allocation124_spill] sm:$0xff]  ;;  %v18962_v39 = vpop.permute.xlu1 %11933 }
 0xb2c   : > { %v18952_v13 = vsel %vm1145_vm7, %v23028_v20, %v21593_v9  ;;  %v18959_v2 = vsel %vm1145_vm7, %v23030_v12, %v21595_v32  ;;  %6978 = vmatmul.mubr.f32.vlgmr.msra.gmra.mrb[22].mxu0 %v23031_v43  ;;  %v9226_v36 = vpack.c.bf16 %v5840_v17, %v5823_v27  ;;  %v23032_v49 = vld [vmem:[#allocation196_spill] sm:$0xff]  ;;  %v23035_v20 = vpack.c.bf16 %v18524_v11, %v18517_v58  ;;  %v18971_v9 = vpop.permute.xlu0 %12003  ;;  %v23040_v43 = vld [vmem:[#allocation254_spill] sm:$0xff]  ;;  %v23042_v58 = vld [vmem:[#allocation161_spill] sm:$0xff] }
 0xb2d   : > { %v23033_v63 = vld [vmem:[#allocation20_spill] sm:$0xff]  ;;  %23036 = vst [vmem:[#allocation334_spill] sm:$0xff] %v18971_v9  ;;  %v5874_v12 = vsel %vm1145_vm7, %v23037_v59, %v21594_v44  ;;  %v23038_v27 = vmov 0.0   ;;  %12298 = vrot.lane.b32.xlu0 %v23042_v58, %s12954_s7  ;;  %v23045_v59 = vunpack.i.l.bf16 %v18615_v28  ;;  %v23046_v17 = vld [vmem:[#allocation129_spill] sm:$0xff]  ;;  %v19000_v11 = vpack.i.bf16 %v4014_v29, %v23049_v57  ;;  %v23067_v57 = vld [vmem:[#allocation138_spill] sm:$0xff] }
 0xb2e   : > { %v23034_v56 = vpack.c.bf16 %v23032_v49, %v23033_v63  ;;  %9225 = vmatpush1.bf16.msra.mxu0 %v23035_v20  ;;  %7048 = vmatprep.mubr.f32.mxu0 %v23038_v27  ;;  %v23043_v63 = vld [vmem:[#allocation63_spill] sm:$0xff]  ;;  %v23044_v20 = vunpack.i.h.bf16 %v18615_v28  ;;  %v23051_v27 = vpack.c.bf16 %v18603_v42, %v18596_v5  ;;  %v23058_v5 = vld [vmem:[#allocation292_spill] sm:$0xff]  ;;  %v23059_v42 = vld [vmem:[#allocation89_spill] sm:$0xff] }
 0xb2f   : > { %9227 = vmatprep.subr.bf16.mxu0 %v9226_v36  ;;  %6907 = vmatmul.mubr.f32.vlgmr.msra.gmra.mrb[24].mxu1 %v23043_v63  ;;  %v23047_v36 = vld [vmem:[#allocation19_spill] sm:$0xff]  ;;  %v18997_v6 = vpop.permute.xlu1 %12013 }
 0xb30   : > { %9255 = vmatprep.subr.bf16.mxu1 %v23034_v56  ;;  %v23039_v56 = vld [vmem:[#allocation250_spill] sm:$0xff]  ;;  %v5857_v44 = vsel %vm1145_vm7, %v23045_v59, %v23044_v20  ;;  %v23048_v32 = vpack.c.bf16 %v23046_v17, %v23047_v36  ;;  %v19007_v16 = vpop.permute.xlu0 %12008  ;;  %v23053_v20 = vld [vmem:[#allocation204_spill] sm:$0xff]  ;;  %v23061_v36 = vunpack.i.h.bf16 %v18684_v1 }
 0xb31   : > { %v23041_v49 = vpack.i.bf16 %v23039_v56, %v23040_v43  ;;  %v23050_v56 = vld [vmem:[#allocation46_spill] sm:$0xff]  ;;  %23052 = vst [vmem:[#allocation117_spill] sm:$0xff] %v19007_v16 }
 0xb32   : > { %9257 = vmatpush1.bf16.msra.mxu1 %v23048_v32  ;;  %7119 = vmatprep.mubr.f32.mxu1 %v23050_v56  ;;  %v23054_v59 = vld [vmem:[#allocation202_spill] sm:$0xff]  ;;  %v23056_v32 = vunpack.i.h.bf16 %v18716_v25 }
 0xb33   : > { %12218 = vrot.lane.b32.xlu1 %v23041_v49, %s12954_s7  ;;  %v9230_v49 = vpack.c.bf16 %v5874_v12, %v5857_v44  ;;  %9229 = vmatpush1.bf16.msra.mxu0 %v23051_v27  ;;  %v23055_v17 = vpack.c.bf16 %v23053_v20, %v23054_v59  ;;  %v23057_v44 = vunpack.i.l.bf16 %v18716_v25  ;;  %v23060_v27 = vpack.i.bf16 %v23058_v5, %v23059_v42  ;;  %v23068_v25 = vld [vmem:[#allocation135_spill] sm:$0xff]  ;;  %v19036_v12 = vpop.permute.xlu1 %12018 }
 0xb34   : > { %v23062_v20 = vunpack.i.l.bf16 %v18684_v1  ;;  %v23069_v53 = vpack.c.bf16 %v23067_v57, %v23068_v25  ;;  %v23070_v42 = vpack.c.bf16 %v18675_v18, %v18668_v14  ;;  %v19042_v1 = vpop.permute.xlu0 %12053  ;;  %v23076_v57 = vunpack.i.l.bf16 %v18775_v41  ;;  %v23077_v14 = vld [vmem:[#allocation293_spill] sm:$0xff]  ;;  %v23078_v18 = vld [vmem:[#allocation95_spill] sm:$0xff] }
 0xb35   : > { %9259 = vmatprep.subr.bf16.mxu1 %v23055_v17  ;;  %v5908_v29 = vsel %vm1145_vm7, %v23057_v44, %v23056_v32  ;;  %9231 = vmatprep.subr.bf16.mxu0 %v9230_v49  ;;  %v23063_v17 = vld [vmem:[#allocation296_spill] sm:$0xff]  ;;  %v23065_v32 = vld [vmem:[#allocation301_spill] sm:$0xff]  ;;  %23071 = vst [vmem:[#allocation116_spill] sm:$0xff] %v19042_v1  ;;  %v12010_v1 = vunpack.i.l.bf16 %v19007_v16 }
 0xb36   : > { %12303 = vrot.lane.b32.xlu0 %v23060_v27, %s12954_s7  ;;  %v5891_v59 = vsel %vm1145_vm7, %v23062_v20, %v23061_v36  ;;  %v23064_v58 = vunpack.i.h.bf16 %v23063_v17  ;;  %v23066_v49 = vunpack.i.h.bf16 %v23065_v32  ;;  %9261 = vmatpush1.bf16.msra.mxu1 %v23069_v53  ;;  %v23072_v36 = vld [vmem:[#allocation212_spill] sm:$0xff] }
 0xb37   : > { %12233 = vrot.lane.b32.xlu1 %v19000_v11, %s12967_s26  ;;  %v9234_v62 = vpack.c.bf16 %v5908_v29, %v5891_v59  ;;  %9233 = vmatpush1.bf16.msra.mxu0 %v23070_v42  ;;  %v23073_v20 = vld [vmem:[#allocation32_spill] sm:$0xff]  ;;  %v23079_v29 = vpack.i.bf16 %v23077_v14, %v23078_v18  ;;  %v23080_v42 = vunpack.i.h.bf16 %v18746_v7  ;;  %v23081_v59 = vunpack.i.l.bf16 %v18746_v7 }
 0xb38   : > { %v12322_v44 = vpack.i.bf16 %v23066_v49, %v23064_v58  ;;  %v23074_v17 = vpack.c.bf16 %v23072_v36, %v23073_v20  ;;  %v23075_v58 = vunpack.i.h.bf16 %v18775_v41  ;;  %v23082_v49 = vld [vmem:[#allocation94_spill] sm:$0xff]  ;;  %v23083_v20 = vld [vmem:[#allocation309_spill] sm:$0xff]  ;;  %v23088_v53 = vld [vmem:[#allocation144_spill] sm:$0xff]  ;;  %v19071_v41 = vpop.permute.xlu1 %12023  ;;  %v23090_v7 = vpack.c.bf16 %v18737_v34, %v18730_v21 }
 0xb39   : > { %9235 = vmatprep.subr.bf16.mxu0 %v9234_v62  ;;  %v5925_v32 = vsel %vm1145_vm7, %v23081_v59, %v23080_v42  ;;  %v23085_v62 = vld [vmem:[#allocation314_spill] sm:$0xff]  ;;  %v19077_v42 = vpop.permute.xlu0 %12058 }
 0xb3a   : > { %9263 = vmatprep.subr.bf16.mxu1 %v23074_v17  ;;  %v5942_v25 = vsel %vm1145_vm7, %v23076_v57, %v23075_v58  ;;  %12308 = vrot.lane.b32.xlu0 %v23079_v29, %s12954_s7  ;;  %v23084_v17 = vunpack.i.h.bf16 %v23083_v20  ;;  %v23086_v58 = vunpack.i.h.bf16 %v23085_v62  ;;  %v23087_v57 = vld [vmem:[#allocation147_spill] sm:$0xff]  ;;  %23091 = vst [vmem:[#allocation333_spill] sm:$0xff] %v19077_v42  ;;  %v23092_v59 = vld [vmem:[#allocation218_spill] sm:$0xff] }
 0xb3b   : > { %12323 = vrot.lane.b32.xlu1 %v12322_v44, %s12954_s7  ;;  %v23089_v27 = vpack.c.bf16 %v23087_v57, %v23088_v53  ;;  %v9238_v29 = vpack.c.bf16 %v5942_v25, %v5925_v32  ;;  %9237 = vmatpush1.bf16.msra.mxu0 %v23090_v7  ;;  %v23093_v20 = vld [vmem:[#allocation38_spill] sm:$0xff]  ;;  %v23096_v53 = vunpack.i.l.bf16 %v18847_v54  ;;  %v23098_v32 = vld [vmem:[#allocation255_spill] sm:$0xff]  ;;  %v23099_v7 = vld [vmem:[#allocation33_spill] sm:$0xff] }
 0xb3c   : > { %v12332_v44 = vpack.i.bf16 %v23086_v58, %v23084_v17  ;;  %v23094_v36 = vpack.c.bf16 %v23092_v59, %v23093_v20  ;;  %v23095_v17 = vunpack.i.h.bf16 %v18847_v54  ;;  %v23097_v62 = vld [vmem:[#allocation290_spill] sm:$0xff]  ;;  %v23101_v58 = vunpack.i.l.bf16 %v18807_v51  ;;  %v23107_v25 = vld [vmem:[#allocation297_spill] sm:$0xff] }
 0xb3d   : > { %9265 = vmatpush1.bf16.msra.mxu1 %v23089_v27  ;;  %9239 = vmatprep.subr.bf16.mxu0 %v9238_v29  ;;  %v23102_v20 = vunpack.i.h.bf16 %v23082_v49  ;;  %v23103_v29 = vunpack.i.l.bf16 %v23082_v49  ;;  %v12337_v18 = vpack.i.bf16 %v23107_v25, %v23058_v5 }
 0xb3e   : > { %9267 = vmatprep.subr.bf16.mxu1 %v23094_v36  ;;  %v5976_v27 = vsel %vm1145_vm7, %v23096_v53, %v23095_v17  ;;  %12313 = vrot.lane.b32.xlu0 %v23099_v7, %s12954_s7  ;;  %v23100_v36 = vunpack.i.h.bf16 %v18807_v51  ;;  %v23104_v17 = vld [vmem:[#allocation156_spill] sm:$0xff]  ;;  %v23105_v53 = vld [vmem:[#allocation153_spill] sm:$0xff]  ;;  %v19109_v7 = vpop.permute.xlu1 %12028 }
 0xb3f   : > { %12333 = vrot.lane.b32.xlu1 %v12332_v44, %s12954_s7  ;;  %v19104_v44 = vsel %vm3938_vm0, %v23103_v29, %v23102_v20  ;;  %v23106_v21 = vpack.c.bf16 %v23104_v17, %v23105_v53  ;;  %v23111_v20 = vpack.c.bf16 %v18800_v8, %v18793_v24  ;;  %v19121_v29 = vpop.permute.xlu0 %12063  ;;  %v23113_v17 = vld [vmem:[#allocation44_spill] sm:$0xff]  ;;  %v23116_v53 = vunpack.i.l.bf16 %v18922_v26 }
 0xb40   : > { %v5959_v57 = vsel %vm1145_vm7, %v23101_v58, %v23100_v36  ;;  %v23108_v36 = vld [vmem:[#allocation28_spill] sm:$0xff]  ;;  %v23109_v58 = vld [vmem:[#allocation294_spill] sm:$0xff]  ;;  %v21612_v24 = vunpack.i.h.bf16 %v19121_v29  ;;  %v21613_v8 = vunpack.i.l.bf16 %v19121_v29 }
 0xb41   : > { %9269 = vmatpush1.bf16.msra.mxu1 %v23106_v21  ;;  %v9242_v34 = vpack.c.bf16 %v5976_v27, %v5959_v57  ;;  %v23110_v59 = vunpack.i.h.bf16 %v23109_v58  ;;  %9241 = vmatpush1.bf16.msra.mxu0 %v23111_v20  ;;  %v23112_v21 = vld [vmem:[#allocation43_spill] sm:$0xff]  ;;  %v23115_v57 = vunpack.i.h.bf16 %v18922_v26  ;;  %v23118_v58 = vunpack.i.l.bf16 %v23097_v62  ;;  %v23126_v20 = vld [vmem:[#allocation158_spill] sm:$0xff] }
 0xb42   : > { %v23114_v27 = vpack.c.bf16 %v23112_v21, %v23113_v17  ;;  %v12005_v21 = vunpack.i.l.bf16 %v18971_v9  ;;  %v19167_v5 = vpop.permute.xlu1 %12033  ;;  %v23128_v26 = vld [vmem:[#allocation303_spill] sm:$0xff] }
 0xb43   : > { %v12317_v54 = vpack.i.bf16 %v23110_v59, %v23108_v36  ;;  %v6010_v59 = vsel %vm1145_vm7, %v23116_v53, %v23115_v57  ;;  %v23117_v36 = vunpack.i.h.bf16 %v23097_v62  ;;  %9243 = vmatprep.subr.bf16.mxu0 %v9242_v34  ;;  %12338 = vrot.lane.b32.xlu1 %v12337_v18, %s12967_s26  ;;  %v23120_v57 = vunpack.i.l.bf16 %v18893_v19 }
 0xb44   : > { %9271 = vmatprep.subr.bf16.mxu1 %v23114_v27  ;;  %v23119_v27 = vunpack.i.h.bf16 %v18893_v19  ;;  %v23122_v34 = vunpack.i.l.bf16 %v23098_v32 }
 0xb45   : > { %v19136_v51 = vsel %vm1529_vm4, %v23118_v58, %v23117_v36  ;;  %12318 = vrot.lane.b32.xlu0 %v12317_v54, %s12954_s7  ;;  %v23121_v36 = vunpack.i.h.bf16 %v23098_v32  ;;  %v19162_v58 = vsel %vm4643_vm9, %v21613_v8, %v21612_v24  ;;  %v23125_v54 = vld [vmem:[#allocation159_spill] sm:$0xff]  ;;  %9245 = vmatpush1.bf16.msra.mxu0 %v23132_v46  ;;  %v21614_v24 = vunpack.i.l.bf16 %v19167_v5  ;;  %v19179_v8 = vpop.permute.xlu0 %12078 }
 0xb46   : > { %v5993_v53 = vsel %vm1145_vm7, %v23120_v57, %v23119_v27  ;;  %23124 = vst [vmem:[#allocation342_spill] sm:$0xff] %v19162_v58  ;;  %v23127_v17 = vpack.c.bf16 %v23125_v54, %v23126_v20  ;;  %v12347_v57 = vpack.i.bf16 %v19104_v44, %v19136_v51  ;;  %23133 = vst [vmem:[#allocation120_spill] sm:$0xff] %v19179_v8  ;;  %v23134_v20 = vld [vmem:[#allocation13_spill] sm:$0xff]  ;;  %v23138_v46 = vunpack.i.l.bf16 %v19109_v7 }
 0xb47   : > { %v19155_v18 = vsel %vm4643_vm9, %v23122_v34, %v23121_v36  ;;  %v9246_v27 = vpack.c.bf16 %v6010_v59, %v5993_v53  ;;  %v23129_v36 = vunpack.i.h.bf16 %v23128_v26  ;;  %v23130_v34 = vld [vmem:[#allocation307_spill] sm:$0xff]  ;;  %v23137_v59 = vunpack.i.h.bf16 %v19007_v16  ;;  %v23148_v26 = vld [vmem:[#allocation241_spill] sm:$0xff] }
 0xb48   : > { %23123 = vst [vmem:[#allocation140_spill] sm:$0xff] %v19155_v18  ;;  %9273 = vmatpush1.bf16.msra.mxu1 %v23127_v17  ;;  %v23131_v19 = vunpack.i.h.bf16 %v23130_v34  ;;  %v23135_v17 = vld [vmem:[#allocation234_spill] sm:$0xff]  ;;  %12348 = vrot.lane.b32.xlu1 %v12347_v57, %s12967_s26  ;;  %v19195_v0 = vsel %vm1145_vm7, %v23139_v3, %v23138_v46  ;;  %v23142_v34 = vld [vmem:[#allocation73_spill] sm:$0xff] }
 0xb49   : > { %v23136_v54 = vpack.c.bf16 %v23134_v20, %v23135_v17  ;;  %v6044_v53 = vsel %vm1145_vm7, %v12010_v1, %v23137_v59  ;;  %9247 = vmatprep.subr.bf16.mxu0 %v9246_v27  ;;  %v23141_v27 = vunpack.i.h.bf16 %v18971_v9  ;;  %v6043_v17 = vsel %vm1145_vm7, %v23143_v31, %v12010_v1  ;;  %v23145_v59 = vld [vmem:[#allocation167_spill] sm:$0xff]  ;;  %v23159_v20 = vld [vmem:[#allocation176_spill] sm:$0xff] }
 0xb4a   : > { %v12327_v42 = vpack.i.bf16 %v23131_v19, %v23129_v36  ;;  %v23140_v19 = vunpack.i.h.bf16 %v18579_v38  ;;  %v19215_v38 = vpop.permute.xlu1 %12038  ;;  %v23151_v1 = vld [vmem:[#allocation99_spill] sm:$0xff] }
 0xb4b   : > { %9275 = vmatprep.subr.bf16.mxu1 %v23136_v54  ;;  %v6027_v57 = vsel %vm1145_vm7, %v12005_v21, %v23141_v27  ;;  %v23144_v54 = vld [vmem:[#allocation168_spill] sm:$0xff]  ;;  %v19222_v27 = vpop.permute.xlu0 %12083  ;;  %v12342_v31 = vpack.i.bf16 %v23151_v1, %v23077_v14  ;;  %v23245_v9 = vld [vmem:[#allocation319_spill] sm:$0xff] }
 0xb4c   : > { %v19202_v36 = vsel %vm1145_vm7, %v23140_v19, %v21614_v24  ;;  %12328 = vrot.lane.b32.xlu0 %v12327_v42, %s12954_s7  ;;  %v23146_v46 = vpack.c.bf16 %v23144_v54, %v23145_v59  ;;  %v9250_v3 = vpack.c.bf16 %v6044_v53, %v6027_v57  ;;  %v23147_v19 = vpack.c.bf16 %v18959_v2, %v18952_v13  ;;  %v23152_v54 = vld [vmem:[#allocation251_spill] sm:$0xff]  ;;  %v23155_v13 = vld [vmem:[#allocation100_spill] sm:$0xff]  ;;  %v23158_v42 = vld [vmem:[#allocation177_spill] sm:$0xff] }
 0xb4d   : > { %v23150_v24 = vpack.c.bf16 %v23148_v26, %v23149_v33  ;;  %v23153_v53 = vunpack.i.h.bf16 %v18843_v50  ;;  %v23157_v26 = vld [vmem:[#allocation83_spill] sm:$0xff]  ;;  %v23160_v59 = vpack.c.bf16 %v23158_v42, %v23159_v20  ;;  %v23168_v33 = vld [vmem:[#allocation198_spill] sm:$0xff]  ;;  %v23169_v20 = vld [vmem:[#allocation25_spill] sm:$0xff] }
 0xb4e   : > { %9277 = vmatpush1.bf16.msra.mxu1 %v23146_v46  ;;  %9249 = vmatpush1.bf16.msra.mxu0 %v23147_v19  ;;  %v23154_v46 = vld [vmem:[#allocation299_spill] sm:$0xff]  ;;  %v19243_v50 = vpop.permute.xlu1 %12043  ;;  %v23170_v42 = vpack.c.bf16 %v23168_v33, %v23169_v20  ;;  %v23172_v19 = vld [vmem:[#allocation104_spill] sm:$0xff]  ;;  %v23184_v20 = vld [vmem:[#allocation105_spill] sm:$0xff] }
 0xb4f   : > { %9279 = vmatprep.subr.bf16.mxu1 %v23150_v24  ;;  %v6026_v57 = vsel %vm1145_vm7, %v23153_v53, %v12005_v21  ;;  %9251 = vmatprep.subr.bf16.mxu0 %v9250_v3  ;;  %v23156_v2 = vpack.i.bf16 %v23154_v46, %v23155_v13  ;;  %v23161_v21 = vunpack.i.l.bf16 %v23142_v34  ;;  %v23162_v3 = vld [vmem:[#allocation114_spill] sm:$0xff]  ;;  %v23177_v13 = vld [vmem:[#allocation195_spill] sm:$0xff] }
 0xb50   : > { %12343 = vrot.lane.b32.xlu0 %v12342_v31, %s12967_s26  ;;  %v9252_v24 = vpack.c.bf16 %v6043_v17, %v6026_v57  ;;  %v23163_v53 = vunpack.i.h.bf16 %v23162_v3  ;;  %v23165_v17 = vld [vmem:[#allocation252_spill] sm:$0xff]  ;;  %v23166_v31 = vld [vmem:[#allocation37_spill] sm:$0xff]  ;;  %v23174_v3 = vld [vmem:[#allocation186_spill] sm:$0xff]  ;;  %v23178_v18 = vunpack.i.h.bf16 %v23177_v13 }
 0xb51   : > { %12353 = vrot.lane.b32.xlu1 %v23156_v2, %s12954_s7  ;;  %v19251_v2 = vpop.permute.xlu0 %12098  ;;  %v23167_v57 = vpack.c.bf16 %v23165_v17, %v23166_v31  ;;  %v23179_v17 = vunpack.i.l.bf16 %v19215_v38  ;;  %v23180_v31 = vunpack.i.h.bf16 %v18615_v28  ;;  %v23199_v28 = vld [vmem:[#allocation311_spill] sm:$0xff] }
 0xb52   : > { %9281 = vmatpush1.bf16.msra.mxu1 %v23160_v59  ;;  %v4672_v46 = vsel %vm4643_vm9, %v23163_v53, %v23161_v21  ;;  %9253 = vmatpush1.bf16.msra.mxu0 %v9252_v24  ;;  %23164 = vst [vmem:[#allocation338_spill] sm:$0xff] %v19251_v2  ;;  %v23171_v59 = vld [vmem:[#allocation300_spill] sm:$0xff]  ;;  %v23176_v53 = vunpack.i.l.bf16 %v23152_v54 }
 0xb53   : > { %9283 = vmatprep.subr.bf16.mxu1 %v23167_v57  ;;  %9351 = vmatprep.subr.bf16.mxu0 %v23170_v42  ;;  %v23173_v14 = vpack.i.bf16 %v23171_v59, %v23172_v19  ;;  %v23175_v21 = vld [vmem:[#allocation184_spill] sm:$0xff]  ;;  %v19275_v33 = vsel %vm1145_vm7, %v23180_v31, %v23179_v17  ;;  %v23182_v57 = vunpack.i.l.bf16 %v19243_v50  ;;  %v23185_v42 = vld [vmem:[#allocation305_spill] sm:$0xff] }
 0xb54   : > { %v9284_v24 = vpack.c.bf16 %v23175_v21, %v23174_v3  ;;  %v4655_v58 = vsel %vm4643_vm9, %v23178_v18, %v23176_v53  ;;  %23181 = vst [vmem:[#allocation337_spill] sm:$0xff] %v19275_v33  ;;  %v23186_v13 = vpack.i.bf16 %v23184_v20, %v23185_v42  ;;  %v23187_v59 = vld [vmem:[#allocation16_spill] sm:$0xff]  ;;  %v19291_v21 = vpop.permute.xlu1 %12048  ;;  %v23190_v53 = vld [vmem:[#allocation53_spill] sm:$0xff]  ;;  %v23268_v33 = vunpack.i.h.bf16 %v18332_v37 }
 0xb55   : > { %12358 = vrot.lane.b32.xlu1 %v23173_v14, %s12954_s7  ;;  %v23183_v14 = vunpack.i.h.bf16 %v18651_v35  ;;  %v9286_v18 = vpack.c.bf16 %v4672_v46, %v4655_v58  ;;  %v21619_v3 = vunpack.i.l.bf16 %v23187_v59  ;;  %7049 = vmatmul.mubr.f32.vlgmr.msra.gmra.mrb[22].mxu0 %v23043_v63  ;;  %23188 = vst [vmem:[#allocation188_spill] sm:$0xff] %v19291_v21  ;;  %v23189_v35 = vunpack.i.l.bf16 %v23157_v26  ;;  %v23193_v58 = vld [vmem:[#allocation22_spill] sm:$0xff]  ;;  %v19303_v20 = vpop.permute.xlu0 %12103  ;;  %v23195_v63 = vld [vmem:[#allocation208_spill] sm:$0xff] }
 0xb56   : > { %12363 = vrot.lane.b32.xlu0 %v23186_v13, %s12954_s7  ;;  %9285 = vmatpush1.bf16.msra.mxu1 %v9284_v24  ;;  %v23191_v17 = vunpack.i.h.bf16 %v23190_v53  ;;  %v23196_v24 = vld [vmem:[#allocation201_spill] sm:$0xff]  ;;  %v23198_v13 = vld [vmem:[#allocation110_spill] sm:$0xff] }
 0xb57   : > { %v19282_v19 = vsel %vm1145_vm7, %v23183_v14, %v23182_v57  ;;  %v23192_v14 = vld [vmem:[#allocation197_spill] sm:$0xff]  ;;  %9287 = vmatprep.subr.bf16.mxu1 %v9286_v18  ;;  %v23197_v42 = vpack.c.bf16 %v23195_v63, %v23196_v24  ;;  %v23200_v53 = vpack.i.bf16 %v23198_v13, %v23199_v28  ;;  %7261 = vmatprep.mubr.f32.mxu0 %v23050_v56  ;;  %v23206_v63 = vld [vmem:[#allocation15_spill] sm:$0xff]  ;;  %v23207_v28 = vld [vmem:[#allocation126_spill] sm:$0xff] }
 0xb58   : > { %v4706_v31 = vsel %vm4643_vm9, %v23191_v17, %v23189_v35  ;;  %v23194_v46 = vpack.c.bf16 %v23192_v14, %v23193_v58  ;;  %v23201_v35 = vld [vmem:[#allocation151_spill] sm:$0xff]  ;;  %v23203_v14 = vld [vmem:[#allocation306_spill] sm:$0xff]  ;;  %v23204_v58 = vld [vmem:[#allocation109_spill] sm:$0xff]  ;;  %v19327_v2 = vpop.permute.xlu1 %12068 }
 0xb59   : > { %12373 = vrot.lane.b32.xlu1 %v23200_v53, %s12954_s7  ;;  %v23202_v17 = vunpack.i.h.bf16 %v23201_v35  ;;  %v23208_v13 = vld [vmem:[#allocation30_spill] sm:$0xff]  ;;  %23210 = vst [vmem:[#allocation336_spill] sm:$0xff] %v19327_v2  ;;  %v23211_v35 = vunpack.i.l.bf16 %v18568_v22  ;;  %v23219_v24 = vld [vmem:[#allocation31_spill] sm:$0xff]  ;;  %v23225_v2 = vld [vmem:[#allocation164_spill] sm:$0xff] }
 0xb5a   : > { %9353 = vmatpush1.bf16.msra.mxu0 %v23194_v46  ;;  %v23205_v46 = vpack.i.bf16 %v23203_v14, %v23204_v58  ;;  %v23209_v53 = vpack.c.bf16 %v23207_v28, %v23208_v13  ;;  %v23214_v58 = vld [vmem:[#allocation205_spill] sm:$0xff]  ;;  %v23222_v13 = vld [vmem:[#allocation312_spill] sm:$0xff] }
 0xb5b   : > { %9355 = vmatprep.subr.bf16.mxu0 %v23197_v42  ;;  %v4689_v57 = vsel %vm4643_vm9, %v23202_v17, %v21619_v3  ;;  %v23212_v17 = vld [vmem:[#allocation48_spill] sm:$0xff]  ;;  %v23218_v42 = vld [vmem:[#allocation215_spill] sm:$0xff]  ;;  %v23221_v28 = vld [vmem:[#allocation313_spill] sm:$0xff] }
 0xb5c   : > { %12368 = vrot.lane.b32.xlu0 %v23205_v46, %s12954_s7  ;;  %v9290_v18 = vpack.c.bf16 %v4706_v31, %v4689_v57  ;;  %9289 = vmatpush1.bf16.msra.mxu1 %v23209_v53  ;;  %v23213_v3 = vunpack.i.h.bf16 %v23212_v17  ;;  %v23215_v31 = vld [vmem:[#allocation203_spill] sm:$0xff]  ;;  %v19337_v46 = vpop.permute.xlu0 %12118  ;;  %v23220_v8 = vpack.c.bf16 %v23218_v42, %v23219_v24  ;;  %v23223_v53 = vpack.i.bf16 %v23221_v28, %v23222_v13  ;;  %v23230_v42 = vld [vmem:[#allocation325_spill] sm:$0xff] }
 0xb5d   : > { %v23216_v57 = vpack.c.bf16 %v23214_v58, %v23215_v31  ;;  %23217 = vst [vmem:[#allocation49_spill] sm:$0xff] %v19337_v46  ;;  %v23224_v17 = vunpack.i.l.bf16 %v23206_v63  ;;  %v23231_v13 = vld [vmem:[#allocation329_spill] sm:$0xff]  ;;  %v23240_v58 = vld [vmem:[#allocation211_spill] sm:$0xff] }
 0xb5e   : > { %v4740_v14 = vsel %vm4643_vm9, %v23213_v3, %v23211_v35  ;;  %9291 = vmatprep.subr.bf16.mxu1 %v9290_v18  ;;  %12378 = vrot.lane.b32.xlu1 %v23223_v53, %s12954_s7  ;;  %v23226_v3 = vunpack.i.h.bf16 %v23225_v2  ;;  %v23227_v18 = vld [vmem:[#allocation113_spill] sm:$0xff]  ;;  %v23232_v53 = vld [vmem:[#allocation328_spill] sm:$0xff]  ;;  %v19362_v2 = vpop.permute.xlu1 %12073 }
 0xb5f   : > { %9357 = vmatpush1.bf16.msra.mxu0 %v23216_v57  ;;  %v23228_v57 = vld [vmem:[#allocation317_spill] sm:$0xff]  ;;  %v23233_v56 = vpack.c.bf16 %v23231_v13, %v23232_v53  ;;  %v23253_v13 = vunpack.i.h.bf16 %v18608_v47 }
 0xb60   : > { %9359 = vmatprep.subr.bf16.mxu0 %v23220_v8  ;;  %v4723_v35 = vsel %vm4643_vm9, %v23226_v3, %v23224_v17  ;;  %v23229_v24 = vpack.i.bf16 %v23227_v18, %v23228_v57  ;;  %v23234_v17 = vunpack.i.l.bf16 %v18640_v40  ;;  %v23235_v3 = vunpack.i.h.bf16 %v18279_v60  ;;  %v23236_v57 = vld [vmem:[#allocation118_spill] sm:$0xff]  ;;  %v23239_v28 = vld [vmem:[#allocation213_spill] sm:$0xff]  ;;  %v19379_v53 = vpop.permute.xlu0 %12123 }
 0xb61   : > { %v9294_v8 = vpack.c.bf16 %v4740_v14, %v4723_v35  ;;  %9293 = vmatpush1.bf16.msra.mxu1 %v23233_v56  ;;  %v10916_v18 = vunpack.i.h.bf16 %v23152_v54  ;;  %v23237_v14 = vld [vmem:[#allocation60_spill] sm:$0xff]  ;;  %v23241_v46 = vpack.c.bf16 %v23239_v28, %v23240_v58  ;;  %v23242_v60 = vld [vmem:[#allocation318_spill] sm:$0xff]  ;;  %v23248_v58 = vld [vmem:[#allocation221_spill] sm:$0xff] }
 0xb62   : > { %12383 = vrot.lane.b32.xlu0 %v23229_v24, %s12954_s7  ;;  %v4774_v31 = vsel %vm4643_vm9, %v23235_v3, %v23234_v17  ;;  %v23238_v35 = vunpack.i.h.bf16 %v23237_v14  ;;  %v23243_v17 = vld [vmem:[#allocation274_spill] sm:$0xff] }
 0xb63   : > { %9361 = vmatpush1.bf16.msra.mxu0 %v23241_v46  ;;  %9295 = vmatprep.subr.bf16.mxu1 %v9294_v8  ;;  %v23244_v3 = vunpack.i.h.bf16 %v23243_v17  ;;  %v23246_v14 = vld [vmem:[#allocation70_spill] sm:$0xff]  ;;  %v23249_v46 = vld [vmem:[#allocation36_spill] sm:$0xff]  ;;  %v23252_v8 = vunpack.i.l.bf16 %v23230_v42 }
 0xb64   : > { %v4048_v24 = vsel %vm3490_vm6, %v23238_v35, %v23236_v57  ;;  %v23247_v21 = vunpack.i.h.bf16 %v23246_v14  ;;  %v23250_v28 = vpack.c.bf16 %v23248_v58, %v23249_v46  ;;  %v23251_v35 = vld [vmem:[#allocation280_spill] sm:$0xff]  ;;  %v23260_v46 = vunpack.i.h.bf16 %v19362_v2 }
 0xb65   : > { %v4045_v16 = vsel %vm3415_vm14, %v23244_v3, %v23242_v60  ;;  %12393 = vrot.lane.b32.xlu1 %v23251_v35, %s12954_s7  ;;  %v4757_v17 = vsel %vm4643_vm9, %v23253_v13, %v23252_v8  ;;  %v23254_v60 = vld [vmem:[#allocation320_spill] sm:$0xff]  ;;  %v23255_v3 = vld [vmem:[#allocation279_spill] sm:$0xff]  ;;  %vm7678_vm6 = vcmask 703488  }
 0xb66   : > { %v19389_v57 = vsel %vm3639_vm1, %v23247_v21, %v23245_v9  ;;  %9363 = vmatprep.subr.bf16.mxu0 %v23250_v28  ;;  %v23256_v56 = vunpack.i.h.bf16 %v23255_v3  ;;  %v23257_v9 = vunpack.i.h.bf16 %v19222_v27  ;;  %v23258_v21 = vunpack.i.l.bf16 %v19222_v27  ;;  %v23263_v13 = vld [vmem:[#allocation275_spill] sm:$0xff] }
 0xb67   : > { %v23261_v28 = vunpack.i.l.bf16 %v19362_v2  ;;  %12388 = vrot.lane.b32.xlu0 %v23263_v13, %s12954_s7  ;;  %v9298_v35 = vpack.c.bf16 %v4774_v31, %v4757_v17  ;;  %v23265_v3 = vpack.c.bf16 %v18555_v48, %v18560_v52  ;;  %v23269_v31 = vunpack.i.l.bf16 %v23152_v54  ;;  %v23270_v13 = vld [vmem:[#allocation219_spill] sm:$0xff]  ;;  %v19445_v52 = vpop.permute.xlu0 %12138  ;;  %v23276_v54 = vld [vmem:[#allocation41_spill] sm:$0xff] }
 0xb68   : > { %v19405_v14 = vsel %vm1539_vm2, %v23256_v56, %v23254_v60  ;;  %v19412_v58 = vsel %vm4643_vm9, %v23258_v21, %v23257_v9  ;;  %v23264_v56 = vld [vmem:[#allocation133_spill] sm:$0xff]  ;;  %v19428_v9 = vpop.permute.xlu1 %12088  ;;  %v23267_v21 = vunpack.i.l.bf16 %v18712_v10  ;;  %23273 = vst [vmem:[#allocation56_spill] sm:$0xff] %v19445_v52  ;;  %vm23654_vm2 = vcmask 973824  }
 0xb69   : > { %23259 = vst [vmem:[#allocation341_spill] sm:$0xff] %v19412_v58  ;;  %v19419_v47 = vsel %vm4643_vm9, %v23261_v28, %v23260_v46  ;;  %9297 = vmatpush1.bf16.msra.mxu1 %v23265_v3  ;;  %23266 = vst [vmem:[#allocation26_spill] sm:$0xff] %v19428_v9  ;;  %v19440_v17 = vsel %vm4643_vm9, %v23269_v31, %v10916_v18  ;;  %v23271_v60 = vld [vmem:[#allocation217_spill] sm:$0xff]  ;;  %v23274_v3 = vunpack.i.l.bf16 %v23098_v32  ;;  %v23275_v28 = vld [vmem:[#allocation226_spill] sm:$0xff] }
 0xb6a   : > { %23262 = vst [vmem:[#allocation340_spill] sm:$0xff] %v19419_v47  ;;  %v4808_v46 = vsel %vm4643_vm9, %v23268_v33, %v23267_v21  ;;  %v23272_v48 = vpack.c.bf16 %v23270_v13, %v23271_v60  ;;  %9299 = vmatprep.subr.bf16.mxu1 %v9298_v35  ;;  %v19452_v33 = vpop.f32.mrb[22].mxu1  ;;  %v12407_v21 = vpack.i.bf16 %v4048_v24, %v4045_v16  ;;  %v23278_v31 = vld [vmem:[#allocation281_spill] sm:$0xff]  ;;  %v23279_v60 = vunpack.i.l.bf16 %v23264_v56 }
 0xb6b   : > { %v19450_v37 = vsel %vm4643_vm9, %v10916_v18, %v23274_v3  ;;  %v23277_v8 = vpack.c.bf16 %v23275_v28, %v23276_v54  ;;  %12398 = vrot.lane.b32.xlu1 %v23278_v31, %s12954_s7  ;;  %v23280_v13 = vunpack.i.h.bf16 %v18680_v55  ;;  %v12422_v18 = vpack.i.bf16 %v19389_v57, %v19405_v14  ;;  %12403 = vrot.lane.b32.xlu0 %v22931_v45, %s12954_s7  ;;  %v23281_v28 = vld [vmem:[#allocation321_spill] sm:$0xff]  ;;  %v23283_v54 = vld [vmem:[#allocation59_spill] sm:$0xff]  ;;  %v23287_v45 = vld [vmem:[#allocation142_spill] sm:$0xff] }
 0xb6c   : > { %9365 = vmatpush1.bf16.msra.mxu0 %v23272_v48  ;;  %v19464_v48 = vpop.f32.mrb[23].mxu1  ;;  %v23282_v3 = vunpack.i.h.bf16 %v23013_v61  ;;  %v23284_v57 = vld [vmem:[#allocation327_spill] sm:$0xff]  ;;  %v23286_v24 = vunpack.i.l.bf16 %v18771_v23  ;;  %v23289_v61 = vld [vmem:[#allocation322_spill] sm:$0xff]  ;;  %v23290_v16 = vld [vmem:[#allocation285_spill] sm:$0xff] }
 0xb6d   : > { %9367 = vmatprep.subr.bf16.mxu0 %v23277_v8  ;;  %v4791_v35 = vsel %vm4643_vm9, %v23280_v13, %v23279_v60  ;;  %v23285_v14 = vpack.c.bf16 %v18627_v15, %v23284_v57  ;;  %v19483_v13 = vpop.permute.xlu1 %12093  ;;  %v23292_v31 = vld [vmem:[#allocation323_spill] sm:$0xff]  ;;  %v23293_v60 = vunpack.i.h.bf16 %v23082_v49  ;;  %v23294_v57 = vld [vmem:[#allocation225_spill] sm:$0xff]  ;;  %v23307_v49 = vunpack.i.l.bf16 %v19303_v20 }
 0xb6e   : > { %v9302_v8 = vpack.c.bf16 %v4808_v46, %v4791_v35  ;;  %v19476_v55 = vsel %vm3789_vm8, %v23282_v3, %v23281_v28  ;;  %v23288_v46 = vunpack.i.h.bf16 %v23287_v45  ;;  %v23291_v28 = vunpack.i.h.bf16 %v23290_v16  ;;  %v23297_v16 = vld [vmem:[#allocation324_spill] sm:$0xff]  ;;  %v23305_v45 = vld [vmem:[#allocation69_spill] sm:$0xff] }
 0xb6f   : > { %9301 = vmatpush1.bf16.msra.mxu1 %v23285_v14  ;;  %v19500_v15 = vsel %vm3938_vm0, %v23293_v60, %v23292_v31  ;;  %v23295_v14 = vld [vmem:[#allocation227_spill] sm:$0xff]  ;;  %v11796_v31 = vunpack.i.h.bf16 %v23142_v34  ;;  %v23299_v60 = vld [vmem:[#allocation233_spill] sm:$0xff]  ;;  %12418 = vrot.lane.b32.xlu1 %v19000_v11, %s12954_s7  ;;  %vm23652_vm8 = vcmask 261120  }
 0xb70   : > { %v4842_v35 = vsel %vm4643_vm9, %v23288_v46, %v23286_v24  ;;  %v19494_v3 = vsel %vm3714_vm3, %v23291_v28, %v23289_v61  ;;  %v23296_v52 = vpack.c.bf16 %v23294_v57, %v23295_v14  ;;  %v19507_v46 = vpop.permute.xlu0 %12143  ;;  %9303 = vmatprep.subr.bf16.mxu1 %v9302_v8  ;;  %v23298_v61 = vunpack.i.h.bf16 %v23097_v62  ;;  %v23300_v57 = vld [vmem:[#allocation45_spill] sm:$0xff]  ;;  %12408 = vrot.lane.b32.xlu0 %v12407_v21, %s12954_s7  ;;  %vm23662_vm13 = vmmov %vm23652_vm8 }
 0xb71   : > { %v23302_v14 = vunpack.i.l.bf16 %v23283_v54  ;;  %v23303_v8 = vld [vmem:[#allocation173_spill] sm:$0xff]  ;;  %vm23656_vm3 = vcmask 785408  }
 0xb72   : > { %9369 = vmatpush1.bf16.msra.mxu0 %v23296_v52  ;;  %v19513_v28 = vsel %vm1529_vm4, %v23298_v61, %v23297_v16  ;;  %v23301_v52 = vpack.c.bf16 %v23299_v60, %v23300_v57  ;;  %v23304_v24 = vunpack.i.h.bf16 %v23303_v8  ;;  %v23306_v61 = vunpack.i.h.bf16 %v19303_v20  ;;  %v23312_v8 = vld [vmem:[#allocation88_spill] sm:$0xff]  ;;  %v23313_v16 = vld [vmem:[#allocation85_spill] sm:$0xff]  ;;  %vm23669_vm15 = vmmov %vm23656_vm3 }
 0xb73   : > { %v23309_v60 = vunpack.i.h.bf16 %v19483_v13  ;;  %v23310_v57 = vunpack.i.l.bf16 %v19483_v13  ;;  %v23314_v58 = vpack.c.bf16 %v23312_v8, %v23313_v16  ;;  %v23316_v32 = vld [vmem:[#allocation149_spill] sm:$0xff]  ;;  %v12442_v8 = vpack.i.bf16 %v19500_v15, %v19513_v28  ;;  %12423 = vrot.lane.b32.xlu1 %v12422_v18, %s12954_s7  ;;  %vm23680_vm14 = vmmov %vm23656_vm3 }
 0xb74   : > { %9371 = vmatprep.subr.bf16.mxu0 %v23301_v52  ;;  %v4825_v62 = vsel %vm4643_vm9, %v23304_v24, %v23302_v14  ;;  %v19533_v47 = vsel %vm4643_vm9, %v23307_v49, %v23306_v61  ;;  %v12020_v14 = vunpack.i.l.bf16 %v19036_v12  ;;  %v19548_v49 = vpop.permute.xlu1 %12108  ;;  %v23315_v61 = vunpack.i.l.bf16 %v18962_v39  ;;  %v23319_v24 = vld [vmem:[#allocation235_spill] sm:$0xff]  ;;  %v23323_v21 = vld [vmem:[#allocation237_spill] sm:$0xff] }
 0xb75   : > { %23308 = vst [vmem:[#allocation50_spill] sm:$0xff] %v19533_v47  ;;  %v19540_v11 = vsel %vm4643_vm9, %v23310_v57, %v23309_v60  ;;  %v9306_v52 = vpack.c.bf16 %v4842_v35, %v4825_v62  ;;  %9305 = vmatpush1.bf16.msra.mxu1 %v23314_v58  ;;  %v23317_v9 = vunpack.i.h.bf16 %v23316_v32  ;;  %v12432_v35 = vpack.i.bf16 %v19476_v55, %v19494_v3  ;;  %v23318_v57 = vld [vmem:[#allocation232_spill] sm:$0xff]  ;;  %v19563_v58 = vpop.permute.xlu0 %12158  ;;  %v23332_v62 = vld [vmem:[#allocation331_spill] sm:$0xff] }
 0xb76   : > { %23311 = vst [vmem:[#allocation62_spill] sm:$0xff] %v19540_v11  ;;  %v23320_v16 = vpack.c.bf16 %v23318_v57, %v23319_v24  ;;  %23321 = vst [vmem:[#allocation339_spill] sm:$0xff] %v19563_v58  ;;  %v12427_v32 = vpack.i.bf16 %v19136_v51, %v23107_v25  ;;  %v12015_v3 = vunpack.i.l.bf16 %v18997_v6  ;;  %v23326_v57 = vld [vmem:[#allocation179_spill] sm:$0xff]  ;;  %v23329_v15 = vunpack.i.l.bf16 %v23187_v59  ;;  %v23333_v58 = vld [vmem:[#allocation98_spill] sm:$0xff] }
 0xb77   : > { %v4876_v60 = vsel %vm4643_vm9, %v23317_v9, %v23315_v61  ;;  %9307 = vmatprep.subr.bf16.mxu1 %v9306_v52  ;;  %v12437_v9 = vpack.i.bf16 %v19104_v44, %v23151_v1  ;;  %v23322_v61 = vld [vmem:[#allocation243_spill] sm:$0xff]  ;;  %v23325_v52 = vunpack.i.l.bf16 %v23305_v45  ;;  %v23327_v51 = vunpack.i.h.bf16 %v23326_v57 }
 0xb78   : > { %9373 = vmatpush1.bf16.msra.mxu0 %v23320_v16  ;;  %v23324_v24 = vpack.c.bf16 %v23322_v61, %v23323_v21  ;;  %v23328_v44 = vunpack.i.h.bf16 %v23187_v59  ;;  %v23330_v61 = vld [vmem:[#allocation287_spill] sm:$0xff]  ;;  %v23335_v21 = vunpack.i.h.bf16 %v19036_v12  ;;  %12428 = vrot.lane.b32.xlu1 %v12427_v32, %s12954_s7  ;;  %v23347_v47 = vunpack.i.l.bf16 %v19379_v53 }
 0xb79   : > { %v4859_v16 = vsel %vm4643_vm9, %v23327_v51, %v23325_v52  ;;  %12413 = vrot.lane.b32.xlu0 %v23330_v61, %s12954_s7  ;;  %v12025_v51 = vunpack.i.l.bf16 %v19071_v41  ;;  %v23338_v61 = vld [vmem:[#allocation242_spill] sm:$0xff]  ;;  %vm23653_vm4 = vcmask 523264  }
 0xb7a   : > { %9375 = vmatprep.subr.bf16.mxu0 %v23324_v24  ;;  %v19587_v28 = vsel %vm4643_vm9, %v23329_v15, %v23328_v44  ;;  %v9310_v18 = vpack.c.bf16 %v4876_v60, %v4859_v16  ;;  %v23331_v24 = vunpack.i.l.bf16 %v23142_v34  ;;  %v23334_v44 = vpack.c.bf16 %v23332_v62, %v23333_v58  ;;  %v19601_v15 = vpop.permute.xlu1 %12113  ;;  %vm23668_vm12 = vmmov %vm23653_vm4 }
 0xb7b   : > { %v4910_v55 = vsel %vm4643_vm9, %v12020_v14, %v23335_v21  ;;  %v23336_v60 = vunpack.i.h.bf16 %v23157_v26  ;;  %v23337_v34 = vunpack.i.l.bf16 %v23157_v26  ;;  %v21637_v62 = vunpack.i.h.bf16 %v19601_v15  ;;  %vm23678_vm10 = vmmov %vm23653_vm4 }
 0xb7c   : > { %v4673_v57 = vsel %vm4643_vm9, %v23331_v24, %v11796_v31  ;;  %9309 = vmatpush1.bf16.msra.mxu1 %v23334_v44  ;;  %v23339_v24 = vld [vmem:[#allocation245_spill] sm:$0xff]  ;;  %v21638_v58 = vunpack.i.l.bf16 %v19601_v15  ;;  %v19618_v44 = vpop.permute.xlu0 %12163  ;;  %v23341_v21 = vunpack.i.l.bf16 %v19121_v29  ;;  %12443 = vrot.lane.b32.xlu1 %v12442_v8, %s12954_s7 }
 0xb7d   : > { %v19611_v16 = vsel %vm4643_vm9, %v23337_v34, %v23336_v60  ;;  %v23340_v52 = vpack.c.bf16 %v23338_v61, %v23339_v24  ;;  %9311 = vmatprep.subr.bf16.mxu1 %v9310_v18  ;;  %v11915_v60 = vunpack.i.l.bf16 %v18919_v4  ;;  %v23342_v34 = vld [vmem:[#allocation121_spill] sm:$0xff]  ;;  %v23345_v18 = vunpack.i.h.bf16 %v18997_v6  ;;  %12433 = vrot.lane.b32.xlu0 %v12432_v35, %s12954_s7 }
 0xb7e   : > { %v4674_v11 = vsel %vm4643_vm9, %v11796_v31, %v23341_v21  ;;  %v23343_v25 = vunpack.i.h.bf16 %v23342_v34  ;;  %v23346_v21 = vunpack.i.h.bf16 %v19379_v53  ;;  %v11826_v35 = vunpack.i.h.bf16 %v23206_v63  ;;  %v7929_v8 = vld [vmem:[%s23364_s29] sm:$0x7]  ;;  %s23500_s29 = smov 77  }
 0xb7f   : > { %9377 = vmatpush1.bf16.msra.mxu0 %v23340_v52  ;;  %v23344_v52 = vpack.c.bf16 %v23040_v43, %v22602_v30  ;;  %v4893_v24 = vsel %vm4643_vm9, %v12015_v3, %v23345_v18  ;;  %v19648_v30 = vsel %vm4643_vm9, %v21638_v58, %v21637_v62  ;;  %v9382_v18 = vpack.c.bf16 %v4674_v11, %v19450_v37 }
 0xb80   : > { %v4909_v61 = vsel %vm4643_vm9, %v23343_v25, %v12020_v14  ;;  %v19641_v34 = vsel %vm4643_vm9, %v23347_v47, %v23346_v21  ;;  %v9314_v43 = vpack.c.bf16 %v4910_v55, %v4893_v24  ;;  %v23348_v25 = vld [vmem:[#allocation330_spill] sm:$0xff]  ;;  %v23349_v14 = vld [vmem:[#allocation108_spill] sm:$0xff]  ;;  %v9384_v47 = vpack.c.bf16 %v4673_v57, %v19440_v17  ;;  %v19670_v37 = vpop.permute.xlu0 %12223  ;;  %7932 = vperm.xlu1 %10066, %v7929_v8  }
 0xb81   : > { %9379 = vmatprep.subr.bf16.mxu0 %v23344_v52  ;;  %v23350_v32 = vpack.c.bf16 %v23348_v25, %v23349_v14  ;;  %v19654_v52 = vpop.permute.xlu1 %12128  ;;  %v23351_v21 = vunpack.i.h.bf16 %v19071_v41  ;;  %v23352_v55 = vld [vmem:[#allocation160_spill] sm:$0xff]  ;;  %v23354_v14 = vld [vmem:[#allocation253_spill] sm:$0xff]  ;;  %v23357_v17 = vunpack.i.l.bf16 %v19362_v2  ;;  %v23358_v11 = vunpack.i.h.bf16 %v23187_v59  ;;  %12438 = vrot.lane.b32.xlu0 %v12437_v9, %s12954_s7 }
 0xb82   : > { %v23353_v24 = vunpack.i.h.bf16 %v23352_v55  ;;  %v11836_v55 = vunpack.i.h.bf16 %v18568_v22  ;;  %v21641_v9 = vunpack.i.h.bf16 %v19507_v46  ;;  %v23374_v8 = vunpack.i.l.bf16 %v19303_v20 }
 0xb83   : > { %9313 = vmatpush1.bf16.msra.mxu1 %v23350_v32  ;;  %v5808_v31 = vsel %vm1145_vm7, %v12025_v51, %v23351_v21  ;;  %v23355_v32 = vld [vmem:[#allocation247_spill] sm:$0xff]  ;;  %v4691_v57 = vsel %vm4643_vm9, %v23358_v11, %v23357_v17  ;;  %v9388_v21 = vpack.c.bf16 %v19611_v16, %v19587_v28  ;;  %v23362_v28 = vunpack.i.l.bf16 %v19222_v27 }
 0xb84   : > { %v4892_v25 = vsel %vm4643_vm9, %v23353_v24, %v12015_v3  ;;  %v23356_v58 = vpack.c.bf16 %v23354_v14, %v23355_v32  ;;  %9315 = vmatprep.subr.bf16.mxu1 %v9314_v43  ;;  %v21640_v3 = vunpack.i.h.bf16 %v19109_v7  ;;  %v23359_v24 = vunpack.i.h.bf16 %v18919_v4  ;;  %v23360_v14 = vld [vmem:[#allocation78_spill] sm:$0xff] }
 0xb85   : > { %v23361_v32 = vunpack.i.h.bf16 %v23360_v14  ;;  %v23363_v16 = vunpack.i.h.bf16 %v23157_v26  ;;  %v19705_v26 = vpop.permute.xlu1 %12133 }
 0xb86   : > { %9381 = vmatpush1.bf16.msra.mxu0 %v23356_v58  ;;  %v9316_v58 = vpack.c.bf16 %v4909_v61, %v4892_v25  ;;  %v5791_v43 = vsel %vm1145_vm7, %v11915_v60, %v23359_v24  ;;  %v23365_v61 = vunpack.i.h.bf16 %v19167_v5  ;;  %v23366_v25 = vunpack.i.l.bf16 %v19167_v5 }
 0xb87   : > { %9383 = vmatprep.subr.bf16.mxu0 %v9382_v18  ;;  %v5807_v59 = vsel %vm1145_vm7, %v23361_v32, %v12025_v51  ;;  %v9318_v17 = vpack.c.bf16 %v5808_v31, %v5791_v43  ;;  %v4708_v18 = vsel %vm4643_vm9, %v23363_v16, %v23362_v28  ;;  %v21642_v51 = vunpack.i.h.bf16 %v19243_v50  ;;  %v23367_v43 = vld [vmem:[#allocation194_spill] sm:$0xff] }
 0xb88   : > { %v5842_v11 = vsel %vm1145_vm7, %v23366_v25, %v23365_v61  ;;  %v21643_v31 = vunpack.i.l.bf16 %v19507_v46  ;;  %9317 = vmatpush1.bf16.msra.mxu1 %v9316_v58  ;;  %v9386_v24 = vpack.c.bf16 %v4708_v18, %v4691_v57  ;;  %v23368_v14 = vunpack.i.h.bf16 %v23367_v43  ;;  %v19712_v61 = vpop.permute.xlu0 %12228 }
 0xb89   : > { %v21639_v28 = vunpack.i.h.bf16 %v19705_v26  ;;  %v12135_v16 = vunpack.i.l.bf16 %v19705_v26  ;;  %9319 = vmatprep.subr.bf16.mxu1 %v9318_v17  ;;  %v23369_v25 = vunpack.i.l.bf16 %v19483_v13  ;;  %v23370_v58 = vunpack.i.l.bf16 %v18568_v22  ;;  %v23373_v22 = vld [vmem:[#allocation131_spill] sm:$0xff] }
 0xb8a   : > { %v5790_v32 = vsel %vm1145_vm7, %v23368_v14, %v11915_v60  ;;  %9385 = vmatpush1.bf16.msra.mxu0 %v9384_v47  ;;  %v23371_v47 = vunpack.i.l.bf16 %v19109_v7  ;;  %v11846_v17 = vunpack.i.h.bf16 %v23230_v42  ;;  %7624 = vrot.lane.b32.xlu0 %v23373_v22, %s21713_s17  ;;  %s12983_s17 = smov 107  }
 0xb8b   : > { %v4725_v62 = vsel %vm4643_vm9, %v11826_v35, %v23369_v25  ;;  %v4741_v57 = vsel %vm4643_vm9, %v23370_v58, %v11836_v55  ;;  %9387 = vmatprep.subr.bf16.mxu0 %v9386_v24  ;;  %v9320_v60 = vpack.c.bf16 %v5807_v59, %v5790_v32  ;;  %v19730_v14 = vsel %vm4643_vm9, %v12135_v16, %v21639_v28  ;;  %v19734_v25 = vld [vmem:[#allocation9] sm:$0x77] }
 0xb8c   : > { %v5825_v43 = vsel %vm1145_vm7, %v23371_v47, %v21640_v3  ;;  %23372 = vst [vmem:[#allocation125_spill] sm:$0xff] %v19730_v14  ;;  %7120 = vmatmul.mubr.f32.vlgmr.msra.gmra.mrb[26].mxu1 %v19734_v25  ;;  %v4742_v24 = vsel %vm4643_vm9, %v11836_v55, %v23374_v8  ;;  %v11856_v32 = vunpack.i.h.bf16 %v18640_v40  ;;  %v19746_v58 = vsel %vm4643_vm9, %v21643_v31, %v21641_v9  ;;  %v19748_v47 = vpop.permute.xlu1 %12148  ;;  %v19759_v18 = vpop.permute.xlu0 %12238 }
 0xb8d   : > { %v9322_v59 = vpack.c.bf16 %v5842_v11, %v5825_v43  ;;  %9321 = vmatpush1.bf16.msra.mxu1 %v9320_v60  ;;  %v9390_v28 = vpack.c.bf16 %v4742_v24, %v4725_v62  ;;  %v23375_v11 = vunpack.i.l.bf16 %v19243_v50  ;;  %v23376_v55 = vmov 0.0   ;;  %7627 = vrot.lane.b32.xlu1 %v23373_v22, %s23379_s30  ;;  %s23501_s30 = smov 80  }
 0xb8e   : > { %7190 = vmatprep.mubr.f32.mxu1 %v23376_v55  ;;  %v23377_v8 = vunpack.i.l.bf16 %v23206_v63  ;;  %9389 = vmatpush1.bf16.msra.mxu0 %v9388_v21  ;;  %v23378_v60 = vunpack.i.l.bf16 %v19601_v15  ;;  %v11866_v9 = vunpack.i.h.bf16 %v23264_v56  ;;  %v23381_v21 = vunpack.i.l.bf16 %v19215_v38 }
 0xb8f   : > { %v5876_v43 = vsel %vm1145_vm7, %v23375_v11, %v21642_v51  ;;  %9323 = vmatprep.subr.bf16.mxu1 %v9322_v59  ;;  %9391 = vmatprep.subr.bf16.mxu0 %v9390_v28  ;;  %v23383_v28 = vunpack.i.l.bf16 %v19379_v53  ;;  %v11876_v51 = vunpack.i.h.bf16 %v18712_v10 }
 0xb90   : > { %v4724_v3 = vsel %vm4643_vm9, %v23377_v8, %v11826_v35  ;;  %v4759_v62 = vsel %vm4643_vm9, %v11846_v17, %v23378_v60  ;;  %v23380_v35 = vunpack.i.h.bf16 %v19215_v38  ;;  %v12165_v8 = vunpack.i.l.bf16 %v19618_v44  ;;  %7631 = vrot.lane.b32.xlu0 %v23373_v22, %s23382_s28  ;;  %v19792_v11 = vpop.permute.xlu0 %12243 }
 0xb91   : > { %v9392_v63 = vpack.c.bf16 %v4741_v57, %v4724_v3  ;;  %v4776_v24 = vsel %vm4643_vm9, %v11856_v32, %v23383_v28  ;;  %v23384_v3 = vunpack.i.l.bf16 %v18640_v40  ;;  %23386 = vst [vmem:[#allocation191_spill] sm:$0xff] %v19792_v11  ;;  %v4793_v40 = vsel %vm4643_vm9, %v11866_v9, %v12135_v16 }
 0xb92   : > { %v5859_v59 = vsel %vm1145_vm7, %v23381_v21, %v23380_v35  ;;  %v23385_v35 = vpack.c.bf16 %v19202_v36, %v19195_v0  ;;  %v19788_v21 = vpop.permute.xlu1 %12153  ;;  %v9394_v31 = vpack.c.bf16 %v4776_v24, %v4759_v62  ;;  %v11886_v0 = vunpack.i.h.bf16 %v23283_v54  ;;  %v23388_v62 = vld [vmem:[#allocation103_spill] sm:$0xff] }
 0xb93   : > { %v9326_v60 = vpack.c.bf16 %v5876_v43, %v5859_v59  ;;  %v4775_v57 = vsel %vm4643_vm9, %v23384_v3, %v11856_v32  ;;  %9393 = vmatpush1.bf16.msra.mxu0 %v9392_v63  ;;  %v21644_v43 = vunpack.i.h.bf16 %v19788_v21  ;;  %v12155_v59 = vunpack.i.l.bf16 %v19788_v21  ;;  %7633 = vrot.lane.b32.xlu1 %v23388_v62, %s23382_s28  ;;  %s12989_s28 = smov 74  }
 0xb94   : > { %9325 = vmatpush1.bf16.msra.mxu1 %v23385_v35  ;;  %v23387_v32 = vunpack.i.l.bf16 %v23230_v42  ;;  %v11896_v36 = vunpack.i.h.bf16 %v18771_v23  ;;  %9395 = vmatprep.subr.bf16.mxu0 %v9394_v31  ;;  %v23389_v24 = vunpack.i.h.bf16 %v19618_v44  ;;  %v23393_v3 = vunpack.i.l.bf16 %v18712_v10 }
 0xb95   : > { %9327 = vmatprep.subr.bf16.mxu1 %v9326_v60  ;;  %v19810_v16 = vsel %vm4643_vm9, %v12155_v59, %v21644_v43  ;;  %7637 = vrot.lane.b32.xlu0 %v23388_v62, %s12967_s26  ;;  %v11926_v60 = vunpack.i.h.bf16 %v23305_v45  ;;  %v4827_v14 = vsel %vm4643_vm9, %v11886_v0, %v12155_v59  ;;  %v23397_v10 = vunpack.i.l.bf16 %v23264_v56  ;;  %v23408_v59 = vld [vmem:[#allocation188_spill] sm:$0xff]  ;;  %s12984_s26 = smov 101  }
 0xb96   : > { %v4758_v28 = vsel %vm4643_vm9, %v23387_v32, %v11846_v17  ;;  %v19805_v63 = vsel %vm4643_vm9, %v12165_v8, %v23389_v24  ;;  %23391 = vst [vmem:[#allocation145_spill] sm:$0xff] %v19810_v16  ;;  %v23392_v17 = vunpack.i.l.bf16 %v19507_v46  ;;  %v4809_v35 = vsel %vm4643_vm9, %v23393_v3, %v11876_v51  ;;  %v23394_v32 = vld [vmem:[#allocation337_spill] sm:$0xff]  ;;  %v19824_v43 = vpop.permute.xlu1 %12168 }
 0xb97   : > { %23390 = vst [vmem:[#allocation123_spill] sm:$0xff] %v19805_v63  ;;  %v9396_v42 = vpack.c.bf16 %v4775_v57, %v4758_v28  ;;  %v23395_v24 = vpack.c.bf16 %v19282_v19, %v23394_v32  ;;  %v11936_v28 = vunpack.i.h.bf16 %v18962_v39  ;;  %v23398_v19 = vunpack.i.l.bf16 %v23283_v54  ;;  %v23399_v32 = vld [vmem:[#allocation169_spill] sm:$0xff]  ;;  %7640 = vrot.lane.b32.xlu1 %v23388_v62, %s12982_s14  ;;  %s12990_s14 = smov 68  }
 0xb98   : > { %v4810_v31 = vsel %vm4643_vm9, %v11876_v51, %v23392_v17  ;;  %v19829_v17 = vpop.permute.xlu0 %12248  ;;  %v4792_v51 = vsel %vm4643_vm9, %v23397_v10, %v11866_v9  ;;  %v12230_v56 = vunpack.i.l.bf16 %v19712_v61  ;;  %v4844_v9 = vsel %vm4643_vm9, %v11896_v36, %v12165_v8 }
 0xb99   : > { %9329 = vmatpush1.bf16.msra.mxu1 %v23395_v24  ;;  %v9398_v22 = vpack.c.bf16 %v4810_v31, %v4793_v40  ;;  %9397 = vmatpush1.bf16.msra.mxu0 %v9396_v42  ;;  %23396 = vst [vmem:[#allocation200_spill] sm:$0xff] %v19829_v17  ;;  %v4826_v3 = vsel %vm4643_vm9, %v23398_v19, %v11886_v0  ;;  %v23400_v31 = vunpack.i.l.bf16 %v18771_v23  ;;  %v23402_v0 = vunpack.i.l.bf16 %v23305_v45  ;;  %v23403_v42 = vld [vmem:[#allocation333_spill] sm:$0xff] }
 0xb9a   : > { %7643 = vrot.lane.b32.xlu0 %v23388_v62, %s23401_s27  ;;  %v9400_v54 = vpack.c.bf16 %v4809_v35, %v4792_v51  ;;  %v19853_v19 = vpop.permute.xlu1 %12173  ;;  %v23405_v57 = vunpack.i.l.bf16 %v18962_v39  ;;  %v23407_v51 = vld [vmem:[#allocation116_spill] sm:$0xff]  ;;  %v23409_v39 = vunpack.i.h.bf16 %v19712_v61  ;;  %v23412_v16 = vunpack.i.h.bf16 %v23403_v42  ;;  %s23528_s27 = smov 71  }
 0xb9b   : > { %v4843_v24 = vsel %vm4643_vm9, %v23400_v31, %v11896_v36  ;;  %9399 = vmatprep.subr.bf16.mxu0 %v9398_v22  ;;  %v4860_v23 = vsel %vm4643_vm9, %v23402_v0, %v11926_v60  ;;  %v12060_v22 = vunpack.i.l.bf16 %v23403_v42  ;;  %23404 = vst [vmem:[#allocation92_spill] sm:$0xff] %v19853_v19  ;;  %v9402_v31 = vpack.c.bf16 %v4844_v9, %v4827_v14 }
 0xb9c   : > { %v4877_v40 = vsel %vm4643_vm9, %v23405_v57, %v11936_v28  ;;  %v21648_v35 = vunpack.i.h.bf16 %v19853_v19  ;;  %v12175_v8 = vunpack.i.l.bf16 %v19853_v19  ;;  %v19860_v36 = vpop.permute.xlu0 %12253  ;;  %v9404_v45 = vpack.c.bf16 %v4843_v24, %v4826_v3  ;;  %7647 = vrot.lane.b32.xlu1 %v23388_v62, %s12983_s17 }
 0xb9d   : > { %9401 = vmatpush1.bf16.msra.mxu0 %v9400_v54  ;;  %23406 = vst [vmem:[#allocation154_spill] sm:$0xff] %v19860_v36  ;;  %v12055_v10 = vunpack.i.l.bf16 %v23407_v51  ;;  %v12050_v14 = vunpack.i.l.bf16 %v23408_v59  ;;  %v19870_v57 = vsel %vm4643_vm9, %v12230_v56, %v23409_v39  ;;  %v4878_v54 = vsel %vm4643_vm9, %v11936_v28, %v12230_v56 }
 0xb9e   : > { %9403 = vmatprep.subr.bf16.mxu0 %v9402_v31  ;;  %23410 = vst [vmem:[#allocation66_spill] sm:$0xff] %v19870_v57  ;;  %v19875_v3 = vsel %vm4643_vm9, %v12175_v8, %v21648_v35  ;;  %v4861_v24 = vsel %vm4643_vm9, %v11926_v60, %v12175_v8  ;;  %7649 = vrot.lane.b32.xlu0 %v19452_v33, %s12983_s17  ;;  %v19880_v9 = vpop.permute.xlu1 %12178  ;;  %v12240_v63 = vunpack.i.l.bf16 %v19759_v18  ;;  %v23417_v0 = vunpack.i.h.bf16 %v23408_v59  ;;  %s12991_s17 = smov 65  }
 0xb9f   : > { %23411 = vst [vmem:[#allocation72_spill] sm:$0xff] %v19875_v3  ;;  %v9406_v31 = vpack.c.bf16 %v4878_v54, %v4861_v24  ;;  %v9408_v62 = vpack.c.bf16 %v4877_v40, %v4860_v23  ;;  %v4912_v39 = vsel %vm4643_vm9, %v12060_v22, %v23412_v16  ;;  %v12180_v28 = vunpack.i.l.bf16 %v19880_v9  ;;  %v23414_v23 = vld [vmem:[#allocation178_spill] sm:$0xff] }
 0xba0   : > { %v19891_v56 = vpop.permute.xlu0 %12258  ;;  %v11920_v40 = vunpack.i.l.bf16 %v23399_v32  ;;  %v23415_v8 = vunpack.i.h.bf16 %v23414_v23  ;;  %v23416_v24 = vunpack.i.h.bf16 %v23407_v51  ;;  %7654 = vrot.lane.b32.xlu1 %v19452_v33, %s12954_s7  ;;  %v12250_v60 = vunpack.i.l.bf16 %v19829_v17  ;;  %v23418_v3 = vld [vmem:[#allocation170_spill] sm:$0xff]  ;;  %s12985_s7 = smov 98  }
 0xba1   : > { %9405 = vmatpush1.bf16.msra.mxu0 %v9404_v45  ;;  %23413 = vst [vmem:[#allocation86_spill] sm:$0xff] %v19891_v56  ;;  %v5893_v45 = vsel %vm1145_vm7, %v12050_v14, %v23417_v0  ;;  %v23419_v23 = vunpack.i.h.bf16 %v23418_v3  ;;  %v23421_v0 = vunpack.i.h.bf16 %v19036_v12  ;;  %v23422_v3 = vunpack.i.h.bf16 %v19071_v41 }
 0xba2   : > { %v5892_v16 = vsel %vm1145_vm7, %v23415_v8, %v12050_v14  ;;  %9407 = vmatprep.subr.bf16.mxu0 %v9406_v31  ;;  %v4895_v54 = vsel %vm4643_vm9, %v12055_v10, %v23416_v24  ;;  %v23420_v31 = vunpack.i.h.bf16 %v19880_v9  ;;  %7657 = vrot.lane.b32.xlu0 %v19452_v33, %s12984_s26  ;;  %v19917_v24 = vpop.permute.xlu1 %12183  ;;  %v21657_v19 = vunpack.i.h.bf16 %v19792_v11  ;;  %s12992_s26 = smov 59  }
 0xba3   : > { %v5909_v8 = vsel %vm1145_vm7, %v23419_v23, %v12180_v28  ;;  %v4911_v14 = vsel %vm4643_vm9, %v23421_v0, %v12060_v22  ;;  %v9410_v35 = vpack.c.bf16 %v4912_v39, %v4895_v54  ;;  %v5809_v23 = vsel %vm1145_vm7, %v23422_v3, %v12240_v63 }
 0xba4   : > { %v5910_v51 = vsel %vm1145_vm7, %v12180_v28, %v23420_v31  ;;  %v9332_v42 = vpack.c.bf16 %v5909_v8, %v5892_v16  ;;  %v12245_v28 = vunpack.i.l.bf16 %v19792_v11  ;;  %v19924_v31 = vpop.permute.xlu0 %12263  ;;  %v23423_v12 = vunpack.i.h.bf16 %v19759_v18  ;;  %7660 = vrot.lane.b32.xlu1 %v19452_v33, %s12985_s7  ;;  %s12993_s7 = smov 62  }
 0xba5   : > { %v9330_v57 = vpack.c.bf16 %v5910_v51, %v5893_v45  ;;  %9409 = vmatpush1.bf16.msra.mxu0 %v9408_v62  ;;  %v23424_v0 = vunpack.i.h.bf16 %v18919_v4  ;;  %v23425_v39 = vunpack.i.h.bf16 %v18997_v6  ;;  %v23426_v16 = vunpack.i.h.bf16 %v23399_v32 }
 0xba6   : > { %v5810_v22 = vsel %vm1145_vm7, %v12240_v63, %v23423_v12  ;;  %9411 = vmatprep.subr.bf16.mxu0 %v9410_v35  ;;  %v21660_v54 = vunpack.i.h.bf16 %v19917_v24  ;;  %v12185_v45 = vunpack.i.l.bf16 %v19917_v24  ;;  %v23427_v4 = vunpack.i.h.bf16 %v19829_v17  ;;  %v19946_v35 = vpop.permute.xlu1 %12188  ;;  %7664 = vrot.lane.b32.xlu0 %v19464_v48, %s23428_s15  ;;  %s12994_s15 = smov 53  }
 0xba7   : > { %v5792_v51 = vsel %vm1145_vm7, %v23424_v0, %v11920_v40  ;;  %v4894_v41 = vsel %vm4643_vm9, %v23425_v39, %v12055_v10  ;;  %9331 = vmatprep.subr.bf16.mxu1 %v9330_v57  ;;  %v5793_v62 = vsel %vm1145_vm7, %v11920_v40, %v23426_v16  ;;  %v21656_v6 = vunpack.i.h.bf16 %v19891_v56 }
 0xba8   : > { %9333 = vmatpush1.bf16.msra.mxu1 %v9332_v42  ;;  %v9412_v63 = vpack.c.bf16 %v4911_v14, %v4894_v41  ;;  %v5844_v8 = vsel %vm1145_vm7, %v12250_v60, %v23427_v4  ;;  %v12260_v10 = vunpack.i.l.bf16 %v19891_v56  ;;  %v9414_v57 = vpack.c.bf16 %v5810_v22, %v5793_v62  ;;  %v19955_v12 = vpop.permute.xlu0 %12268  ;;  %v23431_v41 = vld [vmem:[#allocation332_spill] sm:$0xff]  ;;  %7667 = vrot.lane.b32.xlu1 %v19464_v48, %s12971_s22  ;;  %s12986_s22 = smov 89   ;;  %v23526_v56 = vld [vmem:[#allocation58_spill] sm:$0xff] }
 0xba9   : > { %v9416_v40 = vpack.c.bf16 %v5809_v23, %v5792_v51  ;;  %v23429_v42 = vunpack.i.h.bf16 %v19109_v7  ;;  %v12191_v3 = vunpack.i.h.bf16 %v19946_v35  ;;  %v12190_v33 = vunpack.i.l.bf16 %v19946_v35 }
 0xbaa   : > { %9413 = vmatpush1.bf16.msra.mxu0 %v9412_v63  ;;  %v5827_v0 = vsel %vm1145_vm7, %v12245_v28, %v21657_v19  ;;  %v23430_v23 = vunpack.i.h.bf16 %v19167_v5  ;;  %v21655_v51 = vunpack.i.h.bf16 %v19860_v36  ;;  %v12255_v7 = vunpack.i.l.bf16 %v19860_v36  ;;  %v23433_v63 = vld [vmem:[#allocation93_spill] sm:$0xff]  ;;  %7670 = vrot.lane.b32.xlu0 %v19464_v48, %s12986_s22  ;;  %s12996_s22 = smov 41  }
 0xbab   : > { %v5826_v14 = vsel %vm1145_vm7, %v23429_v42, %v12245_v28  ;;  %9415 = vmatprep.subr.bf16.mxu0 %v9414_v57  ;;  %v9418_v39 = vpack.c.bf16 %v5844_v8, %v5827_v0  ;;  %v23432_v16 = vunpack.i.h.bf16 %v23431_v41  ;;  %v23434_v4 = vunpack.i.h.bf16 %v23433_v63  ;;  %v19983_v57 = vpop.permute.xlu1 %12193 }
 0xbac   : > { %v5843_v22 = vsel %vm1145_vm7, %v23430_v23, %v12250_v60  ;;  %v5927_v5 = vsel %vm1145_vm7, %v12185_v45, %v21660_v54  ;;  %v5944_v60 = vsel %vm1145_vm7, %v12190_v33, %v12191_v3  ;;  %v23435_v28 = vunpack.i.h.bf16 %v19243_v50  ;;  %v19992_v63 = vpop.permute.xlu0 %12273  ;;  %7674 = vrot.lane.b32.xlu1 %v19464_v48, %s12987_s12 }
 0xbad   : > { %v5926_v62 = vsel %vm1145_vm7, %v23432_v16, %v12185_v45  ;;  %v5943_v42 = vsel %vm1145_vm7, %v23434_v4, %v12190_v33  ;;  %7262 = vmatmul.mubr.f32.vlgmr.msra.gmra.mrb[24].mxu0 %v19734_v25  ;;  %v9334_v0 = vpack.c.bf16 %v5944_v60, %v5927_v5  ;;  %v5878_v45 = vsel %vm1145_vm7, %v12260_v10, %v21656_v6 }
 0xbae   : > { %v5877_v8 = vsel %vm1145_vm7, %v23435_v28, %v12260_v10  ;;  %v9336_v23 = vpack.c.bf16 %v5943_v42, %v5926_v62  ;;  %v21659_v41 = vunpack.i.h.bf16 %v19924_v31  ;;  %v12265_v33 = vunpack.i.l.bf16 %v19924_v31  ;;  %9417 = vmatpush1.bf16.msra.mxu0 %v9416_v40  ;;  %7332 = vmatprep.mubr.f32.mxu0 %v23376_v55  ;;  %v23538_v55 = vld [vmem:[#allocation95_spill] sm:$0xff] }
 0xbaf   : > { %v21658_v16 = vunpack.i.h.bf16 %v19955_v12  ;;  %v12270_v50 = vunpack.i.l.bf16 %v19955_v12  ;;  %9419 = vmatprep.subr.bf16.mxu0 %v9418_v39  ;;  %9335 = vmatprep.subr.bf16.mxu1 %v9334_v0  ;;  %v9420_v25 = vpack.c.bf16 %v5843_v22, %v5826_v14  ;;  %v23436_v62 = vunpack.i.h.bf16 %v19215_v38  ;;  %v12199_v39 = vpop.permute.xlu1 %12198 }
 0xbb0   : > { %v12196_v4 = vunpack.i.h.bf16 %v19983_v57  ;;  %v12195_v42 = vunpack.i.l.bf16 %v19983_v57  ;;  %9337 = vmatpush1.bf16.msra.mxu1 %v9336_v23  ;;  %v5861_v40 = vsel %vm1145_vm7, %v12255_v7, %v21655_v51  ;;  %v12201_v38 = vunpack.i.h.bf16 %v12199_v39  ;;  %v20006_v60 = vpop.permute.xlu0 %12278  ;;  %v23437_v23 = vld [vmem:[#allocation182_spill] sm:$0xff] }
 0xbb1   : > { %v5860_v10 = vsel %vm1145_vm7, %v23436_v62, %v12255_v7  ;;  %v9422_v5 = vpack.c.bf16 %v5878_v45, %v5861_v40  ;;  %v12200_v22 = vunpack.i.l.bf16 %v12199_v39  ;;  %v5895_v28 = vsel %vm1145_vm7, %v12265_v33, %v21659_v41  ;;  %v23439_v62 = vld [vmem:[#allocation189_spill] sm:$0xff] }
 0xbb2   : > { %v9424_v14 = vpack.c.bf16 %v5877_v8, %v5860_v10  ;;  %9421 = vmatpush1.bf16.msra.mxu0 %v9420_v25  ;;  %v5912_v7 = vsel %vm1145_vm7, %v12270_v50, %v21658_v16  ;;  %v21667_v48 = vunpack.i.h.bf16 %v19992_v63  ;;  %v12275_v57 = vunpack.i.l.bf16 %v19992_v63 }
 0xbb3   : > { %v21668_v8 = vunpack.i.h.bf16 %v20006_v60  ;;  %v12280_v0 = vunpack.i.l.bf16 %v20006_v60  ;;  %9423 = vmatprep.subr.bf16.mxu0 %v9422_v5  ;;  %v23438_v45 = vunpack.i.h.bf16 %v23437_v23  ;;  %v23440_v10 = vunpack.i.h.bf16 %v23439_v62  ;;  %v12204_v16 = vpop.permute.xlu1 %12203 }
 0xbb4   : > { %v5961_v39 = vsel %vm1145_vm7, %v12195_v42, %v12196_v4  ;;  %v5978_v51 = vsel %vm1145_vm7, %v12200_v22, %v12201_v38  ;;  %v23441_v6 = vunpack.i.h.bf16 %v19880_v9  ;;  %v9426_v41 = vpack.c.bf16 %v5912_v7, %v5895_v28  ;;  %v20029_v23 = vpop.permute.xlu0 %12283 }
 0xbb5   : > { %v5960_v25 = vsel %vm1145_vm7, %v23438_v45, %v12195_v42  ;;  %v5977_v40 = vsel %vm1145_vm7, %v23440_v10, %v12200_v22  ;;  %v9338_v54 = vpack.c.bf16 %v5978_v51, %v5961_v39  ;;  %v5946_v45 = vsel %vm1145_vm7, %v12280_v0, %v21668_v8  ;;  %v23446_v39 = vld [vmem:[#allocation335_spill] sm:$0xff] }
 0xbb6   : > { %v5911_v19 = vsel %vm1145_vm7, %v23441_v6, %v12270_v50  ;;  %v9340_v5 = vpack.c.bf16 %v5977_v40, %v5960_v25  ;;  %9425 = vmatpush1.bf16.msra.mxu0 %v9424_v14  ;;  %v23442_v62 = vunpack.i.h.bf16 %v23408_v59  ;;  %v5945_v9 = vsel %vm1145_vm7, %v12191_v3, %v12280_v0  ;;  %v23444_v0 = vld [vmem:[#allocation248_spill] sm:$0xff] }
 0xbb7   : > { %v12206_v6 = vunpack.i.h.bf16 %v12204_v16  ;;  %v12205_v50 = vunpack.i.l.bf16 %v12204_v16  ;;  %9427 = vmatprep.subr.bf16.mxu0 %v9426_v41  ;;  %9339 = vmatprep.subr.bf16.mxu1 %v9338_v54  ;;  %v21666_v51 = vunpack.i.h.bf16 %v20029_v23  ;;  %v12285_v14 = vunpack.i.l.bf16 %v20029_v23  ;;  %v12209_v28 = vpop.permute.xlu1 %12208 }
 0xbb8   : > { %v5894_v42 = vsel %vm1145_vm7, %v23442_v62, %v12265_v33  ;;  %9341 = vmatpush1.bf16.msra.mxu1 %v9340_v5  ;;  %v5929_v59 = vsel %vm1145_vm7, %v12275_v57, %v21667_v48  ;;  %v23443_v33 = vunpack.i.h.bf16 %v19917_v24  ;;  %v12211_v16 = vunpack.i.h.bf16 %v12209_v28  ;;  %v20048_v54 = vpop.permute.xlu0 %12288 }
 0xbb9   : > { %v9428_v22 = vpack.c.bf16 %v5911_v19, %v5894_v42  ;;  %v9430_v3 = vpack.c.bf16 %v5946_v45, %v5929_v59  ;;  %v12210_v41 = vunpack.i.l.bf16 %v12209_v28  ;;  %v23445_v25 = vunpack.i.h.bf16 %v23444_v0 }
 0xbba   : > { %v5928_v35 = vsel %vm1145_vm7, %v23443_v33, %v12275_v57  ;;  %v21663_v10 = vunpack.i.h.bf16 %v20048_v54  ;;  %v12290_v40 = vunpack.i.l.bf16 %v20048_v54  ;;  %v5995_v24 = vsel %vm1145_vm7, %v12205_v50, %v12206_v6 }
 0xbbb   : > { %9429 = vmatpush1.bf16.msra.mxu0 %v9428_v22  ;;  %v9432_v7 = vpack.c.bf16 %v5945_v9, %v5928_v35  ;;  %v5994_v19 = vsel %vm1145_vm7, %v23445_v25, %v12205_v50  ;;  %v5962_v57 = vsel %vm1145_vm7, %v12196_v4, %v12285_v14  ;;  %v23447_v5 = vunpack.i.h.bf16 %v23446_v39  ;;  %v12214_v22 = vpop.permute.xlu1 %12213 }
 0xbbc   : > { %9431 = vmatprep.subr.bf16.mxu0 %v9430_v3  ;;  %v6012_v62 = vsel %vm1145_vm7, %v12210_v41, %v12211_v16  ;;  %v5963_v42 = vsel %vm1145_vm7, %v12285_v14, %v21666_v51  ;;  %v5979_v9 = vsel %vm1145_vm7, %v12201_v38, %v12290_v40  ;;  %v5980_v50 = vsel %vm1145_vm7, %v12290_v40, %v21663_v10  ;;  %v20068_v4 = vpop.permute.xlu0 %12293  ;;  %v23498_v51 = vld [vmem:[#allocation265_spill] sm:$0xff] }
 0xbbd   : > { %v6011_v45 = vsel %vm1145_vm7, %v23447_v5, %v12210_v41  ;;  %v9342_v59 = vpack.c.bf16 %v6012_v62, %v5995_v24  ;;  %v9434_v35 = vpack.c.bf16 %v5980_v50, %v5963_v42  ;;  %v9436_v28 = vpack.c.bf16 %v5979_v9, %v5962_v57  ;;  %v23450_v42 = vld [vmem:[#allocation117_spill] sm:$0xff] }
 0xbbe   : > { %v9344_v33 = vpack.c.bf16 %v6011_v45, %v5994_v19  ;;  %v12216_v3 = vunpack.i.h.bf16 %v12214_v22  ;;  %v12215_v41 = vunpack.i.l.bf16 %v12214_v22  ;;  %v21661_v0 = vunpack.i.h.bf16 %v20068_v4 }
 0xbbf   : > { %9433 = vmatpush1.bf16.msra.mxu0 %v9432_v7  ;;  %9343 = vmatprep.subr.bf16.mxu1 %v9342_v59  ;;  %v12295_v14 = vunpack.i.l.bf16 %v20068_v4  ;;  %v12219_v38 = vpop.permute.xlu1 %12218  ;;  %v23448_v7 = vld [vmem:[#allocation334_spill] sm:$0xff]  ;;  %v23451_v9 = vunpack.i.h.bf16 %v23450_v42  ;;  %v23454_v42 = vld [vmem:[#allocation24_spill] sm:$0xff] }
 0xbc0   : > { %9435 = vmatprep.subr.bf16.mxu0 %v9434_v35  ;;  %9345 = vmatpush1.bf16.msra.mxu1 %v9344_v33  ;;  %v12221_v25 = vunpack.i.h.bf16 %v12219_v38  ;;  %v12220_v24 = vunpack.i.l.bf16 %v12219_v38  ;;  %v20072_v40 = vpop.permute.xlu0 %12298  ;;  %v23449_v19 = vunpack.i.h.bf16 %v23448_v7  ;;  %v6029_v45 = vsel %vm1145_vm7, %v12215_v41, %v12216_v3 }
 0xbc1   : > { %v21662_v57 = vunpack.i.h.bf16 %v20072_v40  ;;  %v12300_v5 = vunpack.i.l.bf16 %v20072_v40  ;;  %v5996_v62 = vsel %vm1145_vm7, %v12206_v6, %v12295_v14  ;;  %v5997_v50 = vsel %vm1145_vm7, %v12295_v14, %v21661_v0  ;;  %v23466_v0 = vld [vmem:[#allocation206_spill] sm:$0xff] }
 0xbc2   : > { %v6028_v39 = vsel %vm1145_vm7, %v23449_v19, %v12215_v41  ;;  %v6045_v22 = vsel %vm1145_vm7, %v23451_v9, %v12220_v24  ;;  %v6046_v59 = vsel %vm1145_vm7, %v12220_v24, %v12221_v25 }
 0xbc3   : > { %9437 = vmatpush1.bf16.msra.mxu0 %v9436_v28  ;;  %v6013_v33 = vsel %vm1145_vm7, %v12211_v16, %v12300_v5  ;;  %v20089_v35 = vpop.permute.xlu1 %12233  ;;  %v9346_v28 = vpack.c.bf16 %v6046_v59, %v6029_v45  ;;  %v6014_v41 = vsel %vm1145_vm7, %v12300_v5, %v21662_v57  ;;  %v9348_v6 = vpack.c.bf16 %v6045_v22, %v6028_v39  ;;  %v23453_v45 = vld [vmem:[#allocation257_spill] sm:$0xff]  ;;  %v20107_v22 = vld [vmem:[#allocation9 + $0x8] sm:$0x7]  ;;  %v23457_v59 = vld [vmem:[#allocation199_spill] sm:$0xff] }
 0xbc4   : > { %v20094_v38 = vpop.permute.xlu0 %12303  ;;  %v9438_v7 = vpack.c.bf16 %v6014_v41, %v5997_v50  ;;  %v9440_v19 = vpack.c.bf16 %v6013_v33, %v5996_v62  ;;  %v23455_v9 = vpack.c.bf16 %v23453_v45, %v23454_v42  ;;  %23456 = vst [vmem:[#allocation76_spill] sm:$0xff] %v20107_v22  ;;  %v23458_v50 = vld [vmem:[#allocation23_spill] sm:$0xff]  ;;  %v23463_v45 = vld [vmem:[#allocation261_spill] sm:$0xff] }
 0xbc5   : > { %9347 = vmatprep.subr.bf16.mxu1 %v9346_v28  ;;  %v21664_v24 = vunpack.i.h.bf16 %v20094_v38  ;;  %v12305_v14 = vunpack.i.l.bf16 %v20094_v38  ;;  %v23459_v33 = vpack.c.bf16 %v23457_v59, %v23458_v50  ;;  %v23460_v28 = vld [vmem:[#allocation46_spill] sm:$0xff] }
 0xbc6   : > { %9439 = vmatprep.subr.bf16.mxu0 %v9438_v7  ;;  %9349 = vmatpush1.bf16.msra.mxu1 %v9348_v6 }
 0xbc7   : > { %9441 = vmatpush1.bf16.msra.mxu0 %v9440_v19  ;;  %v20098_v16 = vpop.permute.xlu1 %12323  ;;  %9447 = vmatprep.subr.bf16.mxu1 %v23455_v9  ;;  %v6030_v41 = vsel %vm1145_vm7, %v12216_v3, %v12305_v14  ;;  %v23462_v19 = vld [vmem:[#allocation263_spill] sm:$0xff]  ;;  %v6031_v9 = vsel %vm1145_vm7, %v12305_v14, %v21664_v24  ;;  %v23472_v24 = vld [vmem:[#allocation256_spill] sm:$0xff] }
 0xbc8   : > { %23452 = vst [vmem:[#allocation207_spill] sm:$0xff] %v20098_v16  ;;  %v20103_v5 = vpop.permute.xlu0 %12308  ;;  %v23464_v42 = vpack.c.bf16 %v23462_v19, %v23463_v45  ;;  %v23468_v45 = vld [vmem:[#allocation268_spill] sm:$0xff] }
 0xbc9   : > { %v21665_v39 = vunpack.i.h.bf16 %v20103_v5  ;;  %v12310_v62 = vunpack.i.l.bf16 %v20103_v5  ;;  %7191 = vmatmul.mubr.f32.vlgmr.msra.gmra.mrb[26].mxu1 %v20107_v22 }
 0xbca   : > { %9449 = vmatpush1.bf16.msra.mxu1 %v23459_v33  ;;  %7403 = vmatprep.mubr.f32.mxu1 %v23460_v28 }
 0xbcb   : > { %v6047_v6 = vsel %vm1145_vm7, %v12221_v25, %v12310_v62  ;;  %v20116_v7 = vpop.permute.xlu1 %12333  ;;  %9451 = vmatprep.subr.bf16.mxu1 %v23464_v42  ;;  %v6048_v59 = vsel %vm1145_vm7, %v12310_v62, %v21665_v39  ;;  %v23465_v25 = vld [vmem:[#allocation209_spill] sm:$0xff]  ;;  %v23469_v42 = vld [vmem:[#allocation267_spill] sm:$0xff] }
 0xbcc   : > { %23461 = vst [vmem:[#allocation82_spill] sm:$0xff] %v20116_v7  ;;  %v20127_v50 = vpop.permute.xlu0 %12313  ;;  %v9442_v33 = vpack.c.bf16 %v6048_v59, %v6031_v9  ;;  %v9444_v3 = vpack.c.bf16 %v6047_v6, %v6030_v41  ;;  %v23467_v57 = vpack.c.bf16 %v23465_v25, %v23466_v0  ;;  %v23470_v10 = vpack.c.bf16 %v23468_v45, %v23469_v42  ;;  %v23473_v62 = vld [vmem:[#allocation29_spill] sm:$0xff]  ;;  %v23475_v41 = vld [vmem:[#allocation216_spill] sm:$0xff]  ;;  %v23476_v6 = vld [vmem:[#allocation214_spill] sm:$0xff] }
 0xbcd   : > { %v23474_v39 = vpack.c.bf16 %v23472_v24, %v23473_v62  ;;  %v23477_v9 = vpack.c.bf16 %v23475_v41, %v23476_v6  ;;  %v23478_v0 = vld [vmem:[#allocation258_spill] sm:$0xff]  ;;  %v23485_v24 = vld [vmem:[#allocation260_spill] sm:$0xff]  ;;  %v6766_v62 = vpop.f32.mrb[20].mxu0  ;;  %v23516_v7 = vld [vmem:[#allocation229_spill] sm:$0xff] }
 0xbce   : > { %9443 = vmatprep.subr.bf16.mxu0 %v9442_v33  ;;  %9453 = vmatpush1.bf16.msra.mxu1 %v23467_v57  ;;  %v23479_v57 = vld [vmem:[#allocation27_spill] sm:$0xff]  ;;  %v6768_v41 = vpop.f32.mrb[21].mxu0  ;;  %v23488_v6 = vld [vmem:[#allocation222_spill] sm:$0xff] }
 0xbcf   : > { %9445 = vmatpush1.bf16.msra.mxu0 %v9444_v3  ;;  %v20132_v19 = vpop.permute.xlu1 %12338  ;;  %9455 = vmatprep.subr.bf16.mxu1 %v23470_v10  ;;  %v23480_v59 = vpack.c.bf16 %v23478_v0, %v23479_v57  ;;  %v23481_v3 = vld [vmem:[#allocation272_spill] sm:$0xff]  ;;  %v23482_v10 = vld [vmem:[#allocation54_spill] sm:$0xff] }
 0xbd0   : > { %v20137_v14 = vpop.permute.xlu0 %12318  ;;  %9543 = vmatprep.subr.bf16.mxu0 %v23474_v39  ;;  %v23483_v25 = vpack.c.bf16 %v23481_v3, %v23482_v10  ;;  %v23486_v39 = vld [vmem:[#allocation259_spill] sm:$0xff]  ;;  %7681 = vrot.lane.b32.xlu1 %v6766_v62, %s12988_s13  ;;  %v23491_v57 = vld [vmem:[#allocation264_spill] sm:$0xff]  ;;  %s12998_s13 = smov 44  }
 0xbd1   : > { %23471 = vst [vmem:[#allocation298_spill] sm:$0xff] %v20137_v14  ;;  %v23487_v42 = vpack.c.bf16 %v23485_v24, %v23486_v39  ;;  %7676 = vrot.lane.b32.xlu0 %v6766_v62, %s12987_s12  ;;  %v23494_v24 = vld [vmem:[#allocation64_spill] sm:$0xff]  ;;  %s12997_s12 = smov 47  }
 0xbd2   : > { %7333 = vmatmul.mubr.f32.vlgmr.msra.gmra.mrb[24].mxu0 %v20107_v22  ;;  %9457 = vmatpush1.bf16.msra.mxu1 %v23477_v9  ;;  %v23489_v9 = vld [vmem:[#allocation220_spill] sm:$0xff] }
 0xbd3   : > { %9545 = vmatpush1.bf16.msra.mxu0 %v23480_v59  ;;  %v20149_v33 = vpop.permute.xlu1 %12348  ;;  %9459 = vmatprep.subr.bf16.mxu1 %v23483_v25  ;;  %v23490_v0 = vpack.c.bf16 %v23488_v6, %v23489_v9  ;;  %v23492_v59 = vld [vmem:[#allocation262_spill] sm:$0xff]  ;;  %v23502_v6 = vld [vmem:[#allocation223_spill] sm:$0xff] }
 0xbd4   : > { %v20154_v45 = vpop.permute.xlu0 %12328  ;;  %9547 = vmatprep.subr.bf16.mxu0 %v23487_v42  ;;  %7545 = vmatprep.mubr.f32.mxu0 %v23460_v28  ;;  %v23493_v3 = vpack.c.bf16 %v23491_v57, %v23492_v59  ;;  %v23495_v28 = vld [vmem:[#allocation277_spill] sm:$0xff]  ;;  %v23497_v42 = vld [vmem:[#allocation266_spill] sm:$0xff] }
 0xbd5   : > { %23484 = vst [vmem:[#allocation210_spill] sm:$0xff] %v20154_v45  ;;  %v23496_v39 = vpack.c.bf16 %v23494_v24, %v23495_v28  ;;  %v23499_v48 = vpack.c.bf16 %v23497_v42, %v23498_v51  ;;  %7699 = vrot.lane.b32.xlu1 %v6766_v62, %s23500_s29  ;;  %7696 = vrot.lane.b32.xlu0 %v6766_v62, %s23501_s30  ;;  %v23503_v9 = vld [vmem:[#allocation42_spill] sm:$0xff]  ;;  %v23505_v59 = vld [vmem:[#allocation269_spill] sm:$0xff]  ;;  %s8232_s29 = sshll.u32 %s23735_s23, 6  ;;  %s13000_s23 = smov 32  }
 0xbd6   : > { %9461 = vmatpush1.bf16.msra.mxu1 %v23490_v0  ;;  %v23504_v0 = vpack.c.bf16 %v23502_v6, %v23503_v9  ;;  %v23508_v28 = vld [vmem:[#allocation74_spill] sm:$0xff]  ;;  %v23514_v6 = vld [vmem:[#allocation336_spill] sm:$0xff]  ;;  %s23694_s30 = smov 124  }
 0xbd7   : > { %9549 = vmatpush1.bf16.msra.mxu0 %v23493_v3  ;;  %v20167_v10 = vpop.permute.xlu1 %12353  ;;  %9463 = vmatprep.subr.bf16.mxu1 %v23496_v39  ;;  %v23506_v3 = vld [vmem:[#allocation51_spill] sm:$0xff]  ;;  %v23512_v42 = vld [vmem:[#allocation270_spill] sm:$0xff]  ;;  %v12070_v9 = vunpack.i.l.bf16 %v23514_v6 }
 0xbd8   : > { %v20169_v25 = vpop.permute.xlu0 %12343  ;;  %9551 = vmatprep.subr.bf16.mxu0 %v23499_v48  ;;  %v23507_v8 = vpack.c.bf16 %v23505_v59, %v23506_v3  ;;  %v23509_v39 = vld [vmem:[#allocation283_spill] sm:$0xff]  ;;  %v23518_v59 = vld [vmem:[#allocation273_spill] sm:$0xff] }
 0xbd9   : > { %v23510_v51 = vpack.c.bf16 %v23508_v28, %v23509_v39  ;;  %v23511_v48 = vld [vmem:[#allocation271_spill] sm:$0xff]  ;;  %7705 = vrot.lane.b32.xlu1 %v6768_v41, %s12989_s28  ;;  %7703 = vrot.lane.b32.xlu0 %v6766_v62, %s12989_s28  ;;  %v23519_v3 = vld [vmem:[#allocation61_spill] sm:$0xff]  ;;  %v23521_v39 = vld [vmem:[#allocation84_spill] sm:$0xff]  ;;  %s23696_s28 = smov 118  }
 0xbda   : > { %9465 = vmatpush1.bf16.msra.mxu1 %v23504_v0  ;;  %v23513_v22 = vpack.c.bf16 %v23511_v48, %v23512_v42  ;;  %v23515_v0 = vld [vmem:[#allocation230_spill] sm:$0xff]  ;;  %v23520_v36 = vpack.c.bf16 %v23518_v59, %v23519_v3  ;;  %v23524_v48 = vld [vmem:[#allocation316_spill] sm:$0xff] }
 0xbdb   : > { %v20182_v57 = vpop.permute.xlu1 %12358  ;;  %9553 = vmatpush1.bf16.msra.mxu0 %v23507_v8  ;;  %9467 = vmatprep.subr.bf16.mxu1 %v23510_v51  ;;  %v23517_v45 = vpack.c.bf16 %v23515_v0, %v23516_v7  ;;  %v23522_v51 = vld [vmem:[#allocation289_spill] sm:$0xff]  ;;  %v23525_v42 = vld [vmem:[#allocation276_spill] sm:$0xff]  ;;  %v23529_v7 = vld [vmem:[#allocation26_spill] sm:$0xff] }
 0xbdc   : > { %v20187_v24 = vpop.permute.xlu0 %12363  ;;  %9555 = vmatprep.subr.bf16.mxu0 %v23513_v22  ;;  %v23523_v22 = vpack.c.bf16 %v23521_v39, %v23522_v51  ;;  %v23527_v16 = vpack.c.bf16 %v23525_v42, %v23526_v56  ;;  %v23530_v0 = vld [vmem:[#allocation239_spill] sm:$0xff]  ;;  %v23533_v39 = vunpack.i.h.bf16 %v19121_v29  ;;  %v23535_v62 = vld [vmem:[#allocation278_spill] sm:$0xff]  ;;  %v23544_v29 = vunpack.i.l.bf16 %v23524_v48 }
 0xbdd   : > { %7713 = vrot.lane.b32.xlu1 %v6768_v41, %s12990_s14  ;;  %7710 = vrot.lane.b32.xlu0 %v6768_v41, %s23528_s27  ;;  %s23679_s14 = sld [smem:[#allocation345_spill]] }
 0xbde   : > { %9469 = vmatpush1.bf16.msra.mxu1 %v23517_v45  ;;  %v4676_v51 = vsel %vm4643_vm9, %v23533_v39, %v12070_v9  ;;  %v23539_v45 = vld [vmem:[#allocation89_spill] sm:$0xff]  ;;  %v23545_v39 = vld [vmem:[#allocation255_spill] sm:$0xff] }
 0xbdf   : > { %v20199_v8 = vpop.permute.xlu1 %12373  ;;  %9557 = vmatpush1.bf16.msra.mxu0 %v23520_v36  ;;  %9471 = vmatprep.subr.bf16.mxu1 %v23523_v22  ;;  %v23531_v36 = vld [vmem:[#allocation238_spill] sm:$0xff]  ;;  %v23534_v22 = vld [vmem:[#allocation71_spill] sm:$0xff]  ;;  %v23540_v17 = vpack.c.bf16 %v23538_v55, %v23539_v45  ;;  %v23546_v14 = vunpack.i.h.bf16 %v23545_v39 }
 0xbe0   : > { %v20204_v28 = vpop.permute.xlu0 %12368  ;;  %9559 = vmatprep.subr.bf16.mxu0 %v23527_v16  ;;  %v23532_v59 = vpack.c.bf16 %v23530_v0, %v23531_v36  ;;  %v23536_v56 = vpack.c.bf16 %v23534_v22, %v23535_v62  ;;  %v23541_v36 = vld [vmem:[#allocation282_spill] sm:$0xff]  ;;  %v23547_v22 = vunpack.i.h.bf16 %v19924_v31 }
 0xbe1   : > { %v4659_v62 = vsel %vm4643_vm9, %v23546_v14, %v23544_v29  ;;  %7716 = vrot.lane.b32.xlu0 %v6768_v41, %s12991_s17  ;;  %v23553_v29 = vld [vmem:[#allocation249_spill] sm:$0xff]  ;;  %v23555_v41 = vunpack.i.l.bf16 %v23529_v7  ;;  %s12999_s17 = smov 35  }
 0xbe2   : > { %9473 = vmatpush1.bf16.msra.mxu1 %v23532_v59  ;;  %v23542_v59 = vld [vmem:[#allocation68_spill] sm:$0xff]  ;;  %v9478_v55 = vpack.c.bf16 %v4676_v51, %v4659_v62  ;;  %v23556_v51 = vunpack.i.h.bf16 %v19222_v27  ;;  %v23563_v27 = vunpack.i.h.bf16 %v19362_v2  ;;  %v23568_v2 = vunpack.i.h.bf16 %v19992_v63 }
 0xbe3   : > { %v20218_v3 = vpop.permute.xlu1 %12378  ;;  %9561 = vmatpush1.bf16.msra.mxu0 %v23536_v56  ;;  %9475 = vmatprep.subr.bf16.mxu1 %v23540_v17  ;;  %v23543_v11 = vpack.c.bf16 %v23541_v36, %v23542_v59  ;;  %v23549_v17 = vld [vmem:[#allocation120_spill] sm:$0xff]  ;;  %v23550_v36 = vunpack.i.h.bf16 %v19955_v12  ;;  %v23552_v59 = vld [vmem:[#allocation250_spill] sm:$0xff]  ;;  %s20732_s27 = scalar_lea.vmem %s23679_s14, %s8232_s29  ;;  %s13009_s29 = smov 2  }
 0xbe4   : > { %v21680_v16 = vunpack.i.l.bf16 %v20218_v3  ;;  %v20227_v42 = vpop.permute.xlu0 %12383  ;;  %v12080_v45 = vunpack.i.l.bf16 %v23549_v17  ;;  %v23554_v31 = vpack.c.bf16 %v23552_v59, %v23553_v29  ;;  %v4710_v62 = vsel %vm4643_vm9, %v23556_v51, %v23555_v41  ;;  %v23558_v12 = vld [vmem:[#allocation284_spill] sm:$0xff]  ;;  %v23575_v59 = vld [vmem:[#allocation90_spill] sm:$0xff]  ;;  %s23699_s14 = smov 115  }
 0xbe5   : > { %23537 = vst [vmem:[#allocation91_spill] sm:$0xff] %v20227_v42  ;;  %v21681_v0 = vunpack.i.l.bf16 %v20227_v42  ;;  %9563 = vmatprep.subr.bf16.mxu0 %v23543_v11  ;;  %v23560_v29 = vld [vmem:[#allocation288_spill] sm:$0xff]  ;;  %v12071_v51 = vunpack.i.h.bf16 %v23514_v6  ;;  %v23570_v6 = vld [vmem:[#allocation342_spill] sm:$0xff] }
 0xbe6   : > { %v20246_v56 = vsel %vm1145_vm7, %v23547_v22, %v21680_v16  ;;  %9477 = vmatpush1.bf16.msra.mxu1 %v23554_v31  ;;  %v23557_v16 = vld [vmem:[#allocation81_spill] sm:$0xff]  ;;  %v23561_v31 = vld [vmem:[#allocation79_spill] sm:$0xff]  ;;  %v4693_v41 = vsel %vm4643_vm9, %v23563_v27, %v12080_v45 }
 0xbe7   : > { %23548 = vst [vmem:[#allocation87_spill] sm:$0xff] %v20246_v56  ;;  %v20255_v14 = vsel %vm1145_vm7, %v23550_v36, %v21681_v0  ;;  %v20260_v39 = vpop.permute.xlu1 %12393  ;;  %v23559_v11 = vpack.c.bf16 %v23557_v16, %v23558_v12  ;;  %9479 = vmatprep.subr.bf16.mxu1 %v9478_v55  ;;  %v23562_v42 = vpack.c.bf16 %v23560_v29, %v23561_v31  ;;  %v23564_v16 = vunpack.i.h.bf16 %v20006_v60  ;;  %v23566_v12 = vld [vmem:[#allocation338_spill] sm:$0xff]  ;;  %v23571_v31 = vld [vmem:[#allocation140_spill] sm:$0xff] }
 0xbe8   : > { %23551 = vst [vmem:[#allocation34_spill] sm:$0xff] %v20255_v14  ;;  %v21684_v36 = vunpack.i.l.bf16 %v20260_v39  ;;  %v20273_v0 = vpop.permute.xlu0 %12388  ;;  %v9482_v55 = vpack.c.bf16 %v4710_v62, %v4693_v41  ;;  %v23572_v27 = vpack.c.bf16 %v23570_v6, %v23571_v31  ;;  %v23574_v62 = vunpack.i.h.bf16 %v19303_v20  ;;  %v23582_v6 = vld [vmem:[#allocation49_spill] sm:$0xff]  ;;  %v23594_v14 = vld [vmem:[#allocation292_spill] sm:$0xff] }
 0xbe9   : > { %9565 = vmatpush1.bf16.msra.mxu0 %v23559_v11  ;;  %v12091_v20 = vunpack.i.h.bf16 %v23529_v7  ;;  %v23580_v63 = vunpack.i.l.bf16 %v23566_v12 }
 0xbea   : > { %9567 = vmatprep.subr.bf16.mxu0 %v23562_v42  ;;  %v20288_v11 = vsel %vm1145_vm7, %v23564_v16, %v21684_v36  ;;  %v23567_v42 = vunpack.i.l.bf16 %v20273_v0  ;;  %9481 = vmatpush1.bf16.msra.mxu1 %v23572_v27  ;;  %v23573_v16 = vunpack.i.l.bf16 %v19548_v49  ;;  %v11076_v36 = vunpack.i.h.bf16 %v23524_v48 }
 0xbeb   : > { %23565 = vst [vmem:[#allocation96_spill] sm:$0xff] %v20288_v11  ;;  %v20302_v60 = vpop.permute.xlu1 %12398  ;;  %9483 = vmatprep.subr.bf16.mxu1 %v9482_v55  ;;  %v12081_v27 = vunpack.i.h.bf16 %v23549_v17  ;;  %v12120_v55 = vunpack.i.l.bf16 %v23582_v6 }
 0xbec   : > { %v20297_v29 = vsel %vm1145_vm7, %v23568_v2, %v23567_v42  ;;  %v4744_v41 = vsel %vm4643_vm9, %v23574_v62, %v23573_v16  ;;  %v23576_v42 = vld [vmem:[#allocation291_spill] sm:$0xff]  ;;  %v20316_v31 = vpop.permute.xlu0 %12403  ;;  %v23578_v62 = vld [vmem:[#allocation297_spill] sm:$0xff]  ;;  %v23583_v17 = vunpack.i.l.bf16 %v20302_v60 }
 0xbed   : > { %23569 = vst [vmem:[#allocation101_spill] sm:$0xff] %v20297_v29  ;;  %v23577_v2 = vpack.c.bf16 %v23575_v59, %v23576_v42  ;;  %v23579_v22 = vpack.c.bf16 %v23151_v1, %v23578_v62  ;;  %v23581_v59 = vunpack.i.h.bf16 %v19483_v13  ;;  %v23584_v29 = vunpack.i.h.bf16 %v20029_v23  ;;  %v23589_v62 = vld [vmem:[#allocation340_spill] sm:$0xff] }
 0xbee   : > { %v12150_v1 = vunpack.i.l.bf16 %v19748_v47  ;;  %v23587_v13 = vunpack.i.h.bf16 %v20048_v54  ;;  %v9574_v23 = vpack.c.bf16 %v12071_v51, %v11076_v36  ;;  %v23593_v54 = vld [vmem:[#allocation293_spill] sm:$0xff] }
 0xbef   : > { %9569 = vmatpush1.bf16.msra.mxu0 %v23577_v2  ;;  %v4727_v42 = vsel %vm4643_vm9, %v23581_v59, %v23580_v63  ;;  %v4677_v2 = vsel %vm4643_vm9, %v12070_v9, %v12071_v51  ;;  %v20336_v16 = vsel %vm1145_vm7, %v23584_v29, %v23583_v17  ;;  %v23588_v9 = vld [vmem:[#allocation341_spill] sm:$0xff]  ;;  %v20349_v56 = vpop.permute.xlu1 %12418  ;;  %v23591_v29 = vunpack.i.l.bf16 %v19654_v52 }
 0xbf0   : > { %9571 = vmatprep.subr.bf16.mxu0 %v23579_v22  ;;  %23585 = vst [vmem:[#allocation304_spill] sm:$0xff] %v20336_v16  ;;  %v9486_v11 = vpack.c.bf16 %v4744_v41, %v4727_v42  ;;  %v23586_v22 = vunpack.i.l.bf16 %v20316_v31  ;;  %v23590_v59 = vpack.c.bf16 %v23588_v9, %v23589_v62  ;;  %v23592_v41 = vunpack.i.h.bf16 %v19379_v53 }
 0xbf1   : > { %v23596_v9 = vunpack.i.l.bf16 %v23524_v48  ;;  %v4694_v62 = vsel %vm4643_vm9, %v12080_v45, %v12081_v27  ;;  %v23597_v53 = vunpack.i.l.bf16 %v23529_v7  ;;  %v12170_v48 = vunpack.i.l.bf16 %v19824_v43  ;;  %v23600_v45 = vld [vmem:[#allocation50_spill] sm:$0xff] }
 0xbf2   : > { %v20344_v63 = vsel %vm1145_vm7, %v23587_v13, %v23586_v22  ;;  %9485 = vmatpush1.bf16.msra.mxu1 %v23590_v59  ;;  %v4778_v42 = vsel %vm4643_vm9, %v23592_v41, %v23591_v29  ;;  %v23595_v22 = vpack.c.bf16 %v23593_v54, %v23594_v14  ;;  %v20361_v13 = vpop.permute.xlu0 %12408  ;;  %v23598_v29 = vunpack.i.h.bf16 %v19601_v15  ;;  %v23599_v14 = vld [vmem:[#allocation56_spill] sm:$0xff] }
 0xbf3   : > { %9487 = vmatprep.subr.bf16.mxu1 %v9486_v11  ;;  %v4660_v51 = vsel %vm4643_vm9, %v23596_v9, %v11076_v36  ;;  %v4711_v59 = vsel %vm4643_vm9, %v23597_v53, %v12091_v20  ;;  %v12140_v54 = vunpack.i.l.bf16 %v23599_v14  ;;  %v21692_v36 = vunpack.i.l.bf16 %v20349_v56  ;;  %v23601_v9 = vld [vmem:[#allocation62_spill] sm:$0xff]  ;;  %v20380_v53 = vpop.permute.xlu1 %12423 }
 0xbf4   : > { %9573 = vmatpush1.bf16.msra.mxu0 %v23595_v22  ;;  %v4761_v41 = vsel %vm4643_vm9, %v23598_v29, %v12120_v55  ;;  %v12111_v22 = vunpack.i.h.bf16 %v19548_v49  ;;  %v9576_v11 = vpack.c.bf16 %v4677_v2, %v4660_v51  ;;  %v23602_v7 = vpack.c.bf16 %v23600_v45, %v23601_v9  ;;  %v23604_v45 = vld [vmem:[#allocation339_spill] sm:$0xff] }
 0xbf5   : > { %9575 = vmatprep.subr.bf16.mxu0 %v9574_v23  ;;  %v9490_v17 = vpack.c.bf16 %v4778_v42, %v4761_v41  ;;  %v9578_v23 = vpack.c.bf16 %v12091_v20, %v12081_v27  ;;  %v23603_v15 = vunpack.i.h.bf16 %v19507_v46  ;;  %v12101_v16 = vunpack.i.h.bf16 %v23566_v12 }
 0xbf6   : > { %9489 = vmatpush1.bf16.msra.mxu1 %v23602_v7  ;;  %v12121_v2 = vunpack.i.h.bf16 %v23582_v6  ;;  %v12141_v42 = vunpack.i.h.bf16 %v23599_v14  ;;  %v20388_v51 = vpop.permute.xlu0 %12413  ;;  %v9580_v41 = vpack.c.bf16 %v4711_v59, %v4694_v62  ;;  %v12160_v9 = vunpack.i.l.bf16 %v23604_v45 }
 0xbf7   : > { %v4812_v29 = vsel %vm4643_vm9, %v23603_v15, %v12150_v1  ;;  %9491 = vmatprep.subr.bf16.mxu1 %v9490_v17  ;;  %v12131_v7 = vunpack.i.h.bf16 %v19654_v52  ;;  %v21693_v27 = vunpack.i.l.bf16 %v20388_v51  ;;  %v23605_v46 = vunpack.i.h.bf16 %v19705_v26 }
 0xbf8   : > { %9577 = vmatpush1.bf16.msra.mxu0 %v9576_v11  ;;  %v23606_v6 = vunpack.i.l.bf16 %v19548_v49  ;;  %v12151_v11 = vunpack.i.h.bf16 %v19748_v47  ;;  %v9582_v17 = vpack.c.bf16 %v12111_v22, %v12101_v16  ;;  %v12235_v62 = vunpack.i.l.bf16 %v20089_v35 }
 0xbf9   : > { %9579 = vmatprep.subr.bf16.mxu0 %v9578_v23  ;;  %v4795_v20 = vsel %vm4643_vm9, %v23605_v46, %v12140_v54  ;;  %v23607_v59 = vunpack.i.h.bf16 %v20072_v40  ;;  %v23608_v26 = vunpack.i.h.bf16 %v20068_v4  ;;  %v23609_v47 = vpack.c.bf16 %v19641_v34, %v19648_v30  ;;  %v20430_v34 = vpop.permute.xlu1 %12428 }
 0xbfa   : > { %v4745_v14 = vsel %vm4643_vm9, %v23606_v6, %v12111_v22  ;;  %v9494_v15 = vpack.c.bf16 %v4812_v29, %v4795_v20  ;;  %v23610_v22 = vunpack.i.h.bf16 %v19618_v44  ;;  %v23611_v29 = vunpack.i.l.bf16 %v23566_v12  ;;  %v20432_v30 = vpop.permute.xlu0 %12433 }
 0xbfb   : > { %v20406_v23 = vsel %vm1145_vm7, %v23607_v59, %v21692_v36  ;;  %v20413_v49 = vsel %vm1145_vm7, %v23608_v26, %v21693_v27  ;;  %9493 = vmatpush1.bf16.msra.mxu1 %v23609_v47  ;;  %v4762_v20 = vsel %vm4643_vm9, %v12120_v55, %v12121_v2  ;;  %v12161_v4 = vunpack.i.h.bf16 %v23604_v45 }
 0xbfc   : > { %v4846_v40 = vsel %vm4643_vm9, %v23610_v22, %v12170_v48  ;;  %v4728_v46 = vsel %vm4643_vm9, %v23611_v29, %v12101_v16  ;;  %9581 = vmatpush1.bf16.msra.mxu0 %v9580_v41  ;;  %9495 = vmatprep.subr.bf16.mxu1 %v9494_v15  ;;  %v4796_v44 = vsel %vm4643_vm9, %v12140_v54, %v12141_v42  ;;  %v23612_v59 = vunpack.i.l.bf16 %v19654_v52  ;;  %v23614_v29 = vld [vmem:[#allocation125_spill] sm:$0xff] }
 0xbfd   : > { %9583 = vmatprep.subr.bf16.mxu0 %v9582_v17  ;;  %v9584_v16 = vpack.c.bf16 %v4745_v14, %v4728_v46  ;;  %v23613_v55 = vunpack.i.h.bf16 %v19788_v21  ;;  %v12225_v26 = vunpack.i.l.bf16 %v19670_v37  ;;  %v4813_v41 = vsel %vm4643_vm9, %v12150_v1, %v12151_v11 }
 0xbfe   : > { %v4779_v12 = vsel %vm4643_vm9, %v23612_v59, %v12131_v7  ;;  %v9586_v22 = vpack.c.bf16 %v12131_v7, %v12121_v2  ;;  %v12346_v15 = vunpack.i.h.bf16 %v20169_v25  ;;  %v12345_v54 = vunpack.i.l.bf16 %v20169_v25 }
 0xbff   : > { %v4829_v45 = vsel %vm4643_vm9, %v23613_v55, %v12160_v9  ;;  %v21690_v52 = vunpack.i.l.bf16 %v20430_v34  ;;  %v23615_v17 = vpack.c.bf16 %v19746_v58, %v23614_v29  ;;  %v23616_v21 = vunpack.i.h.bf16 %v19712_v61  ;;  %v23617_v55 = vld [vmem:[#allocation92_spill] sm:$0xff] }
 0xc00   : > { %v9498_v47 = vpack.c.bf16 %v4846_v40, %v4829_v45  ;;  %v20455_v1 = vsel %vm4643_vm9, %v12160_v9, %v12161_v4  ;;  %v12226_v2 = vunpack.i.h.bf16 %v19670_v37  ;;  %v12171_v7 = vunpack.i.h.bf16 %v19824_v43  ;;  %9585 = vmatpush1.bf16.msra.mxu0 %v9584_v16  ;;  %v20459_v40 = vpop.permute.xlu0 %12438 }
 0xc01   : > { %9497 = vmatpush1.bf16.msra.mxu1 %v23615_v17  ;;  %v4880_v14 = vsel %vm4643_vm9, %v23616_v21, %v12235_v62  ;;  %v9588_v46 = vpack.c.bf16 %v4779_v12, %v4762_v20  ;;  %v12341_v58 = vunpack.i.h.bf16 %v20132_v19  ;;  %v12340_v59 = vunpack.i.l.bf16 %v20132_v19  ;;  %9587 = vmatprep.subr.bf16.mxu0 %v9586_v22 }
 0xc02   : > { %9499 = vmatprep.subr.bf16.mxu1 %v9498_v47  ;;  %v21691_v61 = vunpack.i.l.bf16 %v20459_v40  ;;  %v23618_v45 = vunpack.i.h.bf16 %v23617_v55  ;;  %v12356_v37 = vunpack.i.h.bf16 %v20167_v10  ;;  %v9590_v17 = vpack.c.bf16 %v12151_v11, %v12141_v42  ;;  %v23621_v55 = vld [vmem:[#allocation123_spill] sm:$0xff] }
 0xc03   : > { %v9592_v16 = vpack.c.bf16 %v4813_v41, %v4796_v44  ;;  %v12355_v21 = vunpack.i.l.bf16 %v20167_v10  ;;  %v23619_v20 = vunpack.i.h.bf16 %v20094_v38  ;;  %v23620_v47 = vunpack.i.h.bf16 %v20103_v5  ;;  %v23626_v5 = vld [vmem:[#allocation66_spill] sm:$0xff] }
 0xc04   : > { %v4863_v9 = vsel %vm4643_vm9, %v23618_v45, %v12225_v26  ;;  %v4914_v11 = vsel %vm4643_vm9, %v12345_v54, %v12346_v15  ;;  %v4847_v38 = vsel %vm4643_vm9, %v12170_v48, %v12171_v7  ;;  %v12236_v44 = vunpack.i.h.bf16 %v20089_v35  ;;  %9589 = vmatpush1.bf16.msra.mxu0 %v9588_v46 }
 0xc05   : > { %v9502_v29 = vpack.c.bf16 %v4880_v14, %v4863_v9  ;;  %v20474_v12 = vsel %vm1145_vm7, %v23619_v20, %v21690_v52  ;;  %v20481_v22 = vsel %vm1145_vm7, %v23620_v47, %v21691_v61  ;;  %v23622_v14 = vld [vmem:[#allocation145_spill] sm:$0xff]  ;;  %v12316_v41 = vunpack.i.h.bf16 %v20127_v50  ;;  %9591 = vmatprep.subr.bf16.mxu0 %v9590_v17  ;;  %v23629_v61 = vld [vmem:[#allocation116_spill] sm:$0xff] }
 0xc06   : > { %v23623_v42 = vpack.c.bf16 %v23621_v55, %v23622_v14  ;;  %v12315_v45 = vunpack.i.l.bf16 %v20127_v50  ;;  %v23624_v9 = vld [vmem:[#allocation333_spill] sm:$0xff]  ;;  %v12361_v55 = vunpack.i.h.bf16 %v20182_v57  ;;  %v4897_v43 = vsel %vm4643_vm9, %v12340_v59, %v12341_v58 }
 0xc07   : > { %v23625_v20 = vunpack.i.h.bf16 %v23624_v9  ;;  %v12360_v48 = vunpack.i.l.bf16 %v20182_v57  ;;  %v12366_v14 = vunpack.i.h.bf16 %v20187_v24  ;;  %v12365_v46 = vunpack.i.l.bf16 %v20187_v24  ;;  %v23627_v9 = vld [vmem:[#allocation72_spill] sm:$0xff] }
 0xc08   : > { %9501 = vmatpush1.bf16.msra.mxu1 %v23623_v42  ;;  %v4864_v42 = vsel %vm4643_vm9, %v12225_v26, %v12226_v2  ;;  %v23628_v6 = vpack.c.bf16 %v23626_v5, %v23627_v9  ;;  %v9596_v17 = vpack.c.bf16 %v4847_v38, %v20455_v1  ;;  %v4881_v52 = vsel %vm4643_vm9, %v12235_v62, %v12236_v44  ;;  %v20521_v26 = vpop.permute.xlu0 %7624  ;;  %v20544_v5 = vpop.permute.xlu1 %12443 }
 0xc09   : > { %9503 = vmatprep.subr.bf16.mxu1 %v9502_v29  ;;  %v4913_v47 = vsel %vm4643_vm9, %v23625_v20, %v12345_v54  ;;  %v9506_v29 = vpack.c.bf16 %v4914_v11, %v4897_v43  ;;  %v9594_v54 = vpack.c.bf16 %v12171_v7, %v12161_v4  ;;  %v5812_v20 = vsel %vm1145_vm7, %v12355_v21, %v12356_v37  ;;  %v23633_v43 = vld [vmem:[#allocation298_spill] sm:$0xff] }
 0xc0a   : > { %v23630_v36 = vunpack.i.h.bf16 %v23629_v61  ;;  %9593 = vmatpush1.bf16.msra.mxu0 %v9592_v16  ;;  %v12351_v4 = vunpack.i.h.bf16 %v20149_v33  ;;  %v12350_v1 = vunpack.i.l.bf16 %v20149_v33  ;;  %v5795_v35 = vsel %vm1145_vm7, %v12315_v45, %v12316_v41 }
 0xc0b   : > { %9595 = vmatprep.subr.bf16.mxu0 %v9594_v54  ;;  %v23631_v62 = vunpack.i.h.bf16 %v19759_v18  ;;  %v12376_v33 = vunpack.i.h.bf16 %v20199_v8  ;;  %v12375_v16 = vunpack.i.l.bf16 %v20199_v8  ;;  %v21694_v38 = vunpack.i.h.bf16 %v20204_v28 }
 0xc0c   : > { %9505 = vmatpush1.bf16.msra.mxu1 %v23628_v6  ;;  %v4896_v11 = vsel %vm4643_vm9, %v23630_v36, %v12340_v59  ;;  %v9598_v6 = vpack.c.bf16 %v12236_v44, %v12226_v2  ;;  %v9510_v36 = vpack.c.bf16 %v5812_v20, %v5795_v35  ;;  %v5829_v59 = vsel %vm1145_vm7, %v12360_v48, %v12361_v55  ;;  %v23636_v35 = vld [vmem:[#allocation200_spill] sm:$0xff] }
 0xc0d   : > { %9507 = vmatprep.subr.bf16.mxu1 %v9506_v29  ;;  %v9508_v7 = vpack.c.bf16 %v4913_v47, %v4896_v11  ;;  %v5811_v61 = vsel %vm1145_vm7, %v23631_v62, %v12355_v21  ;;  %v5846_v2 = vsel %vm1145_vm7, %v12365_v46, %v12366_v14  ;;  %v12370_v44 = vunpack.i.l.bf16 %v20204_v28 }
 0xc0e   : > { %v23632_v18 = vunpack.i.h.bf16 %v23399_v32  ;;  %9597 = vmatpush1.bf16.msra.mxu0 %v9596_v17  ;;  %v9600_v47 = vpack.c.bf16 %v4881_v52, %v4864_v42  ;;  %v12321_v29 = vunpack.i.h.bf16 %v23633_v43  ;;  %v12320_v9 = vunpack.i.l.bf16 %v23633_v43  ;;  %v7632_v52 = vpop.permute.xlu0 %7631  ;;  %v12737_v42 = vld [vmem:[#allocation9] sm:$0x77] }
 0xc0f   : > { %9599 = vmatprep.subr.bf16.mxu0 %v9598_v6  ;;  %v9602_v20 = vpack.c.bf16 %v12351_v4, %v12350_v1  ;;  %v4915_v11 = vsel %vm4643_vm9, %v12346_v15, %v12351_v4  ;;  %v23637_v62 = vunpack.i.h.bf16 %v23636_v35  ;;  %v23638_v6 = vld [vmem:[#allocation91_spill] sm:$0xff]  ;;  %v5863_v25 = vsel %vm1145_vm7, %v12370_v44, %v21694_v38  ;;  %v23641_v35 = vld [vmem:[#allocation86_spill] sm:$0xff] }
 0xc10   : > { %9509 = vmatpush1.bf16.msra.mxu1 %v9508_v7  ;;  %v5794_v21 = vsel %vm1145_vm7, %v23632_v18, %v12315_v45  ;;  %v23634_v7 = vld [vmem:[#allocation191_spill] sm:$0xff]  ;;  %v12386_v18 = vunpack.i.h.bf16 %v23638_v6  ;;  %v5880_v15 = vsel %vm1145_vm7, %v12375_v16, %v12376_v33  ;;  %v5813_v43 = vsel %vm1145_vm7, %v12356_v37, %v12321_v29 }
 0xc11   : > { %9511 = vmatprep.subr.bf16.mxu1 %v9510_v36  ;;  %v9512_v54 = vpack.c.bf16 %v5811_v61, %v5794_v21  ;;  %v23635_v32 = vunpack.i.h.bf16 %v23634_v7  ;;  %v5845_v17 = vsel %vm1145_vm7, %v23637_v62, %v12365_v46  ;;  %v9514_v36 = vpack.c.bf16 %v5846_v2, %v5829_v59  ;;  %v23640_v46 = vld [vmem:[#allocation207_spill] sm:$0xff]  ;;  %v20568_v59 = vpop.permute.xlu1 %7932 }
 0xc12   : > { %v12381_v61 = vunpack.i.h.bf16 %v20218_v3  ;;  %v12326_v4 = vunpack.i.h.bf16 %v23640_v46  ;;  %v12325_v21 = vunpack.i.l.bf16 %v23640_v46  ;;  %9601 = vmatpush1.bf16.msra.mxu0 %v9600_v47  ;;  %v4898_v2 = vsel %vm4643_vm9, %v12341_v58, %v12350_v1  ;;  %v23643_v47 = vld [vmem:[#allocation154_spill] sm:$0xff]  ;;  %vm23682_vm9 = vmmov %vm23653_vm4 }
 0xc13   : > { %v5828_v45 = vsel %vm1145_vm7, %v23635_v32, %v12360_v48  ;;  %7404 = vmatmul.mubr.f32.vlgmr.msra.gmra.mrb[28].mxu1 %v12737_v42  ;;  %v23639_v48 = vmov 0.0   ;;  %9603 = vmatprep.subr.bf16.mxu0 %v9602_v20  ;;  %v9606_v7 = vpack.c.bf16 %v12321_v29, %v12320_v9  ;;  %v9604_v32 = vpack.c.bf16 %v4915_v11, %v4898_v2  ;;  %v23647_v29 = vld [vmem:[#allocation210_spill] sm:$0xff]  ;;  %v7638_v11 = vpop.permute.xlu0 %7637 }
 0xc14   : > { %9513 = vmatpush1.bf16.msra.mxu1 %v9512_v54  ;;  %7474 = vmatprep.mubr.f32.mxu1 %v23639_v48  ;;  %v9516_v54 = vpack.c.bf16 %v5845_v17, %v5828_v45  ;;  %v23642_v62 = vunpack.i.h.bf16 %v23641_v35  ;;  %v9518_v38 = vpack.c.bf16 %v5880_v15, %v5863_v25  ;;  %v12396_v19 = vunpack.i.h.bf16 %v20260_v39 }
 0xc15   : > { %9515 = vmatprep.subr.bf16.mxu1 %v9514_v36  ;;  %v23644_v36 = vunpack.i.h.bf16 %v23643_v47  ;;  %v12391_v58 = vunpack.i.h.bf16 %v20273_v0  ;;  %v23645_v10 = vunpack.i.l.bf16 %v20218_v3  ;;  %v23646_v1 = vunpack.i.l.bf16 %v23638_v6  ;;  %v7628_v45 = vpop.permute.xlu1 %7627  ;;  %v23663_v3 = vld [vmem:[#allocation96_spill] sm:$0xff] }
 0xc16   : > { %v5879_v46 = vsel %vm1145_vm7, %v23642_v62, %v12375_v16  ;;  %v12330_v20 = vunpack.i.l.bf16 %v23647_v29  ;;  %9605 = vmatpush1.bf16.msra.mxu0 %v9604_v32  ;;  %v5796_v17 = vsel %vm1145_vm7, %v12316_v41, %v12320_v9  ;;  %v9610_v15 = vpack.c.bf16 %v12326_v4, %v12325_v21  ;;  %v23650_v41 = vld [vmem:[#allocation82_spill] sm:$0xff] }
 0xc17   : > { %v5862_v27 = vsel %vm1145_vm7, %v23644_v36, %v12370_v44  ;;  %v5897_v37 = vsel %vm1145_vm7, %v23645_v10, %v12381_v61  ;;  %v5914_v16 = vsel %vm1145_vm7, %v23646_v1, %v12386_v18  ;;  %v12331_v44 = vunpack.i.h.bf16 %v23647_v29  ;;  %9607 = vmatprep.subr.bf16.mxu0 %v9606_v7  ;;  %v7644_v10 = vpop.permute.xlu0 %7643 }
 0xc18   : > { %9517 = vmatpush1.bf16.msra.mxu1 %v9516_v54  ;;  %v9520_v25 = vpack.c.bf16 %v5879_v46, %v5862_v27  ;;  %v9608_v2 = vpack.c.bf16 %v5813_v43, %v5796_v17  ;;  %v5830_v54 = vsel %vm1145_vm7, %v12361_v55, %v12325_v21  ;;  %v5847_v35 = vsel %vm1145_vm7, %v12366_v14, %v12326_v4  ;;  %v23651_v14 = vld [vmem:[#allocation131_spill] sm:$0xff] }
 0xc19   : > { %9519 = vmatprep.subr.bf16.mxu1 %v9518_v38  ;;  %v9522_v62 = vpack.c.bf16 %v5914_v16, %v5897_v37  ;;  %v12401_v38 = vunpack.i.h.bf16 %v20302_v60  ;;  %v12406_v32 = vunpack.i.h.bf16 %v20316_v31  ;;  %7546 = vmatmul.mubr.f32.vlgmr.msra.gmra.mrb[26].mxu0 %v12737_v42  ;;  %v23648_v50 = vunpack.i.l.bf16 %v20273_v0  ;;  %v7634_v42 = vpop.permute.xlu1 %7633 }
 0xc1a   : > { %v23649_v57 = vunpack.i.l.bf16 %v20260_v39  ;;  %v12336_v55 = vunpack.i.h.bf16 %v23650_v41  ;;  %v7684_v9 = vsel %vm23652_vm8, %v23651_v14, %v20521_v26  ;;  %9609 = vmatpush1.bf16.msra.mxu0 %v9608_v2  ;;  %v9614_v4 = vpack.c.bf16 %v12331_v44, %v12330_v20  ;;  %7616 = vmatprep.mubr.f32.mxu0 %v23639_v48 }
 0xc1b   : > { %v5931_v27 = vsel %vm1145_vm7, %v23648_v50, %v12391_v58  ;;  %v12335_v21 = vunpack.i.l.bf16 %v23650_v41  ;;  %v9612_v43 = vpack.c.bf16 %v5847_v35, %v5830_v54  ;;  %v7685_v7 = vsel %vm23653_vm4, %v7684_v9, %v7628_v45  ;;  %9611 = vmatprep.subr.bf16.mxu0 %v9610_v15  ;;  %v23657_v45 = vld [vmem:[#allocation34_spill] sm:$0xff]  ;;  %v23664_v41 = vld [vmem:[#allocation101_spill] sm:$0xff] }
 0xc1c   : > { %9521 = vmatpush1.bf16.msra.mxu1 %v9520_v25  ;;  %v5948_v24 = vsel %vm1145_vm7, %v23649_v57, %v12396_v19  ;;  %v7635_v46 = vsel %vm23654_vm2, %v7632_v52, %v7634_v42  ;;  %v5881_v47 = vsel %vm1145_vm7, %v12376_v33, %v12331_v44  ;;  %v23655_v26 = vunpack.i.h.bf16 %v20204_v28  ;;  %v23658_v52 = vld [vmem:[#allocation87_spill] sm:$0xff]  ;;  %v7650_v57 = vpop.permute.xlu0 %7649 }
 0xc1d   : > { %9523 = vmatprep.subr.bf16.mxu1 %v9522_v62  ;;  %v7686_v37 = vsel %vm23656_vm3, %v7685_v7, %v7635_v46  ;;  %v9526_v1 = vpack.c.bf16 %v5948_v24, %v5931_v27  ;;  %v12416_v16 = vunpack.i.h.bf16 %v20388_v51  ;;  %v23659_v17 = vpack.c.bf16 %v23657_v45, %v23658_v52  ;;  %v6908_v45 = vpop.f32.mrb[24].mxu1 }
 0xc1e   : > { %v5864_v36 = vsel %vm1145_vm7, %v23655_v26, %v12330_v20  ;;  %v7935_v29 = vadd.f32 %v20568_v59, %v7686_v37  ;;  %v23660_v8 = vunpack.i.l.bf16 %v20302_v60  ;;  %v23661_v33 = vunpack.i.l.bf16 %v20316_v31  ;;  %9613 = vmatpush1.bf16.msra.mxu0 %v9612_v43  ;;  %v7641_v20 = vpop.permute.xlu1 %7640  ;;  %7723 = vrot.lane.b32.xlu0 %v6908_v45, %s12992_s26  ;;  %s13001_s26 = smov 38  }
 0xc1f   : > { %v12421_v44 = vunpack.i.h.bf16 %v20349_v56  ;;  %v5898_v25 = vsel %vm1145_vm7, %v12381_v61, %v12335_v21  ;;  %v5915_v15 = vsel %vm1145_vm7, %v12386_v18, %v12336_v55  ;;  %v12411_v2 = vunpack.i.h.bf16 %v20361_v13  ;;  %9615 = vmatprep.subr.bf16.mxu0 %v9614_v4  ;;  %7720 = vrot.lane.b32.xlu1 %v6908_v45, %s12993_s7  ;;  %s13002_s7 = smov 8  }
 0xc20   : > { %9525 = vmatpush1.bf16.msra.mxu1 %v23659_v17  ;;  %v5965_v28 = vsel %vm1145_vm7, %v23660_v8, %v12401_v38  ;;  %v5982_v48 = vsel %vm1145_vm7, %v23661_v33, %v12406_v32  ;;  %v7951_v54 = vsub.f32 0.0, %v7935_v29  ;;  %v9616_v35 = vpack.c.bf16 %v5881_v47, %v5864_v36 }
 0xc21   : > { %9527 = vmatprep.subr.bf16.mxu1 %v9526_v1  ;;  %v12410_v62 = vunpack.i.l.bf16 %v20361_v13  ;;  %v7687_v50 = vsel %vm23662_vm13, %v7638_v11, %v7641_v20  ;;  %v9530_v27 = vpack.c.bf16 %v5982_v48, %v5965_v28  ;;  %v12441_v24 = vunpack.i.h.bf16 %v20459_v40  ;;  %v23670_v1 = vld [vmem:[#allocation304_spill] sm:$0xff]  ;;  %v6910_v28 = vpop.f32.mrb[25].mxu1 }
 0xc22   : > { %v23665_v61 = vpack.c.bf16 %v23663_v3, %v23664_v41  ;;  %v9618_v6 = vpack.c.bf16 %v12336_v55, %v12335_v21  ;;  %v23666_v18 = vunpack.i.l.bf16 %v20388_v51  ;;  %v9620_v9 = vpack.c.bf16 %v5915_v15, %v5898_v25  ;;  %9617 = vmatpush1.bf16.msra.mxu0 %v9616_v35  ;;  %v7648_v13 = vpop.permute.xlu1 %7647  ;;  %7730 = vrot.lane.b32.xlu0 %v6908_v45, %s12994_s15 }
 0xc23   : > { %v7967_v42 = vmul.f32 1.442695, %v7951_v54  ;;  %v23667_v11 = vunpack.i.l.bf16 %v20349_v56  ;;  %v5949_v55 = vsel %vm1145_vm7, %v12396_v19, %v12411_v2  ;;  %v12431_v21 = vunpack.i.h.bf16 %v20430_v34  ;;  %7726 = vrot.lane.b32.xlu1 %v6908_v45, %s12976_s11  ;;  %s12995_s11 = smov 50  }
 0xc24   : > { %9529 = vmatpush1.bf16.msra.mxu1 %v23665_v61  ;;  %v5999_v14 = vsel %vm1145_vm7, %v23666_v18, %v12416_v16  ;;  %v7688_v43 = vsel %vm23668_vm12, %v7687_v50, %v7644_v10  ;;  %9619 = vmatprep.subr.bf16.mxu0 %v9618_v6  ;;  %v7652_v7 = vsel %vm7651_vm11, %v7648_v13, %v7650_v57  ;;  %v12425_v47 = vunpack.i.l.bf16 %v20380_v53 }
 0xc25   : > { %9531 = vmatprep.subr.bf16.mxu1 %v9530_v27  ;;  %v6016_v4 = vsel %vm1145_vm7, %v23667_v11, %v12421_v44  ;;  %v5932_v46 = vsel %vm1145_vm7, %v12391_v58, %v12410_v62  ;;  %v7689_v26 = vsel %vm23669_vm15, %v7688_v43, %v7652_v7  ;;  %v9622_v37 = vpack.c.bf16 %v12411_v2, %v12410_v62  ;;  %v23676_v2 = vld [vmem:[#allocation76_spill] sm:$0xff]  ;;  %v7658_v62 = vpop.permute.xlu0 %7657 }
 0xc26   : > { %v9534_v36 = vpack.c.bf16 %v6016_v4, %v5999_v14  ;;  %v12426_v39 = vunpack.i.h.bf16 %v20380_v53  ;;  %v7936_v19 = vadd.f32 %v20568_v59, %v7689_v26  ;;  %v23671_v10 = vpack.c.bf16 %v20344_v63, %v23670_v1  ;;  %9621 = vmatpush1.bf16.msra.mxu0 %v9620_v9  ;;  %7737 = vrot.lane.b32.xlu0 %v6910_v28, %s12995_s11  ;;  %s13004_s11 = smov 17  }
 0xc27   : > { %v23672_v0 = vunpack.i.l.bf16 %v20459_v40  ;;  %12668 = vpow2.f32 %v7967_v42  ;;  %9623 = vmatprep.subr.bf16.mxu0 %v9622_v37  ;;  %v23673_v53 = vunpack.i.l.bf16 %v20430_v34  ;;  %v9624_v17 = vpack.c.bf16 %v5949_v55, %v5932_v46  ;;  %7732 = vrot.lane.b32.xlu1 %v6910_v28, %s12994_s15  ;;  %v7655_v40 = vpop.permute.xlu1 %7654  ;;  %s13003_s15 = smov 29  }
 0xc28   : > { %9533 = vmatpush1.bf16.msra.mxu1 %v23671_v10  ;;  %v7952_v29 = vsub.f32 0.0, %v7936_v19  ;;  %v5966_v63 = vsel %vm1145_vm7, %v12401_v38, %v12425_v47  ;;  %v12436_v8 = vunpack.i.h.bf16 %v20432_v30  ;;  %v5983_v48 = vsel %vm1145_vm7, %v12406_v32, %v12426_v39  ;;  %v7050_v18 = vpop.f32.mrb[22].mxu0 }
 0xc29   : > { %v6050_v58 = vsel %vm1145_vm7, %v23672_v0, %v12441_v24  ;;  %9535 = vmatprep.subr.bf16.mxu1 %v9534_v36  ;;  %v6033_v52 = vsel %vm1145_vm7, %v23673_v53, %v12431_v21  ;;  %v9626_v34 = vpack.c.bf16 %v12426_v39, %v12425_v47  ;;  %v12435_v20 = vunpack.i.l.bf16 %v20432_v30  ;;  %v7665_v3 = vpop.permute.xlu0 %7664  ;;  %v20736_v14 = vpop.f32.mrb[23].mxu0 }
 0xc2a   : > { %v9538_v33 = vpack.c.bf16 %v6050_v58, %v6033_v52  ;;  %v7969_v25 = vmul.f32 1.442695, %v7952_v29  ;;  %v23674_v60 = vpack.c.bf16 %v20406_v23, %v20413_v49  ;;  %9625 = vmatpush1.bf16.msra.mxu0 %v9624_v17  ;;  %v9628_v38 = vpack.c.bf16 %v5983_v48, %v5966_v63  ;;  %7747 = vrot.lane.b32.xlu0 %v6910_v28, %s12996_s22 }
 0xc2b   : > { %9627 = vmatprep.subr.bf16.mxu0 %v9626_v34  ;;  %v6017_v15 = vsel %vm1145_vm7, %v12421_v44, %v12436_v8  ;;  %v6000_v31 = vsel %vm1145_vm7, %v12416_v16, %v12435_v20  ;;  %v9630_v30 = vpack.c.bf16 %v12436_v8, %v12435_v20  ;;  %v12446_v23 = vunpack.i.h.bf16 %v20544_v5  ;;  %7740 = vrot.lane.b32.xlu1 %v6910_v28, %s12997_s12  ;;  %v7661_v27 = vpop.permute.xlu1 %7660  ;;  %s13006_s12 = smov 14  }
 0xc2c   : > { %9537 = vmatpush1.bf16.msra.mxu1 %v23674_v60  ;;  %12670 = vpow2.f32 %v7969_v25  ;;  %v12445_v49 = vunpack.i.l.bf16 %v20544_v5  ;;  %v23675_v32 = vpack.c.bf16 %v20481_v22, %v20474_v12  ;;  %v9632_v44 = vpack.c.bf16 %v6017_v15, %v6000_v31 }
 0xc2d   : > { %9539 = vmatprep.subr.bf16.mxu1 %v9538_v33  ;;  %v6051_v5 = vsel %vm1145_vm7, %v12441_v24, %v12446_v23  ;;  %v7671_v13 = vpop.permute.xlu0 %7670  ;;  %vm7707_vm4 = vcmask 605184  }
 0xc2e   : > { %9629 = vmatpush1.bf16.msra.mxu0 %v9628_v38  ;;  %v6034_v51 = vsel %vm1145_vm7, %v12431_v21, %v12445_v49  ;;  %v9634_v16 = vpack.c.bf16 %v12446_v23, %v12445_v49  ;;  %7743 = vrot.lane.b32.xlu0 %v6910_v28, %s12998_s13  ;;  %vm23677_vm7 = vmmov %vm23652_vm8  ;;  %s13008_s13 = smov 5  }
 0xc2f   : > { %9631 = vmatprep.subr.bf16.mxu0 %v9630_v30  ;;  %v9636_v22 = vpack.c.bf16 %v6051_v5, %v6034_v51  ;;  %v7690_v50 = vsel %vm23677_vm7, %v7655_v40, %v7658_v62  ;;  %7749 = vrot.lane.b32.xlu1 %v7050_v18, %s12996_s22  ;;  %v7668_v9 = vpop.permute.xlu1 %7667  ;;  %vm23681_vm1 = vmmov %vm23677_vm7  ;;  %vm7734_vm7 = vcmask 433152   ;;  %s13005_s22 = smov 26  }
 0xc30   : > { %9541 = vmatpush1.bf16.msra.mxu1 %v23675_v32  ;;  %v7691_v24 = vsel %vm23678_vm10, %v7690_v50, %v7661_v27  ;;  %v7693_v43 = vsel %vm23681_vm1, %v7668_v9, %v7671_v13  ;;  %vm23683_vm8 = vmmov %vm23656_vm3 }
 0xc31   : > { %v12669_v56 = vpop.eup %12668  ;;  %v7692_v6 = vsel %vm23680_vm14, %v7691_v24, %v7665_v3  ;;  %vm23684_vm2 = vmmov %vm23681_vm1 }
 0xc32   : > { %9633 = vmatpush1.bf16.msra.mxu0 %v9632_v44  ;;  %v7999_v12 = vadd.f32 1.0, %v12669_v56  ;;  %7757 = vrot.lane.b32.xlu0 %v7050_v18, %s12999_s17  ;;  %v7937_v42 = vadd.f32 %v20568_v59, %v7692_v6  ;;  %vm23685_vm3 = vmmov %vm23682_vm9  ;;  %s23700_s17 = smov 112  }
 0xc33   : > { %7475 = vmatmul.mubr.f32.vlgmr.msra.gmra.mrb[28].mxu1 %v23676_v2  ;;  %9635 = vmatprep.subr.bf16.mxu0 %v9634_v16  ;;  %v7675_v4 = vpop.permute.xlu1 %7674  ;;  %vm23686_vm11 = vmmov %vm23683_vm8 }
 0xc34   : > { %12672 = vrcp.f32 %v7999_v12  ;;  %7772 = vrot.lane.b32.xlu1 %v7050_v18, %s13000_s23  ;;  %v7953_v11 = vsub.f32 0.0, %v7937_v42  ;;  %vm23687_vm13 = vmmov %vm23681_vm1  ;;  %s23701_s23 = smov 109  }
 0xc35   : > { %vm23688_vm12 = vmmov %vm23685_vm3 }
 0xc36   : > { %v12671_v54 = vpop.eup %12670  ;;  %9637 = vmatpush1.bf16.msra.mxu0 %v9636_v22  ;;  %7786 = vrot.lane.b32.xlu0 %v20736_v14, %s12981_s25  ;;  %v7971_v21 = vmul.f32 1.442695, %v7953_v11  ;;  %vm23689_vm15 = vmmov %vm23683_vm8 }
 0xc37   : > { %v8000_v35 = vadd.f32 1.0, %v12671_v54  ;;  %vm23690_vm10 = vmmov %vm23681_vm1  ;;  %vm7751_vm1 = vcmask 334848  }
 0xc38   : > { %7754 = vrot.lane.b32.xlu1 %v7050_v18, %s13001_s26  ;;  %vm23691_vm14 = vmmov %vm23685_vm3  ;;  %s13011_s26 = smov 100  }
 0xc39   : > { %12674 = vrcp.f32 %v8000_v35  ;;  %7617 = vmatmul.mubr.f32.vlgmr.msra.gmra.mrb[26].mxu0 %v23676_v2 }
 0xc3a   : > { %12676 = vpow2.f32 %v7971_v21 }
 0xc3e   : > { %v12673_v57 = vpop.eup %12672 }
 0xc42   : > { %v7682_v46 = vpop.permute.xlu1 %7681 }
 0xc43   : > { %v12675_v41 = vpop.eup %12674  ;;  %v7677_v55 = vpop.permute.xlu0 %7676 }
 0xc44   : > { %v8047_v61 = vcombine.low %v12673_v57, %v12675_v41  ;;  %v7679_v7 = vsel %vm7678_vm6, %v7675_v4, %v7677_v55  ;;  %v12677_v19 = vpop.eup %12676  ;;  %vm23692_vm6 = vmmov %vm23683_vm8 }
 0xc45   : > { %v7694_v47 = vsel %vm23682_vm9, %v7693_v43, %v7679_v7  ;;  %v8001_v1 = vadd.f32 1.0, %v12677_v19  ;;  %vm23695_vm9 = vmmov %vm23684_vm2 }
 0xc46   : > { %8063 = vst [vmem:[%s20732_s27] sm:$0x77] %v8047_v61  ;;  %v7695_v26 = vsel %vm23683_vm8, %v7694_v47, %v7682_v46  ;;  %vm23697_vm8 = vmmov %vm23685_vm3 }
 0xc47   : > { %v7938_v36 = vadd.f32 %v20568_v59, %v7695_v26  ;;  %v7697_v53 = vpop.permute.xlu0 %7696  ;;  %v7700_v52 = vpop.permute.xlu1 %7699 }
 0xc48   : > { %v7760_v33 = vsel %vm23684_vm2, %v7697_v53, %v7700_v52 }
 0xc49   : > { %v7954_v37 = vsub.f32 0.0, %v7938_v36 }
 0xc4b   : > { %v7973_v39 = vmul.f32 1.442695, %v7954_v37  ;;  %v7704_v17 = vpop.permute.xlu0 %7703  ;;  %v7706_v63 = vpop.permute.xlu1 %7705 }
 0xc4c   : > { %v7708_v8 = vsel %vm7707_vm4, %v7704_v17, %v7706_v63  ;;  %vm23698_vm4 = vmmov %vm23692_vm6 }
 0xc4d   : > { %12678 = vpow2.f32 %v7973_v39  ;;  %v7761_v48 = vsel %vm23685_vm3, %v7760_v33, %v7708_v8  ;;  %vm23705_vm3 = vmmov %vm23684_vm2 }
 0xc4e   : > { %12680 = vrcp.f32 %v8001_v1 }
 0xc4f   : > { %v7711_v28 = vpop.permute.xlu0 %7710  ;;  %v7714_v25 = vpop.permute.xlu1 %7713 }
 0xc50   : > { %v7762_v34 = vsel %vm23686_vm11, %v7761_v48, %v7711_v28  ;;  %vm23706_vm11 = vmmov %vm23697_vm8 }
 0xc51   : > { %v7939_v20 = vadd.f32 %v20568_v59, %v7762_v34 }
 0xc53   : > { %v7955_v60 = vsub.f32 0.0, %v7939_v20  ;;  %v7717_v38 = vpop.permute.xlu0 %7716 }
 0xc54   : > { %v7763_v31 = vsel %vm23687_vm13, %v7714_v25, %v7717_v38  ;;  %vm23707_vm13 = vmmov %vm23697_vm8 }
 0xc55   : > { %v7975_v15 = vmul.f32 1.442695, %v7955_v60 }
 0xc57   : > { %v12679_v10 = vpop.eup %12678 }
 0xc58   : > { %v8002_v0 = vadd.f32 1.0, %v12679_v10  ;;  %v12681_v58 = vpop.eup %12680 }
 0xc5a   : > { %12682 = vrcp.f32 %v8002_v0 }
 0xc5b   : > { %12684 = vpow2.f32 %v7975_v15 }
 0xc64   : > { %v12683_v29 = vpop.eup %12682 }
 0xc65   : > { %v8048_v45 = vcombine.low %v12681_v58, %v12683_v29  ;;  %v12685_v12 = vpop.eup %12684 }
 0xc66   : > { %v8003_v35 = vadd.f32 1.0, %v12685_v12 }
 0xc67   : > { %8064 = vst [vmem:[%s20732_s27 + $0x8] sm:$0x77] %v8048_v45 }
 0xc90   : > { %v7724_v30 = vpop.permute.xlu0 %7723 }
 0xc91   : > { %v7721_v23 = vpop.permute.xlu1 %7720 }
 0xc92   : > { %v7764_v49 = vsel %vm23688_vm12, %v7763_v31, %v7721_v23  ;;  %vm23708_vm12 = vmmov %vm23698_vm4 }
 0xc93   : > { %v7765_v32 = vsel %vm23689_vm15, %v7764_v49, %v7724_v30  ;;  %vm23709_vm15 = vmmov %vm23698_vm4 }
 0xc94   : > { %v7940_v56 = vadd.f32 %v20568_v59, %v7765_v32  ;;  %v7731_v54 = vpop.permute.xlu0 %7730 }
 0xc95   : > { %v7727_v51 = vpop.permute.xlu1 %7726 }
 0xc96   : > { %v7956_v44 = vsub.f32 0.0, %v7940_v56 }
 0xc98   : > { %v7977_v2 = vmul.f32 1.442695, %v7956_v44  ;;  %v7738_v3 = vpop.permute.xlu0 %7737 }
 0xc99   : > { %v7733_v22 = vpop.permute.xlu1 %7732 }
 0xc9a   : > { %12686 = vpow2.f32 %v7977_v2  ;;  %v7735_v40 = vsel %vm7734_vm7, %v7731_v54, %v7733_v22  ;;  %vm23711_vm7 = vmmov %vm23684_vm2 }
 0xc9b   : > { %v7766_v24 = vsel %vm23690_vm10, %v7727_v51, %v7735_v40  ;;  %12688 = vrcp.f32 %v8003_v35  ;;  %vm23712_vm10 = vmmov %vm23697_vm8 }
 0xc9c   : > { %v7192_v16 = vpop.f32.mrb[26].mxu1  ;;  %v7767_v41 = vsel %vm23691_vm14, %v7766_v24, %v7738_v3  ;;  %v7748_v18 = vpop.permute.xlu0 %7747  ;;  %vm23713_vm14 = vmmov %vm23698_vm4 }
 0xc9d   : > { %7802 = vrot.lane.b32.xlu0 %v7192_v16, %s13002_s7  ;;  %7788 = vrot.lane.b32.xlu1 %v7192_v16, %s12981_s25  ;;  %v7194_v5 = vpop.f32.mrb[27].mxu1  ;;  %s13007_s25 = smov 11   ;;  %v7741_v61 = vpop.permute.xlu1 %7740 }
 0xc9e   : > { %v7768_v6 = vsel %vm23692_vm6, %v7767_v41, %v7741_v61  ;;  %vm7836_vm6 = vcmask 941056  }
 0xc9f   : > { %v7941_v9 = vadd.f32 %v20568_v59, %v7768_v6 }
 0xca0   : > { %v7744_v21 = vpop.permute.xlu0 %7743 }
 0xca1   : > { %7776 = vrot.lane.b32.xlu0 %v20736_v14, %s13003_s15  ;;  %7792 = vrot.lane.b32.xlu1 %v7192_v16, %s13004_s11  ;;  %v7750_v42 = vpop.permute.xlu1 %7749  ;;  %v7957_v4 = vsub.f32 0.0, %v7941_v9  ;;  %s23702_s15 = smov 94   ;;  %s23703_s11 = smov 103  }
 0xca2   : > { %v7752_v43 = vsel %vm7751_vm1, %v7748_v18, %v7750_v42  ;;  %vm23714_vm1 = vmmov %vm23684_vm2 }
 0xca3   : > { %v7979_v7 = vmul.f32 1.442695, %v7957_v4  ;;  %v7769_v46 = vsel %vm23695_vm9, %v7744_v21, %v7752_v43  ;;  %vm23716_vm9 = vmmov %vm23698_vm4 }
 0xca4   : > { %v12687_v27 = vpop.eup %12686  ;;  %v7758_v26 = vpop.permute.xlu0 %7757 }
 0xca5   : > { %v7334_v62 = vpop.f32.mrb[24].mxu0  ;;  %7779 = vrot.lane.b32.xlu0 %v20736_v14, %s13005_s22  ;;  %7795 = vrot.lane.b32.xlu1 %v7192_v16, %s13006_s12  ;;  %v8004_v57 = vadd.f32 1.0, %v12687_v27  ;;  %s23704_s22 = smov 88   ;;  %s13013_s12 = smov 85  }
 0xca6   : > { %v20759_v50 = vpop.f32.mrb[25].mxu0  ;;  %v20769_v55 = vpop.permute.xlu1 %7772 }
 0xca7   : > { %12690 = vrcp.f32 %v8004_v57 }
 0xca8   : > { %12692 = vpow2.f32 %v7979_v7  ;;  %v7787_v33 = vpop.permute.xlu0 %7786 }
 0xca9   : > { %7798 = vrot.lane.b32.xlu0 %v7192_v16, %s13007_s25  ;;  %7782 = vrot.lane.b32.xlu1 %v20736_v14, %s12978_s24  ;;  %v12689_v14 = vpop.eup %12688  ;;  %s23693_s24 = smov 121   ;;  %s13014_s25 = smov 82  }
 0xcaa   : > { %v7755_v47 = vpop.permute.xlu1 %7754 }
 0xcab   : > { %v7770_v36 = vsel %vm23697_vm8, %v7769_v46, %v7755_v47 }
 0xcac   : > { %v7771_v37 = vsel %vm23698_vm4, %v7770_v36, %v7758_v26 }
 0xcad   : > { %7809 = vrot.lane.b32.xlu0 %v7194_v5, %s13008_s13  ;;  %7804 = vrot.lane.b32.xlu1 %v7194_v5, %s13002_s7  ;;  %v7942_v39 = vadd.f32 %v20568_v59, %v7771_v37  ;;  %s13012_s7 = smov 106   ;;  %s13015_s13 = smov 73  }
 0xcaf   : > { %v7958_v19 = vsub.f32 0.0, %v7942_v39 }
 0xcb1   : > { %7812 = vrot.lane.b32.xlu0 %v7194_v5, %s13009_s29  ;;  %7816 = vrot.lane.b32.xlu1 %v7194_v5, %s12937_s21  ;;  %v12691_v13 = vpop.eup %12690  ;;  %v7981_v1 = vmul.f32 1.442695, %v7958_v19  ;;  %s13016_s29 = smov 76  }
 0xcb2   : > { %v8049_v11 = vcombine.low %v12689_v14, %v12691_v13  ;;  %v12693_v10 = vpop.eup %12692 }
 0xcb3   : > { %12694 = vpow2.f32 %v7981_v1  ;;  %v8005_v0 = vadd.f32 1.0, %v12693_v10 }
 0xcb4   : > { %8065 = vst [vmem:[%s20732_s27 + $0x10] sm:$0x77] %v8049_v11 }
 0xcb5   : > { %7825 = vrot.lane.b32.xlu0 %v7334_v62, %s23693_s24  ;;  %7822 = vrot.lane.b32.xlu1 %v7334_v62, %s23694_s30  ;;  %12696 = vrcp.f32 %v8005_v0  ;;  %s13017_s24 = smov 70   ;;  %s13018_s30 = smov 67  }
 0xcb9   : > { %7818 = vrot.lane.b32.xlu0 %v7334_v62, %s12937_s21  ;;  %7828 = vrot.lane.b32.xlu1 %v7334_v62, %s23696_s28  ;;  %s13010_s21 = smov 97  }
 0xcbd   : > { %7832 = vrot.lane.b32.xlu0 %v7334_v62, %s23699_s14  ;;  %7851 = vrot.lane.b32.xlu1 %v20759_v50, %s23700_s17  ;;  %v12695_v58 = vpop.eup %12694 }
 0xcbe   : > { %v8006_v29 = vadd.f32 1.0, %v12695_v58 }
 0xcbf   : > { %v12697_v45 = vpop.eup %12696 }
 0xcc0   : > { %12698 = vrcp.f32 %v8006_v29 }
 0xcc1   : > { %7854 = vrot.lane.b32.xlu0 %v20759_v50, %s23701_s23 }
 0xcca   : > { %v12699_v53 = vpop.eup %12698 }
 0xccb   : > { %v8050_v52 = vcombine.low %v12697_v45, %v12699_v53 }
 0xccd   : > { %8066 = vst [vmem:[%s20732_s27 + $0x18] sm:$0x77] %v8050_v52 }
 0xd06   : > { %v7476_v17 = vpop.f32.mrb[28].mxu1 }
 0xd07   : > { %7870 = vrot.lane.b32.xlu0 %v7476_v17, %s13010_s21  ;;  %7867 = vrot.lane.b32.xlu1 %v7476_v17, %s13011_s26  ;;  %v7478_v63 = vpop.f32.mrb[29].mxu1 }
 0xd0b   : > { %7857 = vrot.lane.b32.xlu0 %v20759_v50, %s13012_s7  ;;  %7874 = vrot.lane.b32.xlu1 %v7476_v17, %s23702_s15 }
 0xd0c   : > { %v7618_v8 = vpop.f32.mrb[26].mxu0 }
 0xd0d   : > { %v7620_v28 = vpop.f32.mrb[27].mxu0 }
 0xd0f   : > { %7863 = vrot.lane.b32.xlu0 %v7476_v17, %s23703_s11  ;;  %7834 = vrot.lane.b32.xlu1 %v20759_v50, %s23699_s14  ;;  %v7803_v48 = vpop.permute.xlu0 %7802  ;;  %v7789_v34 = vpop.permute.xlu1 %7788 }
 0xd10   : > { %v7790_v15 = vsel %vm3938_vm0, %v7787_v33, %v7789_v34  ;;  %vm7806_vm0 = vcmask 64512  }
 0xd13   : > { %7861 = vrot.lane.b32.xlu1 %v20759_v50, %s23703_s11  ;;  %7876 = vrot.lane.b32.xlu0 %v7478_v63, %s23702_s15  ;;  %v7777_v20 = vpop.permute.xlu0 %7776  ;;  %v7793_v25 = vpop.permute.xlu1 %7792 }
 0xd14   : > { %v7839_v31 = vsel %vm23684_vm2, %v20769_v55, %v7777_v20  ;;  %v7842_v30 = vsel %vm23705_vm3, %v7790_v15, %v7793_v25  ;;  %vm23719_vm2 = vcmask 842752   ;;  %vm23720_vm3 = vmmov %vm23716_vm9 }
 0xd17   : > { %7884 = vrot.lane.b32.xlu1 %v7478_v63, %s23704_s22  ;;  %7887 = vrot.lane.b32.xlu0 %v7478_v63, %s13013_s12  ;;  %v7780_v60 = vpop.permute.xlu0 %7779  ;;  %v7796_v38 = vpop.permute.xlu1 %7795 }
 0xd18   : > { %v7840_v23 = vsel %vm23706_vm11, %v7839_v31, %v7780_v60  ;;  %v7843_v49 = vsel %vm23707_vm13, %v7842_v30, %v7796_v38  ;;  %vm7878_vm11 = vcmask 769024   ;;  %vm23721_vm13 = vmmov %vm23714_vm1 }
 0xd1b   : > { %7891 = vrot.lane.b32.xlu1 %v7478_v63, %s13014_s25  ;;  %7893 = vrot.lane.b32.xlu0 %v7618_v8, %s13014_s25  ;;  %v7799_v32 = vpop.permute.xlu0 %7798  ;;  %v7783_v56 = vpop.permute.xlu1 %7782 }
 0xd1c   : > { %v7844_v44 = vsel %vm23708_vm12, %v7843_v49, %v7799_v32  ;;  %v7841_v2 = vsel %vm23709_vm15, %v7840_v23, %v7783_v56  ;;  %vm23723_vm15 = vmmov %vm23720_vm3 }
 0xd1d   : > { %v7944_v51 = vadd.f32 %v20568_v59, %v7844_v44  ;;  %v7943_v16 = vadd.f32 %v20568_v59, %v7841_v2 }
 0xd1f   : > { %7881 = vrot.lane.b32.xlu1 %v7478_v63, %s12972_s20  ;;  %7904 = vrot.lane.b32.xlu0 %v7618_v8, %s13015_s13  ;;  %s23710_s20 = smov 79   ;;  %v7960_v5 = vsub.f32 0.0, %v7944_v51  ;;  %v7959_v12 = vsub.f32 0.0, %v7943_v16  ;;  %v7810_v3 = vpop.permute.xlu0 %7809  ;;  %v7805_v41 = vpop.permute.xlu1 %7804 }
 0xd20   : > { %v7807_v11 = vsel %vm7806_vm0, %v7803_v48, %v7805_v41  ;;  %vm7895_vm0 = vcmask 670720  }
 0xd21   : > { %v7985_v22 = vmul.f32 1.442695, %v7960_v5  ;;  %v7983_v54 = vmul.f32 1.442695, %v7959_v12  ;;  %v7845_v55 = vsel %vm23711_vm7, %v7807_v11, %v7810_v3  ;;  %vm23724_vm7 = vmmov %vm23714_vm1 }
 0xd23   : > { %7901 = vrot.lane.b32.xlu1 %v7618_v8, %s13016_s29  ;;  %7910 = vrot.lane.b32.xlu0 %v7620_v28, %s13017_s24  ;;  %12700 = vpow2.f32 %v7985_v22  ;;  %v7813_v61 = vpop.permute.xlu0 %7812  ;;  %v7817_v6 = vpop.permute.xlu1 %7816 }
 0xd24   : > { %12702 = vpow2.f32 %v7983_v54  ;;  %v7846_v21 = vsel %vm23712_vm10, %v7845_v55, %v7813_v61 }
 0xd27   : > { %7908 = vrot.lane.b32.xlu1 %v7618_v8, %s13017_s24  ;;  %7898 = vrot.lane.b32.xlu0 %v7618_v8, %s23710_s20  ;;  %v7826_v18 = vpop.permute.xlu0 %7825  ;;  %v7823_v9 = vpop.permute.xlu1 %7822 }
 0xd28   : > { %v7848_v1 = vsel %vm23714_vm1, %v7823_v9, %v7826_v18 }
 0xd2b   : > { %7914 = vrot.lane.b32.xlu1 %v7620_v28, %s13018_s30  ;;  %v7819_v42 = vpop.permute.xlu0 %7818  ;;  %v7829_v14 = vpop.permute.xlu1 %7828 }
 0xd2c   : > { %v7820_v4 = vsel %vm1271_vm5, %v7817_v6, %v7819_v42  ;;  %vm23715_vm5 = vmmov %vm23697_vm8 }
 0xd2d   : > { %v12701_v35 = vpop.eup %12700  ;;  %v7847_v46 = vsel %vm23713_vm14, %v7846_v21, %v7820_v4  ;;  %v7849_v29 = vsel %vm23715_vm5, %v7848_v1, %v7829_v14  ;;  %vm23717_vm8 = vmmov %vm23714_vm1  ;;  %vm23726_vm14 = vcmask 572416  }
 0xd2e   : > { %v12703_v40 = vpop.eup %12702  ;;  %v8008_v62 = vadd.f32 1.0, %v12701_v35  ;;  %v7945_v47 = vadd.f32 %v20568_v59, %v7847_v46  ;;  %vm23718_vm4 = vmmov %vm23715_vm5 }
 0xd2f   : > { %v8007_v50 = vadd.f32 1.0, %v12703_v40  ;;  %v7833_v13 = vpop.permute.xlu0 %7832  ;;  %v7852_v43 = vpop.permute.xlu1 %7851  ;;  %vm23722_vm12 = vmmov %vm23718_vm4 }
 0xd30   : > { %12704 = vrcp.f32 %v8008_v62  ;;  %v7961_v37 = vsub.f32 0.0, %v7945_v47  ;;  %vm23725_vm10 = vmmov %vm23718_vm4 }
 0xd31   : > { %12706 = vrcp.f32 %v8007_v50  ;;  %vm23728_vm5 = vmmov %vm23718_vm4 }
 0xd32   : > { %v7987_v10 = vmul.f32 1.442695, %v7961_v37 }
 0xd33   : > { %v7855_v7 = vpop.permute.xlu0 %7854 }
 0xd34   : > { %12708 = vpow2.f32 %v7987_v10  ;;  %v7917_v17 = vsel %vm23717_vm8, %v7852_v43, %v7855_v7 }
 0xd3a   : > { %v12705_v27 = vpop.eup %12704 }
 0xd3b   : > { %v12707_v57 = vpop.eup %12706 }
 0xd3c   : > { %v8051_v24 = vcombine.low %v12707_v57, %v12705_v27 }
 0xd3e   : > { %8067 = vst [vmem:[%s20732_s27 + $0x20] sm:$0x77] %v8051_v24  ;;  %v12709_v49 = vpop.eup %12708 }
 0xd3f   : > { %v8009_v16 = vadd.f32 1.0, %v12709_v49 }
 0xd79   : > { %v7871_v26 = vpop.permute.xlu0 %7870  ;;  %v7868_v36 = vpop.permute.xlu1 %7867 }
 0xd7a   : > { %v7920_v56 = vsel %vm23721_vm13, %v7868_v36, %v7871_v26 }
 0xd7d   : > { %v7858_v39 = vpop.permute.xlu0 %7857  ;;  %v7875_v19 = vpop.permute.xlu1 %7874 }
 0xd7e   : > { %v7918_v28 = vsel %vm23718_vm4, %v7917_v17, %v7858_v39 }
 0xd81   : > { %v7864_v0 = vpop.permute.xlu0 %7863  ;;  %v7835_v58 = vpop.permute.xlu1 %7834 }
 0xd82   : > { %v7837_v45 = vsel %vm7836_vm6, %v7833_v13, %v7835_v58  ;;  %vm23727_vm6 = vmmov %vm23720_vm3 }
 0xd83   : > { %v7850_v53 = vsel %vm23716_vm9, %v7849_v29, %v7837_v45  ;;  %vm23729_vm9 = vmmov %vm23720_vm3 }
 0xd84   : > { %v7946_v52 = vadd.f32 %v20568_v59, %v7850_v53 }
 0xd85   : > { %v7862_v63 = vpop.permute.xlu1 %7861  ;;  %v7877_v8 = vpop.permute.xlu0 %7876 }
 0xd86   : > { %v7962_v33 = vsub.f32 0.0, %v7946_v52  ;;  %v7865_v48 = vsel %vm23719_vm2, %v7862_v63, %v7864_v0  ;;  %v7879_v23 = vsel %vm7878_vm11, %v7875_v19, %v7877_v8 }
 0xd87   : > { %v7919_v34 = vsel %vm23720_vm3, %v7918_v28, %v7865_v48  ;;  %v7921_v2 = vsel %vm23722_vm12, %v7920_v56, %v7879_v23 }
 0xd88   : > { %v7989_v20 = vmul.f32 1.442695, %v7962_v33  ;;  %v7947_v25 = vadd.f32 %v20568_v59, %v7919_v34 }
 0xd89   : > { %v7885_v60 = vpop.permute.xlu1 %7884  ;;  %v7888_v38 = vpop.permute.xlu0 %7887 }
 0xd8a   : > { %12710 = vpow2.f32 %v7989_v20  ;;  %v7963_v15 = vsub.f32 0.0, %v7947_v25  ;;  %v7923_v57 = vsel %vm23724_vm7, %v7885_v60, %v7888_v38 }
 0xd8c   : > { %v7991_v32 = vmul.f32 1.442695, %v7963_v15 }
 0xd8d   : > { %v7892_v31 = vpop.permute.xlu1 %7891  ;;  %v7894_v30 = vpop.permute.xlu0 %7893 }
 0xd8e   : > { %12712 = vpow2.f32 %v7991_v32  ;;  %v7896_v50 = vsel %vm7895_vm0, %v7892_v31, %v7894_v30 }
 0xd8f   : > { %12714 = vrcp.f32 %v8009_v16  ;;  %v7924_v3 = vsel %vm23725_vm10, %v7923_v57, %v7896_v50 }
 0xd91   : > { %v7882_v44 = vpop.permute.xlu1 %7881  ;;  %v7905_v51 = vpop.permute.xlu0 %7904 }
 0xd92   : > { %v7922_v5 = vsel %vm23723_vm15, %v7921_v2, %v7882_v44 }
 0xd93   : > { %v7948_v12 = vadd.f32 %v20568_v59, %v7922_v5 }
 0xd94   : > { %v12711_v22 = vpop.eup %12710 }
 0xd95   : > { %v8010_v54 = vadd.f32 1.0, %v12711_v22  ;;  %v7964_v35 = vsub.f32 0.0, %v7948_v12  ;;  %v7902_v40 = vpop.permute.xlu1 %7901  ;;  %v7911_v62 = vpop.permute.xlu0 %7910 }
 0xd96   : > { %v7926_v9 = vsel %vm23714_vm1, %v7902_v40, %v7905_v51 }
 0xd97   : > { %12716 = vrcp.f32 %v8010_v54  ;;  %v7993_v27 = vmul.f32 1.442695, %v7964_v35 }
 0xd98   : > { %v12713_v42 = vpop.eup %12712 }
 0xd99   : > { %12718 = vpow2.f32 %v7993_v27  ;;  %v7909_v24 = vpop.permute.xlu1 %7908  ;;  %v7899_v41 = vpop.permute.xlu0 %7898  ;;  %v8011_v7 = vadd.f32 1.0, %v12713_v42 }
 0xd9a   : > { %v7912_v61 = vsel %vm23726_vm14, %v7909_v24, %v7911_v62  ;;  %v7925_v6 = vsel %vm23727_vm6, %v7924_v3, %v7899_v41  ;;  %v12715_v43 = vpop.eup %12714 }
 0xd9b   : > { %v7949_v18 = vadd.f32 %v20568_v59, %v7925_v6  ;;  %v7927_v11 = vsel %vm23728_vm5, %v7926_v9, %v7912_v61 }
 0xd9d   : > { %v7965_v14 = vsub.f32 0.0, %v7949_v18  ;;  %v7915_v13 = vpop.permute.xlu1 %7914 }
 0xd9e   : > { %v7928_v4 = vsel %vm23729_vm9, %v7927_v11, %v7915_v13 }
 0xd9f   : > { %v7995_v55 = vmul.f32 1.442695, %v7965_v14  ;;  %v7950_v21 = vadd.f32 %v20568_v59, %v7928_v4 }
 0xda1   : > { %v12717_v46 = vpop.eup %12716  ;;  %12720 = vpow2.f32 %v7995_v55  ;;  %v7966_v47 = vsub.f32 0.0, %v7950_v21 }
 0xda2   : > { %v8052_v26 = vcombine.low %v12715_v43, %v12717_v46  ;;  %12722 = vrcp.f32 %v8011_v7 }
 0xda3   : > { %v12719_v36 = vpop.eup %12718  ;;  %v7997_v37 = vmul.f32 1.442695, %v7966_v47 }
 0xda4   : > { %8068 = vst [vmem:[%s20732_s27 + $0x28] sm:$0x77] %v8052_v26  ;;  %v8012_v39 = vadd.f32 1.0, %v12719_v36 }
 0xda5   : > { %12724 = vpow2.f32 %v7997_v37 }
 0xda6   : > { %12726 = vrcp.f32 %v8012_v39 }
 0xdab   : > { %v12721_v19 = vpop.eup %12720 }
 0xdac   : > { %v8013_v1 = vadd.f32 1.0, %v12721_v19  ;;  %v12723_v10 = vpop.eup %12722 }
 0xdae   : > { %12728 = vrcp.f32 %v8013_v1 }
 0xdaf   : > { %v12725_v0 = vpop.eup %12724 }
 0xdb0   : > { %v12727_v59 = vpop.eup %12726  ;;  %v8014_v58 = vadd.f32 1.0, %v12725_v0 }
 0xdb1   : > { %v8053_v29 = vcombine.low %v12723_v10, %v12727_v59 }
 0xdb2   : > { %12730 = vrcp.f32 %v8014_v58 }
 0xdb3   : > { %8069 = vst [vmem:[%s20732_s27 + $0x30] sm:$0x77] %v8053_v29 }
 0xdb8   : > { %v12729_v45 = vpop.eup %12728 }
 0xdbc   : > { %v12731_v53 = vpop.eup %12730 }
 0xdbd   : > { %v8054_v52 = vcombine.low %v12729_v45, %v12731_v53 }
 0xdbf   : > { %8070 = vst [vmem:[%s20732_s27 + $0x38] sm:$0x77] %v8054_v52 }
 0xdc0 PF: > { %p23_p12 = scmp.ge.s32.totalorder %s13213_s16, 6   ;;  %s23730_s17 = smov %s12914_s18 }
 0xdc1   : > { %s23731_s18 = smov %s12918_s19  ;;  %s23732_s19 = smov %s13225_s10 }
 0xdc2   : > { %s23733_s20 = smov %s13213_s16  ;;  %25 = sbr.rel (!%p23_p12) target bundleno = 9 (0x9), region = 120 }
 0xdc9   :  { %8092 = vsyncpa [#allocation3], 1 }
 0xdca   :  { %8094 = vsyncpa [#allocation3 + $0x1], 1 }
 0xdcb   :  { %8095 = vsyncpa [#allocation5], 1 }
 0xdcc   :  { %8096 = vsyncpa [#allocation8], 1 }

</bundles_post_ra>
